<compile_context>
chip_gen: v7x
topology: tpu7x:2x2x1
jax: 0.10.0
libtpu: 0.0.40
codegen_flags: <defaults>
</compile_context>

<pallas_src>
import functools
import math

import jax
import jax.numpy as jnp
from jax import lax
from jax.experimental import pallas as pl
from jax.experimental.pallas import tpu as pltpu


_RESIDENT_PARAMS = ("emb_w", "emb_b", "fc_w", "fc_b")
_PER_LAYER_PARAMS = (
    "wq", "wk", "wv", "bq", "bk", "bv", "wo", "bo",
    "lin1_w", "lin1_b", "lin2_w", "lin2_b",
    "ln1_g", "ln1_b", "ln2_g", "ln2_b",
)


# --------------------------------------------------------------------------- #
# Fused kernel: grid = (batch_tiles, layers).  One step = one encoder layer   #
# applied to a whole batch block; h lives in VMEM scratch across layer steps. #
# --------------------------------------------------------------------------- #
def _fused_transformer_kernel(
    x_ref,
    emb_w_ref, emb_b_ref, fc_w_ref, fc_b_ref,
    wq_ref, wk_ref, wv_ref, bq_ref, bk_ref, bv_ref,
    wo_ref, bo_ref,
    lin1_w_ref, lin1_b_ref, lin2_w_ref, lin2_b_ref,
    ln1_g_ref, ln1_b_ref, ln2_g_ref, ln2_b_ref,
    o_ref,
    h_ref,
    *, nhead, eps,
):
    layer = pl.program_id(1)
    num_layers = pl.num_programs(1)

    b_blk, S, input_dim = x_ref.shape
    d_model = emb_w_ref.shape[1]
    dh = d_model // nhead
    BS = b_blk * S
    scale = 1.0 / math.sqrt(dh)
    inv_d = 1.0 / d_model
    inv_s = 1.0 / S

    def mxu(a_bf16, b_bf16):
        # Operands are already bf16 (casts hoisted); accumulate in f32.
        return jnp.dot(a_bf16, b_bf16, preferred_element_type=jnp.float32)

    def add_ln(x, y, g, b):
        z = x + y
        mu = jnp.sum(z, axis=-1, keepdims=True) * inv_d
        zc = z - mu
        var = jnp.sum(zc * zc, axis=-1, keepdims=True) * inv_d
        return zc * lax.rsqrt(var + eps) * g + b

    # ---- embedding: only on the first layer step of each batch tile --------
    @pl.when(layer == 0)
    def _():
        x2d = x_ref[...].reshape(BS, input_dim).astype(jnp.bfloat16)
        h_ref[...] = mxu(x2d, emb_w_ref[...]) + emb_b_ref[...]

    h = h_ref[...]                               # (BS, D) f32
    h_bf = h.astype(jnp.bfloat16)                # hoisted: shared by 3*nhead matmuls

    # ---- self attention: per-head weights pre-split (no lane-offset slicing)
    attn = jnp.zeros((BS, d_model), jnp.float32)
    for i in range(nhead):
        q = mxu(h_bf, wq_ref[0, i]) + bq_ref[0, i]          # (BS, dh) f32
        k = mxu(h_bf, wk_ref[0, i]) + bk_ref[0, i]
        v = mxu(h_bf, wv_ref[0, i]) + bv_ref[0, i]
        # (BS, dh) -> (b_blk, S, dh): batched attention stays block-diagonal
        # over examples of the batch block.
        q3 = q.reshape(b_blk, S, dh).astype(jnp.bfloat16)
        k3 = k.reshape(b_blk, S, dh).astype(jnp.bfloat16)
        v3 = v.reshape(b_blk, S, dh).astype(jnp.bfloat16)
        s = jnp.einsum("bqd,bkd->bqk", q3, k3,
                       preferred_element_type=jnp.float32) * scale
        s = s - jnp.max(s, axis=-1, keepdims=True)
        p = jnp.exp(s)
        denom = jnp.sum(p, axis=-1, keepdims=True)
        p = p * pl.reciprocal(denom, approx=True)
        o3 = jnp.einsum("bqk,bkd->bqd", p.astype(jnp.bfloat16), v3,
                        preferred_element_type=jnp.float32)
        o_h = o3.reshape(BS, dh).astype(jnp.bfloat16)
        # Head merge + out-projection fused: rows i*dh:(i+1)*dh of W_out.
        attn = attn + mxu(o_h, wo_ref[0, i])
    attn = attn + bo_ref[0]
    h = add_ln(h, attn, ln1_g_ref[0], ln1_b_ref[0])          # norm1(x + attn)

    # ---- feed forward (ReLU) ------------------------------------------------
    ff = jnp.maximum(mxu(h.astype(jnp.bfloat16), lin1_w_ref[0]) + lin1_b_ref[0],
                     0.0)
    ff = mxu(ff.astype(jnp.bfloat16), lin2_w_ref[0]) + lin2_b_ref[0]
    h = add_ln(h, ff, ln2_g_ref[0], ln2_b_ref[0])            # norm2(x + ff)
    h_ref[...] = h

    # ---- mean pool over S + 1-wide head, only on the last layer step -------
    @pl.when(layer == num_layers - 1)
    def _():
        m = jnp.sum(h.reshape(b_blk, S, d_model), axis=1) * inv_s     # (b_blk, D)
        # (1, D) x (b_blk, D)^T -> (1, b_blk): lane-dense output row, f32.
        y = lax.dot_general(fc_w_ref[...], m, (((1,), (1,)), ((), ())),
                            preferred_element_type=jnp.float32)
        o_ref[0] = (y + fc_b_ref[...]).astype(o_ref.dtype)


# --------------------------------------------------------------------------- #
# Parameter init (deterministic, PyTorch-like) + prep for the fused kernel     #
# --------------------------------------------------------------------------- #
def _dense_init(key, fan_in, fan_out):
    k1, k2 = jax.random.split(key)
    bound = 1.0 / math.sqrt(fan_in)
    w = jax.random.uniform(k1, (fan_in, fan_out), jnp.float32, -bound, bound)
    b = jax.random.uniform(k2, (fan_out,), jnp.float32, -bound, bound)
    return w, b


def init_params(key, input_dim, d_model, nhead, num_layers, d_ff):
    keys = jax.random.split(key, 2 + num_layers)
    params = {}
    params["emb_w"], params["emb_b"] = _dense_init(keys[0], input_dim, d_model)
    params["fc_w"], params["fc_b"] = _dense_init(keys[1], d_model, 1)
    layers = []
    for l in range(num_layers):
        lk = jax.random.split(keys[2 + l], 4)
        p = {}
        p["in_proj_w"], p["in_proj_b"] = _dense_init(lk[0], d_model, 3 * d_model)
        p["out_proj_w"], p["out_proj_b"] = _dense_init(lk[1], d_model, d_model)
        p["lin1_w"], p["lin1_b"] = _dense_init(lk[2], d_model, d_ff)
        p["lin2_w"], p["lin2_b"] = _dense_init(lk[3], d_ff, d_model)
        p["ln1_g"] = jnp.ones((d_model,), jnp.float32)
        p["ln1_b"] = jnp.zeros((d_model,), jnp.float32)
        p["ln2_g"] = jnp.ones((d_model,), jnp.float32)
        p["ln2_b"] = jnp.zeros((d_model,), jnp.float32)
        layers.append(p)
    params["layers"] = layers
    return params


def prepare_params(params, *, nhead):
    """Stack per-layer weights (L, ...), pre-split QKV/out-proj per head and
    pre-cast MXU operands to bf16 (cast hoisting is done once, on the host)."""
    layers = params["layers"]
    L = len(layers)
    d_model = params["emb_w"].shape[1]
    dh = d_model // nhead

    def stack(name):
        return jnp.stack([layers[l][name] for l in range(L)])

    in_w = stack("in_proj_w")                      # (L, D, 3D)
    in_b = stack("in_proj_b")                      # (L, 3D)

    def w_heads(cols):                             # (L, D, D) -> (L, H, D, dh)
        return cols.reshape(L, d_model, nhead, dh).transpose(0, 2, 1, 3)

    def b_heads(cols):                             # (L, D) -> (L, H, 1, dh)
        return cols.reshape(L, nhead, 1, dh)

    wq = w_heads(in_w[:, :, 0 * d_model:1 * d_model])
    wk = w_heads(in_w[:, :, 1 * d_model:2 * d_model])
    wv = w_heads(in_w[:, :, 2 * d_model:3 * d_model])
    bq = b_heads(in_b[:, 0 * d_model:1 * d_model])
    bk = b_heads(in_b[:, 1 * d_model:2 * d_model])
    bv = b_heads(in_b[:, 2 * d_model:3 * d_model])
    wo = stack("out_proj_w").reshape(L, nhead, dh, d_model)  # per-head rows

    return {
        "emb_w": params["emb_w"].astype(jnp.bfloat16),
        "emb_b": params["emb_b"].reshape(1, d_model).astype(jnp.float32),
        "fc_w": params["fc_w"].T.astype(jnp.float32),        # (1, d_model)
        "fc_b": params["fc_b"].reshape(1, 1).astype(jnp.float32),
        "wq": wq.astype(jnp.bfloat16),
        "wk": wk.astype(jnp.bfloat16),
        "wv": wv.astype(jnp.bfloat16),
        "bq": bq.astype(jnp.float32),
        "bk": bk.astype(jnp.float32),
        "bv": bv.astype(jnp.float32),
        "wo": wo.astype(jnp.bfloat16),
        "bo": stack("out_proj_b")[:, None, :].astype(jnp.float32),
        "lin1_w": stack("lin1_w").astype(jnp.bfloat16),
        "lin1_b": stack("lin1_b")[:, None, :].astype(jnp.float32),
        "lin2_w": stack("lin2_w").astype(jnp.bfloat16),
        "lin2_b": stack("lin2_b")[:, None, :].astype(jnp.float32),
        "ln1_g": stack("ln1_g")[:, None, :].astype(jnp.float32),
        "ln1_b": stack("ln1_b")[:, None, :].astype(jnp.float32),
        "ln2_g": stack("ln2_g")[:, None, :].astype(jnp.float32),
        "ln2_b": stack("ln2_b")[:, None, :].astype(jnp.float32),
    }


# --------------------------------------------------------------------------- #
# Forward pass: single fused pallas_call, grid = (batch_tiles, layers)         #
# --------------------------------------------------------------------------- #
def transformer_model_forward(prepped, x, *, nhead, b_blk=32,
                              single_buffer_weights=True):
    B, S, input_dim = x.shape
    num_layers = prepped["lin1_w"].shape[0]
    d_model = prepped["emb_w"].shape[1]

    b_blk = max(1, min(b_blk, B))
    num_tiles = pl.cdiv(B, b_blk)
    b_pad = num_tiles * b_blk
    if b_pad != B:
        x = jnp.pad(x, ((0, b_pad - B), (0, 0), (0, 0)))

    kernel = functools.partial(_fused_transformer_kernel, nhead=nhead, eps=1e-5)

    def resident_spec(name):
        arr = prepped[name]
        idx = lambda b, l, _n=arr.ndim: (0,) * _n
        if single_buffer_weights:
            # Constant index_map -> fetched once; Buffered(1) drops the unused
            # second pipeline buffer so resident weights cost 1x VMEM.
            return pl.BlockSpec(arr.shape, idx, pipeline_mode=pl.Buffered(1))
        return pl.BlockSpec(arr.shape, idx)

    def per_layer_spec(name):
        arr = prepped[name]
        block = (1,) + arr.shape[1:]
        idx = lambda b, l, _n=arr.ndim: (l,) + (0,) * (_n - 1)
        # Default double-buffering: layer l+1 weights DMA behind layer l compute.
        return pl.BlockSpec(block, idx)

    in_specs = [pl.BlockSpec((b_blk, S, input_dim), lambda b, l: (b, 0, 0))]
    in_specs += [resident_spec(n) for n in _RESIDENT_PARAMS]
    in_specs += [per_layer_spec(n) for n in _PER_LAYER_PARAMS]

    out = pl.pallas_call(
        kernel,
        out_shape=jax.ShapeDtypeStruct((num_tiles, 1, b_blk), jnp.float32),
        grid=(num_tiles, num_layers),
        in_specs=in_specs,
        out_specs=pl.BlockSpec((1, 1, b_blk), lambda b, l: (b, 0, 0)),
        scratch_shapes=[pltpu.VMEM((b_blk * S, d_model), jnp.float32)],
        compiler_params=pltpu.CompilerParams(
            dimension_semantics=("parallel", "arbitrary"),
            vmem_limit_bytes=48 * 1024 * 1024),
    )(x, *(prepped[n] for n in _RESIDENT_PARAMS + _PER_LAYER_PARAMS))

    return out.reshape(b_pad)[:B].reshape(B, 1)


# --------------------------------------------------------------------------- #
if __name__ == "__main__":
    # Small shapes consistent with the module's forward.
    batch, seq, input_dim = 2, 8, 16
    d_model, nhead, num_layers = 32, 4, 2
    d_ff = 2048  # PyTorch TransformerEncoderLayer default dim_feedforward

    root = jax.random.PRNGKey(0)
    pkey, xkey = jax.random.split(root)
    params = init_params(pkey, input_dim, d_model, nhead, num_layers, d_ff)
    prepped = prepare_params(params, nhead=nhead)
    x = jax.random.normal(xkey, (batch, seq, input_dim), dtype=jnp.float32)

    def run(single_buffer_weights):
        fwd = jax.jit(functools.partial(
            transformer_model_forward, nhead=nhead, b_blk=32,
            single_buffer_weights=single_buffer_weights))
        return jax.block_until_ready(fwd(prepped, x))

    try:
        out = run(True)
    except Exception:
        # Fallback if this JAX build rejects pl.Buffered(1) single-buffering.
        out = run(False)

    assert out.shape == (batch, 1), out.shape
    assert bool(jnp.all(jnp.isfinite(out)))
    print("KERNEL_OK")
</pallas_src>

<mosaic_0001>
module attributes {stable_mosaic.version = 11 : i64} {
  func.func @_fused_transformer_kernel(%arg0: i32, %arg1: i32, %arg2: memref<2x8x16xf32, #tpu.memory_space<vmem>>, %arg3: memref<16x32xbf16, #tpu.memory_space<vmem>>, %arg4: memref<1x32xf32, #tpu.memory_space<vmem>>, %arg5: memref<1x32xf32, #tpu.memory_space<vmem>>, %arg6: memref<1x1xf32, #tpu.memory_space<vmem>>, %arg7: memref<1x4x32x8xbf16, #tpu.memory_space<vmem>>, %arg8: memref<1x4x32x8xbf16, #tpu.memory_space<vmem>>, %arg9: memref<1x4x32x8xbf16, #tpu.memory_space<vmem>>, %arg10: memref<1x4x1x8xf32, #tpu.memory_space<vmem>>, %arg11: memref<1x4x1x8xf32, #tpu.memory_space<vmem>>, %arg12: memref<1x4x1x8xf32, #tpu.memory_space<vmem>>, %arg13: memref<1x4x8x32xbf16, #tpu.memory_space<vmem>>, %arg14: memref<1x1x32xf32, #tpu.memory_space<vmem>>, %arg15: memref<1x32x2048xbf16, #tpu.memory_space<vmem>>, %arg16: memref<1x1x2048xf32, #tpu.memory_space<vmem>>, %arg17: memref<1x2048x32xbf16, #tpu.memory_space<vmem>>, %arg18: memref<1x1x32xf32, #tpu.memory_space<vmem>>, %arg19: memref<1x1x32xf32, #tpu.memory_space<vmem>>, %arg20: memref<1x1x32xf32, #tpu.memory_space<vmem>>, %arg21: memref<1x1x32xf32, #tpu.memory_space<vmem>>, %arg22: memref<1x1x32xf32, #tpu.memory_space<vmem>>, %arg23: memref<1x1x2xf32, #tpu.memory_space<vmem>>, %arg24: memref<16x32xf32, #tpu.memory_space<vmem>>) attributes {dimension_semantics = [#tpu.dimension_semantics<parallel>, #tpu.dimension_semantics<arbitrary>], iteration_bounds = array<i64: 1, 2>, scalar_prefetch = 0 : i64, scratch_operands = 1 : i64, tpu.core_type = #tpu.core_type<tc>, window_params = [{transform_indices = @transform_0, window_bounds = array<i64: 2, 8, 16>}, {pipeline_mode = #tpu.pipeline_mode<synchronous>, transform_indices = @transform_1, window_bounds = array<i64: 16, 32>}, {pipeline_mode = #tpu.pipeline_mode<synchronous>, transform_indices = @transform_2, window_bounds = array<i64: 1, 32>}, {pipeline_mode = #tpu.pipeline_mode<synchronous>, transform_indices = @transform_3, window_bounds = array<i64: 1, 32>}, {pipeline_mode = #tpu.pipeline_mode<synchronous>, transform_indices = @transform_4, window_bounds = array<i64: 1, 1>}, {transform_indices = @transform_5, window_bounds = array<i64: 1, 4, 32, 8>}, {transform_indices = @transform_6, window_bounds = array<i64: 1, 4, 32, 8>}, {transform_indices = @transform_7, window_bounds = array<i64: 1, 4, 32, 8>}, {transform_indices = @transform_8, window_bounds = array<i64: 1, 4, 1, 8>}, {transform_indices = @transform_9, window_bounds = array<i64: 1, 4, 1, 8>}, {transform_indices = @transform_10, window_bounds = array<i64: 1, 4, 1, 8>}, {transform_indices = @transform_11, window_bounds = array<i64: 1, 4, 8, 32>}, {transform_indices = @transform_12, window_bounds = array<i64: 1, 1, 32>}, {transform_indices = @transform_13, window_bounds = array<i64: 1, 32, 2048>}, {transform_indices = @transform_14, window_bounds = array<i64: 1, 1, 2048>}, {transform_indices = @transform_15, window_bounds = array<i64: 1, 2048, 32>}, {transform_indices = @transform_16, window_bounds = array<i64: 1, 1, 32>}, {transform_indices = @transform_17, window_bounds = array<i64: 1, 1, 32>}, {transform_indices = @transform_18, window_bounds = array<i64: 1, 1, 32>}, {transform_indices = @transform_19, window_bounds = array<i64: 1, 1, 32>}, {transform_indices = @transform_20, window_bounds = array<i64: 1, 1, 32>}, {transform_indices = @transform_21, window_bounds = array<i64: 1, 1, 2>}]} {
    %c0_i32 = arith.constant 0 : i32
    %0 = arith.cmpi eq, %arg1, %c0_i32 : i32
    %1 = arith.extui %0 : i1 to i32
    %c0_i32_0 = arith.constant 0 : i32
    %2 = arith.cmpi ne, %1, %c0_i32_0 : i32
    scf.if %2 {
      %c0_190 = arith.constant 0 : index
      %c0_191 = arith.constant 0 : index
      %c0_192 = arith.constant 0 : index
      %274 = vector.load %arg2[%c0_190, %c0_191, %c0_192] : memref<2x8x16xf32, #tpu.memory_space<vmem>>, vector<2x8x16xf32>
      %275 = vector.shape_cast %274 : vector<2x8x16xf32> to vector<16x16xf32>
      %276 = arith.truncf %275 : vector<16x16xf32> to vector<16x16xbf16>
      %c0_193 = arith.constant 0 : index
      %c0_194 = arith.constant 0 : index
      %277 = vector.load %arg3[%c0_193, %c0_194] : memref<16x32xbf16, #tpu.memory_space<vmem>>, vector<16x32xbf16>
      %cst_195 = arith.constant dense<0.000000e+00> : vector<16x32xf32>
      %278 = tpu.matmul %276, %277, %cst_195 {dimension_numbers = #tpu.dot_dimension_numbers<[1], [0], [0], [1], [0, 0, 1, 1], [], []>} : vector<16x16xbf16>, vector<16x32xbf16>, vector<16x32xf32> -> vector<16x32xf32>
      %c0_196 = arith.constant 0 : index
      %c0_197 = arith.constant 0 : index
      %279 = vector.load %arg4[%c0_196, %c0_197] : memref<1x32xf32, #tpu.memory_space<vmem>>, vector<1x32xf32>
      %280 = vector.broadcast %279 : vector<1x32xf32> to vector<16x32xf32>
      %281 = arith.addf %278, %280 : vector<16x32xf32>
      %c0_198 = arith.constant 0 : index
      %c0_199 = arith.constant 0 : index
      %282 = vector.load %arg24[%c0_198, %c0_199] : memref<16x32xf32, #tpu.memory_space<vmem>>, vector<16x32xf32>
      tpu.vector_store %arg24[%c0_198, %c0_199], %281 {strides = array<i32>} : memref<16x32xf32, #tpu.memory_space<vmem>>, vector<16x32xf32>,
    } else {
    }
    %c0 = arith.constant 0 : index
    %c0_1 = arith.constant 0 : index
    %3 = vector.load %arg24[%c0, %c0_1] : memref<16x32xf32, #tpu.memory_space<vmem>>, vector<16x32xf32>
    %4 = arith.truncf %3 : vector<16x32xf32> to vector<16x32xbf16>
    %cst = arith.constant 0.000000e+00 : f32
    %5 = vector.broadcast %cst : f32 to vector<16x32xf32>
    %c0_2 = arith.constant 0 : index
    %c0_3 = arith.constant 0 : index
    %c0_4 = arith.constant 0 : index
    %c0_5 = arith.constant 0 : index
    %6 = vector.load %arg7[%c0_2, %c0_3, %c0_4, %c0_5] : memref<1x4x32x8xbf16, #tpu.memory_space<vmem>>, vector<1x1x32x8xbf16>
    %7 = vector.shape_cast %6 : vector<1x1x32x8xbf16> to vector<32x8xbf16>
    %cst_6 = arith.constant dense<0.000000e+00> : vector<16x8xf32>
    %8 = tpu.matmul %4, %7, %cst_6 {dimension_numbers = #tpu.dot_dimension_numbers<[1], [0], [0], [1], [0, 0, 1, 1], [], []>} : vector<16x32xbf16>, vector<32x8xbf16>, vector<16x8xf32> -> vector<16x8xf32>
    %c0_7 = arith.constant 0 : index
    %c0_8 = arith.constant 0 : index
    %c0_9 = arith.constant 0 : index
    %c0_10 = arith.constant 0 : index
    %9 = vector.load %arg10[%c0_7, %c0_8, %c0_9, %c0_10] : memref<1x4x1x8xf32, #tpu.memory_space<vmem>>, vector<1x1x1x8xf32>
    %10 = vector.shape_cast %9 : vector<1x1x1x8xf32> to vector<1x8xf32>
    %11 = vector.broadcast %10 : vector<1x8xf32> to vector<16x8xf32>
    %12 = arith.addf %8, %11 : vector<16x8xf32>
    %c0_11 = arith.constant 0 : index
    %c0_12 = arith.constant 0 : index
    %c0_13 = arith.constant 0 : index
    %c0_14 = arith.constant 0 : index
    %13 = vector.load %arg8[%c0_11, %c0_12, %c0_13, %c0_14] : memref<1x4x32x8xbf16, #tpu.memory_space<vmem>>, vector<1x1x32x8xbf16>
    %14 = vector.shape_cast %13 : vector<1x1x32x8xbf16> to vector<32x8xbf16>
    %cst_15 = arith.constant dense<0.000000e+00> : vector<16x8xf32>
    %15 = tpu.matmul %4, %14, %cst_15 {dimension_numbers = #tpu.dot_dimension_numbers<[1], [0], [0], [1], [0, 0, 1, 1], [], []>} : vector<16x32xbf16>, vector<32x8xbf16>, vector<16x8xf32> -> vector<16x8xf32>
    %c0_16 = arith.constant 0 : index
    %c0_17 = arith.constant 0 : index
    %c0_18 = arith.constant 0 : index
    %c0_19 = arith.constant 0 : index
    %16 = vector.load %arg11[%c0_16, %c0_17, %c0_18, %c0_19] : memref<1x4x1x8xf32, #tpu.memory_space<vmem>>, vector<1x1x1x8xf32>
    %17 = vector.shape_cast %16 : vector<1x1x1x8xf32> to vector<1x8xf32>
    %18 = vector.broadcast %17 : vector<1x8xf32> to vector<16x8xf32>
    %19 = arith.addf %15, %18 : vector<16x8xf32>
    %c0_20 = arith.constant 0 : index
    %c0_21 = arith.constant 0 : index
    %c0_22 = arith.constant 0 : index
    %c0_23 = arith.constant 0 : index
    %20 = vector.load %arg9[%c0_20, %c0_21, %c0_22, %c0_23] : memref<1x4x32x8xbf16, #tpu.memory_space<vmem>>, vector<1x1x32x8xbf16>
    %21 = vector.shape_cast %20 : vector<1x1x32x8xbf16> to vector<32x8xbf16>
    %cst_24 = arith.constant dense<0.000000e+00> : vector<16x8xf32>
    %22 = tpu.matmul %4, %21, %cst_24 {dimension_numbers = #tpu.dot_dimension_numbers<[1], [0], [0], [1], [0, 0, 1, 1], [], []>} : vector<16x32xbf16>, vector<32x8xbf16>, vector<16x8xf32> -> vector<16x8xf32>
    %c0_25 = arith.constant 0 : index
    %c0_26 = arith.constant 0 : index
    %c0_27 = arith.constant 0 : index
    %c0_28 = arith.constant 0 : index
    %23 = vector.load %arg12[%c0_25, %c0_26, %c0_27, %c0_28] : memref<1x4x1x8xf32, #tpu.memory_space<vmem>>, vector<1x1x1x8xf32>
    %24 = vector.shape_cast %23 : vector<1x1x1x8xf32> to vector<1x8xf32>
    %25 = vector.broadcast %24 : vector<1x8xf32> to vector<16x8xf32>
    %26 = arith.addf %22, %25 : vector<16x8xf32>
    %27 = vector.shape_cast %12 : vector<16x8xf32> to vector<2x8x8xf32>
    %28 = arith.truncf %27 : vector<2x8x8xf32> to vector<2x8x8xbf16>
    %29 = vector.shape_cast %19 : vector<16x8xf32> to vector<2x8x8xf32>
    %30 = arith.truncf %29 : vector<2x8x8xf32> to vector<2x8x8xbf16>
    %31 = vector.shape_cast %26 : vector<16x8xf32> to vector<2x8x8xf32>
    %32 = arith.truncf %31 : vector<2x8x8xf32> to vector<2x8x8xbf16>
    "tpu.trace_start"() <{level = 10 : i32, message = "bqd,bkd->bqk"}> : () -> ()
    %cst_29 = arith.constant dense<0.000000e+00> : vector<2x8x8xf32>
    %33 = tpu.matmul %28, %30, %cst_29 {dimension_numbers = #tpu.dot_dimension_numbers<[2], [2], [1], [1], [0, 0, 0, 1, 1, 1], [0], [0]>} : vector<2x8x8xbf16>, vector<2x8x8xbf16>, vector<2x8x8xf32> -> vector<2x8x8xf32>
    "tpu.trace_stop"() : () -> ()
    %cst_30 = arith.constant 0.353553385 : f32
    %34 = vector.broadcast %cst_30 : f32 to vector<2x8x8xf32>
    %35 = arith.mulf %33, %34 : vector<2x8x8xf32>
    %cst_31 = arith.constant dense<0xFF800000> : vector<2x8xf32>
    %36 = vector.multi_reduction <maximumf>, %35, %cst_31 [2] : vector<2x8x8xf32> to vector<2x8xf32>
    %37 = vector.shape_cast %36 : vector<2x8xf32> to vector<2x8x1xf32>
    %38 = vector.broadcast %37 : vector<2x8x1xf32> to vector<2x8x8xf32>
    %39 = arith.subf %35, %38 : vector<2x8x8xf32>
    %40 = math.exp %39 : vector<2x8x8xf32>
    %cst_32 = arith.constant dense<0.000000e+00> : vector<2x8xf32>
    %41 = vector.multi_reduction <add>, %40, %cst_32 [2] : vector<2x8x8xf32> to vector<2x8xf32>
    %42 = vector.shape_cast %41 : vector<2x8xf32> to vector<2x8x1xf32>
    %43 = tpu.reciprocal %42 {approx = true} : vector<2x8x1xf32> -> vector<2x8x1xf32>
    %44 = vector.broadcast %43 : vector<2x8x1xf32> to vector<2x8x8xf32>
    %45 = arith.mulf %40, %44 : vector<2x8x8xf32>
    %46 = arith.truncf %45 : vector<2x8x8xf32> to vector<2x8x8xbf16>
    "tpu.trace_start"() <{level = 10 : i32, message = "bqk,bkd->bqd"}> : () -> ()
    %cst_33 = arith.constant dense<0.000000e+00> : vector<2x8x8xf32>
    %47 = tpu.matmul %46, %32, %cst_33 {dimension_numbers = #tpu.dot_dimension_numbers<[2], [1], [1], [2], [0, 0, 0, 1, 1, 2], [0], [0]>} : vector<2x8x8xbf16>, vector<2x8x8xbf16>, vector<2x8x8xf32> -> vector<2x8x8xf32>
    "tpu.trace_stop"() : () -> ()
    %48 = vector.shape_cast %47 : vector<2x8x8xf32> to vector<16x8xf32>
    %49 = arith.truncf %48 : vector<16x8xf32> to vector<16x8xbf16>
    %c0_34 = arith.constant 0 : index
    %c0_35 = arith.constant 0 : index
    %c0_36 = arith.constant 0 : index
    %c0_37 = arith.constant 0 : index
    %50 = vector.load %arg13[%c0_34, %c0_35, %c0_36, %c0_37] : memref<1x4x8x32xbf16, #tpu.memory_space<vmem>>, vector<1x1x8x32xbf16>
    %51 = vector.shape_cast %50 : vector<1x1x8x32xbf16> to vector<8x32xbf16>
    %cst_38 = arith.constant dense<0.000000e+00> : vector<16x32xf32>
    %52 = tpu.matmul %49, %51, %cst_38 {dimension_numbers = #tpu.dot_dimension_numbers<[1], [0], [0], [1], [0, 0, 1, 1], [], []>} : vector<16x8xbf16>, vector<8x32xbf16>, vector<16x32xf32> -> vector<16x32xf32>
    %53 = arith.addf %5, %52 : vector<16x32xf32>
    %c0_39 = arith.constant 0 : index
    %c1 = arith.constant 1 : index
    %c0_40 = arith.constant 0 : index
    %c0_41 = arith.constant 0 : index
    %54 = vector.load %arg7[%c0_39, %c1, %c0_40, %c0_41] : memref<1x4x32x8xbf16, #tpu.memory_space<vmem>>, vector<1x1x32x8xbf16>
    %55 = vector.shape_cast %54 : vector<1x1x32x8xbf16> to vector<32x8xbf16>
    %cst_42 = arith.constant dense<0.000000e+00> : vector<16x8xf32>
    %56 = tpu.matmul %4, %55, %cst_42 {dimension_numbers = #tpu.dot_dimension_numbers<[1], [0], [0], [1], [0, 0, 1, 1], [], []>} : vector<16x32xbf16>, vector<32x8xbf16>, vector<16x8xf32> -> vector<16x8xf32>
    %c0_43 = arith.constant 0 : index
    %c1_44 = arith.constant 1 : index
    %c0_45 = arith.constant 0 : index
    %c0_46 = arith.constant 0 : index
    %57 = vector.load %arg10[%c0_43, %c1_44, %c0_45, %c0_46] : memref<1x4x1x8xf32, #tpu.memory_space<vmem>>, vector<1x1x1x8xf32>
    %58 = vector.shape_cast %57 : vector<1x1x1x8xf32> to vector<1x8xf32>
    %59 = vector.broadcast %58 : vector<1x8xf32> to vector<16x8xf32>
    %60 = arith.addf %56, %59 : vector<16x8xf32>
    %c0_47 = arith.constant 0 : index
    %c1_48 = arith.constant 1 : index
    %c0_49 = arith.constant 0 : index
    %c0_50 = arith.constant 0 : index
    %61 = vector.load %arg8[%c0_47, %c1_48, %c0_49, %c0_50] : memref<1x4x32x8xbf16, #tpu.memory_space<vmem>>, vector<1x1x32x8xbf16>
    %62 = vector.shape_cast %61 : vector<1x1x32x8xbf16> to vector<32x8xbf16>
    %cst_51 = arith.constant dense<0.000000e+00> : vector<16x8xf32>
    %63 = tpu.matmul %4, %62, %cst_51 {dimension_numbers = #tpu.dot_dimension_numbers<[1], [0], [0], [1], [0, 0, 1, 1], [], []>} : vector<16x32xbf16>, vector<32x8xbf16>, vector<16x8xf32> -> vector<16x8xf32>
    %c0_52 = arith.constant 0 : index
    %c1_53 = arith.constant 1 : index
    %c0_54 = arith.constant 0 : index
    %c0_55 = arith.constant 0 : index
    %64 = vector.load %arg11[%c0_52, %c1_53, %c0_54, %c0_55] : memref<1x4x1x8xf32, #tpu.memory_space<vmem>>, vector<1x1x1x8xf32>
    %65 = vector.shape_cast %64 : vector<1x1x1x8xf32> to vector<1x8xf32>
    %66 = vector.broadcast %65 : vector<1x8xf32> to vector<16x8xf32>
    %67 = arith.addf %63, %66 : vector<16x8xf32>
    %c0_56 = arith.constant 0 : index
    %c1_57 = arith.constant 1 : index
    %c0_58 = arith.constant 0 : index
    %c0_59 = arith.constant 0 : index
    %68 = vector.load %arg9[%c0_56, %c1_57, %c0_58, %c0_59] : memref<1x4x32x8xbf16, #tpu.memory_space<vmem>>, vector<1x1x32x8xbf16>
    %69 = vector.shape_cast %68 : vector<1x1x32x8xbf16> to vector<32x8xbf16>
    %cst_60 = arith.constant dense<0.000000e+00> : vector<16x8xf32>
    %70 = tpu.matmul %4, %69, %cst_60 {dimension_numbers = #tpu.dot_dimension_numbers<[1], [0], [0], [1], [0, 0, 1, 1], [], []>} : vector<16x32xbf16>, vector<32x8xbf16>, vector<16x8xf32> -> vector<16x8xf32>
    %c0_61 = arith.constant 0 : index
    %c1_62 = arith.constant 1 : index
    %c0_63 = arith.constant 0 : index
    %c0_64 = arith.constant 0 : index
    %71 = vector.load %arg12[%c0_61, %c1_62, %c0_63, %c0_64] : memref<1x4x1x8xf32, #tpu.memory_space<vmem>>, vector<1x1x1x8xf32>
    %72 = vector.shape_cast %71 : vector<1x1x1x8xf32> to vector<1x8xf32>
    %73 = vector.broadcast %72 : vector<1x8xf32> to vector<16x8xf32>
    %74 = arith.addf %70, %73 : vector<16x8xf32>
    %75 = vector.shape_cast %60 : vector<16x8xf32> to vector<2x8x8xf32>
    %76 = arith.truncf %75 : vector<2x8x8xf32> to vector<2x8x8xbf16>
    %77 = vector.shape_cast %67 : vector<16x8xf32> to vector<2x8x8xf32>
    %78 = arith.truncf %77 : vector<2x8x8xf32> to vector<2x8x8xbf16>
    %79 = vector.shape_cast %74 : vector<16x8xf32> to vector<2x8x8xf32>
    %80 = arith.truncf %79 : vector<2x8x8xf32> to vector<2x8x8xbf16>
    "tpu.trace_start"() <{level = 10 : i32, message = "bqd,bkd->bqk"}> : () -> ()
    %cst_65 = arith.constant dense<0.000000e+00> : vector<2x8x8xf32>
    %81 = tpu.matmul %76, %78, %cst_65 {dimension_numbers = #tpu.dot_dimension_numbers<[2], [2], [1], [1], [0, 0, 0, 1, 1, 1], [0], [0]>} : vector<2x8x8xbf16>, vector<2x8x8xbf16>, vector<2x8x8xf32> -> vector<2x8x8xf32>
    "tpu.trace_stop"() : () -> ()
    %cst_66 = arith.constant 0.353553385 : f32
    %82 = vector.broadcast %cst_66 : f32 to vector<2x8x8xf32>
    %83 = arith.mulf %81, %82 : vector<2x8x8xf32>
    %cst_67 = arith.constant dense<0xFF800000> : vector<2x8xf32>
    %84 = vector.multi_reduction <maximumf>, %83, %cst_67 [2] : vector<2x8x8xf32> to vector<2x8xf32>
    %85 = vector.shape_cast %84 : vector<2x8xf32> to vector<2x8x1xf32>
    %86 = vector.broadcast %85 : vector<2x8x1xf32> to vector<2x8x8xf32>
    %87 = arith.subf %83, %86 : vector<2x8x8xf32>
    %88 = math.exp %87 : vector<2x8x8xf32>
    %cst_68 = arith.constant dense<0.000000e+00> : vector<2x8xf32>
    %89 = vector.multi_reduction <add>, %88, %cst_68 [2] : vector<2x8x8xf32> to vector<2x8xf32>
    %90 = vector.shape_cast %89 : vector<2x8xf32> to vector<2x8x1xf32>
    %91 = tpu.reciprocal %90 {approx = true} : vector<2x8x1xf32> -> vector<2x8x1xf32>
    %92 = vector.broadcast %91 : vector<2x8x1xf32> to vector<2x8x8xf32>
    %93 = arith.mulf %88, %92 : vector<2x8x8xf32>
    %94 = arith.truncf %93 : vector<2x8x8xf32> to vector<2x8x8xbf16>
    "tpu.trace_start"() <{level = 10 : i32, message = "bqk,bkd->bqd"}> : () -> ()
    %cst_69 = arith.constant dense<0.000000e+00> : vector<2x8x8xf32>
    %95 = tpu.matmul %94, %80, %cst_69 {dimension_numbers = #tpu.dot_dimension_numbers<[2], [1], [1], [2], [0, 0, 0, 1, 1, 2], [0], [0]>} : vector<2x8x8xbf16>, vector<2x8x8xbf16>, vector<2x8x8xf32> -> vector<2x8x8xf32>
    "tpu.trace_stop"() : () -> ()
    %96 = vector.shape_cast %95 : vector<2x8x8xf32> to vector<16x8xf32>
    %97 = arith.truncf %96 : vector<16x8xf32> to vector<16x8xbf16>
    %c0_70 = arith.constant 0 : index
    %c1_71 = arith.constant 1 : index
    %c0_72 = arith.constant 0 : index
    %c0_73 = arith.constant 0 : index
    %98 = vector.load %arg13[%c0_70, %c1_71, %c0_72, %c0_73] : memref<1x4x8x32xbf16, #tpu.memory_space<vmem>>, vector<1x1x8x32xbf16>
    %99 = vector.shape_cast %98 : vector<1x1x8x32xbf16> to vector<8x32xbf16>
    %cst_74 = arith.constant dense<0.000000e+00> : vector<16x32xf32>
    %100 = tpu.matmul %97, %99, %cst_74 {dimension_numbers = #tpu.dot_dimension_numbers<[1], [0], [0], [1], [0, 0, 1, 1], [], []>} : vector<16x8xbf16>, vector<8x32xbf16>, vector<16x32xf32> -> vector<16x32xf32>
    %101 = arith.addf %53, %100 : vector<16x32xf32>
    %c0_75 = arith.constant 0 : index
    %c2 = arith.constant 2 : index
    %c0_76 = arith.constant 0 : index
    %c0_77 = arith.constant 0 : index
    %102 = vector.load %arg7[%c0_75, %c2, %c0_76, %c0_77] : memref<1x4x32x8xbf16, #tpu.memory_space<vmem>>, vector<1x1x32x8xbf16>
    %103 = vector.shape_cast %102 : vector<1x1x32x8xbf16> to vector<32x8xbf16>
    %cst_78 = arith.constant dense<0.000000e+00> : vector<16x8xf32>
    %104 = tpu.matmul %4, %103, %cst_78 {dimension_numbers = #tpu.dot_dimension_numbers<[1], [0], [0], [1], [0, 0, 1, 1], [], []>} : vector<16x32xbf16>, vector<32x8xbf16>, vector<16x8xf32> -> vector<16x8xf32>
    %c0_79 = arith.constant 0 : index
    %c2_80 = arith.constant 2 : index
    %c0_81 = arith.constant 0 : index
    %c0_82 = arith.constant 0 : index
    %105 = vector.load %arg10[%c0_79, %c2_80, %c0_81, %c0_82] : memref<1x4x1x8xf32, #tpu.memory_space<vmem>>, vector<1x1x1x8xf32>
    %106 = vector.shape_cast %105 : vector<1x1x1x8xf32> to vector<1x8xf32>
    %107 = vector.broadcast %106 : vector<1x8xf32> to vector<16x8xf32>
    %108 = arith.addf %104, %107 : vector<16x8xf32>
    %c0_83 = arith.constant 0 : index
    %c2_84 = arith.constant 2 : index
    %c0_85 = arith.constant 0 : index
    %c0_86 = arith.constant 0 : index
    %109 = vector.load %arg8[%c0_83, %c2_84, %c0_85, %c0_86] : memref<1x4x32x8xbf16, #tpu.memory_space<vmem>>, vector<1x1x32x8xbf16>
    %110 = vector.shape_cast %109 : vector<1x1x32x8xbf16> to vector<32x8xbf16>
    %cst_87 = arith.constant dense<0.000000e+00> : vector<16x8xf32>
    %111 = tpu.matmul %4, %110, %cst_87 {dimension_numbers = #tpu.dot_dimension_numbers<[1], [0], [0], [1], [0, 0, 1, 1], [], []>} : vector<16x32xbf16>, vector<32x8xbf16>, vector<16x8xf32> -> vector<16x8xf32>
    %c0_88 = arith.constant 0 : index
    %c2_89 = arith.constant 2 : index
    %c0_90 = arith.constant 0 : index
    %c0_91 = arith.constant 0 : index
    %112 = vector.load %arg11[%c0_88, %c2_89, %c0_90, %c0_91] : memref<1x4x1x8xf32, #tpu.memory_space<vmem>>, vector<1x1x1x8xf32>
    %113 = vector.shape_cast %112 : vector<1x1x1x8xf32> to vector<1x8xf32>
    %114 = vector.broadcast %113 : vector<1x8xf32> to vector<16x8xf32>
    %115 = arith.addf %111, %114 : vector<16x8xf32>
    %c0_92 = arith.constant 0 : index
    %c2_93 = arith.constant 2 : index
    %c0_94 = arith.constant 0 : index
    %c0_95 = arith.constant 0 : index
    %116 = vector.load %arg9[%c0_92, %c2_93, %c0_94, %c0_95] : memref<1x4x32x8xbf16, #tpu.memory_space<vmem>>, vector<1x1x32x8xbf16>
    %117 = vector.shape_cast %116 : vector<1x1x32x8xbf16> to vector<32x8xbf16>
    %cst_96 = arith.constant dense<0.000000e+00> : vector<16x8xf32>
    %118 = tpu.matmul %4, %117, %cst_96 {dimension_numbers = #tpu.dot_dimension_numbers<[1], [0], [0], [1], [0, 0, 1, 1], [], []>} : vector<16x32xbf16>, vector<32x8xbf16>, vector<16x8xf32> -> vector<16x8xf32>
    %c0_97 = arith.constant 0 : index
    %c2_98 = arith.constant 2 : index
    %c0_99 = arith.constant 0 : index
    %c0_100 = arith.constant 0 : index
    %119 = vector.load %arg12[%c0_97, %c2_98, %c0_99, %c0_100] : memref<1x4x1x8xf32, #tpu.memory_space<vmem>>, vector<1x1x1x8xf32>
    %120 = vector.shape_cast %119 : vector<1x1x1x8xf32> to vector<1x8xf32>
    %121 = vector.broadcast %120 : vector<1x8xf32> to vector<16x8xf32>
    %122 = arith.addf %118, %121 : vector<16x8xf32>
    %123 = vector.shape_cast %108 : vector<16x8xf32> to vector<2x8x8xf32>
    %124 = arith.truncf %123 : vector<2x8x8xf32> to vector<2x8x8xbf16>
    %125 = vector.shape_cast %115 : vector<16x8xf32> to vector<2x8x8xf32>
    %126 = arith.truncf %125 : vector<2x8x8xf32> to vector<2x8x8xbf16>
    %127 = vector.shape_cast %122 : vector<16x8xf32> to vector<2x8x8xf32>
    %128 = arith.truncf %127 : vector<2x8x8xf32> to vector<2x8x8xbf16>
    "tpu.trace_start"() <{level = 10 : i32, message = "bqd,bkd->bqk"}> : () -> ()
    %cst_101 = arith.constant dense<0.000000e+00> : vector<2x8x8xf32>
    %129 = tpu.matmul %124, %126, %cst_101 {dimension_numbers = #tpu.dot_dimension_numbers<[2], [2], [1], [1], [0, 0, 0, 1, 1, 1], [0], [0]>} : vector<2x8x8xbf16>, vector<2x8x8xbf16>, vector<2x8x8xf32> -> vector<2x8x8xf32>
    "tpu.trace_stop"() : () -> ()
    %cst_102 = arith.constant 0.353553385 : f32
    %130 = vector.broadcast %cst_102 : f32 to vector<2x8x8xf32>
    %131 = arith.mulf %129, %130 : vector<2x8x8xf32>
    %cst_103 = arith.constant dense<0xFF800000> : vector<2x8xf32>
    %132 = vector.multi_reduction <maximumf>, %131, %cst_103 [2] : vector<2x8x8xf32> to vector<2x8xf32>
    %133 = vector.shape_cast %132 : vector<2x8xf32> to vector<2x8x1xf32>
    %134 = vector.broadcast %133 : vector<2x8x1xf32> to vector<2x8x8xf32>
    %135 = arith.subf %131, %134 : vector<2x8x8xf32>
    %136 = math.exp %135 : vector<2x8x8xf32>
    %cst_104 = arith.constant dense<0.000000e+00> : vector<2x8xf32>
    %137 = vector.multi_reduction <add>, %136, %cst_104 [2] : vector<2x8x8xf32> to vector<2x8xf32>
    %138 = vector.shape_cast %137 : vector<2x8xf32> to vector<2x8x1xf32>
    %139 = tpu.reciprocal %138 {approx = true} : vector<2x8x1xf32> -> vector<2x8x1xf32>
    %140 = vector.broadcast %139 : vector<2x8x1xf32> to vector<2x8x8xf32>
    %141 = arith.mulf %136, %140 : vector<2x8x8xf32>
    %142 = arith.truncf %141 : vector<2x8x8xf32> to vector<2x8x8xbf16>
    "tpu.trace_start"() <{level = 10 : i32, message = "bqk,bkd->bqd"}> : () -> ()
    %cst_105 = arith.constant dense<0.000000e+00> : vector<2x8x8xf32>
    %143 = tpu.matmul %142, %128, %cst_105 {dimension_numbers = #tpu.dot_dimension_numbers<[2], [1], [1], [2], [0, 0, 0, 1, 1, 2], [0], [0]>} : vector<2x8x8xbf16>, vector<2x8x8xbf16>, vector<2x8x8xf32> -> vector<2x8x8xf32>
    "tpu.trace_stop"() : () -> ()
    %144 = vector.shape_cast %143 : vector<2x8x8xf32> to vector<16x8xf32>
    %145 = arith.truncf %144 : vector<16x8xf32> to vector<16x8xbf16>
    %c0_106 = arith.constant 0 : index
    %c2_107 = arith.constant 2 : index
    %c0_108 = arith.constant 0 : index
    %c0_109 = arith.constant 0 : index
    %146 = vector.load %arg13[%c0_106, %c2_107, %c0_108, %c0_109] : memref<1x4x8x32xbf16, #tpu.memory_space<vmem>>, vector<1x1x8x32xbf16>
    %147 = vector.shape_cast %146 : vector<1x1x8x32xbf16> to vector<8x32xbf16>
    %cst_110 = arith.constant dense<0.000000e+00> : vector<16x32xf32>
    %148 = tpu.matmul %145, %147, %cst_110 {dimension_numbers = #tpu.dot_dimension_numbers<[1], [0], [0], [1], [0, 0, 1, 1], [], []>} : vector<16x8xbf16>, vector<8x32xbf16>, vector<16x32xf32> -> vector<16x32xf32>
    %149 = arith.addf %101, %148 : vector<16x32xf32>
    %c0_111 = arith.constant 0 : index
    %c3 = arith.constant 3 : index
    %c0_112 = arith.constant 0 : index
    %c0_113 = arith.constant 0 : index
    %150 = vector.load %arg7[%c0_111, %c3, %c0_112, %c0_113] : memref<1x4x32x8xbf16, #tpu.memory_space<vmem>>, vector<1x1x32x8xbf16>
    %151 = vector.shape_cast %150 : vector<1x1x32x8xbf16> to vector<32x8xbf16>
    %cst_114 = arith.constant dense<0.000000e+00> : vector<16x8xf32>
    %152 = tpu.matmul %4, %151, %cst_114 {dimension_numbers = #tpu.dot_dimension_numbers<[1], [0], [0], [1], [0, 0, 1, 1], [], []>} : vector<16x32xbf16>, vector<32x8xbf16>, vector<16x8xf32> -> vector<16x8xf32>
    %c0_115 = arith.constant 0 : index
    %c3_116 = arith.constant 3 : index
    %c0_117 = arith.constant 0 : index
    %c0_118 = arith.constant 0 : index
    %153 = vector.load %arg10[%c0_115, %c3_116, %c0_117, %c0_118] : memref<1x4x1x8xf32, #tpu.memory_space<vmem>>, vector<1x1x1x8xf32>
    %154 = vector.shape_cast %153 : vector<1x1x1x8xf32> to vector<1x8xf32>
    %155 = vector.broadcast %154 : vector<1x8xf32> to vector<16x8xf32>
    %156 = arith.addf %152, %155 : vector<16x8xf32>
    %c0_119 = arith.constant 0 : index
    %c3_120 = arith.constant 3 : index
    %c0_121 = arith.constant 0 : index
    %c0_122 = arith.constant 0 : index
    %157 = vector.load %arg8[%c0_119, %c3_120, %c0_121, %c0_122] : memref<1x4x32x8xbf16, #tpu.memory_space<vmem>>, vector<1x1x32x8xbf16>
    %158 = vector.shape_cast %157 : vector<1x1x32x8xbf16> to vector<32x8xbf16>
    %cst_123 = arith.constant dense<0.000000e+00> : vector<16x8xf32>
    %159 = tpu.matmul %4, %158, %cst_123 {dimension_numbers = #tpu.dot_dimension_numbers<[1], [0], [0], [1], [0, 0, 1, 1], [], []>} : vector<16x32xbf16>, vector<32x8xbf16>, vector<16x8xf32> -> vector<16x8xf32>
    %c0_124 = arith.constant 0 : index
    %c3_125 = arith.constant 3 : index
    %c0_126 = arith.constant 0 : index
    %c0_127 = arith.constant 0 : index
    %160 = vector.load %arg11[%c0_124, %c3_125, %c0_126, %c0_127] : memref<1x4x1x8xf32, #tpu.memory_space<vmem>>, vector<1x1x1x8xf32>
    %161 = vector.shape_cast %160 : vector<1x1x1x8xf32> to vector<1x8xf32>
    %162 = vector.broadcast %161 : vector<1x8xf32> to vector<16x8xf32>
    %163 = arith.addf %159, %162 : vector<16x8xf32>
    %c0_128 = arith.constant 0 : index
    %c3_129 = arith.constant 3 : index
    %c0_130 = arith.constant 0 : index
    %c0_131 = arith.constant 0 : index
    %164 = vector.load %arg9[%c0_128, %c3_129, %c0_130, %c0_131] : memref<1x4x32x8xbf16, #tpu.memory_space<vmem>>, vector<1x1x32x8xbf16>
    %165 = vector.shape_cast %164 : vector<1x1x32x8xbf16> to vector<32x8xbf16>
    %cst_132 = arith.constant dense<0.000000e+00> : vector<16x8xf32>
    %166 = tpu.matmul %4, %165, %cst_132 {dimension_numbers = #tpu.dot_dimension_numbers<[1], [0], [0], [1], [0, 0, 1, 1], [], []>} : vector<16x32xbf16>, vector<32x8xbf16>, vector<16x8xf32> -> vector<16x8xf32>
    %c0_133 = arith.constant 0 : index
    %c3_134 = arith.constant 3 : index
    %c0_135 = arith.constant 0 : index
    %c0_136 = arith.constant 0 : index
    %167 = vector.load %arg12[%c0_133, %c3_134, %c0_135, %c0_136] : memref<1x4x1x8xf32, #tpu.memory_space<vmem>>, vector<1x1x1x8xf32>
    %168 = vector.shape_cast %167 : vector<1x1x1x8xf32> to vector<1x8xf32>
    %169 = vector.broadcast %168 : vector<1x8xf32> to vector<16x8xf32>
    %170 = arith.addf %166, %169 : vector<16x8xf32>
    %171 = vector.shape_cast %156 : vector<16x8xf32> to vector<2x8x8xf32>
    %172 = arith.truncf %171 : vector<2x8x8xf32> to vector<2x8x8xbf16>
    %173 = vector.shape_cast %163 : vector<16x8xf32> to vector<2x8x8xf32>
    %174 = arith.truncf %173 : vector<2x8x8xf32> to vector<2x8x8xbf16>
    %175 = vector.shape_cast %170 : vector<16x8xf32> to vector<2x8x8xf32>
    %176 = arith.truncf %175 : vector<2x8x8xf32> to vector<2x8x8xbf16>
    "tpu.trace_start"() <{level = 10 : i32, message = "bqd,bkd->bqk"}> : () -> ()
    %cst_137 = arith.constant dense<0.000000e+00> : vector<2x8x8xf32>
    %177 = tpu.matmul %172, %174, %cst_137 {dimension_numbers = #tpu.dot_dimension_numbers<[2], [2], [1], [1], [0, 0, 0, 1, 1, 1], [0], [0]>} : vector<2x8x8xbf16>, vector<2x8x8xbf16>, vector<2x8x8xf32> -> vector<2x8x8xf32>
    "tpu.trace_stop"() : () -> ()
    %cst_138 = arith.constant 0.353553385 : f32
    %178 = vector.broadcast %cst_138 : f32 to vector<2x8x8xf32>
    %179 = arith.mulf %177, %178 : vector<2x8x8xf32>
    %cst_139 = arith.constant dense<0xFF800000> : vector<2x8xf32>
    %180 = vector.multi_reduction <maximumf>, %179, %cst_139 [2] : vector<2x8x8xf32> to vector<2x8xf32>
    %181 = vector.shape_cast %180 : vector<2x8xf32> to vector<2x8x1xf32>
    %182 = vector.broadcast %181 : vector<2x8x1xf32> to vector<2x8x8xf32>
    %183 = arith.subf %179, %182 : vector<2x8x8xf32>
    %184 = math.exp %183 : vector<2x8x8xf32>
    %cst_140 = arith.constant dense<0.000000e+00> : vector<2x8xf32>
    %185 = vector.multi_reduction <add>, %184, %cst_140 [2] : vector<2x8x8xf32> to vector<2x8xf32>
    %186 = vector.shape_cast %185 : vector<2x8xf32> to vector<2x8x1xf32>
    %187 = tpu.reciprocal %186 {approx = true} : vector<2x8x1xf32> -> vector<2x8x1xf32>
    %188 = vector.broadcast %187 : vector<2x8x1xf32> to vector<2x8x8xf32>
    %189 = arith.mulf %184, %188 : vector<2x8x8xf32>
    %190 = arith.truncf %189 : vector<2x8x8xf32> to vector<2x8x8xbf16>
    "tpu.trace_start"() <{level = 10 : i32, message = "bqk,bkd->bqd"}> : () -> ()
    %cst_141 = arith.constant dense<0.000000e+00> : vector<2x8x8xf32>
    %191 = tpu.matmul %190, %176, %cst_141 {dimension_numbers = #tpu.dot_dimension_numbers<[2], [1], [1], [2], [0, 0, 0, 1, 1, 2], [0], [0]>} : vector<2x8x8xbf16>, vector<2x8x8xbf16>, vector<2x8x8xf32> -> vector<2x8x8xf32>
    "tpu.trace_stop"() : () -> ()
    %192 = vector.shape_cast %191 : vector<2x8x8xf32> to vector<16x8xf32>
    %193 = arith.truncf %192 : vector<16x8xf32> to vector<16x8xbf16>
    %c0_142 = arith.constant 0 : index
    %c3_143 = arith.constant 3 : index
    %c0_144 = arith.constant 0 : index
    %c0_145 = arith.constant 0 : index
    %194 = vector.load %arg13[%c0_142, %c3_143, %c0_144, %c0_145] : memref<1x4x8x32xbf16, #tpu.memory_space<vmem>>, vector<1x1x8x32xbf16>
    %195 = vector.shape_cast %194 : vector<1x1x8x32xbf16> to vector<8x32xbf16>
    %cst_146 = arith.constant dense<0.000000e+00> : vector<16x32xf32>
    %196 = tpu.matmul %193, %195, %cst_146 {dimension_numbers = #tpu.dot_dimension_numbers<[1], [0], [0], [1], [0, 0, 1, 1], [], []>} : vector<16x8xbf16>, vector<8x32xbf16>, vector<16x32xf32> -> vector<16x32xf32>
    %197 = arith.addf %149, %196 : vector<16x32xf32>
    %c0_147 = arith.constant 0 : index
    %c0_148 = arith.constant 0 : index
    %c0_149 = arith.constant 0 : index
    %198 = vector.load %arg14[%c0_147, %c0_148, %c0_149] : memref<1x1x32xf32, #tpu.memory_space<vmem>>, vector<1x1x32xf32>
    %199 = vector.shape_cast %198 : vector<1x1x32xf32> to vector<1x32xf32>
    %200 = vector.broadcast %199 : vector<1x32xf32> to vector<16x32xf32>
    %201 = arith.addf %197, %200 : vector<16x32xf32>
    %c0_150 = arith.constant 0 : index
    %c0_151 = arith.constant 0 : index
    %c0_152 = arith.constant 0 : index
    %202 = vector.load %arg19[%c0_150, %c0_151, %c0_152] : memref<1x1x32xf32, #tpu.memory_space<vmem>>, vector<1x1x32xf32>
    %203 = vector.shape_cast %202 : vector<1x1x32xf32> to vector<1x32xf32>
    %c0_153 = arith.constant 0 : index
    %c0_154 = arith.constant 0 : index
    %c0_155 = arith.constant 0 : index
    %204 = vector.load %arg20[%c0_153, %c0_154, %c0_155] : memref<1x1x32xf32, #tpu.memory_space<vmem>>, vector<1x1x32xf32>
    %205 = vector.shape_cast %204 : vector<1x1x32xf32> to vector<1x32xf32>
    %206 = arith.addf %3, %201 : vector<16x32xf32>
    %cst_156 = arith.constant dense<0.000000e+00> : vector<16xf32>
    %207 = vector.multi_reduction <add>, %206, %cst_156 [1] : vector<16x32xf32> to vector<16xf32>
    %208 = vector.shape_cast %207 : vector<16xf32> to vector<16x1xf32>
    %cst_157 = arith.constant 3.125000e-02 : f32
    %209 = vector.broadcast %cst_157 : f32 to vector<16x1xf32>
    %210 = arith.mulf %208, %209 : vector<16x1xf32>
    %211 = vector.broadcast %210 : vector<16x1xf32> to vector<16x32xf32>
    %212 = arith.subf %206, %211 : vector<16x32xf32>
    %213 = arith.mulf %212, %212 : vector<16x32xf32>
    %cst_158 = arith.constant dense<0.000000e+00> : vector<16xf32>
    %214 = vector.multi_reduction <add>, %213, %cst_158 [1] : vector<16x32xf32> to vector<16xf32>
    %215 = vector.shape_cast %214 : vector<16xf32> to vector<16x1xf32>
    %cst_159 = arith.constant 3.125000e-02 : f32
    %216 = vector.broadcast %cst_159 : f32 to vector<16x1xf32>
    %217 = arith.mulf %215, %216 : vector<16x1xf32>
    %cst_160 = arith.constant 9.99999974E-6 : f32
    %218 = vector.broadcast %cst_160 : f32 to vector<16x1xf32>
    %219 = arith.addf %217, %218 : vector<16x1xf32>
    %220 = math.rsqrt %219 : vector<16x1xf32>
    %221 = vector.broadcast %220 : vector<16x1xf32> to vector<16x32xf32>
    %222 = arith.mulf %212, %221 : vector<16x32xf32>
    %223 = vector.broadcast %203 : vector<1x32xf32> to vector<16x32xf32>
    %224 = arith.mulf %222, %223 : vector<16x32xf32>
    %225 = vector.broadcast %205 : vector<1x32xf32> to vector<16x32xf32>
    %226 = arith.addf %224, %225 : vector<16x32xf32>
    %227 = arith.truncf %226 : vector<16x32xf32> to vector<16x32xbf16>
    %c0_161 = arith.constant 0 : index
    %c0_162 = arith.constant 0 : index
    %c0_163 = arith.constant 0 : index
    %228 = vector.load %arg15[%c0_161, %c0_162, %c0_163] : memref<1x32x2048xbf16, #tpu.memory_space<vmem>>, vector<1x32x2048xbf16>
    %229 = vector.shape_cast %228 : vector<1x32x2048xbf16> to vector<32x2048xbf16>
    %cst_164 = arith.constant dense<0.000000e+00> : vector<16x2048xf32>
    %230 = tpu.matmul %227, %229, %cst_164 {dimension_numbers = #tpu.dot_dimension_numbers<[1], [0], [0], [1], [0, 0, 1, 1], [], []>} : vector<16x32xbf16>, vector<32x2048xbf16>, vector<16x2048xf32> -> vector<16x2048xf32>
    %c0_165 = arith.constant 0 : index
    %c0_166 = arith.constant 0 : index
    %c0_167 = arith.constant 0 : index
    %231 = vector.load %arg16[%c0_165, %c0_166, %c0_167] : memref<1x1x2048xf32, #tpu.memory_space<vmem>>, vector<1x1x2048xf32>
    %232 = vector.shape_cast %231 : vector<1x1x2048xf32> to vector<1x2048xf32>
    %233 = vector.broadcast %232 : vector<1x2048xf32> to vector<16x2048xf32>
    %234 = arith.addf %230, %233 : vector<16x2048xf32>
    %cst_168 = arith.constant 0.000000e+00 : f32
    %235 = vector.broadcast %cst_168 : f32 to vector<16x2048xf32>
    %236 = arith.maximumf %234, %235 : vector<16x2048xf32>
    %237 = arith.truncf %236 : vector<16x2048xf32> to vector<16x2048xbf16>
    %c0_169 = arith.constant 0 : index
    %c0_170 = arith.constant 0 : index
    %c0_171 = arith.constant 0 : index
    %238 = vector.load %arg17[%c0_169, %c0_170, %c0_171] : memref<1x2048x32xbf16, #tpu.memory_space<vmem>>, vector<1x2048x32xbf16>
    %239 = vector.shape_cast %238 : vector<1x2048x32xbf16> to vector<2048x32xbf16>
    %cst_172 = arith.constant dense<0.000000e+00> : vector<16x32xf32>
    %240 = tpu.matmul %237, %239, %cst_172 {dimension_numbers = #tpu.dot_dimension_numbers<[1], [0], [0], [1], [0, 0, 1, 1], [], []>} : vector<16x2048xbf16>, vector<2048x32xbf16>, vector<16x32xf32> -> vector<16x32xf32>
    %c0_173 = arith.constant 0 : index
    %c0_174 = arith.constant 0 : index
    %c0_175 = arith.constant 0 : index
    %241 = vector.load %arg18[%c0_173, %c0_174, %c0_175] : memref<1x1x32xf32, #tpu.memory_space<vmem>>, vector<1x1x32xf32>
    %242 = vector.shape_cast %241 : vector<1x1x32xf32> to vector<1x32xf32>
    %243 = vector.broadcast %242 : vector<1x32xf32> to vector<16x32xf32>
    %244 = arith.addf %240, %243 : vector<16x32xf32>
    %c0_176 = arith.constant 0 : index
    %c0_177 = arith.constant 0 : index
    %c0_178 = arith.constant 0 : index
    %245 = vector.load %arg21[%c0_176, %c0_177, %c0_178] : memref<1x1x32xf32, #tpu.memory_space<vmem>>, vector<1x1x32xf32>
    %246 = vector.shape_cast %245 : vector<1x1x32xf32> to vector<1x32xf32>
    %c0_179 = arith.constant 0 : index
    %c0_180 = arith.constant 0 : index
    %c0_181 = arith.constant 0 : index
    %247 = vector.load %arg22[%c0_179, %c0_180, %c0_181] : memref<1x1x32xf32, #tpu.memory_space<vmem>>, vector<1x1x32xf32>
    %248 = vector.shape_cast %247 : vector<1x1x32xf32> to vector<1x32xf32>
    %249 = arith.addf %226, %244 : vector<16x32xf32>
    %cst_182 = arith.constant dense<0.000000e+00> : vector<16xf32>
    %250 = vector.multi_reduction <add>, %249, %cst_182 [1] : vector<16x32xf32> to vector<16xf32>
    %251 = vector.shape_cast %250 : vector<16xf32> to vector<16x1xf32>
    %cst_183 = arith.constant 3.125000e-02 : f32
    %252 = vector.broadcast %cst_183 : f32 to vector<16x1xf32>
    %253 = arith.mulf %251, %252 : vector<16x1xf32>
    %254 = vector.broadcast %253 : vector<16x1xf32> to vector<16x32xf32>
    %255 = arith.subf %249, %254 : vector<16x32xf32>
    %256 = arith.mulf %255, %255 : vector<16x32xf32>
    %cst_184 = arith.constant dense<0.000000e+00> : vector<16xf32>
    %257 = vector.multi_reduction <add>, %256, %cst_184 [1] : vector<16x32xf32> to vector<16xf32>
    %258 = vector.shape_cast %257 : vector<16xf32> to vector<16x1xf32>
    %cst_185 = arith.constant 3.125000e-02 : f32
    %259 = vector.broadcast %cst_185 : f32 to vector<16x1xf32>
    %260 = arith.mulf %258, %259 : vector<16x1xf32>
    %cst_186 = arith.constant 9.99999974E-6 : f32
    %261 = vector.broadcast %cst_186 : f32 to vector<16x1xf32>
    %262 = arith.addf %260, %261 : vector<16x1xf32>
    %263 = math.rsqrt %262 : vector<16x1xf32>
    %264 = vector.broadcast %263 : vector<16x1xf32> to vector<16x32xf32>
    %265 = arith.mulf %255, %264 : vector<16x32xf32>
    %266 = vector.broadcast %246 : vector<1x32xf32> to vector<16x32xf32>
    %267 = arith.mulf %265, %266 : vector<16x32xf32>
    %268 = vector.broadcast %248 : vector<1x32xf32> to vector<16x32xf32>
    %269 = arith.addf %267, %268 : vector<16x32xf32>
    %c0_187 = arith.constant 0 : index
    %c0_188 = arith.constant 0 : index
    %270 = vector.load %arg24[%c0_187, %c0_188] : memref<16x32xf32, #tpu.memory_space<vmem>>, vector<16x32xf32>
    tpu.vector_store %arg24[%c0_187, %c0_188], %269 {strides = array<i32>} : memref<16x32xf32, #tpu.memory_space<vmem>>, vector<16x32xf32>,
    %c1_i32 = arith.constant 1 : i32
    %271 = arith.cmpi eq, %arg1, %c1_i32 : i32
    %272 = arith.extui %271 : i1 to i32
    %c0_i32_189 = arith.constant 0 : i32
    %273 = arith.cmpi ne, %272, %c0_i32_189 : i32
    scf.if %273 {
      %274 = vector.shape_cast %269 : vector<16x32xf32> to vector<2x8x32xf32>
      %cst_190 = arith.constant dense<0.000000e+00> : vector<2x32xf32>
      %275 = vector.multi_reduction <add>, %274, %cst_190 [1] : vector<2x8x32xf32> to vector<2x32xf32>
      %cst_191 = arith.constant 1.250000e-01 : f32
      %276 = vector.broadcast %cst_191 : f32 to vector<2x32xf32>
      %277 = arith.mulf %275, %276 : vector<2x32xf32>
      %c0_192 = arith.constant 0 : index
      %c0_193 = arith.constant 0 : index
      %278 = vector.load %arg5[%c0_192, %c0_193] : memref<1x32xf32, #tpu.memory_space<vmem>>, vector<1x32xf32>
      %cst_194 = arith.constant dense<0.000000e+00> : vector<1x2xf32>
      %279 = tpu.matmul %278, %277, %cst_194 {dimension_numbers = #tpu.dot_dimension_numbers<[1], [1], [0], [0], [0, 0, 1, 0], [], []>} : vector<1x32xf32>, vector<2x32xf32>, vector<1x2xf32> -> vector<1x2xf32>
      %c0_195 = arith.constant 0 : index
      %c0_196 = arith.constant 0 : index
      %280 = vector.load %arg6[%c0_195, %c0_196] : memref<1x1xf32, #tpu.memory_space<vmem>>, vector<1x1xf32>
      %281 = vector.broadcast %280 : vector<1x1xf32> to vector<1x2xf32>
      %282 = arith.addf %279, %281 : vector<1x2xf32>
      %c0_197 = arith.constant 0 : index
      %c0_198 = arith.constant 0 : index
      %c0_199 = arith.constant 0 : index
      %283 = vector.load %arg23[%c0_197, %c0_198, %c0_199] : memref<1x1x2xf32, #tpu.memory_space<vmem>>, vector<1x1x2xf32>
      %284 = vector.shape_cast %283 : vector<1x1x2xf32> to vector<1x2xf32>
      %285 = vector.shape_cast %282 : vector<1x2xf32> to vector<1x1x2xf32>
      tpu.vector_store %arg23[%c0_197, %c0_198, %c0_199], %285 {strides = array<i32>} : memref<1x1x2xf32, #tpu.memory_space<vmem>>, vector<1x1x2xf32>,
    } else {
    }
    return
  }
  func.func @transform_0(%arg0: i32, %arg1: i32) -> (i32, i32, i32) {
    %c0_i32 = arith.constant 0 : i32
    %c0_i32_0 = arith.constant 0 : i32
    %c0_i32_1 = arith.constant 0 : i32
    return %arg0, %c0_i32, %c0_i32_0 : i32, i32, i32
  }
  func.func @transform_1(%arg0: i32, %arg1: i32) -> (i32, i32) {
    %c0_i32 = arith.constant 0 : i32
    %c0_i32_0 = arith.constant 0 : i32
    %c0_i32_1 = arith.constant 0 : i32
    return %c0_i32, %c0_i32_0 : i32, i32
  }
  func.func @transform_2(%arg0: i32, %arg1: i32) -> (i32, i32) {
    %c0_i32 = arith.constant 0 : i32
    %c0_i32_0 = arith.constant 0 : i32
    %c0_i32_1 = arith.constant 0 : i32
    return %c0_i32, %c0_i32_0 : i32, i32
  }
  func.func @transform_3(%arg0: i32, %arg1: i32) -> (i32, i32) {
    %c0_i32 = arith.constant 0 : i32
    %c0_i32_0 = arith.constant 0 : i32
    %c0_i32_1 = arith.constant 0 : i32
    return %c0_i32, %c0_i32_0 : i32, i32
  }
  func.func @transform_4(%arg0: i32, %arg1: i32) -> (i32, i32) {
    %c0_i32 = arith.constant 0 : i32
    %c0_i32_0 = arith.constant 0 : i32
    %c0_i32_1 = arith.constant 0 : i32
    return %c0_i32, %c0_i32_0 : i32, i32
  }
  func.func @transform_5(%arg0: i32, %arg1: i32) -> (i32, i32, i32, i32) {
    %c0_i32 = arith.constant 0 : i32
    %c0_i32_0 = arith.constant 0 : i32
    %c0_i32_1 = arith.constant 0 : i32
    %c0_i32_2 = arith.constant 0 : i32
    return %arg1, %c0_i32, %c0_i32_0, %c0_i32_1 : i32, i32, i32, i32
  }
  func.func @transform_6(%arg0: i32, %arg1: i32) -> (i32, i32, i32, i32) {
    %c0_i32 = arith.constant 0 : i32
    %c0_i32_0 = arith.constant 0 : i32
    %c0_i32_1 = arith.constant 0 : i32
    %c0_i32_2 = arith.constant 0 : i32
    return %arg1, %c0_i32, %c0_i32_0, %c0_i32_1 : i32, i32, i32, i32
  }
  func.func @transform_7(%arg0: i32, %arg1: i32) -> (i32, i32, i32, i32) {
    %c0_i32 = arith.constant 0 : i32
    %c0_i32_0 = arith.constant 0 : i32
    %c0_i32_1 = arith.constant 0 : i32
    %c0_i32_2 = arith.constant 0 : i32
    return %arg1, %c0_i32, %c0_i32_0, %c0_i32_1 : i32, i32, i32, i32
  }
  func.func @transform_8(%arg0: i32, %arg1: i32) -> (i32, i32, i32, i32) {
    %c0_i32 = arith.constant 0 : i32
    %c0_i32_0 = arith.constant 0 : i32
    %c0_i32_1 = arith.constant 0 : i32
    %c0_i32_2 = arith.constant 0 : i32
    return %arg1, %c0_i32, %c0_i32_0, %c0_i32_1 : i32, i32, i32, i32
  }
  func.func @transform_9(%arg0: i32, %arg1: i32) -> (i32, i32, i32, i32) {
    %c0_i32 = arith.constant 0 : i32
    %c0_i32_0 = arith.constant 0 : i32
    %c0_i32_1 = arith.constant 0 : i32
    %c0_i32_2 = arith.constant 0 : i32
    return %arg1, %c0_i32, %c0_i32_0, %c0_i32_1 : i32, i32, i32, i32
  }
  func.func @transform_10(%arg0: i32, %arg1: i32) -> (i32, i32, i32, i32) {
    %c0_i32 = arith.constant 0 : i32
    %c0_i32_0 = arith.constant 0 : i32
    %c0_i32_1 = arith.constant 0 : i32
    %c0_i32_2 = arith.constant 0 : i32
    return %arg1, %c0_i32, %c0_i32_0, %c0_i32_1 : i32, i32, i32, i32
  }
  func.func @transform_11(%arg0: i32, %arg1: i32) -> (i32, i32, i32, i32) {
    %c0_i32 = arith.constant 0 : i32
    %c0_i32_0 = arith.constant 0 : i32
    %c0_i32_1 = arith.constant 0 : i32
    %c0_i32_2 = arith.constant 0 : i32
    return %arg1, %c0_i32, %c0_i32_0, %c0_i32_1 : i32, i32, i32, i32
  }
  func.func @transform_12(%arg0: i32, %arg1: i32) -> (i32, i32, i32) {
    %c0_i32 = arith.constant 0 : i32
    %c0_i32_0 = arith.constant 0 : i32
    %c0_i32_1 = arith.constant 0 : i32
    return %arg1, %c0_i32, %c0_i32_0 : i32, i32, i32
  }
  func.func @transform_13(%arg0: i32, %arg1: i32) -> (i32, i32, i32) {
    %c0_i32 = arith.constant 0 : i32
    %c0_i32_0 = arith.constant 0 : i32
    %c0_i32_1 = arith.constant 0 : i32
    return %arg1, %c0_i32, %c0_i32_0 : i32, i32, i32
  }
  func.func @transform_14(%arg0: i32, %arg1: i32) -> (i32, i32, i32) {
    %c0_i32 = arith.constant 0 : i32
    %c0_i32_0 = arith.constant 0 : i32
    %c0_i32_1 = arith.constant 0 : i32
    return %arg1, %c0_i32, %c0_i32_0 : i32, i32, i32
  }
  func.func @transform_15(%arg0: i32, %arg1: i32) -> (i32, i32, i32) {
    %c0_i32 = arith.constant 0 : i32
    %c0_i32_0 = arith.constant 0 : i32
    %c0_i32_1 = arith.constant 0 : i32
    return %arg1, %c0_i32, %c0_i32_0 : i32, i32, i32
  }
  func.func @transform_16(%arg0: i32, %arg1: i32) -> (i32, i32, i32) {
    %c0_i32 = arith.constant 0 : i32
    %c0_i32_0 = arith.constant 0 : i32
    %c0_i32_1 = arith.constant 0 : i32
    return %arg1, %c0_i32, %c0_i32_0 : i32, i32, i32
  }
  func.func @transform_17(%arg0: i32, %arg1: i32) -> (i32, i32, i32) {
    %c0_i32 = arith.constant 0 : i32
    %c0_i32_0 = arith.constant 0 : i32
    %c0_i32_1 = arith.constant 0 : i32
    return %arg1, %c0_i32, %c0_i32_0 : i32, i32, i32
  }
  func.func @transform_18(%arg0: i32, %arg1: i32) -> (i32, i32, i32) {
    %c0_i32 = arith.constant 0 : i32
    %c0_i32_0 = arith.constant 0 : i32
    %c0_i32_1 = arith.constant 0 : i32
    return %arg1, %c0_i32, %c0_i32_0 : i32, i32, i32
  }
  func.func @transform_19(%arg0: i32, %arg1: i32) -> (i32, i32, i32) {
    %c0_i32 = arith.constant 0 : i32
    %c0_i32_0 = arith.constant 0 : i32
    %c0_i32_1 = arith.constant 0 : i32
    return %arg1, %c0_i32, %c0_i32_0 : i32, i32, i32
  }
  func.func @transform_20(%arg0: i32, %arg1: i32) -> (i32, i32, i32) {
    %c0_i32 = arith.constant 0 : i32
    %c0_i32_0 = arith.constant 0 : i32
    %c0_i32_1 = arith.constant 0 : i32
    return %arg1, %c0_i32, %c0_i32_0 : i32, i32, i32
  }
  func.func @transform_21(%arg0: i32, %arg1: i32) -> (i32, i32, i32) {
    %c0_i32 = arith.constant 0 : i32
    %c0_i32_0 = arith.constant 0 : i32
    %c0_i32_1 = arith.constant 0 : i32
    return %arg0, %c0_i32, %c0_i32_0 : i32, i32, i32
  }
}

module attributes {stable_mosaic.version = 11 : i64} {
  func.func @_fused_transformer_kernel(%arg0: i32, %arg1: i32, %arg2: memref<2x8x16xf32, #tpu.memory_space<vmem>>, %arg3: memref<16x32xbf16, #tpu.memory_space<vmem>>, %arg4: memref<1x32xf32, #tpu.memory_space<vmem>>, %arg5: memref<1x32xf32, #tpu.memory_space<vmem>>, %arg6: memref<1x1xf32, #tpu.memory_space<vmem>>, %arg7: memref<1x4x32x8xbf16, #tpu.memory_space<vmem>>, %arg8: memref<1x4x32x8xbf16, #tpu.memory_space<vmem>>, %arg9: memref<1x4x32x8xbf16, #tpu.memory_space<vmem>>, %arg10: memref<1x4x1x8xf32, #tpu.memory_space<vmem>>, %arg11: memref<1x4x1x8xf32, #tpu.memory_space<vmem>>, %arg12: memref<1x4x1x8xf32, #tpu.memory_space<vmem>>, %arg13: memref<1x4x8x32xbf16, #tpu.memory_space<vmem>>, %arg14: memref<1x1x32xf32, #tpu.memory_space<vmem>>, %arg15: memref<1x32x2048xbf16, #tpu.memory_space<vmem>>, %arg16: memref<1x1x2048xf32, #tpu.memory_space<vmem>>, %arg17: memref<1x2048x32xbf16, #tpu.memory_space<vmem>>, %arg18: memref<1x1x32xf32, #tpu.memory_space<vmem>>, %arg19: memref<1x1x32xf32, #tpu.memory_space<vmem>>, %arg20: memref<1x1x32xf32, #tpu.memory_space<vmem>>, %arg21: memref<1x1x32xf32, #tpu.memory_space<vmem>>, %arg22: memref<1x1x32xf32, #tpu.memory_space<vmem>>, %arg23: memref<1x1x2xf32, #tpu.memory_space<vmem>>, %arg24: memref<16x32xf32, #tpu.memory_space<vmem>>) attributes {dimension_semantics = [#tpu.dimension_semantics<parallel>, #tpu.dimension_semantics<arbitrary>], iteration_bounds = array<i64: 1, 2>, scalar_prefetch = 0 : i64, scratch_operands = 1 : i64, tpu.core_type = #tpu.core_type<tc>, window_params = [{transform_indices = @transform_0, window_bounds = array<i64: 2, 8, 16>}, {pipeline_mode = #tpu.pipeline_mode<synchronous>, transform_indices = @transform_1, window_bounds = array<i64: 16, 32>}, {pipeline_mode = #tpu.pipeline_mode<synchronous>, transform_indices = @transform_2, window_bounds = array<i64: 1, 32>}, {pipeline_mode = #tpu.pipeline_mode<synchronous>, transform_indices = @transform_3, window_bounds = array<i64: 1, 32>}, {pipeline_mode = #tpu.pipeline_mode<synchronous>, transform_indices = @transform_4, window_bounds = array<i64: 1, 1>}, {transform_indices = @transform_5, window_bounds = array<i64: 1, 4, 32, 8>}, {transform_indices = @transform_6, window_bounds = array<i64: 1, 4, 32, 8>}, {transform_indices = @transform_7, window_bounds = array<i64: 1, 4, 32, 8>}, {transform_indices = @transform_8, window_bounds = array<i64: 1, 4, 1, 8>}, {transform_indices = @transform_9, window_bounds = array<i64: 1, 4, 1, 8>}, {transform_indices = @transform_10, window_bounds = array<i64: 1, 4, 1, 8>}, {transform_indices = @transform_11, window_bounds = array<i64: 1, 4, 8, 32>}, {transform_indices = @transform_12, window_bounds = array<i64: 1, 1, 32>}, {transform_indices = @transform_13, window_bounds = array<i64: 1, 32, 2048>}, {transform_indices = @transform_14, window_bounds = array<i64: 1, 1, 2048>}, {transform_indices = @transform_15, window_bounds = array<i64: 1, 2048, 32>}, {transform_indices = @transform_16, window_bounds = array<i64: 1, 1, 32>}, {transform_indices = @transform_17, window_bounds = array<i64: 1, 1, 32>}, {transform_indices = @transform_18, window_bounds = array<i64: 1, 1, 32>}, {transform_indices = @transform_19, window_bounds = array<i64: 1, 1, 32>}, {transform_indices = @transform_20, window_bounds = array<i64: 1, 1, 32>}, {transform_indices = @transform_21, window_bounds = array<i64: 1, 1, 2>}]} {
    %c0_i32 = arith.constant 0 : i32
    %0 = arith.cmpi eq, %arg1, %c0_i32 : i32
    %1 = arith.extui %0 : i1 to i32
    %c0_i32_0 = arith.constant 0 : i32
    %2 = arith.cmpi ne, %1, %c0_i32_0 : i32
    scf.if %2 {
      %c0_190 = arith.constant 0 : index
      %c0_191 = arith.constant 0 : index
      %c0_192 = arith.constant 0 : index
      %274 = vector.load %arg2[%c0_190, %c0_191, %c0_192] : memref<2x8x16xf32, #tpu.memory_space<vmem>>, vector<2x8x16xf32>
      %275 = vector.shape_cast %274 : vector<2x8x16xf32> to vector<16x16xf32>
      %276 = arith.truncf %275 : vector<16x16xf32> to vector<16x16xbf16>
      %c0_193 = arith.constant 0 : index
      %c0_194 = arith.constant 0 : index
      %277 = vector.load %arg3[%c0_193, %c0_194] : memref<16x32xbf16, #tpu.memory_space<vmem>>, vector<16x32xbf16>
      %cst_195 = arith.constant dense<0.000000e+00> : vector<16x32xf32>
      %278 = tpu.matmul %276, %277, %cst_195 {dimension_numbers = #tpu.dot_dimension_numbers<[1], [0], [0], [1], [0, 0, 1, 1], [], []>} : vector<16x16xbf16>, vector<16x32xbf16>, vector<16x32xf32> -> vector<16x32xf32>
      %c0_196 = arith.constant 0 : index
      %c0_197 = arith.constant 0 : index
      %279 = vector.load %arg4[%c0_196, %c0_197] : memref<1x32xf32, #tpu.memory_space<vmem>>, vector<1x32xf32>
      %280 = vector.broadcast %279 : vector<1x32xf32> to vector<16x32xf32>
      %281 = arith.addf %278, %280 : vector<16x32xf32>
      %c0_198 = arith.constant 0 : index
      %c0_199 = arith.constant 0 : index
      %282 = vector.load %arg24[%c0_198, %c0_199] : memref<16x32xf32, #tpu.memory_space<vmem>>, vector<16x32xf32>
      tpu.vector_store %arg24[%c0_198, %c0_199], %281 {strides = array<i32>} : memref<16x32xf32, #tpu.memory_space<vmem>>, vector<16x32xf32>,
    } else {
    }
    %c0 = arith.constant 0 : index
    %c0_1 = arith.constant 0 : index
    %3 = vector.load %arg24[%c0, %c0_1] : memref<16x32xf32, #tpu.memory_space<vmem>>, vector<16x32xf32>
    %4 = arith.truncf %3 : vector<16x32xf32> to vector<16x32xbf16>
    %cst = arith.constant 0.000000e+00 : f32
    %5 = vector.broadcast %cst : f32 to vector<16x32xf32>
    %c0_2 = arith.constant 0 : index
    %c0_3 = arith.constant 0 : index
    %c0_4 = arith.constant 0 : index
    %c0_5 = arith.constant 0 : index
    %6 = vector.load %arg7[%c0_2, %c0_3, %c0_4, %c0_5] : memref<1x4x32x8xbf16, #tpu.memory_space<vmem>>, vector<1x1x32x8xbf16>
    %7 = vector.shape_cast %6 : vector<1x1x32x8xbf16> to vector<32x8xbf16>
    %cst_6 = arith.constant dense<0.000000e+00> : vector<16x8xf32>
    %8 = tpu.matmul %4, %7, %cst_6 {dimension_numbers = #tpu.dot_dimension_numbers<[1], [0], [0], [1], [0, 0, 1, 1], [], []>} : vector<16x32xbf16>, vector<32x8xbf16>, vector<16x8xf32> -> vector<16x8xf32>
    %c0_7 = arith.constant 0 : index
    %c0_8 = arith.constant 0 : index
    %c0_9 = arith.constant 0 : index
    %c0_10 = arith.constant 0 : index
    %9 = vector.load %arg10[%c0_7, %c0_8, %c0_9, %c0_10] : memref<1x4x1x8xf32, #tpu.memory_space<vmem>>, vector<1x1x1x8xf32>
    %10 = vector.shape_cast %9 : vector<1x1x1x8xf32> to vector<1x8xf32>
    %11 = vector.broadcast %10 : vector<1x8xf32> to vector<16x8xf32>
    %12 = arith.addf %8, %11 : vector<16x8xf32>
    %c0_11 = arith.constant 0 : index
    %c0_12 = arith.constant 0 : index
    %c0_13 = arith.constant 0 : index
    %c0_14 = arith.constant 0 : index
    %13 = vector.load %arg8[%c0_11, %c0_12, %c0_13, %c0_14] : memref<1x4x32x8xbf16, #tpu.memory_space<vmem>>, vector<1x1x32x8xbf16>
    %14 = vector.shape_cast %13 : vector<1x1x32x8xbf16> to vector<32x8xbf16>
    %cst_15 = arith.constant dense<0.000000e+00> : vector<16x8xf32>
    %15 = tpu.matmul %4, %14, %cst_15 {dimension_numbers = #tpu.dot_dimension_numbers<[1], [0], [0], [1], [0, 0, 1, 1], [], []>} : vector<16x32xbf16>, vector<32x8xbf16>, vector<16x8xf32> -> vector<16x8xf32>
    %c0_16 = arith.constant 0 : index
    %c0_17 = arith.constant 0 : index
    %c0_18 = arith.constant 0 : index
    %c0_19 = arith.constant 0 : index
    %16 = vector.load %arg11[%c0_16, %c0_17, %c0_18, %c0_19] : memref<1x4x1x8xf32, #tpu.memory_space<vmem>>, vector<1x1x1x8xf32>
    %17 = vector.shape_cast %16 : vector<1x1x1x8xf32> to vector<1x8xf32>
    %18 = vector.broadcast %17 : vector<1x8xf32> to vector<16x8xf32>
    %19 = arith.addf %15, %18 : vector<16x8xf32>
    %c0_20 = arith.constant 0 : index
    %c0_21 = arith.constant 0 : index
    %c0_22 = arith.constant 0 : index
    %c0_23 = arith.constant 0 : index
    %20 = vector.load %arg9[%c0_20, %c0_21, %c0_22, %c0_23] : memref<1x4x32x8xbf16, #tpu.memory_space<vmem>>, vector<1x1x32x8xbf16>
    %21 = vector.shape_cast %20 : vector<1x1x32x8xbf16> to vector<32x8xbf16>
    %cst_24 = arith.constant dense<0.000000e+00> : vector<16x8xf32>
    %22 = tpu.matmul %4, %21, %cst_24 {dimension_numbers = #tpu.dot_dimension_numbers<[1], [0], [0], [1], [0, 0, 1, 1], [], []>} : vector<16x32xbf16>, vector<32x8xbf16>, vector<16x8xf32> -> vector<16x8xf32>
    %c0_25 = arith.constant 0 : index
    %c0_26 = arith.constant 0 : index
    %c0_27 = arith.constant 0 : index
    %c0_28 = arith.constant 0 : index
    %23 = vector.load %arg12[%c0_25, %c0_26, %c0_27, %c0_28] : memref<1x4x1x8xf32, #tpu.memory_space<vmem>>, vector<1x1x1x8xf32>
    %24 = vector.shape_cast %23 : vector<1x1x1x8xf32> to vector<1x8xf32>
    %25 = vector.broadcast %24 : vector<1x8xf32> to vector<16x8xf32>
    %26 = arith.addf %22, %25 : vector<16x8xf32>
    %27 = vector.shape_cast %12 : vector<16x8xf32> to vector<2x8x8xf32>
    %28 = arith.truncf %27 : vector<2x8x8xf32> to vector<2x8x8xbf16>
    %29 = vector.shape_cast %19 : vector<16x8xf32> to vector<2x8x8xf32>
    %30 = arith.truncf %29 : vector<2x8x8xf32> to vector<2x8x8xbf16>
    %31 = vector.shape_cast %26 : vector<16x8xf32> to vector<2x8x8xf32>
    %32 = arith.truncf %31 : vector<2x8x8xf32> to vector<2x8x8xbf16>
    "tpu.trace_start"() <{level = 10 : i32, message = "bqd,bkd->bqk"}> : () -> ()
    %cst_29 = arith.constant dense<0.000000e+00> : vector<2x8x8xf32>
    %33 = tpu.matmul %28, %30, %cst_29 {dimension_numbers = #tpu.dot_dimension_numbers<[2], [2], [1], [1], [0, 0, 0, 1, 1, 1], [0], [0]>} : vector<2x8x8xbf16>, vector<2x8x8xbf16>, vector<2x8x8xf32> -> vector<2x8x8xf32>
    "tpu.trace_stop"() : () -> ()
    %cst_30 = arith.constant 0.353553385 : f32
    %34 = vector.broadcast %cst_30 : f32 to vector<2x8x8xf32>
    %35 = arith.mulf %33, %34 : vector<2x8x8xf32>
    %cst_31 = arith.constant dense<0xFF800000> : vector<2x8xf32>
    %36 = vector.multi_reduction <maximumf>, %35, %cst_31 [2] : vector<2x8x8xf32> to vector<2x8xf32>
    %37 = vector.shape_cast %36 : vector<2x8xf32> to vector<2x8x1xf32>
    %38 = vector.broadcast %37 : vector<2x8x1xf32> to vector<2x8x8xf32>
    %39 = arith.subf %35, %38 : vector<2x8x8xf32>
    %40 = math.exp %39 : vector<2x8x8xf32>
    %cst_32 = arith.constant dense<0.000000e+00> : vector<2x8xf32>
    %41 = vector.multi_reduction <add>, %40, %cst_32 [2] : vector<2x8x8xf32> to vector<2x8xf32>
    %42 = vector.shape_cast %41 : vector<2x8xf32> to vector<2x8x1xf32>
    %43 = tpu.reciprocal %42 {approx = true} : vector<2x8x1xf32> -> vector<2x8x1xf32>
    %44 = vector.broadcast %43 : vector<2x8x1xf32> to vector<2x8x8xf32>
    %45 = arith.mulf %40, %44 : vector<2x8x8xf32>
    %46 = arith.truncf %45 : vector<2x8x8xf32> to vector<2x8x8xbf16>
    "tpu.trace_start"() <{level = 10 : i32, message = "bqk,bkd->bqd"}> : () -> ()
    %cst_33 = arith.constant dense<0.000000e+00> : vector<2x8x8xf32>
    %47 = tpu.matmul %46, %32, %cst_33 {dimension_numbers = #tpu.dot_dimension_numbers<[2], [1], [1], [2], [0, 0, 0, 1, 1, 2], [0], [0]>} : vector<2x8x8xbf16>, vector<2x8x8xbf16>, vector<2x8x8xf32> -> vector<2x8x8xf32>
    "tpu.trace_stop"() : () -> ()
    %48 = vector.shape_cast %47 : vector<2x8x8xf32> to vector<16x8xf32>
    %49 = arith.truncf %48 : vector<16x8xf32> to vector<16x8xbf16>
    %c0_34 = arith.constant 0 : index
    %c0_35 = arith.constant 0 : index
    %c0_36 = arith.constant 0 : index
    %c0_37 = arith.constant 0 : index
    %50 = vector.load %arg13[%c0_34, %c0_35, %c0_36, %c0_37] : memref<1x4x8x32xbf16, #tpu.memory_space<vmem>>, vector<1x1x8x32xbf16>
    %51 = vector.shape_cast %50 : vector<1x1x8x32xbf16> to vector<8x32xbf16>
    %cst_38 = arith.constant dense<0.000000e+00> : vector<16x32xf32>
    %52 = tpu.matmul %49, %51, %cst_38 {dimension_numbers = #tpu.dot_dimension_numbers<[1], [0], [0], [1], [0, 0, 1, 1], [], []>} : vector<16x8xbf16>, vector<8x32xbf16>, vector<16x32xf32> -> vector<16x32xf32>
    %53 = arith.addf %5, %52 : vector<16x32xf32>
    %c0_39 = arith.constant 0 : index
    %c1 = arith.constant 1 : index
    %c0_40 = arith.constant 0 : index
    %c0_41 = arith.constant 0 : index
    %54 = vector.load %arg7[%c0_39, %c1, %c0_40, %c0_41] : memref<1x4x32x8xbf16, #tpu.memory_space<vmem>>, vector<1x1x32x8xbf16>
    %55 = vector.shape_cast %54 : vector<1x1x32x8xbf16> to vector<32x8xbf16>
    %cst_42 = arith.constant dense<0.000000e+00> : vector<16x8xf32>
    %56 = tpu.matmul %4, %55, %cst_42 {dimension_numbers = #tpu.dot_dimension_numbers<[1], [0], [0], [1], [0, 0, 1, 1], [], []>} : vector<16x32xbf16>, vector<32x8xbf16>, vector<16x8xf32> -> vector<16x8xf32>
    %c0_43 = arith.constant 0 : index
    %c1_44 = arith.constant 1 : index
    %c0_45 = arith.constant 0 : index
    %c0_46 = arith.constant 0 : index
    %57 = vector.load %arg10[%c0_43, %c1_44, %c0_45, %c0_46] : memref<1x4x1x8xf32, #tpu.memory_space<vmem>>, vector<1x1x1x8xf32>
    %58 = vector.shape_cast %57 : vector<1x1x1x8xf32> to vector<1x8xf32>
    %59 = vector.broadcast %58 : vector<1x8xf32> to vector<16x8xf32>
    %60 = arith.addf %56, %59 : vector<16x8xf32>
    %c0_47 = arith.constant 0 : index
    %c1_48 = arith.constant 1 : index
    %c0_49 = arith.constant 0 : index
    %c0_50 = arith.constant 0 : index
    %61 = vector.load %arg8[%c0_47, %c1_48, %c0_49, %c0_50] : memref<1x4x32x8xbf16, #tpu.memory_space<vmem>>, vector<1x1x32x8xbf16>
    %62 = vector.shape_cast %61 : vector<1x1x32x8xbf16> to vector<32x8xbf16>
    %cst_51 = arith.constant dense<0.000000e+00> : vector<16x8xf32>
    %63 = tpu.matmul %4, %62, %cst_51 {dimension_numbers = #tpu.dot_dimension_numbers<[1], [0], [0], [1], [0, 0, 1, 1], [], []>} : vector<16x32xbf16>, vector<32x8xbf16>, vector<16x8xf32> -> vector<16x8xf32>
    %c0_52 = arith.constant 0 : index
    %c1_53 = arith.constant 1 : index
    %c0_54 = arith.constant 0 : index
    %c0_55 = arith.constant 0 : index
    %64 = vector.load %arg11[%c0_52, %c1_53, %c0_54, %c0_55] : memref<1x4x1x8xf32, #tpu.memory_space<vmem>>, vector<1x1x1x8xf32>
    %65 = vector.shape_cast %64 : vector<1x1x1x8xf32> to vector<1x8xf32>
    %66 = vector.broadcast %65 : vector<1x8xf32> to vector<16x8xf32>
    %67 = arith.addf %63, %66 : vector<16x8xf32>
    %c0_56 = arith.constant 0 : index
    %c1_57 = arith.constant 1 : index
    %c0_58 = arith.constant 0 : index
    %c0_59 = arith.constant 0 : index
    %68 = vector.load %arg9[%c0_56, %c1_57, %c0_58, %c0_59] : memref<1x4x32x8xbf16, #tpu.memory_space<vmem>>, vector<1x1x32x8xbf16>
    %69 = vector.shape_cast %68 : vector<1x1x32x8xbf16> to vector<32x8xbf16>
    %cst_60 = arith.constant dense<0.000000e+00> : vector<16x8xf32>
    %70 = tpu.matmul %4, %69, %cst_60 {dimension_numbers = #tpu.dot_dimension_numbers<[1], [0], [0], [1], [0, 0, 1, 1], [], []>} : vector<16x32xbf16>, vector<32x8xbf16>, vector<16x8xf32> -> vector<16x8xf32>
    %c0_61 = arith.constant 0 : index
    %c1_62 = arith.constant 1 : index
    %c0_63 = arith.constant 0 : index
    %c0_64 = arith.constant 0 : index
    %71 = vector.load %arg12[%c0_61, %c1_62, %c0_63, %c0_64] : memref<1x4x1x8xf32, #tpu.memory_space<vmem>>, vector<1x1x1x8xf32>
    %72 = vector.shape_cast %71 : vector<1x1x1x8xf32> to vector<1x8xf32>
    %73 = vector.broadcast %72 : vector<1x8xf32> to vector<16x8xf32>
    %74 = arith.addf %70, %73 : vector<16x8xf32>
    %75 = vector.shape_cast %60 : vector<16x8xf32> to vector<2x8x8xf32>
    %76 = arith.truncf %75 : vector<2x8x8xf32> to vector<2x8x8xbf16>
    %77 = vector.shape_cast %67 : vector<16x8xf32> to vector<2x8x8xf32>
    %78 = arith.truncf %77 : vector<2x8x8xf32> to vector<2x8x8xbf16>
    %79 = vector.shape_cast %74 : vector<16x8xf32> to vector<2x8x8xf32>
    %80 = arith.truncf %79 : vector<2x8x8xf32> to vector<2x8x8xbf16>
    "tpu.trace_start"() <{level = 10 : i32, message = "bqd,bkd->bqk"}> : () -> ()
    %cst_65 = arith.constant dense<0.000000e+00> : vector<2x8x8xf32>
    %81 = tpu.matmul %76, %78, %cst_65 {dimension_numbers = #tpu.dot_dimension_numbers<[2], [2], [1], [1], [0, 0, 0, 1, 1, 1], [0], [0]>} : vector<2x8x8xbf16>, vector<2x8x8xbf16>, vector<2x8x8xf32> -> vector<2x8x8xf32>
    "tpu.trace_stop"() : () -> ()
    %cst_66 = arith.constant 0.353553385 : f32
    %82 = vector.broadcast %cst_66 : f32 to vector<2x8x8xf32>
    %83 = arith.mulf %81, %82 : vector<2x8x8xf32>
    %cst_67 = arith.constant dense<0xFF800000> : vector<2x8xf32>
    %84 = vector.multi_reduction <maximumf>, %83, %cst_67 [2] : vector<2x8x8xf32> to vector<2x8xf32>
    %85 = vector.shape_cast %84 : vector<2x8xf32> to vector<2x8x1xf32>
    %86 = vector.broadcast %85 : vector<2x8x1xf32> to vector<2x8x8xf32>
    %87 = arith.subf %83, %86 : vector<2x8x8xf32>
    %88 = math.exp %87 : vector<2x8x8xf32>
    %cst_68 = arith.constant dense<0.000000e+00> : vector<2x8xf32>
    %89 = vector.multi_reduction <add>, %88, %cst_68 [2] : vector<2x8x8xf32> to vector<2x8xf32>
    %90 = vector.shape_cast %89 : vector<2x8xf32> to vector<2x8x1xf32>
    %91 = tpu.reciprocal %90 {approx = true} : vector<2x8x1xf32> -> vector<2x8x1xf32>
    %92 = vector.broadcast %91 : vector<2x8x1xf32> to vector<2x8x8xf32>
    %93 = arith.mulf %88, %92 : vector<2x8x8xf32>
    %94 = arith.truncf %93 : vector<2x8x8xf32> to vector<2x8x8xbf16>
    "tpu.trace_start"() <{level = 10 : i32, message = "bqk,bkd->bqd"}> : () -> ()
    %cst_69 = arith.constant dense<0.000000e+00> : vector<2x8x8xf32>
    %95 = tpu.matmul %94, %80, %cst_69 {dimension_numbers = #tpu.dot_dimension_numbers<[2], [1], [1], [2], [0, 0, 0, 1, 1, 2], [0], [0]>} : vector<2x8x8xbf16>, vector<2x8x8xbf16>, vector<2x8x8xf32> -> vector<2x8x8xf32>
    "tpu.trace_stop"() : () -> ()
    %96 = vector.shape_cast %95 : vector<2x8x8xf32> to vector<16x8xf32>
    %97 = arith.truncf %96 : vector<16x8xf32> to vector<16x8xbf16>
    %c0_70 = arith.constant 0 : index
    %c1_71 = arith.constant 1 : index
    %c0_72 = arith.constant 0 : index
    %c0_73 = arith.constant 0 : index
    %98 = vector.load %arg13[%c0_70, %c1_71, %c0_72, %c0_73] : memref<1x4x8x32xbf16, #tpu.memory_space<vmem>>, vector<1x1x8x32xbf16>
    %99 = vector.shape_cast %98 : vector<1x1x8x32xbf16> to vector<8x32xbf16>
    %cst_74 = arith.constant dense<0.000000e+00> : vector<16x32xf32>
    %100 = tpu.matmul %97, %99, %cst_74 {dimension_numbers = #tpu.dot_dimension_numbers<[1], [0], [0], [1], [0, 0, 1, 1], [], []>} : vector<16x8xbf16>, vector<8x32xbf16>, vector<16x32xf32> -> vector<16x32xf32>
    %101 = arith.addf %53, %100 : vector<16x32xf32>
    %c0_75 = arith.constant 0 : index
    %c2 = arith.constant 2 : index
    %c0_76 = arith.constant 0 : index
    %c0_77 = arith.constant 0 : index
    %102 = vector.load %arg7[%c0_75, %c2, %c0_76, %c0_77] : memref<1x4x32x8xbf16, #tpu.memory_space<vmem>>, vector<1x1x32x8xbf16>
    %103 = vector.shape_cast %102 : vector<1x1x32x8xbf16> to vector<32x8xbf16>
    %cst_78 = arith.constant dense<0.000000e+00> : vector<16x8xf32>
    %104 = tpu.matmul %4, %103, %cst_78 {dimension_numbers = #tpu.dot_dimension_numbers<[1], [0], [0], [1], [0, 0, 1, 1], [], []>} : vector<16x32xbf16>, vector<32x8xbf16>, vector<16x8xf32> -> vector<16x8xf32>
    %c0_79 = arith.constant 0 : index
    %c2_80 = arith.constant 2 : index
    %c0_81 = arith.constant 0 : index
    %c0_82 = arith.constant 0 : index
    %105 = vector.load %arg10[%c0_79, %c2_80, %c0_81, %c0_82] : memref<1x4x1x8xf32, #tpu.memory_space<vmem>>, vector<1x1x1x8xf32>
    %106 = vector.shape_cast %105 : vector<1x1x1x8xf32> to vector<1x8xf32>
    %107 = vector.broadcast %106 : vector<1x8xf32> to vector<16x8xf32>
    %108 = arith.addf %104, %107 : vector<16x8xf32>
    %c0_83 = arith.constant 0 : index
    %c2_84 = arith.constant 2 : index
    %c0_85 = arith.constant 0 : index
    %c0_86 = arith.constant 0 : index
    %109 = vector.load %arg8[%c0_83, %c2_84, %c0_85, %c0_86] : memref<1x4x32x8xbf16, #tpu.memory_space<vmem>>, vector<1x1x32x8xbf16>
    %110 = vector.shape_cast %109 : vector<1x1x32x8xbf16> to vector<32x8xbf16>
    %cst_87 = arith.constant dense<0.000000e+00> : vector<16x8xf32>
    %111 = tpu.matmul %4, %110, %cst_87 {dimension_numbers = #tpu.dot_dimension_numbers<[1], [0], [0], [1], [0, 0, 1, 1], [], []>} : vector<16x32xbf16>, vector<32x8xbf16>, vector<16x8xf32> -> vector<16x8xf32>
    %c0_88 = arith.constant 0 : index
    %c2_89 = arith.constant 2 : index
    %c0_90 = arith.constant 0 : index
    %c0_91 = arith.constant 0 : index
    %112 = vector.load %arg11[%c0_88, %c2_89, %c0_90, %c0_91] : memref<1x4x1x8xf32, #tpu.memory_space<vmem>>, vector<1x1x1x8xf32>
    %113 = vector.shape_cast %112 : vector<1x1x1x8xf32> to vector<1x8xf32>
    %114 = vector.broadcast %113 : vector<1x8xf32> to vector<16x8xf32>
    %115 = arith.addf %111, %114 : vector<16x8xf32>
    %c0_92 = arith.constant 0 : index
    %c2_93 = arith.constant 2 : index
    %c0_94 = arith.constant 0 : index
    %c0_95 = arith.constant 0 : index
    %116 = vector.load %arg9[%c0_92, %c2_93, %c0_94, %c0_95] : memref<1x4x32x8xbf16, #tpu.memory_space<vmem>>, vector<1x1x32x8xbf16>
    %117 = vector.shape_cast %116 : vector<1x1x32x8xbf16> to vector<32x8xbf16>
    %cst_96 = arith.constant dense<0.000000e+00> : vector<16x8xf32>
    %118 = tpu.matmul %4, %117, %cst_96 {dimension_numbers = #tpu.dot_dimension_numbers<[1], [0], [0], [1], [0, 0, 1, 1], [], []>} : vector<16x32xbf16>, vector<32x8xbf16>, vector<16x8xf32> -> vector<16x8xf32>
    %c0_97 = arith.constant 0 : index
    %c2_98 = arith.constant 2 : index
    %c0_99 = arith.constant 0 : index
    %c0_100 = arith.constant 0 : index
    %119 = vector.load %arg12[%c0_97, %c2_98, %c0_99, %c0_100] : memref<1x4x1x8xf32, #tpu.memory_space<vmem>>, vector<1x1x1x8xf32>
    %120 = vector.shape_cast %119 : vector<1x1x1x8xf32> to vector<1x8xf32>
    %121 = vector.broadcast %120 : vector<1x8xf32> to vector<16x8xf32>
    %122 = arith.addf %118, %121 : vector<16x8xf32>
    %123 = vector.shape_cast %108 : vector<16x8xf32> to vector<2x8x8xf32>
    %124 = arith.truncf %123 : vector<2x8x8xf32> to vector<2x8x8xbf16>
    %125 = vector.shape_cast %115 : vector<16x8xf32> to vector<2x8x8xf32>
    %126 = arith.truncf %125 : vector<2x8x8xf32> to vector<2x8x8xbf16>
    %127 = vector.shape_cast %122 : vector<16x8xf32> to vector<2x8x8xf32>
    %128 = arith.truncf %127 : vector<2x8x8xf32> to vector<2x8x8xbf16>
    "tpu.trace_start"() <{level = 10 : i32, message = "bqd,bkd->bqk"}> : () -> ()
    %cst_101 = arith.constant dense<0.000000e+00> : vector<2x8x8xf32>
    %129 = tpu.matmul %124, %126, %cst_101 {dimension_numbers = #tpu.dot_dimension_numbers<[2], [2], [1], [1], [0, 0, 0, 1, 1, 1], [0], [0]>} : vector<2x8x8xbf16>, vector<2x8x8xbf16>, vector<2x8x8xf32> -> vector<2x8x8xf32>
    "tpu.trace_stop"() : () -> ()
    %cst_102 = arith.constant 0.353553385 : f32
    %130 = vector.broadcast %cst_102 : f32 to vector<2x8x8xf32>
    %131 = arith.mulf %129, %130 : vector<2x8x8xf32>
    %cst_103 = arith.constant dense<0xFF800000> : vector<2x8xf32>
    %132 = vector.multi_reduction <maximumf>, %131, %cst_103 [2] : vector<2x8x8xf32> to vector<2x8xf32>
    %133 = vector.shape_cast %132 : vector<2x8xf32> to vector<2x8x1xf32>
    %134 = vector.broadcast %133 : vector<2x8x1xf32> to vector<2x8x8xf32>
    %135 = arith.subf %131, %134 : vector<2x8x8xf32>
    %136 = math.exp %135 : vector<2x8x8xf32>
    %cst_104 = arith.constant dense<0.000000e+00> : vector<2x8xf32>
    %137 = vector.multi_reduction <add>, %136, %cst_104 [2] : vector<2x8x8xf32> to vector<2x8xf32>
    %138 = vector.shape_cast %137 : vector<2x8xf32> to vector<2x8x1xf32>
    %139 = tpu.reciprocal %138 {approx = true} : vector<2x8x1xf32> -> vector<2x8x1xf32>
    %140 = vector.broadcast %139 : vector<2x8x1xf32> to vector<2x8x8xf32>
    %141 = arith.mulf %136, %140 : vector<2x8x8xf32>
    %142 = arith.truncf %141 : vector<2x8x8xf32> to vector<2x8x8xbf16>
    "tpu.trace_start"() <{level = 10 : i32, message = "bqk,bkd->bqd"}> : () -> ()
    %cst_105 = arith.constant dense<0.000000e+00> : vector<2x8x8xf32>
    %143 = tpu.matmul %142, %128, %cst_105 {dimension_numbers = #tpu.dot_dimension_numbers<[2], [1], [1], [2], [0, 0, 0, 1, 1, 2], [0], [0]>} : vector<2x8x8xbf16>, vector<2x8x8xbf16>, vector<2x8x8xf32> -> vector<2x8x8xf32>
    "tpu.trace_stop"() : () -> ()
    %144 = vector.shape_cast %143 : vector<2x8x8xf32> to vector<16x8xf32>
    %145 = arith.truncf %144 : vector<16x8xf32> to vector<16x8xbf16>
    %c0_106 = arith.constant 0 : index
    %c2_107 = arith.constant 2 : index
    %c0_108 = arith.constant 0 : index
    %c0_109 = arith.constant 0 : index
    %146 = vector.load %arg13[%c0_106, %c2_107, %c0_108, %c0_109] : memref<1x4x8x32xbf16, #tpu.memory_space<vmem>>, vector<1x1x8x32xbf16>
    %147 = vector.shape_cast %146 : vector<1x1x8x32xbf16> to vector<8x32xbf16>
    %cst_110 = arith.constant dense<0.000000e+00> : vector<16x32xf32>
    %148 = tpu.matmul %145, %147, %cst_110 {dimension_numbers = #tpu.dot_dimension_numbers<[1], [0], [0], [1], [0, 0, 1, 1], [], []>} : vector<16x8xbf16>, vector<8x32xbf16>, vector<16x32xf32> -> vector<16x32xf32>
    %149 = arith.addf %101, %148 : vector<16x32xf32>
    %c0_111 = arith.constant 0 : index
    %c3 = arith.constant 3 : index
    %c0_112 = arith.constant 0 : index
    %c0_113 = arith.constant 0 : index
    %150 = vector.load %arg7[%c0_111, %c3, %c0_112, %c0_113] : memref<1x4x32x8xbf16, #tpu.memory_space<vmem>>, vector<1x1x32x8xbf16>
    %151 = vector.shape_cast %150 : vector<1x1x32x8xbf16> to vector<32x8xbf16>
    %cst_114 = arith.constant dense<0.000000e+00> : vector<16x8xf32>
    %152 = tpu.matmul %4, %151, %cst_114 {dimension_numbers = #tpu.dot_dimension_numbers<[1], [0], [0], [1], [0, 0, 1, 1], [], []>} : vector<16x32xbf16>, vector<32x8xbf16>, vector<16x8xf32> -> vector<16x8xf32>
    %c0_115 = arith.constant 0 : index
    %c3_116 = arith.constant 3 : index
    %c0_117 = arith.constant 0 : index
    %c0_118 = arith.constant 0 : index
    %153 = vector.load %arg10[%c0_115, %c3_116, %c0_117, %c0_118] : memref<1x4x1x8xf32, #tpu.memory_space<vmem>>, vector<1x1x1x8xf32>
    %154 = vector.shape_cast %153 : vector<1x1x1x8xf32> to vector<1x8xf32>
    %155 = vector.broadcast %154 : vector<1x8xf32> to vector<16x8xf32>
    %156 = arith.addf %152, %155 : vector<16x8xf32>
    %c0_119 = arith.constant 0 : index
    %c3_120 = arith.constant 3 : index
    %c0_121 = arith.constant 0 : index
    %c0_122 = arith.constant 0 : index
    %157 = vector.load %arg8[%c0_119, %c3_120, %c0_121, %c0_122] : memref<1x4x32x8xbf16, #tpu.memory_space<vmem>>, vector<1x1x32x8xbf16>
    %158 = vector.shape_cast %157 : vector<1x1x32x8xbf16> to vector<32x8xbf16>
    %cst_123 = arith.constant dense<0.000000e+00> : vector<16x8xf32>
    %159 = tpu.matmul %4, %158, %cst_123 {dimension_numbers = #tpu.dot_dimension_numbers<[1], [0], [0], [1], [0, 0, 1, 1], [], []>} : vector<16x32xbf16>, vector<32x8xbf16>, vector<16x8xf32> -> vector<16x8xf32>
    %c0_124 = arith.constant 0 : index
    %c3_125 = arith.constant 3 : index
    %c0_126 = arith.constant 0 : index
    %c0_127 = arith.constant 0 : index
    %160 = vector.load %arg11[%c0_124, %c3_125, %c0_126, %c0_127] : memref<1x4x1x8xf32, #tpu.memory_space<vmem>>, vector<1x1x1x8xf32>
    %161 = vector.shape_cast %160 : vector<1x1x1x8xf32> to vector<1x8xf32>
    %162 = vector.broadcast %161 : vector<1x8xf32> to vector<16x8xf32>
    %163 = arith.addf %159, %162 : vector<16x8xf32>
    %c0_128 = arith.constant 0 : index
    %c3_129 = arith.constant 3 : index
    %c0_130 = arith.constant 0 : index
    %c0_131 = arith.constant 0 : index
    %164 = vector.load %arg9[%c0_128, %c3_129, %c0_130, %c0_131] : memref<1x4x32x8xbf16, #tpu.memory_space<vmem>>, vector<1x1x32x8xbf16>
    %165 = vector.shape_cast %164 : vector<1x1x32x8xbf16> to vector<32x8xbf16>
    %cst_132 = arith.constant dense<0.000000e+00> : vector<16x8xf32>
    %166 = tpu.matmul %4, %165, %cst_132 {dimension_numbers = #tpu.dot_dimension_numbers<[1], [0], [0], [1], [0, 0, 1, 1], [], []>} : vector<16x32xbf16>, vector<32x8xbf16>, vector<16x8xf32> -> vector<16x8xf32>
    %c0_133 = arith.constant 0 : index
    %c3_134 = arith.constant 3 : index
    %c0_135 = arith.constant 0 : index
    %c0_136 = arith.constant 0 : index
    %167 = vector.load %arg12[%c0_133, %c3_134, %c0_135, %c0_136] : memref<1x4x1x8xf32, #tpu.memory_space<vmem>>, vector<1x1x1x8xf32>
    %168 = vector.shape_cast %167 : vector<1x1x1x8xf32> to vector<1x8xf32>
    %169 = vector.broadcast %168 : vector<1x8xf32> to vector<16x8xf32>
    %170 = arith.addf %166, %169 : vector<16x8xf32>
    %171 = vector.shape_cast %156 : vector<16x8xf32> to vector<2x8x8xf32>
    %172 = arith.truncf %171 : vector<2x8x8xf32> to vector<2x8x8xbf16>
    %173 = vector.shape_cast %163 : vector<16x8xf32> to vector<2x8x8xf32>
    %174 = arith.truncf %173 : vector<2x8x8xf32> to vector<2x8x8xbf16>
    %175 = vector.shape_cast %170 : vector<16x8xf32> to vector<2x8x8xf32>
    %176 = arith.truncf %175 : vector<2x8x8xf32> to vector<2x8x8xbf16>
    "tpu.trace_start"() <{level = 10 : i32, message = "bqd,bkd->bqk"}> : () -> ()
    %cst_137 = arith.constant dense<0.000000e+00> : vector<2x8x8xf32>
    %177 = tpu.matmul %172, %174, %cst_137 {dimension_numbers = #tpu.dot_dimension_numbers<[2], [2], [1], [1], [0, 0, 0, 1, 1, 1], [0], [0]>} : vector<2x8x8xbf16>, vector<2x8x8xbf16>, vector<2x8x8xf32> -> vector<2x8x8xf32>
    "tpu.trace_stop"() : () -> ()
    %cst_138 = arith.constant 0.353553385 : f32
    %178 = vector.broadcast %cst_138 : f32 to vector<2x8x8xf32>
    %179 = arith.mulf %177, %178 : vector<2x8x8xf32>
    %cst_139 = arith.constant dense<0xFF800000> : vector<2x8xf32>
    %180 = vector.multi_reduction <maximumf>, %179, %cst_139 [2] : vector<2x8x8xf32> to vector<2x8xf32>
    %181 = vector.shape_cast %180 : vector<2x8xf32> to vector<2x8x1xf32>
    %182 = vector.broadcast %181 : vector<2x8x1xf32> to vector<2x8x8xf32>
    %183 = arith.subf %179, %182 : vector<2x8x8xf32>
    %184 = math.exp %183 : vector<2x8x8xf32>
    %cst_140 = arith.constant dense<0.000000e+00> : vector<2x8xf32>
    %185 = vector.multi_reduction <add>, %184, %cst_140 [2] : vector<2x8x8xf32> to vector<2x8xf32>
    %186 = vector.shape_cast %185 : vector<2x8xf32> to vector<2x8x1xf32>
    %187 = tpu.reciprocal %186 {approx = true} : vector<2x8x1xf32> -> vector<2x8x1xf32>
    %188 = vector.broadcast %187 : vector<2x8x1xf32> to vector<2x8x8xf32>
    %189 = arith.mulf %184, %188 : vector<2x8x8xf32>
    %190 = arith.truncf %189 : vector<2x8x8xf32> to vector<2x8x8xbf16>
    "tpu.trace_start"() <{level = 10 : i32, message = "bqk,bkd->bqd"}> : () -> ()
    %cst_141 = arith.constant dense<0.000000e+00> : vector<2x8x8xf32>
    %191 = tpu.matmul %190, %176, %cst_141 {dimension_numbers = #tpu.dot_dimension_numbers<[2], [1], [1], [2], [0, 0, 0, 1, 1, 2], [0], [0]>} : vector<2x8x8xbf16>, vector<2x8x8xbf16>, vector<2x8x8xf32> -> vector<2x8x8xf32>
    "tpu.trace_stop"() : () -> ()
    %192 = vector.shape_cast %191 : vector<2x8x8xf32> to vector<16x8xf32>
    %193 = arith.truncf %192 : vector<16x8xf32> to vector<16x8xbf16>
    %c0_142 = arith.constant 0 : index
    %c3_143 = arith.constant 3 : index
    %c0_144 = arith.constant 0 : index
    %c0_145 = arith.constant 0 : index
    %194 = vector.load %arg13[%c0_142, %c3_143, %c0_144, %c0_145] : memref<1x4x8x32xbf16, #tpu.memory_space<vmem>>, vector<1x1x8x32xbf16>
    %195 = vector.shape_cast %194 : vector<1x1x8x32xbf16> to vector<8x32xbf16>
    %cst_146 = arith.constant dense<0.000000e+00> : vector<16x32xf32>
    %196 = tpu.matmul %193, %195, %cst_146 {dimension_numbers = #tpu.dot_dimension_numbers<[1], [0], [0], [1], [0, 0, 1, 1], [], []>} : vector<16x8xbf16>, vector<8x32xbf16>, vector<16x32xf32> -> vector<16x32xf32>
    %197 = arith.addf %149, %196 : vector<16x32xf32>
    %c0_147 = arith.constant 0 : index
    %c0_148 = arith.constant 0 : index
    %c0_149 = arith.constant 0 : index
    %198 = vector.load %arg14[%c0_147, %c0_148, %c0_149] : memref<1x1x32xf32, #tpu.memory_space<vmem>>, vector<1x1x32xf32>
    %199 = vector.shape_cast %198 : vector<1x1x32xf32> to vector<1x32xf32>
    %200 = vector.broadcast %199 : vector<1x32xf32> to vector<16x32xf32>
    %201 = arith.addf %197, %200 : vector<16x32xf32>
    %c0_150 = arith.constant 0 : index
    %c0_151 = arith.constant 0 : index
    %c0_152 = arith.constant 0 : index
    %202 = vector.load %arg19[%c0_150, %c0_151, %c0_152] : memref<1x1x32xf32, #tpu.memory_space<vmem>>, vector<1x1x32xf32>
    %203 = vector.shape_cast %202 : vector<1x1x32xf32> to vector<1x32xf32>
    %c0_153 = arith.constant 0 : index
    %c0_154 = arith.constant 0 : index
    %c0_155 = arith.constant 0 : index
    %204 = vector.load %arg20[%c0_153, %c0_154, %c0_155] : memref<1x1x32xf32, #tpu.memory_space<vmem>>, vector<1x1x32xf32>
    %205 = vector.shape_cast %204 : vector<1x1x32xf32> to vector<1x32xf32>
    %206 = arith.addf %3, %201 : vector<16x32xf32>
    %cst_156 = arith.constant dense<0.000000e+00> : vector<16xf32>
    %207 = vector.multi_reduction <add>, %206, %cst_156 [1] : vector<16x32xf32> to vector<16xf32>
    %208 = vector.shape_cast %207 : vector<16xf32> to vector<16x1xf32>
    %cst_157 = arith.constant 3.125000e-02 : f32
    %209 = vector.broadcast %cst_157 : f32 to vector<16x1xf32>
    %210 = arith.mulf %208, %209 : vector<16x1xf32>
    %211 = vector.broadcast %210 : vector<16x1xf32> to vector<16x32xf32>
    %212 = arith.subf %206, %211 : vector<16x32xf32>
    %213 = arith.mulf %212, %212 : vector<16x32xf32>
    %cst_158 = arith.constant dense<0.000000e+00> : vector<16xf32>
    %214 = vector.multi_reduction <add>, %213, %cst_158 [1] : vector<16x32xf32> to vector<16xf32>
    %215 = vector.shape_cast %214 : vector<16xf32> to vector<16x1xf32>
    %cst_159 = arith.constant 3.125000e-02 : f32
    %216 = vector.broadcast %cst_159 : f32 to vector<16x1xf32>
    %217 = arith.mulf %215, %216 : vector<16x1xf32>
    %cst_160 = arith.constant 9.99999974E-6 : f32
    %218 = vector.broadcast %cst_160 : f32 to vector<16x1xf32>
    %219 = arith.addf %217, %218 : vector<16x1xf32>
    %220 = math.rsqrt %219 : vector<16x1xf32>
    %221 = vector.broadcast %220 : vector<16x1xf32> to vector<16x32xf32>
    %222 = arith.mulf %212, %221 : vector<16x32xf32>
    %223 = vector.broadcast %203 : vector<1x32xf32> to vector<16x32xf32>
    %224 = arith.mulf %222, %223 : vector<16x32xf32>
    %225 = vector.broadcast %205 : vector<1x32xf32> to vector<16x32xf32>
    %226 = arith.addf %224, %225 : vector<16x32xf32>
    %227 = arith.truncf %226 : vector<16x32xf32> to vector<16x32xbf16>
    %c0_161 = arith.constant 0 : index
    %c0_162 = arith.constant 0 : index
    %c0_163 = arith.constant 0 : index
    %228 = vector.load %arg15[%c0_161, %c0_162, %c0_163] : memref<1x32x2048xbf16, #tpu.memory_space<vmem>>, vector<1x32x2048xbf16>
    %229 = vector.shape_cast %228 : vector<1x32x2048xbf16> to vector<32x2048xbf16>
    %cst_164 = arith.constant dense<0.000000e+00> : vector<16x2048xf32>
    %230 = tpu.matmul %227, %229, %cst_164 {dimension_numbers = #tpu.dot_dimension_numbers<[1], [0], [0], [1], [0, 0, 1, 1], [], []>} : vector<16x32xbf16>, vector<32x2048xbf16>, vector<16x2048xf32> -> vector<16x2048xf32>
    %c0_165 = arith.constant 0 : index
    %c0_166 = arith.constant 0 : index
    %c0_167 = arith.constant 0 : index
    %231 = vector.load %arg16[%c0_165, %c0_166, %c0_167] : memref<1x1x2048xf32, #tpu.memory_space<vmem>>, vector<1x1x2048xf32>
    %232 = vector.shape_cast %231 : vector<1x1x2048xf32> to vector<1x2048xf32>
    %233 = vector.broadcast %232 : vector<1x2048xf32> to vector<16x2048xf32>
    %234 = arith.addf %230, %233 : vector<16x2048xf32>
    %cst_168 = arith.constant 0.000000e+00 : f32
    %235 = vector.broadcast %cst_168 : f32 to vector<16x2048xf32>
    %236 = arith.maximumf %234, %235 : vector<16x2048xf32>
    %237 = arith.truncf %236 : vector<16x2048xf32> to vector<16x2048xbf16>
    %c0_169 = arith.constant 0 : index
    %c0_170 = arith.constant 0 : index
    %c0_171 = arith.constant 0 : index
    %238 = vector.load %arg17[%c0_169, %c0_170, %c0_171] : memref<1x2048x32xbf16, #tpu.memory_space<vmem>>, vector<1x2048x32xbf16>
    %239 = vector.shape_cast %238 : vector<1x2048x32xbf16> to vector<2048x32xbf16>
    %cst_172 = arith.constant dense<0.000000e+00> : vector<16x32xf32>
    %240 = tpu.matmul %237, %239, %cst_172 {dimension_numbers = #tpu.dot_dimension_numbers<[1], [0], [0], [1], [0, 0, 1, 1], [], []>} : vector<16x2048xbf16>, vector<2048x32xbf16>, vector<16x32xf32> -> vector<16x32xf32>
    %c0_173 = arith.constant 0 : index
    %c0_174 = arith.constant 0 : index
    %c0_175 = arith.constant 0 : index
    %241 = vector.load %arg18[%c0_173, %c0_174, %c0_175] : memref<1x1x32xf32, #tpu.memory_space<vmem>>, vector<1x1x32xf32>
    %242 = vector.shape_cast %241 : vector<1x1x32xf32> to vector<1x32xf32>
    %243 = vector.broadcast %242 : vector<1x32xf32> to vector<16x32xf32>
    %244 = arith.addf %240, %243 : vector<16x32xf32>
    %c0_176 = arith.constant 0 : index
    %c0_177 = arith.constant 0 : index
    %c0_178 = arith.constant 0 : index
    %245 = vector.load %arg21[%c0_176, %c0_177, %c0_178] : memref<1x1x32xf32, #tpu.memory_space<vmem>>, vector<1x1x32xf32>
    %246 = vector.shape_cast %245 : vector<1x1x32xf32> to vector<1x32xf32>
    %c0_179 = arith.constant 0 : index
    %c0_180 = arith.constant 0 : index
    %c0_181 = arith.constant 0 : index
    %247 = vector.load %arg22[%c0_179, %c0_180, %c0_181] : memref<1x1x32xf32, #tpu.memory_space<vmem>>, vector<1x1x32xf32>
    %248 = vector.shape_cast %247 : vector<1x1x32xf32> to vector<1x32xf32>
    %249 = arith.addf %226, %244 : vector<16x32xf32>
    %cst_182 = arith.constant dense<0.000000e+00> : vector<16xf32>
    %250 = vector.multi_reduction <add>, %249, %cst_182 [1] : vector<16x32xf32> to vector<16xf32>
    %251 = vector.shape_cast %250 : vector<16xf32> to vector<16x1xf32>
    %cst_183 = arith.constant 3.125000e-02 : f32
    %252 = vector.broadcast %cst_183 : f32 to vector<16x1xf32>
    %253 = arith.mulf %251, %252 : vector<16x1xf32>
    %254 = vector.broadcast %253 : vector<16x1xf32> to vector<16x32xf32>
    %255 = arith.subf %249, %254 : vector<16x32xf32>
    %256 = arith.mulf %255, %255 : vector<16x32xf32>
    %cst_184 = arith.constant dense<0.000000e+00> : vector<16xf32>
    %257 = vector.multi_reduction <add>, %256, %cst_184 [1] : vector<16x32xf32> to vector<16xf32>
    %258 = vector.shape_cast %257 : vector<16xf32> to vector<16x1xf32>
    %cst_185 = arith.constant 3.125000e-02 : f32
    %259 = vector.broadcast %cst_185 : f32 to vector<16x1xf32>
    %260 = arith.mulf %258, %259 : vector<16x1xf32>
    %cst_186 = arith.constant 9.99999974E-6 : f32
    %261 = vector.broadcast %cst_186 : f32 to vector<16x1xf32>
    %262 = arith.addf %260, %261 : vector<16x1xf32>
    %263 = math.rsqrt %262 : vector<16x1xf32>
    %264 = vector.broadcast %263 : vector<16x1xf32> to vector<16x32xf32>
    %265 = arith.mulf %255, %264 : vector<16x32xf32>
    %266 = vector.broadcast %246 : vector<1x32xf32> to vector<16x32xf32>
    %267 = arith.mulf %265, %266 : vector<16x32xf32>
    %268 = vector.broadcast %248 : vector<1x32xf32> to vector<16x32xf32>
    %269 = arith.addf %267, %268 : vector<16x32xf32>
    %c0_187 = arith.constant 0 : index
    %c0_188 = arith.constant 0 : index
    %270 = vector.load %arg24[%c0_187, %c0_188] : memref<16x32xf32, #tpu.memory_space<vmem>>, vector<16x32xf32>
    tpu.vector_store %arg24[%c0_187, %c0_188], %269 {strides = array<i32>} : memref<16x32xf32, #tpu.memory_space<vmem>>, vector<16x32xf32>,
    %c1_i32 = arith.constant 1 : i32
    %271 = arith.cmpi eq, %arg1, %c1_i32 : i32
    %272 = arith.extui %271 : i1 to i32
    %c0_i32_189 = arith.constant 0 : i32
    %273 = arith.cmpi ne, %272, %c0_i32_189 : i32
    scf.if %273 {
      %274 = vector.shape_cast %269 : vector<16x32xf32> to vector<2x8x32xf32>
      %cst_190 = arith.constant dense<0.000000e+00> : vector<2x32xf32>
      %275 = vector.multi_reduction <add>, %274, %cst_190 [1] : vector<2x8x32xf32> to vector<2x32xf32>
      %cst_191 = arith.constant 1.250000e-01 : f32
      %276 = vector.broadcast %cst_191 : f32 to vector<2x32xf32>
      %277 = arith.mulf %275, %276 : vector<2x32xf32>
      %c0_192 = arith.constant 0 : index
      %c0_193 = arith.constant 0 : index
      %278 = vector.load %arg5[%c0_192, %c0_193] : memref<1x32xf32, #tpu.memory_space<vmem>>, vector<1x32xf32>
      %cst_194 = arith.constant dense<0.000000e+00> : vector<1x2xf32>
      %279 = tpu.matmul %278, %277, %cst_194 {dimension_numbers = #tpu.dot_dimension_numbers<[1], [1], [0], [0], [0, 0, 1, 0], [], []>} : vector<1x32xf32>, vector<2x32xf32>, vector<1x2xf32> -> vector<1x2xf32>
      %c0_195 = arith.constant 0 : index
      %c0_196 = arith.constant 0 : index
      %280 = vector.load %arg6[%c0_195, %c0_196] : memref<1x1xf32, #tpu.memory_space<vmem>>, vector<1x1xf32>
      %281 = vector.broadcast %280 : vector<1x1xf32> to vector<1x2xf32>
      %282 = arith.addf %279, %281 : vector<1x2xf32>
      %c0_197 = arith.constant 0 : index
      %c0_198 = arith.constant 0 : index
      %c0_199 = arith.constant 0 : index
      %283 = vector.load %arg23[%c0_197, %c0_198, %c0_199] : memref<1x1x2xf32, #tpu.memory_space<vmem>>, vector<1x1x2xf32>
      %284 = vector.shape_cast %283 : vector<1x1x2xf32> to vector<1x2xf32>
      %285 = vector.shape_cast %282 : vector<1x2xf32> to vector<1x1x2xf32>
      tpu.vector_store %arg23[%c0_197, %c0_198, %c0_199], %285 {strides = array<i32>} : memref<1x1x2xf32, #tpu.memory_space<vmem>>, vector<1x1x2xf32>,
    } else {
    }
    return
  }
  func.func @transform_0(%arg0: i32, %arg1: i32) -> (i32, i32, i32) {
    %c0_i32 = arith.constant 0 : i32
    %c0_i32_0 = arith.constant 0 : i32
    %c0_i32_1 = arith.constant 0 : i32
    return %arg0, %c0_i32, %c0_i32_0 : i32, i32, i32
  }
  func.func @transform_1(%arg0: i32, %arg1: i32) -> (i32, i32) {
    %c0_i32 = arith.constant 0 : i32
    %c0_i32_0 = arith.constant 0 : i32
    %c0_i32_1 = arith.constant 0 : i32
    return %c0_i32, %c0_i32_0 : i32, i32
  }
  func.func @transform_2(%arg0: i32, %arg1: i32) -> (i32, i32) {
    %c0_i32 = arith.constant 0 : i32
    %c0_i32_0 = arith.constant 0 : i32
    %c0_i32_1 = arith.constant 0 : i32
    return %c0_i32, %c0_i32_0 : i32, i32
  }
  func.func @transform_3(%arg0: i32, %arg1: i32) -> (i32, i32) {
    %c0_i32 = arith.constant 0 : i32
    %c0_i32_0 = arith.constant 0 : i32
    %c0_i32_1 = arith.constant 0 : i32
    return %c0_i32, %c0_i32_0 : i32, i32
  }
  func.func @transform_4(%arg0: i32, %arg1: i32) -> (i32, i32) {
    %c0_i32 = arith.constant 0 : i32
    %c0_i32_0 = arith.constant 0 : i32
    %c0_i32_1 = arith.constant 0 : i32
    return %c0_i32, %c0_i32_0 : i32, i32
  }
  func.func @transform_5(%arg0: i32, %arg1: i32) -> (i32, i32, i32, i32) {
    %c0_i32 = arith.constant 0 : i32
    %c0_i32_0 = arith.constant 0 : i32
    %c0_i32_1 = arith.constant 0 : i32
    %c0_i32_2 = arith.constant 0 : i32
    return %arg1, %c0_i32, %c0_i32_0, %c0_i32_1 : i32, i32, i32, i32
  }
  func.func @transform_6(%arg0: i32, %arg1: i32) -> (i32, i32, i32, i32) {
    %c0_i32 = arith.constant 0 : i32
    %c0_i32_0 = arith.constant 0 : i32
    %c0_i32_1 = arith.constant 0 : i32
    %c0_i32_2 = arith.constant 0 : i32
    return %arg1, %c0_i32, %c0_i32_0, %c0_i32_1 : i32, i32, i32, i32
  }
  func.func @transform_7(%arg0: i32, %arg1: i32) -> (i32, i32, i32, i32) {
    %c0_i32 = arith.constant 0 : i32
    %c0_i32_0 = arith.constant 0 : i32
    %c0_i32_1 = arith.constant 0 : i32
    %c0_i32_2 = arith.constant 0 : i32
    return %arg1, %c0_i32, %c0_i32_0, %c0_i32_1 : i32, i32, i32, i32
  }
  func.func @transform_8(%arg0: i32, %arg1: i32) -> (i32, i32, i32, i32) {
    %c0_i32 = arith.constant 0 : i32
    %c0_i32_0 = arith.constant 0 : i32
    %c0_i32_1 = arith.constant 0 : i32
    %c0_i32_2 = arith.constant 0 : i32
    return %arg1, %c0_i32, %c0_i32_0, %c0_i32_1 : i32, i32, i32, i32
  }
  func.func @transform_9(%arg0: i32, %arg1: i32) -> (i32, i32, i32, i32) {
    %c0_i32 = arith.constant 0 : i32
    %c0_i32_0 = arith.constant 0 : i32
    %c0_i32_1 = arith.constant 0 : i32
    %c0_i32_2 = arith.constant 0 : i32
    return %arg1, %c0_i32, %c0_i32_0, %c0_i32_1 : i32, i32, i32, i32
  }
  func.func @transform_10(%arg0: i32, %arg1: i32) -> (i32, i32, i32, i32) {
    %c0_i32 = arith.constant 0 : i32
    %c0_i32_0 = arith.constant 0 : i32
    %c0_i32_1 = arith.constant 0 : i32
    %c0_i32_2 = arith.constant 0 : i32
    return %arg1, %c0_i32, %c0_i32_0, %c0_i32_1 : i32, i32, i32, i32
  }
  func.func @transform_11(%arg0: i32, %arg1: i32) -> (i32, i32, i32, i32) {
    %c0_i32 = arith.constant 0 : i32
    %c0_i32_0 = arith.constant 0 : i32
    %c0_i32_1 = arith.constant 0 : i32
    %c0_i32_2 = arith.constant 0 : i32
    return %arg1, %c0_i32, %c0_i32_0, %c0_i32_1 : i32, i32, i32, i32
  }
  func.func @transform_12(%arg0: i32, %arg1: i32) -> (i32, i32, i32) {
    %c0_i32 = arith.constant 0 : i32
    %c0_i32_0 = arith.constant 0 : i32
    %c0_i32_1 = arith.constant 0 : i32
    return %arg1, %c0_i32, %c0_i32_0 : i32, i32, i32
  }
  func.func @transform_13(%arg0: i32, %arg1: i32) -> (i32, i32, i32) {
    %c0_i32 = arith.constant 0 : i32
    %c0_i32_0 = arith.constant 0 : i32
    %c0_i32_1 = arith.constant 0 : i32
    return %arg1, %c0_i32, %c0_i32_0 : i32, i32, i32
  }
  func.func @transform_14(%arg0: i32, %arg1: i32) -> (i32, i32, i32) {
    %c0_i32 = arith.constant 0 : i32
    %c0_i32_0 = arith.constant 0 : i32
    %c0_i32_1 = arith.constant 0 : i32
    return %arg1, %c0_i32, %c0_i32_0 : i32, i32, i32
  }
  func.func @transform_15(%arg0: i32, %arg1: i32) -> (i32, i32, i32) {
    %c0_i32 = arith.constant 0 : i32
    %c0_i32_0 = arith.constant 0 : i32
    %c0_i32_1 = arith.constant 0 : i32
    return %arg1, %c0_i32, %c0_i32_0 : i32, i32, i32
  }
  func.func @transform_16(%arg0: i32, %arg1: i32) -> (i32, i32, i32) {
    %c0_i32 = arith.constant 0 : i32
    %c0_i32_0 = arith.constant 0 : i32
    %c0_i32_1 = arith.constant 0 : i32
    return %arg1, %c0_i32, %c0_i32_0 : i32, i32, i32
  }
  func.func @transform_17(%arg0: i32, %arg1: i32) -> (i32, i32, i32) {
    %c0_i32 = arith.constant 0 : i32
    %c0_i32_0 = arith.constant 0 : i32
    %c0_i32_1 = arith.constant 0 : i32
    return %arg1, %c0_i32, %c0_i32_0 : i32, i32, i32
  }
  func.func @transform_18(%arg0: i32, %arg1: i32) -> (i32, i32, i32) {
    %c0_i32 = arith.constant 0 : i32
    %c0_i32_0 = arith.constant 0 : i32
    %c0_i32_1 = arith.constant 0 : i32
    return %arg1, %c0_i32, %c0_i32_0 : i32, i32, i32
  }
  func.func @transform_19(%arg0: i32, %arg1: i32) -> (i32, i32, i32) {
    %c0_i32 = arith.constant 0 : i32
    %c0_i32_0 = arith.constant 0 : i32
    %c0_i32_1 = arith.constant 0 : i32
    return %arg1, %c0_i32, %c0_i32_0 : i32, i32, i32
  }
  func.func @transform_20(%arg0: i32, %arg1: i32) -> (i32, i32, i32) {
    %c0_i32 = arith.constant 0 : i32
    %c0_i32_0 = arith.constant 0 : i32
    %c0_i32_1 = arith.constant 0 : i32
    return %arg1, %c0_i32, %c0_i32_0 : i32, i32, i32
  }
  func.func @transform_21(%arg0: i32, %arg1: i32) -> (i32, i32, i32) {
    %c0_i32 = arith.constant 0 : i32
    %c0_i32_0 = arith.constant 0 : i32
    %c0_i32_1 = arith.constant 0 : i32
    return %arg0, %c0_i32, %c0_i32_0 : i32, i32, i32
  }
}

</mosaic_0001>

<bundles_post_ra>
// kernel: transformer_model_forward.1
= control target key start
LH: loop header
LB: loop body
LE: loop exit
PB: predicated region body
PF: predicated region fallthrough
CT: control target
= control target key end

     0   :  { %s7301_s0 = inlined_call_operand.vmem [shape: f32[2,8,16], index: 0, kind: input, shape index: {}]   ;;  %s7302_s1 = inlined_call_operand.vmem [shape: bf16[16,32], index: 1, kind: input, shape index: {}]   ;;  %s7303_s2 = inlined_call_operand.vmem [shape: f32[1,32], index: 2, kind: input, shape index: {}]   ;;  %s7304_s3 = inlined_call_operand.vmem [shape: f32[1,32], index: 3, kind: input, shape index: {}]   ;;  %s7305_s4 = inlined_call_operand.<no memory space> [shape: f32[1,1], index: 4, kind: input, shape index: {}]   ;;  %s7306_s5 = inlined_call_operand.vmem [shape: bf16[2,4,32,8], index: 5, kind: input, shape index: {}]   ;;  %s7307_s6 = inlined_call_operand.vmem [shape: bf16[2,4,32,8], index: 6, kind: input, shape index: {}]   ;;  %s7308_s7 = inlined_call_operand.vmem [shape: bf16[2,4,32,8], index: 7, kind: input, shape index: {}]   ;;  %s7309_s8 = inlined_call_operand.vmem [shape: f32[2,4,1,8], index: 8, kind: input, shape index: {}]   ;;  %s7310_s9 = inlined_call_operand.vmem [shape: f32[2,4,1,8], index: 9, kind: input, shape index: {}]   ;;  %s7311_s10 = inlined_call_operand.vmem [shape: f32[2,4,1,8], index: 10, kind: input, shape index: {}]   ;;  %s7312_s11 = inlined_call_operand.vmem [shape: bf16[2,4,8,32], index: 11, kind: input, shape index: {}]   ;;  %s7313_s12 = inlined_call_operand.vmem [shape: f32[2,1,32], index: 12, kind: input, shape index: {}]   ;;  %s7314_s13 = inlined_call_operand.vmem [shape: bf16[2,32,2048], index: 13, kind: input, shape index: {}]   ;;  %s7315_s14 = inlined_call_operand.vmem [shape: f32[2,1,2048], index: 14, kind: input, shape index: {}]   ;;  %s7316_s15 = inlined_call_operand.vmem [shape: bf16[2,2048,32], index: 15, kind: input, shape index: {}]   ;;  %s7317_s16 = inlined_call_operand.vmem [shape: f32[2,1,32], index: 16, kind: input, shape index: {}]   ;;  %s7318_s17 = inlined_call_operand.vmem [shape: f32[2,1,32], index: 17, kind: input, shape index: {}]   ;;  %s7319_s18 = inlined_call_operand.vmem [shape: f32[2,1,32], index: 18, kind: input, shape index: {}]   ;;  %s7320_s19 = inlined_call_operand.vmem [shape: f32[2,1,32], index: 19, kind: input, shape index: {}]   ;;  %s7321_s20 = inlined_call_operand.vmem [shape: f32[2,1,32], index: 20, kind: input, shape index: {}]   ;;  %s7322_s21 = inlined_call_operand.hbm [shape: f32[1,1,2], index: 21, kind: output, shape index: {}]  }
   0x1   :  { %7330 = sst [smem:[#allocation13_spill]] %s7301_s0 }
   0x2   :  { %7331 = sst [smem:[#allocation14_spill]] %s7302_s1 }
   0x3   :  { %7332 = sst [smem:[#allocation15_spill]] %s7303_s2 }
   0x4   :  { %7333 = sst [smem:[#allocation16_spill]] %s7304_s3 }
   0x5   :  { %7334 = sst [smem:[#allocation17_spill]] %s7305_s4 }
   0x6   :  { %7335 = sst [smem:[#allocation18_spill]] %s7306_s5  ;;  %s7346_s26 = sld [smem:[#allocation17_spill]] }
   0x7   :  { %7336 = sst [smem:[#allocation19_spill]] %s7307_s6 }
   0x8   :  { %7337 = sst [smem:[#allocation20_spill]] %s7308_s7 }
   0x9   :  { %7338 = sst [smem:[#allocation21_spill]] %s7309_s8 }
   0xa   :  { %7339 = sst [smem:[#allocation22_spill]] %s7310_s9 }
   0xb   :  { %7340 = sst [smem:[#allocation23_spill]] %s7311_s10 }
   0xc   :  { %7341 = sst [smem:[#allocation24_spill]] %s7312_s11  ;;  %v26_v0 = vstv %s7346_s26 }
   0xd   :  { %7342 = sst [smem:[#allocation25_spill]] %s7313_s12  ;;  %27 = vst [vmem:[#allocation3] sm:$0x1] %v26_v0 }
   0xe   :  { %7343 = sst [smem:[#allocation26_spill]] %s7314_s13 }
   0xf   :  { %7344 = sst [smem:[#allocation27_spill]] %s7315_s14 }
  0x10   :  { %7345 = sst [smem:[#allocation28_spill]] %s7322_s21 }
  0x11   :  { %28 = vsyncpa [#allocation5], 0  ;;  %s6573_s27 = smov 0   ;;  %s6575_s3 = smov 0  }
  0x12   :  { %s6577_s28 = smov 0  }
  0x13 LB: > { %7347 = sst [smem:[#allocation7_spill]] %s6445_s3  ;;  %s43_s0 = sadd.s32 1, %s6445_s3  ;;  %s6449_s28 = sphi %s6577_s28, %s34_s28   ;;  %s6445_s3 = sphi %s6575_s3, %s7378_s3   ;;  %s6441_s27 = sphi %s6573_s27, %s7377_s27  }
  0x14   : > { %7348 = sst [smem:[#allocation8_spill]] %s6449_s28  ;;  %p44_p0 = scmp.ge.s32.totalorder %s43_s0, 2 }
  0x15   : > { %p5355_p1 = scmp.ge.s32.totalorder %s6449_s28, 1  ;;  %p747_p2 = scmp.lt.s32.totalorder %s6449_s28, 3 }
  0x16   : > { %s7380_s0 = smov (%p44_p0, %s43_s0), 0 }
  0x17   : > { %7349 = sst [smem:[#allocation9_spill]] %s7380_s0  ;;  %p748_p3 = pnand %p5355_p1, %p747_p2 }
  0x19   : > { %751 = sbr.rel (%p748_p3) target bundleno = 5626 (0x15fa), region = 104 }
  0x20   : > { %p872_p4 = scmp.lt.s32.totalorder %s6441_s27, 1  ;;  %s7350_s1 = sld [smem:[#allocation18_spill]] }
  0x21   : > { %s7352_s6 = sld [smem:[#allocation19_spill]]  ;;  %s7353_s7 = sld [smem:[#allocation20_spill]] }
  0x22   : > { %s6596_s4 = scalar_select %p872_p4, %s6441_s27, 1 }
  0x23   : > { %s7355_s8 = sld [smem:[#allocation21_spill]]  ;;  %s7357_s9 = sld [smem:[#allocation22_spill]] }
  0x24   : > { %s5673_s30 = sshll.u32 %s6596_s4, 6  ;;  %s5362_s5 = sshll.u32 %s6596_s4, 2 }
  0x25   : > { %s7358_s10 = sld [smem:[#allocation23_spill]]  ;;  %s5676_s29 = sshll.u32 %s6596_s4, 4 }
  0x26   : > { %s6603_s24 = scalar_lea.vmem %s7350_s1, %s5673_s30  ;;  %s7360_s11 = sld [smem:[#allocation24_spill]] }
  0x27   : > { %7351 = sst [smem:[#allocation10_spill]] %s6603_s24  ;;  %s6608_s26 = scalar_lea.vmem %s7352_s6, %s5673_s30 }
  0x28   : > { %s6613_s3 = scalar_lea.vmem %s7353_s7, %s5673_s30  ;;  %s7361_s13 = sld [smem:[#allocation26_spill]] }
  0x29   : > { %7354 = sst [smem:[#allocation11_spill]] %s6613_s3  ;;  %s6618_s22 = scalar_lea.vmem %s7355_s8, %s5362_s5 }
  0x2a   : > { %7356 = sst [smem:[#allocation12_spill]] %s6618_s22  ;;  %s6623_s24 = scalar_lea.vmem %s7357_s9, %s5362_s5 }
  0x2b   : > { %s6628_s6 = scalar_lea.vmem %s7358_s10, %s5362_s5  ;;  %s5677_s8 = sshll.u32 %s6596_s4, 8 }
  0x2c   : > { %s6638_s28 = scalar_lea.vmem %s7360_s11, %s5676_s29  ;;  %s7362_s14 = sld [smem:[#allocation27_spill]] }
  0x2d   : > { %s5678_s25 = sshll.u32 %s6596_s4, 10  ;;  %s923_s30 = scalar_lea.vmem %s7317_s16, %s6596_s4 }
  0x2e   : > { %s6644_s1 = scalar_lea.vmem %s7361_s13, %s5677_s8  ;;  %s6659_s21 = scalar_lea.vmem %s7316_s15, %s5678_s25 }
  0x2f   : > { %s926_s8 = scalar_lea.vmem %s7318_s17, %s6596_s4  ;;  %s929_s9 = scalar_lea.vmem %s7319_s18, %s6596_s4 }
  0x30   : > { %s932_s13 = scalar_lea.vmem %s7320_s19, %s6596_s4  ;;  %s935_s0 = scalar_lea.vmem %s7321_s20, %s6596_s4 }
  0x31   : > { %p5372_p5 = scmp.ne.s32.totalorder %s6441_s27, 0 }
  0x32   : > { %s6649_s5 = scalar_lea.vmem %s7362_s14, %s5676_s29  ;;  %s7363_s3 = sld [smem:[#allocation14_spill]] (!%p5372_p5)  ;;  %v6451_v2 = vmov (!%p5372_p5), 0.0   ;;  %vm6452_vm0 = vmmov (!%p5372_p5), 0   ;;  %vm959_vm1 = vcmask (!%p5372_p5), 130048   ;;  %vm1004_vm2 = vcmask (!%p5372_p5), 261120  }
  0x33   : > { %940 = sbr.rel (%p5372_p5) target bundleno = 277 (0x115), region = 108  ;;  %5935 = vmatprep.subr.bf16.mxu0 (!%p5372_p5), %v6451_v2  ;;  %s7364_s22 = sld [smem:[#allocation13_spill]] (!%p5372_p5)  ;;  %5937 = vmatprep.mubr.msk.bf16.mxu0 (!%p5372_p5), %vm6452_vm0, %v6451_v2 }
  0x34   : > { %s7365_s10 = sld [smem:[#allocation15_spill]] (!%p5372_p5) }
  0x38   : > { %v6201_v1 = vld [vmem:[%s7363_s3] sm:$0xff] (!%p5372_p5)  }
  0x39   : > { %v941_v3 = vld [vmem:[%s7364_s22] sm:$0xff] (!%p5372_p5)  ;;  %v942_v4 = vld [vmem:[%s7364_s22 + $0x8] sm:$0xff] (!%p5372_p5)  ;;  %5936 = vmatpush3.bf16.msra.mxu0 (!%p5372_p5), %v6201_v1 }
  0x3a   : > { %v943_v5 = vpack.c.bf16 %v942_v4, %v941_v3  ;;  %v5373_v6 = vld [vmem:[%s7365_s10] ss:$0 sm:$0xff] }
  0x3c   : > { %5938 = vmatmul.mubr.msk.bf16.vlgmr.msra.gmra.mrb[0].mxu0 %vm959_vm1, %v943_v5 }
 0x10f   : > { %v997_v7 = vpop.f32.mrb[0].mxu0 }
 0x110   : > { %v998_v8 = vadd.f32 %v5373_v6, %v997_v7  ;;  %v5939_v9 = vpop.f32.mrb[1].mxu0 }
 0x111   : > { %v1000_v10 = vpop.f32.mrb[2].mxu0 }
 0x112   : > { %1005 = vst.msk [vmem:[#allocation2] sm:$0xff] %vm1004_vm2, %v998_v8  ;;  %v1001_v11 = vadd.f32 %v5373_v6, %v1000_v10  ;;  %v5940_v12 = vpop.f32.mrb[3].mxu0 }
 0x114   : > { %1006 = vst.msk [vmem:[#allocation2 + $0x8] sm:$0xff] %vm1004_vm2, %v1001_v11 }
 0x115 PF: > { %s7366_s7 = sld [smem:[#allocation10_spill]]  ;;  %v6202_v13 = vld [vmem:[%s6608_s26] sm:$0xff]   ;;  %v6453_v14 = vmov 0.0   ;;  %s7367_s25 = sld [smem:[#allocation11_spill]]  ;;  %v6203_v15 = vld [vmem:[%s6608_s26 + $0x8] sm:$0xff]   ;;  %vm6454_vm3 = vmmov 0  }
 0x116   : > { %5949 = vmatprep.subr.bf16.mxu1 %v6453_v14  ;;  %5941 = vmatprep.subr.bf16.mxu0 %v6453_v14  ;;  %vm1033_vm4 = vcmask 261120   ;;  %s7368_s3 = sld [smem:[#allocation12_spill]]  ;;  %v5380_v23 = vld [vmem:[%s6623_s24] ss:$0 sm:$0xff]  ;;  %vm1212_vm5 = vcmask 64512   ;;  %vm1334_vm6 = vcmask 1043456  }
 0x117   : > { %5950 = vmatpush3.bf16.msra.mxu1 %v6202_v13  ;;  %5953 = vmatprep.mubr.msk.bf16.mxu1 %vm6454_vm3, %v6453_v14  ;;  %v5384_v40 = vld [vmem:[%s6628_s6] ss:$0 sm:$0xff]  ;;  %p5666_p6 = scmp.ne.s32.totalorder %s6441_s27, 1 }
 0x118   : > { %5951 = vmatprep.subr.bf16.mxu1 %v6453_v14  ;;  %5945 = vmatprep.mubr.msk.bf16.mxu0 %vm6454_vm3, %v6453_v14  ;;  %vm6457_vm7 = vmmov (!%p5666_p6), 0   ;;  %vm5036_vm8 = vcmask (!%p5666_p6), 1041409   ;;  %vm5113_vm9 = vcmask (!%p5666_p6), 8192  }
 0x119   : > { %v1007_v17 = vld [vmem:[#allocation2] sm:$0xff] }
 0x11b   : > { %v6204_v16 = vld [vmem:[%s7366_s7] sm:$0xff]   ;;  %v1008_v18 = vld [vmem:[#allocation2 + $0x8] sm:$0xff]  ;;  %5952 = vmatpush3.bf16.msra.mxu1 %v6203_v15 }
 0x11c   : > { %5942 = vmatpush3.bf16.msra.mxu0 %v6204_v16  ;;  %v6205_v19 = vld [vmem:[%s7366_s7 + $0x8] sm:$0xff]   ;;  %v6701_v20 = vpack.c.bf16 %v1008_v18, %v1007_v17  ;;  %v6206_v21 = vld [vmem:[%s7367_s25] sm:$0xff]   ;;  %5965 = vmatprep.subr.bf16.mxu1 %v6453_v14  ;;  %v6208_v17 = vld [vmem:[%s6608_s26 + $0x10] sm:$0xff]  }
 0x11d   : > { %5943 = vmatprep.subr.bf16.mxu0 %v6453_v14  ;;  %v6207_v22 = vld [vmem:[%s7367_s25 + $0x8] sm:$0xff]   ;;  %v5376_v28 = vld [vmem:[%s7368_s3] ss:$0 sm:$0xff] }
 0x11e   : > { %5954 = vmatmul.mubr.msk.bf16.vlgmr.msra.gmra.mrb[0].mxu1 %vm1033_vm4, %v6701_v20 }
 0x11f   : > { %5967 = vmatprep.mubr.msk.bf16.mxu1 %vm6454_vm3, %v6453_v14 }
 0x120   : > { %5944 = vmatpush3.bf16.msra.mxu0 %v6205_v19 }
 0x121   : > { %5957 = vmatprep.subr.bf16.mxu0 %v6453_v14 }
 0x123   : > { %5946 = vmatmul.mubr.msk.bf16.vlgmr.msra.gmra.mrb[0].mxu0 %vm1033_vm4, %v6701_v20 }
 0x124   : > { %5958 = vmatpush3.bf16.msra.mxu0 %v6206_v21  ;;  %5961 = vmatprep.mubr.msk.bf16.mxu0 %vm6454_vm3, %v6453_v14 }
 0x125   : > { %5959 = vmatprep.subr.bf16.mxu0 %v6453_v14 }
 0x128   : > { %5960 = vmatpush3.bf16.msra.mxu0 %v6207_v22  ;;  %v6209_v22 = vld [vmem:[%s6608_s26 + $0x18] sm:$0xff]  }
 0x129   : > { %5971 = vmatprep.subr.bf16.mxu0 %v6453_v14 }
 0x12b   : > { %5962 = vmatmul.mubr.msk.bf16.vlgmr.msra.gmra.mrb[4].mxu0 %vm1033_vm4, %v6701_v20 }
 0x12c   : > { %5973 = vmatprep.mubr.msk.bf16.mxu0 %vm6454_vm3, %v6453_v14 }
 0x1f1   : > { %v1135_v24 = vpop.f32.mrb[0].mxu1 }
 0x1f2   : > { %v1136_v25 = vadd.f32 %v5380_v23, %v1135_v24  ;;  %v5955_v26 = vpop.f32.mrb[1].mxu1 }
 0x1f3   : > { %v1138_v27 = vpop.f32.mrb[2].mxu1  ;;  %v6212_v26 = vld [vmem:[%s7367_s25 + $0x10] sm:$0xff]  }
 0x1f4   : > { %v1208_v30 = vpack.c.bf16 %v1136_v25, %v1136_v25  ;;  %v1139_v31 = vadd.f32 %v5380_v23, %v1138_v27  ;;  %v5956_v32 = vpop.f32.mrb[3].mxu1  ;;  %v6210_v23 = vld [vmem:[%s7366_s7 + $0x10] sm:$0xff]   ;;  %v6211_v25 = vld [vmem:[%s7366_s7 + $0x18] sm:$0xff]  }
 0x1f5   : > { %v6213_v27 = vld [vmem:[%s7367_s25 + $0x18] sm:$0xff]  }
 0x1f6   : > { %v1071_v29 = vpop.f32.mrb[0].mxu0  ;;  %v1217_v35 = vsel %vm1212_vm5, %v1208_v30, 0  ;;  %v1209_v36 = vpack.c.bf16 %v1139_v31, %v1139_v31 }
 0x1f7   : > { %v5947_v33 = vpop.f32.mrb[1].mxu0  ;;  %v1072_v37 = vadd.f32 %v5376_v28, %v1071_v29  ;;  %5966 = vmatpush3.bf16.xpose.msra.mxu1 %v1217_v35 }
 0x1f8   : > { %v1074_v34 = vpop.f32.mrb[2].mxu0  ;;  %v1263_v39 = vsel %vm1212_vm5, %v1209_v36, 0  ;;  %5977 = vmatprep.subr.bf16.mxu1 %v6453_v14  ;;  %v5406_v36 = vld [vmem:[%s6623_s24 + $0x1] ss:$0 sm:$0xff] }
 0x1f9   : > { %v5948_v38 = vpop.f32.mrb[3].mxu0  ;;  %5972 = vmatpush3.bf16.xpose.msra.mxu0 %v1263_v39  ;;  %v1206_v41 = vpack.c.bf16 %v1072_v37, %v1072_v37  ;;  %v1075_v42 = vadd.f32 %v5376_v28, %v1074_v34 }
 0x1fa   : > { %5983 = vmatprep.subr.bf16.mxu0 %v6453_v14 }
 0x1fb   : > { %v1207_v47 = vpack.c.bf16 %v1075_v42, %v1075_v42  ;;  %v5397_v42 = vld [vmem:[%s7368_s3 + $0x1] ss:$0 sm:$0xff] }
 0x1fe   : > { %v1199_v43 = vpop.f32.mrb[4].mxu0  ;;  %5968 = vmatmul.mubr.msk.bf16.vlgmr.msra.gmra.mrb[4].mxu1 %vm1212_vm5, %v1206_v41 }
 0x1ff   : > { %v1200_v44 = vadd.f32 %v5384_v40, %v1199_v43  ;;  %v5963_v45 = vpop.f32.mrb[5].mxu0  ;;  %5979 = vmatprep.mubr.msk.bf16.mxu1 %vm6454_vm3, %v6453_v14 }
 0x200   : > { %v1202_v46 = vpop.f32.mrb[6].mxu0  ;;  %5974 = vmatmul.mubr.msk.bf16.vlgmr.msra.gmra.mrb[8].mxu0 %vm1212_vm5, %v1207_v47 }
 0x201   : > { %v1210_v48 = vpack.c.bf16 %v1200_v44, %v1200_v44  ;;  %v1203_v49 = vadd.f32 %v5384_v40, %v1202_v46  ;;  %v5964_v50 = vpop.f32.mrb[7].mxu0  ;;  %5985 = vmatprep.mubr.msk.bf16.mxu0 %vm6454_vm3, %v6453_v14 }
 0x203   : > { %v1336_v51 = vsel %vm1334_vm6, %v1210_v48, 0  ;;  %v1211_v52 = vpack.c.bf16 %v1203_v49, %v1203_v49 }
 0x204   : > { %5978 = vmatpush3.bf16.msra.mxu1 %v1336_v51 }
 0x205   : > { %v1382_v53 = vsel %vm1334_vm6, %v1211_v52, 0  ;;  %5989 = vmatprep.subr.bf16.mxu1 %v6453_v14 }
 0x206   : > { %5984 = vmatpush3.bf16.msra.mxu0 %v1382_v53 }
 0x207   : > { %5997 = vmatprep.subr.bf16.mxu0 %v6453_v14 }
 0x2d1   : > { %v1253_v54 = vpop.f32.mrb[4].mxu1 }
 0x2d2   : > { %v5969_v55 = vpop.f32.mrb[5].mxu1  ;;  %v1305_v62 = vmul.f32 0.35355338, %v1253_v54 }
 0x2d3   : > { %v1256_v56 = vpop.f32.mrb[6].mxu1  ;;  %v1299_v57 = vpop.f32.mrb[8].mxu0 }
 0x2d4   : > { %v1306_v58 = vmul.f32 0.35355338, %v1299_v57  ;;  %v5970_v59 = vpop.f32.mrb[7].mxu1  ;;  %v5975_v60 = vpop.f32.mrb[9].mxu0  ;;  %v1307_v1 = vsel %vm1212_vm5, %v1305_v62, -inf }
 0x2d5   : > { %v1302_v61 = vpop.f32.mrb[10].mxu0  ;;  %v5415_v57 = vld [vmem:[%s6628_s6 + $0x1] ss:$0 sm:$0xff] }
 0x2d6   : > { %v5976_v63 = vpop.f32.mrb[11].mxu0  ;;  %v1310_v0 = vsel %vm1212_vm5, %v1306_v58, -inf }
 0x2d7   : > { %1311 = vmax.xlane.f32.xlu0 %v1310_v0 }
 0x2db   : > { %1308 = vmax.xlane.f32.xlu0 %v1307_v1 }
 0x364   : > { %v1312_v2 = vpop.xlane.xlu0 %1311 }
 0x365   : > { %v1314_v3 = vsub.f32 %v1306_v58, %v1312_v2 }
 0x367   : > { %v1317_v4 = vmul.f32 1.442695, %v1314_v3 }
 0x368   : > { %v1309_v5 = vpop.xlane.xlu0 %1308 }
 0x369   : > { %6354 = vpow2.f32 %v1317_v4  ;;  %v1313_v6 = vsub.f32 %v1305_v62, %v1309_v5 }
 0x36b   : > { %v1315_v7 = vmul.f32 1.442695, %v1313_v6 }
 0x36d   : > { %6356 = vpow2.f32 %v1315_v7 }
 0x373   : > { %v6355_v8 = vpop.eup %6354 }
 0x374   : > { %v1322_v9 = vsel %vm1212_vm5, %v6355_v8, 0.0 }
 0x375   : > { %1323 = vadd.xlane.f32.xlu1 %v1322_v9 }
 0x377   : > { %v6357_v10 = vpop.eup %6356 }
 0x378   : > { %v1319_v11 = vsel %vm1212_vm5, %v6357_v10, 0.0 }
 0x379   : > { %1320 = vadd.xlane.f32.xlu1 %v1319_v11 }
 0x402   : > { %v1324_v12 = vpop.xlane.xlu1 %1323 }
 0x403   : > { %6358 = vrcp.f32 %v1324_v12 }
 0x406   : > { %v1321_v13 = vpop.xlane.xlu1 %1320 }
 0x407   : > { %6360 = vrcp.f32 %v1321_v13 }
 0x40d   : > { %v6359_v15 = vpop.eup %6358 }
 0x40e   : > { %v1328_v16 = vmul.f32 %v6359_v15, %v6355_v8 }
 0x410   : > { %v1330_v18 = vpack.c.bf16 %v1328_v16, %v1328_v16 }
 0x411   : > { %v6361_v19 = vpop.eup %6360 }
 0x412   : > { %v1327_v21 = vmul.f32 %v6361_v19, %v6357_v10  ;;  %5986 = vmatmul.mubr.msk.bf16.vlgmr.msra.gmra.mrb[12].mxu0 %vm1212_vm5, %v1330_v18 }
 0x413   : > { %5998 = vmatpush3.bf16.msra.mxu0 %v6208_v17  ;;  %6001 = vmatprep.mubr.msk.bf16.mxu0 %vm6454_vm3, %v6453_v14 }
 0x414   : > { %v1329_v24 = vpack.c.bf16 %v1327_v21, %v1327_v21  ;;  %5999 = vmatprep.subr.bf16.mxu0 %v6453_v14 }
 0x416   : > { %5980 = vmatmul.mubr.msk.bf16.vlgmr.msra.gmra.mrb[8].mxu1 %vm1212_vm5, %v1329_v24 }
 0x417   : > { %6000 = vmatpush3.bf16.msra.mxu0 %v6209_v22  ;;  %5990 = vmatpush3.bf16.msra.mxu1 %v6210_v23 }
 0x418   : > { %5991 = vmatprep.subr.bf16.mxu1 %v6453_v14  ;;  %5993 = vmatprep.mubr.msk.bf16.mxu1 %vm6454_vm3, %v6453_v14 }
 0x419   : > { %6013 = vmatprep.subr.bf16.mxu0 %v6453_v14 }
 0x41a   : > { %6002 = vmatmul.mubr.msk.bf16.vlgmr.msra.gmra.mrb[16].mxu0 %vm1033_vm4, %v6701_v20 }
 0x41b   : > { %5992 = vmatpush3.bf16.msra.mxu1 %v6211_v25  ;;  %6015 = vmatprep.mubr.msk.bf16.mxu0 %vm6454_vm3, %v6453_v14 }
 0x41c   : > { %6005 = vmatprep.subr.bf16.mxu1 %v6453_v14 }
 0x41e   : > { %5994 = vmatmul.mubr.msk.bf16.vlgmr.msra.gmra.mrb[12].mxu1 %vm1033_vm4, %v6701_v20 }
 0x41f   : > { %6009 = vmatprep.mubr.msk.bf16.mxu1 %vm6454_vm3, %v6453_v14  ;;  %6006 = vmatpush3.bf16.msra.mxu1 %v6212_v26 }
 0x420   : > { %6007 = vmatprep.subr.bf16.mxu1 %v6453_v14 }
 0x423   : > { %6008 = vmatpush3.bf16.msra.mxu1 %v6213_v27 }
 0x424   : > { %6019 = vmatprep.subr.bf16.mxu1 %v6453_v14 }
 0x426   : > { %6010 = vmatmul.mubr.msk.bf16.vlgmr.msra.gmra.mrb[16].mxu1 %vm1033_vm4, %v6701_v20 }
 0x427   : > { %6021 = vmatprep.mubr.msk.bf16.mxu1 %vm6454_vm3, %v6453_v14 }
 0x4e5   : > { %v6773_v28 = vpop.f32.mrb[12].mxu0 }
 0x4e6   : > { %v5987_v29 = vpop.f32.mrb[13].mxu0 }
 0x4e7   : > { %v1421_v30 = vpop.f32.mrb[14].mxu0 }
 0x4e8   : > { %v5988_v31 = vpop.f32.mrb[15].mxu0 }
 0x4e9   : > { %v6775_v32 = vpop.f32.mrb[8].mxu1 }
 0x4ea   : > { %v1424_v33 = vpack.c.bf16 %v6773_v28, %v6775_v32  ;;  %v5981_v34 = vpop.f32.mrb[9].mxu1 }
 0x4eb   : > { %v1375_v35 = vpop.f32.mrb[10].mxu1  ;;  %v5423_v34 = vld [vmem:[%s6638_s28 + $0x4] sm:$0xf] }
 0x4ec   : > { %v5982_v37 = vpop.f32.mrb[11].mxu1 }
 0x4ed   : > { %v1551_v38 = vpop.f32.mrb[16].mxu0  ;;  %v1425_v37 = vld [vmem:[%s6638_s28] sm:$0xf] }
 0x4ee   : > { %v1552_v39 = vadd.f32 %v5406_v36, %v1551_v38  ;;  %v6003_v40 = vpop.f32.mrb[17].mxu0 }
 0x4ef   : > { %v1554_v41 = vpop.f32.mrb[18].mxu0  ;;  %v1847_v40 = vsel %vm1334_vm6, %v5423_v34, 0 }
 0x4f0   : > { %v1626_v43 = vpack.c.bf16 %v1552_v39, %v1552_v39  ;;  %v1555_v44 = vadd.f32 %v5406_v36, %v1554_v41  ;;  %v6004_v45 = vpop.f32.mrb[19].mxu0 }
 0x4f1   : > { %v1485_v46 = vpop.f32.mrb[12].mxu1 }
 0x4f2   : > { %v1634_v47 = vsel %vm1212_vm5, %v1626_v43, 0  ;;  %v1627_v48 = vpack.c.bf16 %v1555_v44, %v1555_v44  ;;  %v1486_v49 = vadd.f32 %v5397_v42, %v1485_v46  ;;  %v5995_v50 = vpop.f32.mrb[13].mxu1  ;;  %v6214_v43 = vld [vmem:[%s6608_s26 + $0x20] sm:$0xff]   ;;  %v6215_v44 = vld [vmem:[%s6608_s26 + $0x28] sm:$0xff]  }
 0x4f3   : > { %6014 = vmatpush3.bf16.xpose.msra.mxu0 %v1634_v47  ;;  %v1488_v51 = vpop.f32.mrb[14].mxu1  ;;  %v6216_v46 = vld [vmem:[%s7366_s7 + $0x20] sm:$0xff]  }
 0x4f4   : > { %v1680_v52 = vsel %vm1212_vm5, %v1627_v48, 0  ;;  %v5996_v53 = vpop.f32.mrb[15].mxu1  ;;  %6025 = vmatprep.subr.bf16.mxu0 %v6453_v14  ;;  %v1624_v54 = vpack.c.bf16 %v1486_v49, %v1486_v49  ;;  %v1489_v55 = vadd.f32 %v5397_v42, %v1488_v51  ;;  %v1894_v42 = vsel %vm1334_vm6, %v1425_v37, 0 }
 0x4f5   : > { %6020 = vmatpush3.bf16.xpose.msra.mxu1 %v1680_v52  ;;  %v6217_v52 = vld [vmem:[%s7366_s7 + $0x28] sm:$0xff]  }
 0x4f6   : > { %6031 = vmatprep.subr.bf16.mxu1 %v6453_v14  ;;  %v1625_v56 = vpack.c.bf16 %v1489_v55, %v1489_v55 }
 0x4f9   : > { %v1617_v58 = vpop.f32.mrb[16].mxu1 }
 0x4fa   : > { %6016 = vmatmul.mubr.msk.bf16.vlgmr.msra.gmra.mrb[20].mxu0 %vm1212_vm5, %v1624_v54  ;;  %v1618_v59 = vadd.f32 %v5415_v57, %v1617_v58  ;;  %v6011_v60 = vpop.f32.mrb[17].mxu1  ;;  %v6218_v54 = vld [vmem:[%s7367_s25 + $0x20] sm:$0xff]   ;;  %v6219_v58 = vld [vmem:[%s7367_s25 + $0x28] sm:$0xff]  }
 0x4fb   : > { %6027 = vmatprep.mubr.msk.bf16.mxu0 %vm6454_vm3, %v6453_v14  ;;  %v1620_v61 = vpop.f32.mrb[18].mxu1 }
 0x4fc   : > { %6022 = vmatmul.mubr.msk.bf16.vlgmr.msra.gmra.mrb[20].mxu1 %vm1212_vm5, %v1625_v56  ;;  %v1628_v62 = vpack.c.bf16 %v1618_v59, %v1618_v59  ;;  %v1621_v63 = vadd.f32 %v5415_v57, %v1620_v61  ;;  %v6012_v0 = vpop.f32.mrb[19].mxu1  ;;  %v5440_v59 = vld [vmem:[%s6623_s24 + $0x2] ss:$0 sm:$0xff] }
 0x4fd   : > { %6033 = vmatprep.mubr.msk.bf16.mxu1 %vm6454_vm3, %v6453_v14 }
 0x4fe   : > { %v1752_v1 = vsel %vm1334_vm6, %v1628_v62, 0  ;;  %v1629_v2 = vpack.c.bf16 %v1621_v63, %v1621_v63 }
 0x4ff   : > { %6026 = vmatpush3.bf16.msra.mxu0 %v1752_v1 }
 0x500   : > { %v1798_v3 = vsel %vm1334_vm6, %v1629_v2, 0  ;;  %6037 = vmatprep.subr.bf16.mxu0 %v6453_v14 }
 0x501   : > { %6032 = vmatpush3.bf16.msra.mxu1 %v1798_v3 }
 0x502   : > { %6043 = vmatprep.subr.bf16.mxu1 %v6453_v14 }
 0x5cd   : > { %v1670_v4 = vpop.f32.mrb[20].mxu0 }
 0x5ce   : > { %v1722_v5 = vmul.f32 0.35355338, %v1670_v4  ;;  %v6017_v6 = vpop.f32.mrb[21].mxu0 }
 0x5cf   : > { %v1673_v7 = vpop.f32.mrb[22].mxu0  ;;  %v1716_v8 = vpop.f32.mrb[20].mxu1 }
 0x5d0   : > { %v1723_v9 = vmul.f32 0.35355338, %v1716_v8  ;;  %v6018_v10 = vpop.f32.mrb[23].mxu0  ;;  %v6023_v11 = vpop.f32.mrb[21].mxu1  ;;  %v1724_v12 = vsel %vm1212_vm5, %v1722_v5, -inf }
 0x5d1   : > { %v1719_v13 = vpop.f32.mrb[22].mxu1  ;;  %1725 = vmax.xlane.f32.xlu0 %v1724_v12  ;;  %v5431_v12 = vld [vmem:[%s7368_s3 + $0x2] ss:$0 sm:$0xff] }
 0x5d2   : > { %v6024_v15 = vpop.f32.mrb[23].mxu1  ;;  %v1727_v16 = vsel %vm1212_vm5, %v1723_v9, -inf }
 0x5d3   : > { %1728 = vmax.xlane.f32.xlu1 %v1727_v16 }
 0x65e   : > { %v1726_v17 = vpop.xlane.xlu0 %1725 }
 0x65f   : > { %v1730_v18 = vsub.f32 %v1722_v5, %v1726_v17 }
 0x660   : > { %v1729_v19 = vpop.xlane.xlu1 %1728 }
 0x661   : > { %v1732_v21 = vmul.f32 1.442695, %v1730_v18  ;;  %v1731_v22 = vsub.f32 %v1723_v9, %v1729_v19 }
 0x663   : > { %6362 = vpow2.f32 %v1732_v21  ;;  %v1734_v23 = vmul.f32 1.442695, %v1731_v22 }
 0x665   : > { %6364 = vpow2.f32 %v1734_v23  ;;  %v5449_v23 = vld [vmem:[%s6628_s6 + $0x2] ss:$0 sm:$0xff] }
 0x66d   : > { %v6363_v24 = vpop.eup %6362 }
 0x66e   : > { %v1736_v25 = vsel %vm1212_vm5, %v6363_v24, 0.0 }
 0x66f   : > { %v6365_v26 = vpop.eup %6364  ;;  %1737 = vadd.xlane.f32.xlu0 %v1736_v25 }
 0x670   : > { %v1739_v27 = vsel %vm1212_vm5, %v6365_v26, 0.0 }
 0x671   : > { %1740 = vadd.xlane.f32.xlu1 %v1739_v27 }
 0x6fc   : > { %v1738_v29 = vpop.xlane.xlu0 %1737 }
 0x6fd   : > { %6366 = vrcp.f32 %v1738_v29 }
 0x6fe   : > { %v1741_v30 = vpop.xlane.xlu1 %1740 }
 0x6ff   : > { %6368 = vrcp.f32 %v1741_v30 }
 0x707   : > { %v6367_v31 = vpop.eup %6366 }
 0x708   : > { %v1744_v35 = vmul.f32 %v6367_v31, %v6363_v24 }
 0x709   : > { %v6369_v36 = vpop.eup %6368 }
 0x70a   : > { %v1745_v38 = vmul.f32 %v6369_v36, %v6365_v26  ;;  %v1746_v39 = vpack.c.bf16 %v1744_v35, %v1744_v35 }
 0x70c   : > { %6028 = vmatmul.mubr.msk.bf16.vlgmr.msra.gmra.mrb[24].mxu0 %vm1212_vm5, %v1746_v39  ;;  %v1747_v41 = vpack.c.bf16 %v1745_v38, %v1745_v38 }
 0x70d   : > { %6038 = vmatpush3.bf16.msra.mxu0 %v1847_v40  ;;  %6039 = vmatprep.mubr.msk.bf16.mxu0 %vm6454_vm3, %v6453_v14 }
 0x70e   : > { %6034 = vmatmul.mubr.msk.bf16.vlgmr.msra.gmra.mrb[24].mxu1 %vm1212_vm5, %v1747_v41  ;;  %6049 = vmatprep.subr.bf16.mxu0 %v6453_v14 }
 0x70f   : > { %6044 = vmatpush3.bf16.msra.mxu1 %v1894_v42  ;;  %6045 = vmatprep.mubr.msk.bf16.mxu1 %vm6454_vm3, %v6453_v14 }
 0x710   : > { %6057 = vmatprep.subr.bf16.mxu1 %v6453_v14 }
 0x716   : > { %6046 = vmatmul.mubr.msk.bf16.vlgmr.msra.gmra.mrb[28].mxu1 %vm1212_vm5, %v1424_v33 }
 0x717   : > { %6058 = vmatpush3.bf16.msra.mxu1 %v6214_v43  ;;  %6061 = vmatprep.mubr.msk.bf16.mxu1 %vm6454_vm3, %v6453_v14 }
 0x718   : > { %6059 = vmatprep.subr.bf16.mxu1 %v6453_v14 }
 0x71b   : > { %6060 = vmatpush3.bf16.msra.mxu1 %v6215_v44 }
 0x71c   : > { %6073 = vmatprep.subr.bf16.mxu1 %v6453_v14 }
 0x71e   : > { %6062 = vmatmul.mubr.msk.bf16.vlgmr.msra.gmra.mrb[32].mxu1 %vm1033_vm4, %v6701_v20 }
 0x71f   : > { %6075 = vmatprep.mubr.msk.bf16.mxu1 %vm6454_vm3, %v6453_v14 }
 0x7df   : > { %v1788_v28 = vpop.f32.mrb[24].mxu0 }
 0x7e0   : > { %v6029_v32 = vpop.f32.mrb[25].mxu0 }
 0x7e1   : > { %v1791_v33 = vpop.f32.mrb[26].mxu0  ;;  %v1834_v45 = vpop.f32.mrb[24].mxu1 }
 0x7e2   : > { %v1840_v47 = vpack.c.bf16 %v1834_v45, %v1788_v28  ;;  %v6030_v48 = vpop.f32.mrb[27].mxu0  ;;  %v6035_v49 = vpop.f32.mrb[25].mxu1 }
 0x7e3   : > { %v1837_v50 = vpop.f32.mrb[26].mxu1 }
 0x7e4   : > { %v6036_v51 = vpop.f32.mrb[27].mxu1  ;;  %6040 = vmatmul.mubr.msk.bf16.vlgmr.msra.gmra.mrb[28].mxu0 %vm1212_vm5, %v1840_v47 }
 0x7e5   : > { %6050 = vmatpush3.bf16.msra.mxu0 %v6216_v46  ;;  %6053 = vmatprep.mubr.msk.bf16.mxu0 %vm6454_vm3, %v6453_v14 }
 0x7e6   : > { %6051 = vmatprep.subr.bf16.mxu0 %v6453_v14 }
 0x7e9   : > { %v1930_v53 = vpop.f32.mrb[28].mxu1  ;;  %6052 = vmatpush3.bf16.msra.mxu0 %v6217_v52 }
 0x7ea   : > { %v6047_v55 = vpop.f32.mrb[29].mxu1  ;;  %6065 = vmatprep.subr.bf16.mxu0 %v6453_v14 }
 0x7eb   : > { %v1933_v56 = vpop.f32.mrb[30].mxu1 }
 0x7ec   : > { %v6048_v57 = vpop.f32.mrb[31].mxu1  ;;  %6054 = vmatmul.mubr.msk.bf16.vlgmr.msra.gmra.mrb[32].mxu0 %vm1033_vm4, %v6701_v20 }
 0x7ed   : > { %6066 = vmatpush3.bf16.msra.mxu0 %v6218_v54  ;;  %6069 = vmatprep.mubr.msk.bf16.mxu0 %vm6454_vm3, %v6453_v14 }
 0x7ee   : > { %6067 = vmatprep.subr.bf16.mxu0 %v6453_v14 }
 0x7f1   : > { %v2062_v60 = vpop.f32.mrb[32].mxu1  ;;  %6068 = vmatpush3.bf16.msra.mxu0 %v6219_v58 }
 0x7f2   : > { %v2063_v61 = vadd.f32 %v5440_v59, %v2062_v60  ;;  %v6063_v62 = vpop.f32.mrb[33].mxu1  ;;  %6079 = vmatprep.subr.bf16.mxu0 %v6453_v14 }
 0x7f3   : > { %v2065_v63 = vpop.f32.mrb[34].mxu1 }
 0x7f4   : > { %v2137_v0 = vpack.c.bf16 %v2063_v61, %v2063_v61  ;;  %v2066_v1 = vadd.f32 %v5440_v59, %v2065_v63  ;;  %v6064_v2 = vpop.f32.mrb[35].mxu1  ;;  %6070 = vmatmul.mubr.msk.bf16.vlgmr.msra.gmra.mrb[36].mxu0 %vm1033_vm4, %v6701_v20  ;;  %v5457_v59 = vld [vmem:[%s6638_s28 + $0x8] sm:$0xf] }
 0x7f5   : > { %6081 = vmatprep.mubr.msk.bf16.mxu0 %vm6454_vm3, %v6453_v14  ;;  %v6222_v2 = vld [vmem:[%s7366_s7 + $0x30] sm:$0xff]  }
 0x7f6   : > { %v2145_v3 = vsel %vm1212_vm5, %v2137_v0, 0  ;;  %v2138_v4 = vpack.c.bf16 %v2066_v1, %v2066_v1  ;;  %v2358_v0 = vsel %vm1334_vm6, %v5457_v59, 0 }
 0x7f7   : > { %6074 = vmatpush3.bf16.xpose.msra.mxu1 %v2145_v3  ;;  %v6223_v3 = vld [vmem:[%s7366_s7 + $0x38] sm:$0xff]  }
 0x7f8   : > { %v2191_v5 = vsel %vm1212_vm5, %v2138_v4, 0  ;;  %6085 = vmatprep.subr.bf16.mxu1 %v6453_v14 }
 0x7fa   : > { %6080 = vmatpush3.bf16.xpose.msra.mxu0 %v2191_v5 }
 0x7fb   : > { %6091 = vmatprep.subr.bf16.mxu0 %v6453_v14 }
 0x8b7   : > { %v1883_v6 = vpop.f32.mrb[28].mxu0 }
 0x8b8   : > { %v6850_v7 = vadd.f32 %v1930_v53, %v1883_v6  ;;  %v6041_v8 = vpop.f32.mrb[29].mxu0 }
 0x8b9   : > { %v1886_v9 = vpop.f32.mrb[30].mxu0 }
 0x8ba   : > { %v6852_v10 = vadd.f32 %v1933_v56, %v1886_v9  ;;  %v6042_v11 = vpop.f32.mrb[31].mxu0  ;;  %v6220_v9 = vld [vmem:[%s6608_s26 + $0x30] sm:$0xff]  }
 0x8bf   : > { %v1996_v13 = vpop.f32.mrb[32].mxu0 }
 0x8c0   : > { %v1997_v15 = vadd.f32 %v5431_v12, %v1996_v13  ;;  %v6055_v16 = vpop.f32.mrb[33].mxu0 }
 0x8c1   : > { %v1999_v17 = vpop.f32.mrb[34].mxu0 }
 0x8c2   : > { %v2135_v18 = vpack.c.bf16 %v1997_v15, %v1997_v15  ;;  %v2000_v19 = vadd.f32 %v5431_v12, %v1999_v17  ;;  %v6056_v21 = vpop.f32.mrb[35].mxu0  ;;  %v6221_v17 = vld [vmem:[%s6608_s26 + $0x38] sm:$0xff]   ;;  %s7369_s26 = sld [smem:[#allocation25_spill]] }
 0x8c4   : > { %v2136_v22 = vpack.c.bf16 %v2000_v19, %v2000_v19  ;;  %6076 = vmatmul.mubr.msk.bf16.vlgmr.msra.gmra.mrb[36].mxu1 %vm1212_vm5, %v2135_v18  ;;  %v6224_v18 = vld [vmem:[%s7367_s25 + $0x30] sm:$0xff]   ;;  %v6225_v19 = vld [vmem:[%s7367_s25 + $0x38] sm:$0xff]  }
 0x8c5   : > { %6087 = vmatprep.mubr.msk.bf16.mxu1 %vm6454_vm3, %v6453_v14 }
 0x8c6   : > { %6082 = vmatmul.mubr.msk.bf16.vlgmr.msra.gmra.mrb[40].mxu0 %vm1212_vm5, %v2136_v22 }
 0x8c7   : > { %v2128_v24 = vpop.f32.mrb[36].mxu0  ;;  %6093 = vmatprep.mubr.msk.bf16.mxu0 %vm6454_vm3, %v6453_v14 }
 0x8c8   : > { %v2129_v25 = vadd.f32 %v5449_v23, %v2128_v24  ;;  %v6071_v26 = vpop.f32.mrb[37].mxu0 }
 0x8c9   : > { %v2131_v27 = vpop.f32.mrb[38].mxu0 }
 0x8ca   : > { %v2139_v29 = vpack.c.bf16 %v2129_v25, %v2129_v25  ;;  %v2132_v30 = vadd.f32 %v5449_v23, %v2131_v27  ;;  %v6072_v31 = vpop.f32.mrb[39].mxu0 }
 0x8cc   : > { %v2263_v34 = vsel %vm1334_vm6, %v2139_v29, 0  ;;  %v2140_v35 = vpack.c.bf16 %v2132_v30, %v2132_v30 }
 0x8cd   : > { %6086 = vmatpush3.bf16.msra.mxu1 %v2263_v34  ;;  %v5473_v34 = vld [vmem:[%s6623_s24 + $0x3] ss:$0 sm:$0xff] }
 0x8ce   : > { %v2309_v36 = vsel %vm1334_vm6, %v2140_v35, 0  ;;  %6097 = vmatprep.subr.bf16.mxu1 %v6453_v14 }
 0x8cf   : > { %6092 = vmatpush3.bf16.msra.mxu0 %v2309_v36 }
 0x8d0   : > { %6103 = vmatprep.subr.bf16.mxu0 %v6453_v14 }
 0x997   : > { %v2181_v37 = vpop.f32.mrb[36].mxu1 }
 0x998   : > { %v2233_v38 = vmul.f32 0.35355338, %v2181_v37  ;;  %v6077_v39 = vpop.f32.mrb[37].mxu1 }
 0x999   : > { %v2184_v40 = vpop.f32.mrb[38].mxu1  ;;  %v2227_v41 = vpop.f32.mrb[40].mxu0 }
 0x99a   : > { %v2234_v42 = vmul.f32 0.35355338, %v2227_v41  ;;  %v6078_v43 = vpop.f32.mrb[39].mxu1  ;;  %v6083_v44 = vpop.f32.mrb[41].mxu0  ;;  %v2235_v28 = vsel %vm1212_vm5, %v2233_v38, -inf }
 0x99b   : > { %2236 = vmax.xlane.f32.xlu0 %v2235_v28  ;;  %v2230_v32 = vpop.f32.mrb[42].mxu0 }
 0x99c   : > { %v6084_v33 = vpop.f32.mrb[43].mxu0  ;;  %v2238_v45 = vsel %vm1212_vm5, %v2234_v42, -inf }
 0x99d   : > { %2239 = vmax.xlane.f32.xlu1 %v2238_v45  ;;  %v5482_v33 = vld [vmem:[%s6628_s6 + $0x3] ss:$0 sm:$0xff] }
 0xa28   : > { %v2237_v46 = vpop.xlane.xlu0 %2236 }
 0xa29   : > { %v2241_v47 = vsub.f32 %v2233_v38, %v2237_v46  ;;  %v5464_v38 = vld [vmem:[%s7368_s3 + $0x3] ss:$0 sm:$0xff] }
 0xa2a   : > { %v2240_v48 = vpop.xlane.xlu1 %2239 }
 0xa2b   : > { %v2243_v49 = vmul.f32 1.442695, %v2241_v47  ;;  %v2242_v50 = vsub.f32 %v2234_v42, %v2240_v48 }
 0xa2d   : > { %6370 = vpow2.f32 %v2243_v49  ;;  %v2245_v51 = vmul.f32 1.442695, %v2242_v50 }
 0xa2f   : > { %6372 = vpow2.f32 %v2245_v51 }
 0xa37   : > { %v6371_v52 = vpop.eup %6370 }
 0xa38   : > { %v2247_v53 = vsel %vm1212_vm5, %v6371_v52, 0.0 }
 0xa39   : > { %v6373_v54 = vpop.eup %6372  ;;  %2248 = vadd.xlane.f32.xlu0 %v2247_v53 }
 0xa3a   : > { %v2250_v55 = vsel %vm1212_vm5, %v6373_v54, 0.0 }
 0xa3b   : > { %2251 = vadd.xlane.f32.xlu1 %v2250_v55 }
 0xac6   : > { %v2249_v56 = vpop.xlane.xlu0 %2248 }
 0xac7   : > { %6374 = vrcp.f32 %v2249_v56 }
 0xac8   : > { %v2252_v57 = vpop.xlane.xlu1 %2251 }
 0xac9   : > { %6376 = vrcp.f32 %v2252_v57 }
 0xad1   : > { %v6375_v58 = vpop.eup %6374 }
 0xad2   : > { %v2255_v60 = vmul.f32 %v6375_v58, %v6371_v52 }
 0xad3   : > { %v6377_v61 = vpop.eup %6376 }
 0xad4   : > { %v2256_v62 = vmul.f32 %v6377_v61, %v6373_v54  ;;  %v2257_v63 = vpack.c.bf16 %v2255_v60, %v2255_v60 }
 0xad6   : > { %6088 = vmatmul.mubr.msk.bf16.vlgmr.msra.gmra.mrb[40].mxu1 %vm1212_vm5, %v2257_v63  ;;  %v2258_v1 = vpack.c.bf16 %v2256_v62, %v2256_v62 }
 0xad7   : > { %6098 = vmatpush3.bf16.msra.mxu1 %v2358_v0  ;;  %6099 = vmatprep.mubr.msk.bf16.mxu1 %vm6454_vm3, %v6453_v14 }
 0xad8   : > { %6094 = vmatmul.mubr.msk.bf16.vlgmr.msra.gmra.mrb[44].mxu0 %vm1212_vm5, %v2258_v1  ;;  %6111 = vmatprep.subr.bf16.mxu1 %v6453_v14 }
 0xad9   : > { %6107 = vmatprep.mubr.msk.bf16.mxu0 %vm6454_vm3, %v6453_v14  ;;  %6104 = vmatpush3.bf16.msra.mxu0 %v6222_v2 }
 0xada   : > { %6105 = vmatprep.subr.bf16.mxu0 %v6453_v14 }
 0xadd   : > { %6106 = vmatpush3.bf16.msra.mxu0 %v6223_v3 }
 0xade   : > { %6119 = vmatprep.subr.bf16.mxu0 %v6453_v14 }
 0xae0   : > { %6108 = vmatmul.mubr.msk.bf16.vlgmr.msra.gmra.mrb[48].mxu0 %vm1033_vm4, %v6701_v20 }
 0xae1   : > { %6123 = vmatprep.mubr.msk.bf16.mxu0 %vm6454_vm3, %v6453_v14  ;;  %6120 = vmatpush3.bf16.msra.mxu0 %v6224_v18 }
 0xae2   : > { %6121 = vmatprep.subr.bf16.mxu0 %v6453_v14 }
 0xae5   : > { %6122 = vmatpush3.bf16.msra.mxu0 %v6225_v19  ;;  %v5490_v19 = vld [vmem:[%s6638_s28 + $0xc] sm:$0xf]  ;;  %s7370_s28 = scalar_lea.vmem %s7369_s26, %s6596_s4  ;;  %s7371_s4 = sld [smem:[#allocation16_spill]] (!%p5666_p6) }
 0xae6   : > { %6133 = vmatprep.subr.bf16.mxu0 %v6453_v14 }
 0xae8   : > { %6124 = vmatmul.mubr.msk.bf16.vlgmr.msra.gmra.mrb[52].mxu0 %vm1033_vm4, %v6701_v20 }
 0xae9   : > { %6135 = vmatprep.mubr.msk.bf16.mxu0 %vm6454_vm3, %v6453_v14 }
 0xba9   : > { %v2299_v4 = vpop.f32.mrb[40].mxu1 }
 0xbaa   : > { %v6089_v5 = vpop.f32.mrb[41].mxu1 }
 0xbab   : > { %v2302_v6 = vpop.f32.mrb[42].mxu1  ;;  %v2345_v8 = vpop.f32.mrb[44].mxu0 }
 0xbac   : > { %v2351_v11 = vpack.c.bf16 %v2345_v8, %v2299_v4  ;;  %v6090_v12 = vpop.f32.mrb[43].mxu1  ;;  %v6095_v13 = vpop.f32.mrb[45].mxu0 }
 0xbad   : > { %v2348_v15 = vpop.f32.mrb[46].mxu0 }
 0xbae   : > { %v6096_v16 = vpop.f32.mrb[47].mxu0  ;;  %6100 = vmatmul.mubr.msk.bf16.vlgmr.msra.gmra.mrb[44].mxu1 %vm1212_vm5, %v2351_v11 }
 0xbaf   : > { %6112 = vmatpush3.bf16.msra.mxu1 %v6220_v9  ;;  %6115 = vmatprep.mubr.msk.bf16.mxu1 %vm6454_vm3, %v6453_v14 }
 0xbb0   : > { %6113 = vmatprep.subr.bf16.mxu1 %v6453_v14 }
 0xbb3   : > { %6114 = vmatpush3.bf16.msra.mxu1 %v6221_v17  ;;  %v2462_v21 = vpop.f32.mrb[48].mxu0 }
 0xbb4   : > { %6127 = vmatprep.subr.bf16.mxu1 %v6453_v14  ;;  %v6109_v22 = vpop.f32.mrb[49].mxu0  ;;  %v2463_v43 = vadd.f32 %v5464_v38, %v2462_v21 }
 0xbb5   : > { %v2465_v23 = vpop.f32.mrb[50].mxu0 }
 0xbb6   : > { %6116 = vmatmul.mubr.msk.bf16.vlgmr.msra.gmra.mrb[48].mxu1 %vm1033_vm4, %v6701_v20  ;;  %v6110_v24 = vpop.f32.mrb[51].mxu0  ;;  %v2466_v28 = vadd.f32 %v5464_v38, %v2465_v23 }
 0xbb7   : > { %6129 = vmatprep.mubr.msk.bf16.mxu1 %vm6454_vm3, %v6453_v14 }
 0xbb8   : > { %v2602_v32 = vpack.c.bf16 %v2466_v28, %v2466_v28 }
 0xbbb   : > { %v2594_v45 = vpop.f32.mrb[52].mxu0 }
 0xbbc   : > { %v2595_v46 = vadd.f32 %v5482_v33, %v2594_v45  ;;  %v6125_v47 = vpop.f32.mrb[53].mxu0 }
 0xbbd   : > { %v2597_v48 = vpop.f32.mrb[54].mxu0 }
 0xbbe   : > { %v2605_v49 = vpack.c.bf16 %v2595_v46, %v2595_v46  ;;  %v2598_v50 = vadd.f32 %v5482_v33, %v2597_v48  ;;  %v6126_v51 = vpop.f32.mrb[55].mxu0  ;;  %v6395_v46 = vld [vmem:[#allocation2 + $0x8] sm:$0xff] }
 0xbc0   : > { %v2729_v52 = vsel %vm1334_vm6, %v2605_v49, 0  ;;  %v2606_v53 = vpack.c.bf16 %v2598_v50, %v2598_v50 }
 0xbc2   : > { %v2775_v54 = vsel %vm1334_vm6, %v2606_v53, 0 }
 0xc81   : > { %v2394_v25 = vpop.f32.mrb[44].mxu1 }
 0xc82   : > { %v6907_v26 = vadd.f32 %v2394_v25, %v6850_v7  ;;  %v6101_v27 = vpop.f32.mrb[45].mxu1  ;;  %v2824_v25 = vsel %vm1334_vm6, %v5490_v19, 0 }
 0xc83   : > { %v2397_v29 = vpop.f32.mrb[46].mxu1 }
 0xc84   : > { %v6910_v30 = vadd.f32 %v2397_v29, %v6852_v10  ;;  %v6102_v31 = vpop.f32.mrb[47].mxu1  ;;  %v2601_v10 = vpack.c.bf16 %v2463_v43, %v2463_v43 }
 0xc89   : > { %v2528_v20 = vpop.f32.mrb[48].mxu1 }
 0xc8a   : > { %v2529_v35 = vadd.f32 %v5473_v34, %v2528_v20  ;;  %v6117_v36 = vpop.f32.mrb[49].mxu1 }
 0xc8b   : > { %v2531_v37 = vpop.f32.mrb[50].mxu1 }
 0xc8c   : > { %v2603_v39 = vpack.c.bf16 %v2529_v35, %v2529_v35  ;;  %v2532_v40 = vadd.f32 %v5473_v34, %v2531_v37  ;;  %v6118_v41 = vpop.f32.mrb[51].mxu1 }
 0xc8d   : > { %v5492_v41 = vld [vmem:[%s7370_s28] ss:$0 sm:$0xff] }
 0xc8e   : > { %v2611_v42 = vsel %vm1212_vm5, %v2603_v39, 0  ;;  %v2604_v7 = vpack.c.bf16 %v2532_v40, %v2532_v40 }
 0xc8f   : > { %6128 = vmatpush3.bf16.xpose.msra.mxu1 %v2611_v42 }
 0xc90   : > { %v2657_v44 = vsel %vm1212_vm5, %v2604_v7, 0  ;;  %6139 = vmatprep.subr.bf16.mxu1 %v6453_v14 }
 0xc91   : > { %6134 = vmatpush3.bf16.xpose.msra.mxu0 %v2657_v44 }
 0xc92   : > { %6145 = vmatprep.subr.bf16.mxu0 %v6453_v14 }
 0xc96   : > { %6130 = vmatmul.mubr.msk.bf16.vlgmr.msra.gmra.mrb[52].mxu1 %vm1212_vm5, %v2601_v10 }
 0xc97   : > { %6141 = vmatprep.mubr.msk.bf16.mxu1 %vm6454_vm3, %v6453_v14  ;;  %6140 = vmatpush3.bf16.msra.mxu1 %v2729_v52 }
 0xc98   : > { %6136 = vmatmul.mubr.msk.bf16.vlgmr.msra.gmra.mrb[56].mxu0 %vm1212_vm5, %v2602_v32  ;;  %6151 = vmatprep.subr.bf16.mxu1 %v6453_v14  ;;  %v6394_v32 = vld [vmem:[#allocation2] sm:$0xff] }
 0xc99   : > { %6147 = vmatprep.mubr.msk.bf16.mxu0 %vm6454_vm3, %v6453_v14  ;;  %6146 = vmatpush3.bf16.msra.mxu0 %v2775_v54 }
 0xd69   : > { %v2647_v55 = vpop.f32.mrb[52].mxu1 }
 0xd6a   : > { %v2699_v56 = vmul.f32 0.35355338, %v2647_v55  ;;  %v6131_v57 = vpop.f32.mrb[53].mxu1 }
 0xd6b   : > { %v2650_v58 = vpop.f32.mrb[54].mxu1  ;;  %v2693_v59 = vpop.f32.mrb[56].mxu0  ;;  %v2925_v57 = vld [vmem:[%s6644_s1] sm:$0xff] }
 0xd6c   : > { %v2700_v60 = vmul.f32 0.35355338, %v2693_v59  ;;  %v6132_v61 = vpop.f32.mrb[55].mxu1  ;;  %v6137_v62 = vpop.f32.mrb[57].mxu0  ;;  %v2701_v63 = vsel %vm1212_vm5, %v2699_v56, -inf  ;;  %v2933_v58 = vld [vmem:[%s6644_s1 + $0x40] sm:$0xff] }
 0xd6d   : > { %2702 = vmax.xlane.f32.xlu0 %v2701_v63  ;;  %v2696_v0 = vpop.f32.mrb[58].mxu0  ;;  %v2926_v59 = vld [vmem:[%s6644_s1 + $0x8] sm:$0xff]  ;;  %v5495_v62 = vcombine.low %v2925_v57, %v2933_v58 }
 0xd6e   : > { %v6138_v1 = vpop.f32.mrb[59].mxu0  ;;  %v2704_v2 = vsel %vm1212_vm5, %v2700_v60, -inf  ;;  %v2934_v61 = vld [vmem:[%s6644_s1 + $0x48] sm:$0xff] }
 0xd6f   : > { %2705 = vmax.xlane.f32.xlu1 %v2704_v2  ;;  %v5497_v63 = vcombine.low %v2926_v59, %v2934_v61  ;;  %v5498_v0 = vcombine.high %v2926_v59, %v2934_v61  ;;  %v2941_v1 = vld [vmem:[%s6644_s1 + $0x80] sm:$0xff]  ;;  %v2932_v59 = vld [vmem:[%s6644_s1 + $0x38] sm:$0xff] }
 0xd70   : > { %v2949_v2 = vld [vmem:[%s6644_s1 + $0xc0] sm:$0xff] }
 0xdfa   : > { %v2703_v3 = vpop.xlane.xlu0 %2702 }
 0xdfb   : > { %v2707_v4 = vsub.f32 %v2699_v56, %v2703_v3  ;;  %v2942_v3 = vld [vmem:[%s6644_s1 + $0x88] sm:$0xff] }
 0xdfc   : > { %v2706_v5 = vpop.xlane.xlu1 %2705 }
 0xdfd   : > { %v2709_v6 = vmul.f32 1.442695, %v2707_v4  ;;  %v2708_v8 = vsub.f32 %v2700_v60, %v2706_v5  ;;  %v5496_v60 = vcombine.high %v2925_v57, %v2933_v58  ;;  %v5512_v4 = vcombine.high %v2941_v1, %v2949_v2  ;;  %v2950_v5 = vld [vmem:[%s6644_s1 + $0xc8] sm:$0xff]  ;;  %v2931_v57 = vld [vmem:[%s6644_s1 + $0x30] sm:$0xff] }
 0xdfe   : > { %v2939_v58 = vld [vmem:[%s6644_s1 + $0x70] sm:$0xff] }
 0xdff   : > { %6378 = vpow2.f32 %v2709_v6  ;;  %v2711_v9 = vmul.f32 1.442695, %v2708_v8  ;;  %3204 = vmatprep.subr.bf16.mxu0 %v5496_v60  ;;  %v5511_v6 = vcombine.low %v2941_v1, %v2949_v2  ;;  %v5513_v8 = vcombine.low %v2942_v3, %v2950_v5  ;;  %v2940_v60 = vld [vmem:[%s6644_s1 + $0x78] sm:$0xff]  ;;  %v2947_v1 = vld [vmem:[%s6644_s1 + $0xb0] sm:$0xff] }
 0xe00   : > { %v2955_v2 = vld [vmem:[%s6644_s1 + $0xf0] sm:$0xff] }
 0xe01   : > { %6380 = vpow2.f32 %v2711_v9  ;;  %v5514_v9 = vcombine.high %v2942_v3, %v2950_v5  ;;  %v2948_v3 = vld [vmem:[%s6644_s1 + $0xb8] sm:$0xff]  ;;  %v5507_v5 = vcombine.low %v2931_v57, %v2939_v58 }
 0xe09   : > { %v6379_v11 = vpop.eup %6378 }
 0xe0a   : > { %v2713_v12 = vsel %vm1212_vm5, %v6379_v11, 0.0 }
 0xe0b   : > { %v6381_v13 = vpop.eup %6380  ;;  %2714 = vadd.xlane.f32.xlu0 %v2713_v12  ;;  %v2935_v12 = vld [vmem:[%s6644_s1 + $0x50] sm:$0xff] }
 0xe0c   : > { %v2716_v15 = vsel %vm1212_vm5, %v6381_v13, 0.0 }
 0xe0d   : > { %2717 = vadd.xlane.f32.xlu1 %v2716_v15 }
 0xe98   : > { %v2715_v16 = vpop.xlane.xlu0 %2714 }
 0xe99   : > { %6382 = vrcp.f32 %v2715_v16  ;;  %v2936_v16 = vld [vmem:[%s6644_s1 + $0x58] sm:$0xff] }
 0xe9a   : > { %v2718_v17 = vpop.xlane.xlu1 %2717 }
 0xe9b   : > { %6384 = vrcp.f32 %v2718_v17  ;;  %v6455_v17 = vmov 0  }
 0xea3   : > { %v6383_v18 = vpop.eup %6382 }
 0xea4   : > { %v2721_v21 = vmul.f32 %v6383_v18, %v6379_v11  ;;  %v2927_v11 = vld [vmem:[%s6644_s1 + $0x10] sm:$0xff] }
 0xea5   : > { %v6385_v22 = vpop.eup %6384  ;;  %v5500_v15 = vcombine.high %v2927_v11, %v2935_v12  ;;  %v5499_v18 = vcombine.low %v2927_v11, %v2935_v12  ;;  %v5523_v11 = vcombine.low %v2947_v1, %v2955_v2 }
 0xea6   : > { %v2722_v23 = vmul.f32 %v6385_v22, %v6381_v13  ;;  %v2723_v24 = vpack.c.bf16 %v2721_v21, %v2721_v21  ;;  %v2928_v13 = vld [vmem:[%s6644_s1 + $0x18] sm:$0xff] }
 0xea7   : > { %v5501_v19 = vcombine.low %v2928_v13, %v2936_v16  ;;  %v5502_v21 = vcombine.high %v2928_v13, %v2936_v16  ;;  %v6226_v13 = vld [vmem:[%s6659_s21 + $0x40] sm:$0xff]  }
 0xea8   : > { %6142 = vmatmul.mubr.msk.bf16.vlgmr.msra.gmra.mrb[56].mxu1 %vm1212_vm5, %v2723_v24  ;;  %v2724_v27 = vpack.c.bf16 %v2722_v23, %v2722_v23  ;;  %v6228_v16 = vld [vmem:[%s6659_s21] sm:$0xff]  }
 0xea9   : > { %6152 = vmatpush3.bf16.msra.mxu1 %v2824_v25  ;;  %6153 = vmatprep.mubr.msk.bf16.mxu1 %vm6454_vm3, %v6453_v14 }
 0xeaa   : > { %6148 = vmatmul.mubr.msk.bf16.vlgmr.msra.gmra.mrb[60].mxu0 %vm1212_vm5, %v2724_v27  ;;  %3247 = vmatprep.subr.bf16.mxu1 %v5498_v0  ;;  %v5510_v0 = vcombine.high %v2932_v59, %v2940_v60 }
 0xeab   : > { %3205 = vmatpush1.bf16.msra.mxu0 %v5495_v62  ;;  %3236 = vmatprep.mubr.bf16.mxu0 %v6455_v17 }
 0xeac   : > { %3206 = vmatprep.subr.bf16.mxu0 %v5512_v4  ;;  %v2956_v4 = vld [vmem:[%s6644_s1 + $0xf8] sm:$0xff] }
 0xead   : > { %v5525_v12 = vcombine.low %v2948_v3, %v2956_v4 }
 0xeaf   : > { %3207 = vmatpush1.bf16.msra.mxu0 %v5511_v6  ;;  %v5509_v6 = vcombine.low %v2932_v59, %v2940_v60 }
 0xeb0   : > { %3290 = vmatprep.subr.bf16.mxu0 %v5500_v15  ;;  %v6227_v15 = vld [vmem:[%s6659_s21 + $0xc0] sm:$0xff]  }
 0xf7b   : > { %v2765_v29 = vpop.f32.mrb[56].mxu1 }
 0xf7c   : > { %v6143_v31 = vpop.f32.mrb[57].mxu1 }
 0xf7d   : > { %v2768_v34 = vpop.f32.mrb[58].mxu1  ;;  %v2811_v20 = vpop.f32.mrb[60].mxu0 }
 0xf7e   : > { %v2817_v35 = vpack.c.bf16 %v2811_v20, %v2765_v29  ;;  %v6144_v36 = vpop.f32.mrb[59].mxu1  ;;  %v6149_v37 = vpop.f32.mrb[61].mxu0  ;;  %v5493_v34 = vld [vmem:[%s926_s8] ss:$0 sm:$0xff] }
 0xf7f   : > { %v2814_v38 = vpop.f32.mrb[62].mxu0 }
 0xf80   : > { %v6150_v39 = vpop.f32.mrb[63].mxu0  ;;  %6154 = vmatmul.mubr.msk.bf16.vlgmr.msra.gmra.mrb[60].mxu1 %vm1212_vm5, %v2817_v35  ;;  %v5494_v38 = vld [vmem:[%s929_s9] ss:$0 sm:$0xff] }
 0xf81   : > { %3248 = vmatpush1.bf16.msra.mxu1 %v5497_v63  ;;  %3279 = vmatprep.mubr.bf16.mxu1 %v6455_v17  ;;  %v5508_v63 = vcombine.high %v2931_v57, %v2939_v58 }
 0xf82   : > { %3249 = vmatprep.subr.bf16.mxu1 %v5514_v9  ;;  %v5526_v9 = vcombine.high %v2948_v3, %v2956_v4 }
 0xf85   : > { %3250 = vmatpush1.bf16.msra.mxu1 %v5513_v8  ;;  %v5524_v8 = vcombine.high %v2947_v1, %v2955_v2 }
 0xf86   : > { %3333 = vmatprep.subr.bf16.mxu1 %v5502_v21  ;;  %v6231_v21 = vld [vmem:[%s6659_s21 + $0xc8] sm:$0xff]  }
0x1053   : > { %v2860_v40 = vpop.f32.mrb[60].mxu1 }
0x1054   : > { %v2867_v14 = vadd.f32 %v2860_v40, %v6907_v26  ;;  %v6155_v42 = vpop.f32.mrb[61].mxu1  ;;  %v2943_v40 = vld [vmem:[%s6644_s1 + $0x90] sm:$0xff] }
0x1055   : > { %v2863_v7 = vpop.f32.mrb[62].mxu1  ;;  %v2952_v42 = vld [vmem:[%s6644_s1 + $0xd8] sm:$0xff] }
0x1056   : > { %v2876_v43 = vadd.f32 %v5492_v41, %v2867_v14  ;;  %v2868_v44 = vadd.f32 %v2863_v7, %v6910_v30  ;;  %v6156_v10 = vpop.f32.mrb[63].mxu1  ;;  %v2944_v14 = vld [vmem:[%s6644_s1 + $0x98] sm:$0xff] }
0x1058   : > { %v2877_v28 = vadd.f32 %v5492_v41, %v2868_v44  ;;  %v2880_v33 = vadd.f32 %v6394_v32, %v2876_v43  ;;  %v2951_v41 = vld [vmem:[%s6644_s1 + $0xd0] sm:$0xff]  ;;  %v2929_v32 = vld [vmem:[%s6644_s1 + $0x20] sm:$0xff] }
0x1059   : > { %v5516_v10 = vcombine.high %v2943_v40, %v2951_v41 }
0x105a   : > { %v2882_v45 = vsel %vm1033_vm4, %v2880_v33, 0.0  ;;  %v2881_v47 = vadd.f32 %v6395_v46, %v2877_v28  ;;  %v5518_v28 = vcombine.high %v2944_v14, %v2952_v42  ;;  %v2938_v46 = vld [vmem:[%s6644_s1 + $0x68] sm:$0xff] }
0x105b   : > { %2883 = vadd.xlane.f32.xlu0 %v2882_v45  ;;  %v2930_v45 = vld [vmem:[%s6644_s1 + $0x28] sm:$0xff] }
0x105c   : > { %v2885_v48 = vsel %vm1033_vm4, %v2881_v47, 0.0 }
0x105d   : > { %2886 = vadd.xlane.f32.xlu1 %v2885_v48  ;;  %v5517_v48 = vcombine.low %v2944_v14, %v2952_v42  ;;  %v6249_v14 = vld [vmem:[%s6659_s21 + $0xa8] sm:$0xff]   ;;  %v6250_v42 = vld [vmem:[%s6659_s21 + $0x70] sm:$0xff]  }
0x10e8   : > { %v2884_v26 = vpop.xlane.xlu0 %2883 }
0x10e9   : > { %v2888_v49 = vmul.f32 0.03125, %v2884_v26 }
0x10ea   : > { %v2887_v50 = vpop.xlane.xlu1 %2886 }
0x10eb   : > { %v2890_v30 = vsub.f32 %v2880_v33, %v2888_v49  ;;  %v2889_v51 = vmul.f32 0.03125, %v2887_v50  ;;  %v2937_v33 = vld [vmem:[%s6644_s1 + $0x60] sm:$0xff]  ;;  %v5506_v49 = vcombine.high %v2930_v45, %v2938_v46 }
0x10ec   : > { %v5504_v26 = vcombine.high %v2929_v32, %v2937_v33  ;;  %v2945_v50 = vld [vmem:[%s6644_s1 + $0xa0] sm:$0xff] }
0x10ed   : > { %v2891_v52 = vsub.f32 %v2881_v47, %v2889_v51  ;;  %v2892_v53 = vmul.f32 %v2890_v30, %v2890_v30  ;;  %v5515_v47 = vcombine.low %v2943_v40, %v2951_v41  ;;  %v2946_v51 = vld [vmem:[%s6644_s1 + $0xa8] sm:$0xff] }
0x10ee   : > { %v6247_v40 = vld [vmem:[%s6659_s21 + $0xe8] sm:$0xff]  }
0x10ef   : > { %v2894_v54 = vsel %vm1033_vm4, %v2892_v53, 0.0  ;;  %v2893_v55 = vmul.f32 %v2891_v52, %v2891_v52  ;;  %v5503_v53 = vcombine.low %v2929_v32, %v2937_v33  ;;  %v6248_v41 = vld [vmem:[%s6659_s21 + $0x28] sm:$0xff]   ;;  %v6254_v32 = vld [vmem:[%s6659_s21 + $0x78] sm:$0xff]  }
0x10f0   : > { %2895 = vadd.xlane.f32.xlu0 %v2894_v54  ;;  %v5505_v54 = vcombine.low %v2930_v45, %v2938_v46  ;;  %v6255_v33 = vld [vmem:[%s6659_s21 + $0xf8] sm:$0xff]  }
0x10f1   : > { %v2897_v56 = vsel %vm1033_vm4, %v2893_v55, 0.0  ;;  %v6256_v45 = vld [vmem:[%s6659_s21 + $0x38] sm:$0xff]  }
0x10f2   : > { %2898 = vadd.xlane.f32.xlu1 %v2897_v56  ;;  %v6257_v46 = vld [vmem:[%s6659_s21 + $0xb8] sm:$0xff]  }
0x117d   : > { %v2896_v22 = vpop.xlane.xlu0 %2895 }
0x117e   : > { %v2900_v23 = vmul.f32 0.03125, %v2896_v22  ;;  %v6233_v22 = vld [vmem:[%s6659_s21 + $0x88] sm:$0xff]  }
0x117f   : > { %v2899_v24 = vpop.xlane.xlu1 %2898 }
0x1180   : > { %v2902_v25 = vadd.f32 1e-05, %v2900_v23  ;;  %v2901_v27 = vmul.f32 0.03125, %v2899_v24  ;;  %v6234_v23 = vld [vmem:[%s6659_s21 + $0x50] sm:$0xff]  }
0x1181   : > { %v6235_v24 = vld [vmem:[%s6659_s21 + $0xd0] sm:$0xff]  }
0x1182   : > { %6386 = vrsqrt.f32 %v2902_v25  ;;  %v2903_v29 = vadd.f32 1e-05, %v2901_v27  ;;  %v6236_v25 = vld [vmem:[%s6659_s21 + $0x10] sm:$0xff]  }
0x1183   : > { %v6237_v27 = vld [vmem:[%s6659_s21 + $0x90] sm:$0xff]  }
0x1184   : > { %6388 = vrsqrt.f32 %v2903_v29  ;;  %v6238_v29 = vld [vmem:[%s6659_s21 + $0x58] sm:$0xff]  }
0x118c   : > { %v6387_v31 = vpop.eup %6386 }
0x118d   : > { %v2906_v20 = vmul.f32 %v6387_v31, %v2890_v30  ;;  %v2953_v30 = vld [vmem:[%s6644_s1 + $0xe0] sm:$0xff]  ;;  %v6239_v31 = vld [vmem:[%s6659_s21 + $0xd8] sm:$0xff]  }
0x118e   : > { %v6389_v35 = vpop.eup %6388  ;;  %v5520_v55 = vcombine.high %v2945_v50, %v2953_v30  ;;  %v5519_v61 = vcombine.low %v2945_v50, %v2953_v30  ;;  %v7062_v30 = vld [vmem:[%s6649_s5 + $0x8] sm:$0xff] }
0x118f   : > { %v2914_v36 = vmul.f32 %v5493_v34, %v2906_v20  ;;  %v2907_v37 = vmul.f32 %v6389_v35, %v2891_v52  ;;  %v2954_v52 = vld [vmem:[%s6644_s1 + $0xe8] sm:$0xff]  ;;  %v6241_v20 = vld [vmem:[%s6659_s21 + $0x98] sm:$0xff]   ;;  %v6242_v35 = vld [vmem:[%s6659_s21 + $0x60] sm:$0xff]  }
0x1190   : > { %v5522_v56 = vcombine.high %v2946_v51, %v2954_v52  ;;  %v5521_v62 = vcombine.low %v2946_v51, %v2954_v52 }
0x1191   : > { %v2915_v39 = vmul.f32 %v5493_v34, %v2907_v37  ;;  %v6978_v7 = vadd.f32 %v5494_v38, %v2914_v36  ;;  %v6240_v34 = vld [vmem:[%s6659_s21 + $0x18] sm:$0xff]   ;;  %v6243_v36 = vld [vmem:[%s6659_s21 + $0xe0] sm:$0xff]  }
0x1192   : > { %v6244_v37 = vld [vmem:[%s6659_s21 + $0x20] sm:$0xff]  }
0x1193   : > { %v6980_v43 = vadd.f32 %v5494_v38, %v2915_v39  ;;  %v6245_v38 = vld [vmem:[%s6659_s21 + $0xa0] sm:$0xff]   ;;  %v6246_v39 = vld [vmem:[%s6659_s21 + $0x68] sm:$0xff]  }
0x1195   : > { %v6984_v44 = vpack.c.bf16 %v6980_v43, %v6978_v7 }
0x1197   : > { %5527 = vmatmul.mubr.msk.bf16.vlgmr.msra.gmra.mrb[64].mxu0 %vm1033_vm4, %v6984_v44  ;;  %5528 = vmatmul.mubr.msk.bf16.vlgmr.msra.gmra.mrb[64].mxu1 %vm1033_vm4, %v6984_v44 }
0x1198   : > { %3291 = vmatpush1.bf16.msra.mxu0 %v5499_v18  ;;  %3334 = vmatpush1.bf16.msra.mxu1 %v5501_v19  ;;  %v6229_v18 = vld [vmem:[%s6659_s21 + $0x80] sm:$0xff]   ;;  %v6230_v19 = vld [vmem:[%s6659_s21 + $0x48] sm:$0xff]  }
0x1199   : > { %3292 = vmatprep.subr.bf16.mxu0 %v5516_v10  ;;  %3335 = vmatprep.subr.bf16.mxu1 %v5518_v28  ;;  %v6252_v10 = vld [vmem:[%s6659_s21 + $0x30] sm:$0xff]  }
0x119a   : > { %3322 = vmatprep.mubr.bf16.mxu0 %v6455_v17  ;;  %3365 = vmatprep.mubr.bf16.mxu1 %v6455_v17  ;;  %v6253_v28 = vld [vmem:[%s6659_s21 + $0xb0] sm:$0xff]  }
0x119c   : > { %3293 = vmatpush1.bf16.msra.mxu0 %v5515_v47  ;;  %3336 = vmatpush1.bf16.msra.mxu1 %v5517_v48  ;;  %v6258_v47 = vld [vmem:[%s6659_s21 + $0x140] sm:$0xff]  }
0x119d   : > { %3376 = vmatprep.subr.bf16.mxu0 %v5504_v26  ;;  %3419 = vmatprep.subr.bf16.mxu1 %v5506_v49  ;;  %v6259_v48 = vld [vmem:[%s6659_s21 + $0x1c0] sm:$0xff]   ;;  %v2961_v26 = vlaneseq }
0x119f   : > { %5529 = vmatmul.mubr.msk.bf16.vlgmr.msra.gmra.mrb[68].mxu0 %vm1033_vm4, %v6984_v44  ;;  %5530 = vmatmul.mubr.msk.bf16.vlgmr.msra.gmra.mrb[68].mxu1 %vm1033_vm4, %v6984_v44  ;;  %v7058_v49 = vshrl.u32 %v2961_v26, 7 }
0x11a0   : > { %3377 = vmatpush1.bf16.msra.mxu0 %v5503_v53  ;;  %3420 = vmatpush1.bf16.msra.mxu1 %v5505_v54  ;;  %v2957_v54 = vld [vmem:[%s6649_s5] sm:$0xff] }
0x11a1   : > { %3378 = vmatprep.subr.bf16.mxu0 %v5520_v55  ;;  %3421 = vmatprep.subr.bf16.mxu1 %v5522_v56  ;;  %v2987_v50 = vsub.s32 6, %v7058_v49  ;;  %v7068_v52 = vsub.s32 0, %v7058_v49  ;;  %v2971_v53 = vsub.s32 2, %v7058_v49  ;;  %v2967_v55 = vsub.s32 1, %v7058_v49 }
0x11a2   : > { %3408 = vmatprep.mubr.bf16.mxu0 %v6455_v17  ;;  %3451 = vmatprep.mubr.bf16.mxu1 %v6455_v17  ;;  %v2975_v56 = vsub.s32 3, %v7058_v49  ;;  %v2991_v1 = vsub.s32 7, %v7058_v49 }
0x11a3   : > { %v7065_v51 = vrot.slane %v7062_v30, %v2987_v50  ;;  %v2964_v57 = vrot.slane %v2957_v54, %v7068_v52  ;;  %v2972_v58 = vrot.slane %v2957_v54, %v2971_v53  ;;  %v2968_v59 = vrot.slane %v2957_v54, %v2967_v55 }
0x11a4   : > { %3379 = vmatpush1.bf16.msra.mxu0 %v5519_v61  ;;  %3422 = vmatpush1.bf16.msra.mxu1 %v5521_v62  ;;  %v2976_v60 = vrot.slane %v2957_v54, %v2975_v56  ;;  %v2979_v61 = vsub.s32 4, %v7058_v49 }
0x11a5   : > { %3462 = vmatprep.subr.bf16.mxu0 %v5508_v63  ;;  %3505 = vmatprep.subr.bf16.mxu1 %v5510_v0  ;;  %v2983_v0 = vsub.s32 5, %v7058_v49 }
0x11a7   : > { %5531 = vmatmul.mubr.msk.bf16.vlgmr.msra.gmra.mrb[72].mxu0 %vm1033_vm4, %v6984_v44  ;;  %5532 = vmatmul.mubr.msk.bf16.vlgmr.msra.gmra.mrb[72].mxu1 %vm1033_vm4, %v6984_v44 }
0x11a8   : > { %3463 = vmatpush1.bf16.msra.mxu0 %v5507_v5  ;;  %3506 = vmatpush1.bf16.msra.mxu1 %v5509_v6 }
0x11a9   : > { %3464 = vmatprep.subr.bf16.mxu0 %v5524_v8  ;;  %3507 = vmatprep.subr.bf16.mxu1 %v5526_v9 }
0x11aa   : > { %3494 = vmatprep.mubr.bf16.mxu0 %v6455_v17  ;;  %3537 = vmatprep.mubr.bf16.mxu1 %v6455_v17  ;;  %v6232_v17 = vld [vmem:[%s6659_s21 + $0x8] sm:$0xff]  }
0x11ac   : > { %3465 = vmatpush1.bf16.msra.mxu0 %v5523_v11  ;;  %3508 = vmatpush1.bf16.msra.mxu1 %v5525_v12 }
0x11ad   : > { %5757 = vmatprep.subr.bf16.mxu0 %v6226_v13  ;;  %5779 = vmatprep.subr.bf16.mxu1 %v6227_v15 }
0x11af   : > { %5533 = vmatmul.mubr.msk.bf16.vlgmr.msra.gmra.mrb[76].mxu0 %vm1033_vm4, %v6984_v44  ;;  %5534 = vmatmul.mubr.msk.bf16.vlgmr.msra.gmra.mrb[76].mxu1 %vm1033_vm4, %v6984_v44  ;;  %v6251_v44 = vld [vmem:[%s6659_s21 + $0xf0] sm:$0xff]  }
0x11b0   : > { %5758 = vmatpush3.bf16.msra.mxu0 %v6228_v16  ;;  %5780 = vmatpush3.bf16.msra.mxu1 %v6229_v18  ;;  %v2980_v18 = vrot.slane %v2957_v54, %v2979_v61 }
0x11b1   : > { %5759 = vmatprep.subr.bf16.mxu0 %v6230_v19  ;;  %5781 = vmatprep.subr.bf16.mxu1 %v6231_v21  ;;  %v2988_v19 = vrot.slane %v2957_v54, %v2987_v50 }
0x11b4   : > { %5760 = vmatpush3.bf16.msra.mxu0 %v6232_v17  ;;  %5782 = vmatpush3.bf16.msra.mxu1 %v6233_v22  ;;  %v2984_v22 = vrot.slane %v2957_v54, %v2983_v0 }
0x11b5   : > { %5761 = vmatprep.subr.bf16.mxu0 %v6234_v23  ;;  %5783 = vmatprep.subr.bf16.mxu1 %v6235_v24  ;;  %v2992_v23 = vrot.slane %v2957_v54, %v2991_v1  ;;  %v3004_v54 = vrot.slane %v7062_v30, %v2971_v53  ;;  %v3008_v53 = vrot.slane %v7062_v30, %v2975_v56 }
0x11b8   : > { %5762 = vmatpush3.bf16.msra.mxu0 %v6236_v25  ;;  %5784 = vmatpush3.bf16.msra.mxu1 %v6237_v27 }
0x11b9   : > { %5763 = vmatprep.subr.bf16.mxu0 %v6238_v29  ;;  %5785 = vmatprep.subr.bf16.mxu1 %v6239_v31 }
0x11bc   : > { %5764 = vmatpush3.bf16.msra.mxu0 %v6240_v34  ;;  %5786 = vmatpush3.bf16.msra.mxu1 %v6241_v20 }
0x11bd   : > { %5765 = vmatprep.subr.bf16.mxu0 %v6242_v35  ;;  %5787 = vmatprep.subr.bf16.mxu1 %v6243_v36 }
0x11c0   : > { %5766 = vmatpush3.bf16.msra.mxu0 %v6244_v37  ;;  %5788 = vmatpush3.bf16.msra.mxu1 %v6245_v38 }
0x11c1   : > { %5767 = vmatprep.subr.bf16.mxu0 %v6246_v39  ;;  %5789 = vmatprep.subr.bf16.mxu1 %v6247_v40 }
0x11c4   : > { %5768 = vmatpush3.bf16.msra.mxu0 %v6248_v41  ;;  %5790 = vmatpush3.bf16.msra.mxu1 %v6249_v14  ;;  %v6260_v14 = vld [vmem:[%s6659_s21 + $0x100] sm:$0xff]  }
0x11c5   : > { %5769 = vmatprep.subr.bf16.mxu0 %v6250_v42  ;;  %5791 = vmatprep.subr.bf16.mxu1 %v6251_v44  ;;  %v6261_v42 = vld [vmem:[%s6659_s21 + $0x180] sm:$0xff]  }
0x11c8   : > { %5770 = vmatpush3.bf16.msra.mxu0 %v6252_v10  ;;  %5792 = vmatpush3.bf16.msra.mxu1 %v6253_v28 }
0x11c9   : > { %5771 = vmatprep.subr.bf16.mxu0 %v6254_v32  ;;  %5793 = vmatprep.subr.bf16.mxu1 %v6255_v33  ;;  %v6262_v33 = vld [vmem:[%s6659_s21 + $0x148] sm:$0xff]  }
0x11cc   : > { %5772 = vmatpush3.bf16.msra.mxu0 %v6256_v45  ;;  %5794 = vmatpush3.bf16.msra.mxu1 %v6257_v46  ;;  %v6263_v45 = vld [vmem:[%s6659_s21 + $0x1c8] sm:$0xff]   ;;  %v2996_v46 = vrot.slane %v7062_v30, %v7068_v52 }
0x11cd   : > { %5801 = vmatprep.subr.bf16.mxu0 %v6258_v47  ;;  %5823 = vmatprep.subr.bf16.mxu1 %v6259_v48 }
0x126a   : > { %v3238_v62 = vpop.f32.mrb[64].mxu0  ;;  %v3281_v63 = vpop.f32.mrb[64].mxu1 }
0x126b   : > { %v3239_v2 = vadd.f32 %v3238_v62, %v2964_v57  ;;  %v3282_v3 = vadd.f32 %v3281_v63, %v2972_v58  ;;  %v3240_v4 = vpop.f32.mrb[65].mxu0  ;;  %v3283_v5 = vpop.f32.mrb[65].mxu1  ;;  %v3000_v62 = vrot.slane %v7062_v30, %v2967_v55  ;;  %v6267_v55 = vld [vmem:[%s6659_s21 + $0x1d0] sm:$0xff]  }
0x126c   : > { %v3241_v6 = vadd.f32 %v3240_v4, %v2968_v59  ;;  %v3284_v8 = vadd.f32 %v3283_v5, %v2976_v60  ;;  %v3242_v9 = vpop.f32.mrb[66].mxu0  ;;  %v3285_v11 = vpop.f32.mrb[66].mxu1  ;;  %v6265_v4 = vld [vmem:[%s6659_s21 + $0x188] sm:$0xff]  }
0x126d   : > { %v3243_v12 = vadd.f32 %v3242_v9, %v2964_v57  ;;  %v3286_v13 = vadd.f32 %v3285_v11, %v2972_v58  ;;  %v3244_v15 = vpop.f32.mrb[67].mxu0  ;;  %v3287_v16 = vpop.f32.mrb[67].mxu1  ;;  %v3548_v24 = vmax.f32 %v3239_v2, 0.0  ;;  %v3550_v25 = vmax.f32 %v3282_v3, 0.0  ;;  %v6264_v3 = vld [vmem:[%s6659_s21 + $0x108] sm:$0xff]   ;;  %v6266_v11 = vld [vmem:[%s6659_s21 + $0x150] sm:$0xff]  }
0x126e   : > { %v3245_v21 = vadd.f32 %v3244_v15, %v2968_v59  ;;  %v3288_v17 = vadd.f32 %v3287_v16, %v2976_v60  ;;  %v3549_v31 = vmax.f32 %v3241_v6, 0.0  ;;  %v3551_v34 = vmax.f32 %v3284_v8, 0.0 }
0x126f   : > { %v3564_v27 = vmax.f32 %v3243_v12, 0.0  ;;  %v3566_v29 = vmax.f32 %v3286_v13, 0.0 }
0x1270   : > { %v3565_v20 = vmax.f32 %v3245_v21, 0.0  ;;  %v3567_v35 = vmax.f32 %v3288_v17, 0.0 }
0x1271   : > { %v3580_v36 = vpack.c.bf16 %v3564_v27, %v3548_v24  ;;  %v3582_v37 = vpack.c.bf16 %v3566_v29, %v3550_v25  ;;  %v6269_v24 = vld [vmem:[%s6659_s21 + $0x190] sm:$0xff]  }
0x1272   : > { %v3581_v38 = vpack.c.bf16 %v3565_v20, %v3549_v31  ;;  %v3583_v39 = vpack.c.bf16 %v3567_v35, %v3551_v34  ;;  %v3324_v40 = vpop.f32.mrb[68].mxu0  ;;  %v3367_v41 = vpop.f32.mrb[68].mxu1  ;;  %v6270_v34 = vld [vmem:[%s6659_s21 + $0x158] sm:$0xff]  }
0x1273   : > { %v3325_v44 = vadd.f32 %v3324_v40, %v2980_v18  ;;  %v3368_v10 = vadd.f32 %v3367_v41, %v2988_v19  ;;  %v3326_v28 = vpop.f32.mrb[69].mxu0  ;;  %v3369_v32 = vpop.f32.mrb[69].mxu1  ;;  %v6271_v20 = vld [vmem:[%s6659_s21 + $0x1d8] sm:$0xff]  }
0x1274   : > { %v3327_v47 = vadd.f32 %v3326_v28, %v2984_v22  ;;  %v3370_v48 = vadd.f32 %v3369_v32, %v2992_v23  ;;  %v3328_v26 = vpop.f32.mrb[70].mxu0  ;;  %v3371_v50 = vpop.f32.mrb[70].mxu1  ;;  %4659 = vmatprep.mubr.bf16.mxu0 %v3581_v38  ;;  %4700 = vmatprep.mubr.bf16.mxu1 %v3583_v39  ;;  %v6272_v32 = vld [vmem:[%s6659_s21 + $0x118] sm:$0xff]  }
0x1275   : > { %v3329_v57 = vadd.f32 %v3328_v26, %v2980_v18  ;;  %v3372_v58 = vadd.f32 %v3371_v50, %v2988_v19  ;;  %v3330_v59 = vpop.f32.mrb[71].mxu0  ;;  %v3373_v60 = vpop.f32.mrb[71].mxu1  ;;  %4660 = vmatmul.mubr.bf16.vlgmr.msra.gmra.mrb[80].mxu0 %v3580_v36  ;;  %4701 = vmatmul.mubr.bf16.vlgmr.msra.gmra.mrb[80].mxu1 %v3582_v37  ;;  %v3552_v5 = vmax.f32 %v3325_v44, 0.0  ;;  %v3554_v6 = vmax.f32 %v3368_v10, 0.0 }
0x1276   : > { %v3331_v63 = vadd.f32 %v3330_v59, %v2984_v22  ;;  %v3374_v2 = vadd.f32 %v3373_v60, %v2992_v23  ;;  %5802 = vmatpush3.bf16.msra.mxu0 %v6260_v14  ;;  %5824 = vmatpush3.bf16.msra.mxu1 %v6261_v42  ;;  %v3553_v12 = vmax.f32 %v3327_v47, 0.0  ;;  %v3555_v13 = vmax.f32 %v3370_v48, 0.0  ;;  %v6268_v23 = vld [vmem:[%s6659_s21 + $0x110] sm:$0xff]  }
0x1277   : > { %v3568_v8 = vmax.f32 %v3329_v57, 0.0  ;;  %v3570_v9 = vmax.f32 %v3372_v58, 0.0  ;;  %5803 = vmatprep.subr.bf16.mxu0 %v6262_v33  ;;  %5825 = vmatprep.subr.bf16.mxu1 %v6263_v45  ;;  %v3012_v42 = vrot.slane %v7062_v30, %v2979_v61  ;;  %v3016_v44 = vrot.slane %v7062_v30, %v2983_v0  ;;  %v6273_v33 = vld [vmem:[%s6659_s21 + $0x198] sm:$0xff]   ;;  %v6274_v61 = vld [vmem:[%s6659_s21 + $0x160] sm:$0xff]  }
0x1278   : > { %v3569_v15 = vmax.f32 %v3331_v63, 0.0  ;;  %v3571_v16 = vmax.f32 %v3374_v2, 0.0  ;;  %v3024_v45 = vrot.slane %v7062_v30, %v2991_v1  ;;  %v6275_v0 = vld [vmem:[%s6659_s21 + $0x1e0] sm:$0xff]  }
0x1279   : > { %v7105_v18 = vpack.c.bf16 %v3568_v8, %v3552_v5  ;;  %v7107_v19 = vpack.c.bf16 %v3570_v9, %v3554_v6  ;;  %v6276_v63 = vld [vmem:[%s6659_s21 + $0x120] sm:$0xff]   ;;  %v6278_v6 = vld [vmem:[%s6659_s21 + $0x168] sm:$0xff]  }
0x127a   : > { %v3585_v56 = vpack.c.bf16 %v3569_v15, %v3553_v12  ;;  %v3587_v21 = vpack.c.bf16 %v3571_v16, %v3555_v13  ;;  %5804 = vmatpush3.bf16.msra.mxu0 %v6264_v3  ;;  %5826 = vmatpush3.bf16.msra.mxu1 %v6265_v4  ;;  %v3410_v17 = vpop.f32.mrb[72].mxu0  ;;  %v3453_v22 = vpop.f32.mrb[72].mxu1  ;;  %v6277_v2 = vld [vmem:[%s6659_s21 + $0x1a0] sm:$0xff]   ;;  %v6279_v8 = vld [vmem:[%s6659_s21 + $0x1e8] sm:$0xff]  }
0x127b   : > { %v3411_v25 = vadd.f32 %v3410_v17, %v2996_v46  ;;  %v3454_v27 = vadd.f32 %v3453_v22, %v3004_v54  ;;  %v3412_v29 = vpop.f32.mrb[73].mxu0  ;;  %v3455_v31 = vpop.f32.mrb[73].mxu1  ;;  %5805 = vmatprep.subr.bf16.mxu0 %v6266_v11  ;;  %5827 = vmatprep.subr.bf16.mxu1 %v6267_v55  ;;  %v6280_v22 = vld [vmem:[%s6659_s21 + $0x128] sm:$0xff]  }
0x127c   : > { %v3413_v35 = vadd.f32 %v3412_v29, %v3000_v62  ;;  %v3456_v36 = vadd.f32 %v3455_v31, %v3008_v53  ;;  %v3414_v37 = vpop.f32.mrb[74].mxu0  ;;  %v3457_v38 = vpop.f32.mrb[74].mxu1  ;;  %4741 = vmatprep.mubr.bf16.mxu0 %v3585_v56  ;;  %4782 = vmatprep.mubr.bf16.mxu1 %v3587_v21  ;;  %v6282_v31 = vld [vmem:[%s6659_s21 + $0x170] sm:$0xff]  }
0x127d   : > { %v3415_v39 = vadd.f32 %v3414_v37, %v2996_v46  ;;  %v3458_v40 = vadd.f32 %v3457_v38, %v3004_v54  ;;  %v3416_v41 = vpop.f32.mrb[75].mxu0  ;;  %v3459_v14 = vpop.f32.mrb[75].mxu1  ;;  %v3556_v46 = vmax.f32 %v3411_v25, 0.0  ;;  %v3558_v47 = vmax.f32 %v3454_v27, 0.0 }
0x127e   : > { %v3417_v10 = vadd.f32 %v3416_v41, %v3000_v62  ;;  %v3460_v28 = vadd.f32 %v3459_v14, %v3008_v53  ;;  %5806 = vmatpush3.bf16.msra.mxu0 %v6268_v23  ;;  %5828 = vmatpush3.bf16.msra.mxu1 %v6269_v24  ;;  %v3557_v50 = vmax.f32 %v3413_v35, 0.0  ;;  %v3559_v54 = vmax.f32 %v3456_v36, 0.0  ;;  %v6281_v23 = vld [vmem:[%s6659_s21 + $0x1a8] sm:$0xff]   ;;  %v6284_v41 = vld [vmem:[%s6659_s21 + $0x130] sm:$0xff]  }
0x127f   : > { %v3572_v48 = vmax.f32 %v3415_v39, 0.0  ;;  %v3574_v26 = vmax.f32 %v3458_v40, 0.0  ;;  %5807 = vmatprep.subr.bf16.mxu0 %v6270_v34  ;;  %5829 = vmatprep.subr.bf16.mxu1 %v6271_v20  ;;  %v6285_v14 = vld [vmem:[%s6659_s21 + $0x1b0] sm:$0xff]  }
0x1280   : > { %v3573_v57 = vmax.f32 %v3417_v10, 0.0  ;;  %v3575_v58 = vmax.f32 %v3460_v28, 0.0  ;;  %v6288_v10 = vld [vmem:[%s6659_s21 + $0x138] sm:$0xff]  }
0x1281   : > { %v7126_v59 = vpack.c.bf16 %v3572_v48, %v3556_v46  ;;  %v7128_v49 = vpack.c.bf16 %v3574_v26, %v3558_v47  ;;  %v6289_v28 = vld [vmem:[%s6659_s21 + $0x1b8] sm:$0xff]   ;;  %v6293_v46 = vld [vmem:[%s6659_s21 + $0x280] sm:$0xff]   ;;  %v6294_v47 = vld [vmem:[%s6659_s21 + $0x248] sm:$0xff]  }
0x1282   : > { %v7130_v30 = vpack.c.bf16 %v3573_v57, %v3557_v50  ;;  %v7132_v1 = vpack.c.bf16 %v3575_v58, %v3559_v54  ;;  %5808 = vmatpush3.bf16.msra.mxu0 %v6272_v32  ;;  %5830 = vmatpush3.bf16.msra.mxu1 %v6273_v33  ;;  %v3496_v60 = vpop.f32.mrb[76].mxu0  ;;  %v3539_v62 = vpop.f32.mrb[76].mxu1  ;;  %v6290_v32 = vld [vmem:[%s6659_s21 + $0x240] sm:$0xff]   ;;  %v6295_v48 = vld [vmem:[%s6659_s21 + $0x2c8] sm:$0xff]   ;;  %v6301_v50 = vld [vmem:[%s6659_s21 + $0x290] sm:$0xff]  }
0x1283   : > { %v3497_v3 = vadd.f32 %v3496_v60, %v3012_v42  ;;  %v3540_v4 = vadd.f32 %v3539_v62, %v7065_v51  ;;  %v3498_v53 = vpop.f32.mrb[77].mxu0  ;;  %v3541_v5 = vpop.f32.mrb[77].mxu1  ;;  %5809 = vmatprep.subr.bf16.mxu0 %v6274_v61  ;;  %5831 = vmatprep.subr.bf16.mxu1 %v6275_v0  ;;  %v6291_v33 = vld [vmem:[%s6659_s21 + $0x2c0] sm:$0xff]   ;;  %v6296_v26 = vld [vmem:[%s6659_s21 + $0x208] sm:$0xff]   ;;  %v6298_v0 = vld [vmem:[%s6659_s21 + $0x250] sm:$0xff]  }
0x1284   : > { %v3499_v9 = vadd.f32 %v3498_v53, %v3016_v44  ;;  %v3542_v11 = vadd.f32 %v3541_v5, %v3024_v45  ;;  %v3500_v55 = vpop.f32.mrb[78].mxu0  ;;  %v3543_v12 = vpop.f32.mrb[78].mxu1  ;;  %v6297_v61 = vld [vmem:[%s6659_s21 + $0x288] sm:$0xff]   ;;  %v6302_v54 = vld [vmem:[%s6659_s21 + $0x258] sm:$0xff]   ;;  %v6307_v60 = vld [vmem:[%s6659_s21 + $0x2e0] sm:$0xff]  }
0x1285   : > { %v3501_v13 = vadd.f32 %v3500_v55, %v3012_v42  ;;  %v3544_v15 = vadd.f32 %v3543_v12, %v7065_v51  ;;  %v3502_v16 = vpop.f32.mrb[79].mxu0  ;;  %v3545_v56 = vpop.f32.mrb[79].mxu1  ;;  %v3560_v24 = vmax.f32 %v3497_v3, 0.0  ;;  %v3562_v25 = vmax.f32 %v3540_v4, 0.0  ;;  %v6283_v51 = vld [vmem:[%s6659_s21 + $0x1f0] sm:$0xff]   ;;  %v6286_v42 = vld [vmem:[%s6659_s21 + $0x178] sm:$0xff]  }
0x1286   : > { %v3503_v21 = vadd.f32 %v3502_v16, %v3016_v44  ;;  %v3546_v17 = vadd.f32 %v3545_v56, %v3024_v45  ;;  %5810 = vmatpush3.bf16.msra.mxu0 %v6276_v63  ;;  %5832 = vmatpush3.bf16.msra.mxu1 %v6277_v2  ;;  %v3561_v34 = vmax.f32 %v3499_v9, 0.0  ;;  %v3563_v20 = vmax.f32 %v3542_v11, 0.0  ;;  %v6287_v44 = vld [vmem:[%s6659_s21 + $0x1f8] sm:$0xff]   ;;  %v6292_v45 = vld [vmem:[%s6659_s21 + $0x200] sm:$0xff]   ;;  %v6310_v2 = vld [vmem:[%s6659_s21 + $0x268] sm:$0xff]  }
0x1287   : > { %v3576_v27 = vmax.f32 %v3501_v13, 0.0  ;;  %v3578_v29 = vmax.f32 %v3544_v15, 0.0  ;;  %5811 = vmatprep.subr.bf16.mxu0 %v6278_v6  ;;  %5833 = vmatprep.subr.bf16.mxu1 %v6279_v8  ;;  %v6303_v57 = vld [vmem:[%s6659_s21 + $0x2d8] sm:$0xff]   ;;  %v6308_v62 = vld [vmem:[%s6659_s21 + $0x220] sm:$0xff]   ;;  %v6311_v3 = vld [vmem:[%s6659_s21 + $0x2e8] sm:$0xff]  }
0x1288   : > { %v3577_v35 = vmax.f32 %v3503_v21, 0.0  ;;  %v3579_v36 = vmax.f32 %v3546_v17, 0.0  ;;  %v6304_v58 = vld [vmem:[%s6659_s21 + $0x218] sm:$0xff]   ;;  %v6309_v63 = vld [vmem:[%s6659_s21 + $0x2a0] sm:$0xff]   ;;  %v6312_v4 = vld [vmem:[%s6659_s21 + $0x228] sm:$0xff]  }
0x1289   : > { %v7144_v37 = vpack.c.bf16 %v3576_v27, %v3560_v24  ;;  %v7146_v38 = vpack.c.bf16 %v3578_v29, %v3562_v25  ;;  %v6313_v53 = vld [vmem:[%s6659_s21 + $0x2a8] sm:$0xff]   ;;  %v6314_v5 = vld [vmem:[%s6659_s21 + $0x270] sm:$0xff]   ;;  %v6318_v11 = vld [vmem:[%s6659_s21 + $0x278] sm:$0xff]  }
0x128a   : > { %v7148_v39 = vpack.c.bf16 %v3577_v35, %v3561_v34  ;;  %v7150_v40 = vpack.c.bf16 %v3579_v36, %v3563_v20  ;;  %5812 = vmatpush3.bf16.msra.mxu0 %v6280_v22  ;;  %5834 = vmatpush3.bf16.msra.mxu1 %v6281_v23  ;;  %v6315_v6 = vld [vmem:[%s6659_s21 + $0x2f0] sm:$0xff]   ;;  %v6319_v55 = vld [vmem:[%s6659_s21 + $0x2f8] sm:$0xff]   ;;  %v6322_v15 = vld [vmem:[%s6659_s21 + $0x340] sm:$0xff]  }
0x128b   : > { %5813 = vmatprep.subr.bf16.mxu0 %v6282_v31  ;;  %5835 = vmatprep.subr.bf16.mxu1 %v6283_v51  ;;  %v6316_v8 = vld [vmem:[%s6659_s21 + $0x230] sm:$0xff]   ;;  %v6320_v12 = vld [vmem:[%s6659_s21 + $0x238] sm:$0xff]   ;;  %v6323_v16 = vld [vmem:[%s6659_s21 + $0x3c0] sm:$0xff]  }
0x128c   : > { %v6317_v9 = vld [vmem:[%s6659_s21 + $0x2b0] sm:$0xff]   ;;  %v6321_v13 = vld [vmem:[%s6659_s21 + $0x2b8] sm:$0xff]   ;;  %v6324_v56 = vld [vmem:[%s6659_s21 + $0x300] sm:$0xff]  }
0x128d   : > { %v6325_v21 = vld [vmem:[%s6659_s21 + $0x380] sm:$0xff]   ;;  %v6326_v17 = vld [vmem:[%s6659_s21 + $0x348] sm:$0xff]   ;;  %v6330_v25 = vld [vmem:[%s6659_s21 + $0x350] sm:$0xff]  }
0x128e   : > { %5814 = vmatpush3.bf16.msra.mxu0 %v6284_v41  ;;  %5836 = vmatpush3.bf16.msra.mxu1 %v6285_v14  ;;  %v6327_v22 = vld [vmem:[%s6659_s21 + $0x3c8] sm:$0xff]   ;;  %v6333_v27 = vld [vmem:[%s6659_s21 + $0x390] sm:$0xff]   ;;  %v6334_v29 = vld [vmem:[%s6659_s21 + $0x358] sm:$0xff]  }
0x128f   : > { %5815 = vmatprep.subr.bf16.mxu0 %v6286_v42  ;;  %5837 = vmatprep.subr.bf16.mxu1 %v6287_v44  ;;  %v6328_v23 = vld [vmem:[%s6659_s21 + $0x308] sm:$0xff]   ;;  %v6335_v31 = vld [vmem:[%s6659_s21 + $0x3d8] sm:$0xff]   ;;  %v6338_v20 = vld [vmem:[%s6659_s21 + $0x360] sm:$0xff]  }
0x1290   : > { %v6329_v24 = vld [vmem:[%s6659_s21 + $0x388] sm:$0xff]   ;;  %v6336_v51 = vld [vmem:[%s6659_s21 + $0x318] sm:$0xff]   ;;  %v6339_v35 = vld [vmem:[%s6659_s21 + $0x3e0] sm:$0xff]  }
0x1291   : > { %v6337_v34 = vld [vmem:[%s6659_s21 + $0x398] sm:$0xff]   ;;  %v6340_v36 = vld [vmem:[%s6659_s21 + $0x320] sm:$0xff]   ;;  %v6343_v41 = vld [vmem:[%s6659_s21 + $0x3e8] sm:$0xff]  }
0x1292   : > { %5816 = vmatpush3.bf16.msra.mxu0 %v6288_v10  ;;  %5838 = vmatpush3.bf16.msra.mxu1 %v6289_v28  ;;  %v6344_v14 = vld [vmem:[%s6659_s21 + $0x328] sm:$0xff]   ;;  %v6346_v44 = vld [vmem:[%s6659_s21 + $0x370] sm:$0xff]  }
0x1293   : > { %5845 = vmatprep.subr.bf16.mxu0 %v6290_v32  ;;  %5867 = vmatprep.subr.bf16.mxu1 %v6291_v33  ;;  %v6345_v42 = vld [vmem:[%s6659_s21 + $0x3a8] sm:$0xff]   ;;  %v6347_v10 = vld [vmem:[%s6659_s21 + $0x3f0] sm:$0xff]   ;;  %v6350_v33 = vld [vmem:[%s6659_s21 + $0x378] sm:$0xff]  }
0x1294   : > { %v6348_v28 = vld [vmem:[%s6659_s21 + $0x330] sm:$0xff]  }
0x1295   : > { %4742 = vmatmul.mubr.bf16.vlgmr.msra.gmra.mrb[84].mxu0 %v7105_v18  ;;  %4783 = vmatmul.mubr.bf16.vlgmr.msra.gmra.mrb[84].mxu1 %v7107_v19  ;;  %v6299_v18 = vld [vmem:[%s6659_s21 + $0x2d0] sm:$0xff]  }
0x1296   : > { %5846 = vmatpush3.bf16.msra.mxu0 %v6292_v45  ;;  %4823 = vmatprep.mubr.bf16.mxu0 %v7130_v30  ;;  %v6300_v19 = vld [vmem:[%s6659_s21 + $0x210] sm:$0xff]   ;;  %v6305_v30 = vld [vmem:[%s6659_s21 + $0x298] sm:$0xff]  }
0x1297   : > { %5868 = vmatpush3.bf16.msra.mxu1 %v6293_v46  ;;  %4864 = vmatprep.mubr.bf16.mxu1 %v7132_v1  ;;  %v6306_v1 = vld [vmem:[%s6659_s21 + $0x260] sm:$0xff]   ;;  %v6349_v32 = vld [vmem:[%s6659_s21 + $0x3b0] sm:$0xff]   ;;  %v6351_v45 = vld [vmem:[%s6659_s21 + $0x3f8] sm:$0xff]  }
0x1298   : > { %5847 = vmatprep.subr.bf16.mxu0 %v6294_v47  ;;  %5869 = vmatprep.subr.bf16.mxu1 %v6295_v48  ;;  %v6352_v46 = vld [vmem:[%s6659_s21 + $0x338] sm:$0xff]  }
0x1299   : > { %v6353_v47 = vld [vmem:[%s6659_s21 + $0x3b8] sm:$0xff]  }
0x129a   : > { %5848 = vmatpush3.bf16.msra.mxu0 %v6296_v26 }
0x129b   : > { %5870 = vmatpush3.bf16.msra.mxu1 %v6297_v61  ;;  %5849 = vmatprep.subr.bf16.mxu0 %v6298_v0  ;;  %v5535_v61 = vld [vmem:[%s923_s30] ss:$0 sm:$0xff] }
0x129c   : > { %5871 = vmatprep.subr.bf16.mxu1 %v6299_v18 }
0x129e   : > { %5850 = vmatpush3.bf16.msra.mxu0 %v6300_v19 }
0x129f   : > { %5872 = vmatpush3.bf16.msra.mxu1 %v6301_v50  ;;  %5851 = vmatprep.subr.bf16.mxu0 %v6302_v54 }
0x12a0   : > { %5873 = vmatprep.subr.bf16.mxu1 %v6303_v57 }
0x12a2   : > { %5852 = vmatpush3.bf16.msra.mxu0 %v6304_v58 }
0x12a3   : > { %5874 = vmatpush3.bf16.msra.mxu1 %v6305_v30  ;;  %5853 = vmatprep.subr.bf16.mxu0 %v6306_v1 }
0x12a4   : > { %5875 = vmatprep.subr.bf16.mxu1 %v6307_v60 }
0x12a6   : > { %5854 = vmatpush3.bf16.msra.mxu0 %v6308_v62 }
0x12a7   : > { %5876 = vmatpush3.bf16.msra.mxu1 %v6309_v63  ;;  %5855 = vmatprep.subr.bf16.mxu0 %v6310_v2 }
0x12a8   : > { %5877 = vmatprep.subr.bf16.mxu1 %v6311_v3 }
0x12aa   : > { %5856 = vmatpush3.bf16.msra.mxu0 %v6312_v4 }
0x12ab   : > { %5878 = vmatpush3.bf16.msra.mxu1 %v6313_v53  ;;  %5857 = vmatprep.subr.bf16.mxu0 %v6314_v5 }
0x12ac   : > { %5879 = vmatprep.subr.bf16.mxu1 %v6315_v6 }
0x12ae   : > { %5858 = vmatpush3.bf16.msra.mxu0 %v6316_v8 }
0x12af   : > { %5880 = vmatpush3.bf16.msra.mxu1 %v6317_v9  ;;  %5859 = vmatprep.subr.bf16.mxu0 %v6318_v11 }
0x12b0   : > { %5881 = vmatprep.subr.bf16.mxu1 %v6319_v55 }
0x12b2   : > { %5860 = vmatpush3.bf16.msra.mxu0 %v6320_v12 }
0x12b3   : > { %5882 = vmatpush3.bf16.msra.mxu1 %v6321_v13  ;;  %5889 = vmatprep.subr.bf16.mxu0 %v6322_v15 }
0x12b4   : > { %5911 = vmatprep.subr.bf16.mxu1 %v6323_v16 }
0x12b5   : > { %4824 = vmatmul.mubr.bf16.vlgmr.msra.gmra.mrb[88].mxu0 %v7126_v59  ;;  %v6331_v59 = vld [vmem:[%s6659_s21 + $0x3d0] sm:$0xff]  }
0x12b6   : > { %4865 = vmatmul.mubr.bf16.vlgmr.msra.gmra.mrb[88].mxu1 %v7128_v49  ;;  %5890 = vmatpush3.bf16.msra.mxu0 %v6324_v56  ;;  %v6332_v49 = vld [vmem:[%s6659_s21 + $0x310] sm:$0xff]  }
0x12b7   : > { %4905 = vmatprep.mubr.bf16.mxu0 %v7148_v39  ;;  %5912 = vmatpush3.bf16.msra.mxu1 %v6325_v21  ;;  %v6341_v39 = vld [vmem:[%s6659_s21 + $0x3a0] sm:$0xff]  }
0x12b8   : > { %4946 = vmatprep.mubr.bf16.mxu1 %v7150_v40  ;;  %5891 = vmatprep.subr.bf16.mxu0 %v6326_v17  ;;  %v6342_v40 = vld [vmem:[%s6659_s21 + $0x368] sm:$0xff]  }
0x12b9   : > { %5913 = vmatprep.subr.bf16.mxu1 %v6327_v22 }
0x12ba   : > { %5892 = vmatpush3.bf16.msra.mxu0 %v6328_v23 }
0x12bb   : > { %5914 = vmatpush3.bf16.msra.mxu1 %v6329_v24  ;;  %5893 = vmatprep.subr.bf16.mxu0 %v6330_v25 }
0x12bc   : > { %5915 = vmatprep.subr.bf16.mxu1 %v6331_v59 }
0x12be   : > { %5894 = vmatpush3.bf16.msra.mxu0 %v6332_v49 }
0x12bf   : > { %5916 = vmatpush3.bf16.msra.mxu1 %v6333_v27  ;;  %5895 = vmatprep.subr.bf16.mxu0 %v6334_v29 }
0x12c0   : > { %5917 = vmatprep.subr.bf16.mxu1 %v6335_v31 }
0x12c2   : > { %5896 = vmatpush3.bf16.msra.mxu0 %v6336_v51 }
0x12c3   : > { %5918 = vmatpush3.bf16.msra.mxu1 %v6337_v34  ;;  %5897 = vmatprep.subr.bf16.mxu0 %v6338_v20 }
0x12c4   : > { %5919 = vmatprep.subr.bf16.mxu1 %v6339_v35 }
0x12c6   : > { %5898 = vmatpush3.bf16.msra.mxu0 %v6340_v36 }
0x12c7   : > { %5920 = vmatpush3.bf16.msra.mxu1 %v6341_v39  ;;  %5899 = vmatprep.subr.bf16.mxu0 %v6342_v40 }
0x12c8   : > { %5921 = vmatprep.subr.bf16.mxu1 %v6343_v41 }
0x12ca   : > { %5900 = vmatpush3.bf16.msra.mxu0 %v6344_v14 }
0x12cb   : > { %5922 = vmatpush3.bf16.msra.mxu1 %v6345_v42  ;;  %5901 = vmatprep.subr.bf16.mxu0 %v6346_v44 }
0x12cc   : > { %5923 = vmatprep.subr.bf16.mxu1 %v6347_v10 }
0x12ce   : > { %5902 = vmatpush3.bf16.msra.mxu0 %v6348_v28 }
0x12cf   : > { %5924 = vmatpush3.bf16.msra.mxu1 %v6349_v32  ;;  %5903 = vmatprep.subr.bf16.mxu0 %v6350_v33 }
0x12d0   : > { %5925 = vmatprep.subr.bf16.mxu1 %v6351_v45 }
0x12d2   : > { %5904 = vmatpush3.bf16.msra.mxu0 %v6352_v46 }
0x12d3   : > { %5926 = vmatpush3.bf16.msra.mxu1 %v6353_v47 }
0x12d5   : > { %4906 = vmatmul.mubr.bf16.vlgmr.msra.gmra.mrb[92].mxu0 %v7144_v37 }
0x12d6   : > { %4947 = vmatmul.mubr.bf16.vlgmr.msra.gmra.mrb[92].mxu1 %v7146_v38 }
0x1348   : > { %v5773_v48 = vpop.f32.mrb[80].mxu0  ;;  %v5795_v26 = vpop.f32.mrb[80].mxu1 }
0x1349   : > { %v5774_v0 = vpop.f32.mrb[81].mxu0  ;;  %v5796_v18 = vpop.f32.mrb[81].mxu1 }
0x134a   : > { %v5775_v19 = vadd.f32 %v5774_v0, %v5773_v48  ;;  %v5797_v50 = vadd.f32 %v5796_v18, %v5795_v26  ;;  %v5776_v54 = vpop.f32.mrb[82].mxu0  ;;  %v5798_v57 = vpop.f32.mrb[82].mxu1 }
0x134b   : > { %v5777_v58 = vpop.f32.mrb[83].mxu0  ;;  %v5799_v30 = vpop.f32.mrb[83].mxu1 }
0x134c   : > { %v4662_v1 = vadd.f32 %v5775_v19, %v5535_v61  ;;  %v5778_v60 = vadd.f32 %v5777_v58, %v5776_v54  ;;  %v5800_v37 = vadd.f32 %v5799_v30, %v5798_v57 }
0x134e   : > { %v4703_v62 = vadd.f32 %v5797_v50, %v4662_v1  ;;  %v4665_v38 = vadd.f32 %v5778_v60, %v5535_v61 }
0x1350   : > { %v4706_v63 = vadd.f32 %v5800_v37, %v4665_v38 }
0x1368   : > { %v5817_v2 = vpop.f32.mrb[84].mxu0  ;;  %v5839_v3 = vpop.f32.mrb[84].mxu1 }
0x1369   : > { %v5818_v4 = vpop.f32.mrb[85].mxu0  ;;  %v5840_v53 = vpop.f32.mrb[85].mxu1 }
0x136a   : > { %v5819_v5 = vadd.f32 %v5818_v4, %v5817_v2  ;;  %v5841_v6 = vadd.f32 %v5840_v53, %v5839_v3  ;;  %v5820_v8 = vpop.f32.mrb[86].mxu0  ;;  %v5842_v9 = vpop.f32.mrb[86].mxu1 }
0x136b   : > { %v5821_v11 = vpop.f32.mrb[87].mxu0  ;;  %v5843_v55 = vpop.f32.mrb[87].mxu1 }
0x136c   : > { %v4744_v12 = vadd.f32 %v5819_v5, %v4703_v62  ;;  %v5822_v13 = vadd.f32 %v5821_v11, %v5820_v8  ;;  %v5844_v15 = vadd.f32 %v5843_v55, %v5842_v9  ;;  %v5664_v8 = vld [vmem:[%s932_s13] ss:$0 sm:$0xff] }
0x136d   : > { %v5665_v55 = vld [vmem:[%s935_s0] ss:$0 sm:$0xff] }
0x136e   : > { %v4785_v16 = vadd.f32 %v5841_v6, %v4744_v12  ;;  %v4747_v56 = vadd.f32 %v5822_v13, %v4706_v63 }
0x1370   : > { %v4788_v21 = vadd.f32 %v5844_v15, %v4747_v56 }
0x1388   : > { %v5861_v17 = vpop.f32.mrb[88].mxu0 }
0x1389   : > { %v5883_v22 = vpop.f32.mrb[88].mxu1  ;;  %v5862_v23 = vpop.f32.mrb[89].mxu0 }
0x138a   : > { %v5863_v24 = vadd.f32 %v5862_v23, %v5861_v17  ;;  %v5884_v25 = vpop.f32.mrb[89].mxu1  ;;  %v5864_v59 = vpop.f32.mrb[90].mxu0 }
0x138b   : > { %v5885_v49 = vadd.f32 %v5884_v25, %v5883_v22  ;;  %v5886_v27 = vpop.f32.mrb[90].mxu1  ;;  %v5865_v29 = vpop.f32.mrb[91].mxu0  ;;  %v6456_v22 = vmov (!%p5666_p6), 0.0   ;;  %v5024_v25 = vld [vmem:[#allocation3] sm:$0x1] (!%p5666_p6) }
0x138c   : > { %v4826_v31 = vadd.f32 %v5863_v24, %v4785_v16  ;;  %v5866_v51 = vadd.f32 %v5865_v29, %v5864_v59  ;;  %v5887_v34 = vpop.f32.mrb[91].mxu1  ;;  %6157 = vmatprep.subr.mxu0 (!%p5666_p6), %v6456_v22  ;;  %6159 = vmatprep.mubr.msk.f32.mxu0 (!%p5666_p6), %vm6457_vm7, %v6456_v22  ;;  %v6458_v59 = vmov (!%p5666_p6), 0  }
0x138d   : > { %v5888_v20 = vadd.f32 %v5887_v34, %v5886_v27  ;;  %6396 = vset.pattern.permute.xlu0 (!%p5666_p6), %v6458_v59 }
0x138e   : > { %v4867_v35 = vadd.f32 %v5885_v49, %v4826_v31  ;;  %v4829_v36 = vadd.f32 %v5866_v51, %v4788_v21 }
0x1390   : > { %v4870_v39 = vadd.f32 %v5888_v20, %v4829_v36 }
0x13a8   : > { %v5905_v40 = vpop.f32.mrb[92].mxu0 }
0x13a9   : > { %v5927_v41 = vpop.f32.mrb[92].mxu1  ;;  %v5906_v14 = vpop.f32.mrb[93].mxu0 }
0x13aa   : > { %v5907_v42 = vadd.f32 %v5906_v14, %v5905_v40  ;;  %v5928_v44 = vpop.f32.mrb[93].mxu1  ;;  %v5908_v10 = vpop.f32.mrb[94].mxu0 }
0x13ab   : > { %v5929_v28 = vadd.f32 %v5928_v44, %v5927_v41  ;;  %v5930_v32 = vpop.f32.mrb[94].mxu1  ;;  %v5909_v33 = vpop.f32.mrb[95].mxu0 }
0x13ac   : > { %v4908_v45 = vadd.f32 %v5907_v42, %v4867_v35  ;;  %v5910_v46 = vadd.f32 %v5909_v33, %v5908_v10  ;;  %v5931_v47 = vpop.f32.mrb[95].mxu1  ;;  %v5023_v42 = vld [vmem:[%s7371_s4] sm:$0x1] (!%p5666_p6) }
0x13ad   : > { %v5932_v48 = vadd.f32 %v5931_v47, %v5930_v32 }
0x13ae   : > { %v4949_v26 = vadd.f32 %v5929_v28, %v4908_v45  ;;  %v4911_v61 = vadd.f32 %v5910_v46, %v4870_v39 }
0x13b0   : > { %v4952_v0 = vadd.f32 %v5932_v48, %v4911_v61  ;;  %v4957_v18 = vadd.f32 %v4949_v26, %v6978_v7 }
0x13b2   : > { %v4959_v19 = vsel %vm1033_vm4, %v4957_v18, 0.0  ;;  %v4958_v50 = vadd.f32 %v4952_v0, %v6980_v43 }
0x13b3   : > { %4960 = vadd.xlane.f32.xlu0 %v4959_v19 }
0x13b4   : > { %v4962_v54 = vsel %vm1033_vm4, %v4958_v50, 0.0 }
0x13b5   : > { %4963 = vadd.xlane.f32.xlu1 %v4962_v54 }
0x1440   : > { %v4961_v57 = vpop.xlane.xlu0 %4960 }
0x1441   : > { %v4965_v58 = vmul.f32 0.03125, %v4961_v57 }
0x1442   : > { %v4964_v30 = vpop.xlane.xlu1 %4963 }
0x1443   : > { %v4967_v1 = vsub.f32 %v4957_v18, %v4965_v58  ;;  %v4966_v60 = vmul.f32 0.03125, %v4964_v30 }
0x1445   : > { %v4968_v37 = vsub.f32 %v4958_v50, %v4966_v60  ;;  %v4969_v62 = vmul.f32 %v4967_v1, %v4967_v1 }
0x1447   : > { %v4971_v38 = vsel %vm1033_vm4, %v4969_v62, 0.0  ;;  %v4970_v63 = vmul.f32 %v4968_v37, %v4968_v37 }
0x1448   : > { %4972 = vadd.xlane.f32.xlu0 %v4971_v38 }
0x1449   : > { %v4974_v7 = vsel %vm1033_vm4, %v4970_v63, 0.0 }
0x144a   : > { %4975 = vadd.xlane.f32.xlu1 %v4974_v7 }
0x145e   : > { %5027 = vperm.xlu0 (!%p5666_p6), %6396, %v5024_v25  }
0x14d5   : > { %v4973_v43 = vpop.xlane.xlu0 %4972 }
0x14d6   : > { %v4977_v2 = vmul.f32 0.03125, %v4973_v43 }
0x14d7   : > { %v4976_v3 = vpop.xlane.xlu1 %4975 }
0x14d8   : > { %v4979_v4 = vadd.f32 1e-05, %v4977_v2  ;;  %v4978_v53 = vmul.f32 0.03125, %v4976_v3 }
0x14da   : > { %6390 = vrsqrt.f32 %v4979_v4  ;;  %v4980_v5 = vadd.f32 1e-05, %v4978_v53 }
0x14dc   : > { %6392 = vrsqrt.f32 %v4980_v5 }
0x14dd   : > { %v5028_v44 = vpop.permute.xlu0 (!%p5666_p6), %5027 }
0x14de   : > { %v5033_v10 = vrot.slane (!%p5666_p6), %v5028_v44, %v7068_v52 }
0x14e4   : > { %v6391_v6 = vpop.eup %6390 }
0x14e5   : > { %v4983_v9 = vmul.f32 %v6391_v6, %v4967_v1 }
0x14e6   : > { %v6393_v11 = vpop.eup %6392 }
0x14e7   : > { %v4991_v12 = vmul.f32 %v5664_v8, %v4983_v9  ;;  %v4984_v13 = vmul.f32 %v6393_v11, %v4968_v37  ;;  %5006 = sbr.rel (%p5666_p6) target bundleno = 5591 (0x15d7), region = 112 }
0x14e9   : > { %v4999_v15 = vadd.f32 %v5665_v55, %v4991_v12  ;;  %v4992_v16 = vmul.f32 %v5664_v8, %v4984_v13 }
0x14eb   : > { %5001 = vst.msk [vmem:[#allocation2] sm:$0xff] %vm1033_vm4, %v4999_v15  ;;  %v5000_v56 = vadd.f32 %v5665_v55, %v4992_v16  ;;  %v5007_v21 = vsel (!%p5666_p6), %vm1033_vm4, %v4999_v15, 0.0 }
0x14ec   : > { %v5008_v23 = vrot.slane (!%p5666_p6), %v5007_v21, 4 }
0x14ed   : > { %5002 = vst.msk [vmem:[#allocation2 + $0x8] sm:$0xff] %vm1033_vm4, %v5000_v56  ;;  %v5014_v17 = vsel (!%p5666_p6), %vm1033_vm4, %v5000_v56, 0.0 }
0x14ee   : > { %v5015_v24 = vrot.slane %v5014_v17, 4  ;;  %v5009_v49 = vadd.f32 %v5008_v23, %v5007_v21 }
0x14f0   : > { %v5016_v27 = vadd.f32 %v5015_v24, %v5014_v17  ;;  %v5010_v29 = vrot.slane %v5009_v49, 2 }
0x14f2   : > { %v5017_v31 = vrot.slane %v5016_v27, 2  ;;  %v5011_v51 = vadd.f32 %v5010_v29, %v5009_v49 }
0x14f4   : > { %v5018_v34 = vadd.f32 %v5017_v31, %v5016_v27  ;;  %v5012_v20 = vrot.slane %v5011_v51, 1 }
0x14f6   : > { %v5019_v35 = vrot.slane %v5018_v34, 1  ;;  %v5013_v36 = vadd.f32 %v5012_v20, %v5011_v51 }
0x14f8   : > { %v5020_v39 = vadd.f32 %v5019_v35, %v5018_v34  ;;  %v5021_v40 = vmul.f32 0.125, %v5013_v36 }
0x14fa   : > { %v5022_v41 = vmul.f32 0.125, %v5020_v39 }
0x14fc   : > { %v5037_v14 = vsel %vm5036_vm8, %v5022_v41, %v5021_v40 }
0x14fd   : > { %6158 = vmatpush3.xpose.msk.msra.mxu0 %vm1033_vm4, %v5037_v14 }
0x1500   : > { %6160 = vmatmul.mubr.msk.f32.vlgmr.msra.gmra.mrb[0].mxu0 %vm1033_vm4, %v5023_v42 }
0x15d3   : > { %v5109_v28 = vpop.f32.mrb[0].mxu0 }
0x15d4   : > { %v5110_v32 = vadd.f32 %v5109_v28, %v5033_v10  ;;  %v6161_v33 = vpop.f32.mrb[1].mxu0 }
0x15d6   : > { %5114 = vst.msk [vmem:[#allocation4] sm:$0x1] %vm5113_vm9, %v5110_v32 }
0x15d7 PF: > { %s7372_s0 = sld [smem:[#allocation8_spill]]  ;;  %s6459_s10 = smov [#allocation4]  }
0x15d8   : > { %s5124_s7 = sshll.u32 %s6459_s10, 4  ;;  %s5125_s7 = int_to_ptr.vmem [resolvable:$true] %s5124_s7 }
0x15d9   : > { %s6397_s25 = scalar_lea.vmem %s5125_s7, 16  ;;  %s6403_s3 = scalar_lea.vmem %s5125_s7, 32 }
0x15da   : > { %p6398_p8 = scmp.ne.s32.totalorder %s5125_s7, %s6397_s25  ;;  %p6404_p11 = scmp.lt.s32.totalorder %s5125_s7, %s5125_s7 }
0x15db   : > { %p6405_p12 = scmp.lt.s32.totalorder %s6403_s3, %s6397_s25 }
0x15dd   : > { %s7373_s14 = sadd.s32 4294967295, %s7372_s0   ;;  %p6406_p13 = por %p6405_p12, %p6404_p11 }
0x15de   : > { %p7266_p7 = scmp.eq.s32.totalorder %s7373_s14, 1 }
0x15e0   : > { %p6399_p9 = pnand %p6398_p8, %p7266_p7 }
0x15e2   : > { %p6400_p10 = pneg %p6399_p9 }
0x15e4   : > { %p6407_p0 = pnand %p6406_p13, %p6400_p10 }
0x15e6   : > { %6410 = shalt.err (!%p6407_p0)
}
0x15e7   : > { %s7375_s26 = sld [smem:[#allocation28_spill]] }
0x15ed   : > { %s6411_s28 = scalar_lea.hbm %s7375_s26, 16 }
0x15ee   : > { %p6412_p1 = scmp.ne.s32.totalorder %s7375_s26, %s6411_s28  ;;  %p6417_p4 = scmp.lt.u32.totalorder %s6411_s28, %s7375_s26 }
0x15f0   : > { %p6413_p2 = pnand %p6412_p1, %p7266_p7 }
0x15f2   : > { %p6414_p3 = pneg %p6413_p2 }
0x15f4   : > { %p6419_p5 = pnand %p6417_p4, %p6414_p3 }
0x15f6   : > { %6422 = shalt.err (!%p6419_p5)
}
0x15f7   : > { %6163 = dma.vmem_to_hbm [thread:$0]  (%p7266_p7), %s5125_s7, 16, %s7375_s26, [#allocation5]  }
0x15f8   : > { %6436 = dma.done.wait (%p7266_p7), [#allocation5], 16  }
0x15f9   : > { %6438 = vsyncadd (%p7266_p7), [#allocation5], 4294967280 }
0x15fa PF: > { %s7376_s30 = sld [smem:[#allocation8_spill]]  ;;  %s7377_s27 = sld [smem:[#allocation7_spill]] }
0x15fb   : > { %s7378_s3 = sld [smem:[#allocation9_spill]] }
0x1600   : > { %s34_s28 = sadd.s32 1, %s7376_s30  }
0x1601   : > { %p31_p6 = scmp.ge.s32.totalorder %s34_s28, 4  }
0x1603   :  { %33 = sbr.rel (!%p31_p6) target bundleno = 19 (0x13), region = 209 }
0x160a   :  { %5137 = vsyncpa [#allocation5], 1 }
0x160b   :  { %5139 = vsyncpa [#allocation5 + $0x1], 1 }

// kernel: transformer_model_forward.1
= control target key start
LH: loop header
LB: loop body
LE: loop exit
PB: predicated region body
PF: predicated region fallthrough
CT: control target
= control target key end

     0   :  { %s7301_s0 = inlined_call_operand.vmem [shape: f32[2,8,16], index: 0, kind: input, shape index: {}]   ;;  %s7302_s1 = inlined_call_operand.vmem [shape: bf16[16,32], index: 1, kind: input, shape index: {}]   ;;  %s7303_s2 = inlined_call_operand.vmem [shape: f32[1,32], index: 2, kind: input, shape index: {}]   ;;  %s7304_s3 = inlined_call_operand.vmem [shape: f32[1,32], index: 3, kind: input, shape index: {}]   ;;  %s7305_s4 = inlined_call_operand.<no memory space> [shape: f32[1,1], index: 4, kind: input, shape index: {}]   ;;  %s7306_s5 = inlined_call_operand.vmem [shape: bf16[2,4,32,8], index: 5, kind: input, shape index: {}]   ;;  %s7307_s6 = inlined_call_operand.vmem [shape: bf16[2,4,32,8], index: 6, kind: input, shape index: {}]   ;;  %s7308_s7 = inlined_call_operand.vmem [shape: bf16[2,4,32,8], index: 7, kind: input, shape index: {}]   ;;  %s7309_s8 = inlined_call_operand.vmem [shape: f32[2,4,1,8], index: 8, kind: input, shape index: {}]   ;;  %s7310_s9 = inlined_call_operand.vmem [shape: f32[2,4,1,8], index: 9, kind: input, shape index: {}]   ;;  %s7311_s10 = inlined_call_operand.vmem [shape: f32[2,4,1,8], index: 10, kind: input, shape index: {}]   ;;  %s7312_s11 = inlined_call_operand.vmem [shape: bf16[2,4,8,32], index: 11, kind: input, shape index: {}]   ;;  %s7313_s12 = inlined_call_operand.vmem [shape: f32[2,1,32], index: 12, kind: input, shape index: {}]   ;;  %s7314_s13 = inlined_call_operand.vmem [shape: bf16[2,32,2048], index: 13, kind: input, shape index: {}]   ;;  %s7315_s14 = inlined_call_operand.vmem [shape: f32[2,1,2048], index: 14, kind: input, shape index: {}]   ;;  %s7316_s15 = inlined_call_operand.vmem [shape: bf16[2,2048,32], index: 15, kind: input, shape index: {}]   ;;  %s7317_s16 = inlined_call_operand.vmem [shape: f32[2,1,32], index: 16, kind: input, shape index: {}]   ;;  %s7318_s17 = inlined_call_operand.vmem [shape: f32[2,1,32], index: 17, kind: input, shape index: {}]   ;;  %s7319_s18 = inlined_call_operand.vmem [shape: f32[2,1,32], index: 18, kind: input, shape index: {}]   ;;  %s7320_s19 = inlined_call_operand.vmem [shape: f32[2,1,32], index: 19, kind: input, shape index: {}]   ;;  %s7321_s20 = inlined_call_operand.vmem [shape: f32[2,1,32], index: 20, kind: input, shape index: {}]   ;;  %s7322_s21 = inlined_call_operand.hbm [shape: f32[1,1,2], index: 21, kind: output, shape index: {}]  }
   0x1   :  { %7330 = sst [smem:[#allocation13_spill]] %s7301_s0 }
   0x2   :  { %7331 = sst [smem:[#allocation14_spill]] %s7302_s1 }
   0x3   :  { %7332 = sst [smem:[#allocation15_spill]] %s7303_s2 }
   0x4   :  { %7333 = sst [smem:[#allocation16_spill]] %s7304_s3 }
   0x5   :  { %7334 = sst [smem:[#allocation17_spill]] %s7305_s4 }
   0x6   :  { %7335 = sst [smem:[#allocation18_spill]] %s7306_s5  ;;  %s7346_s26 = sld [smem:[#allocation17_spill]] }
   0x7   :  { %7336 = sst [smem:[#allocation19_spill]] %s7307_s6 }
   0x8   :  { %7337 = sst [smem:[#allocation20_spill]] %s7308_s7 }
   0x9   :  { %7338 = sst [smem:[#allocation21_spill]] %s7309_s8 }
   0xa   :  { %7339 = sst [smem:[#allocation22_spill]] %s7310_s9 }
   0xb   :  { %7340 = sst [smem:[#allocation23_spill]] %s7311_s10 }
   0xc   :  { %7341 = sst [smem:[#allocation24_spill]] %s7312_s11  ;;  %v26_v0 = vstv %s7346_s26 }
   0xd   :  { %7342 = sst [smem:[#allocation25_spill]] %s7313_s12  ;;  %27 = vst [vmem:[#allocation3] sm:$0x1] %v26_v0 }
   0xe   :  { %7343 = sst [smem:[#allocation26_spill]] %s7314_s13 }
   0xf   :  { %7344 = sst [smem:[#allocation27_spill]] %s7315_s14 }
  0x10   :  { %7345 = sst [smem:[#allocation28_spill]] %s7322_s21 }
  0x11   :  { %28 = vsyncpa [#allocation5], 0  ;;  %s6573_s27 = smov 0   ;;  %s6575_s3 = smov 0  }
  0x12   :  { %s6577_s28 = smov 0  }
  0x13 LB: > { %7347 = sst [smem:[#allocation7_spill]] %s6445_s3  ;;  %s43_s0 = sadd.s32 1, %s6445_s3  ;;  %s6449_s28 = sphi %s6577_s28, %s34_s28   ;;  %s6445_s3 = sphi %s6575_s3, %s7378_s3   ;;  %s6441_s27 = sphi %s6573_s27, %s7377_s27  }
  0x14   : > { %7348 = sst [smem:[#allocation8_spill]] %s6449_s28  ;;  %p44_p0 = scmp.ge.s32.totalorder %s43_s0, 2 }
  0x15   : > { %p5355_p1 = scmp.ge.s32.totalorder %s6449_s28, 1  ;;  %p747_p2 = scmp.lt.s32.totalorder %s6449_s28, 3 }
  0x16   : > { %s7380_s0 = smov (%p44_p0, %s43_s0), 0 }
  0x17   : > { %7349 = sst [smem:[#allocation9_spill]] %s7380_s0  ;;  %p748_p3 = pnand %p5355_p1, %p747_p2 }
  0x19   : > { %751 = sbr.rel (%p748_p3) target bundleno = 5626 (0x15fa), region = 104 }
  0x20   : > { %p872_p4 = scmp.lt.s32.totalorder %s6441_s27, 1  ;;  %s7350_s1 = sld [smem:[#allocation18_spill]] }
  0x21   : > { %s7352_s6 = sld [smem:[#allocation19_spill]]  ;;  %s7353_s7 = sld [smem:[#allocation20_spill]] }
  0x22   : > { %s6596_s4 = scalar_select %p872_p4, %s6441_s27, 1 }
  0x23   : > { %s7355_s8 = sld [smem:[#allocation21_spill]]  ;;  %s7357_s9 = sld [smem:[#allocation22_spill]] }
  0x24   : > { %s5673_s30 = sshll.u32 %s6596_s4, 6  ;;  %s5362_s5 = sshll.u32 %s6596_s4, 2 }
  0x25   : > { %s7358_s10 = sld [smem:[#allocation23_spill]]  ;;  %s5676_s29 = sshll.u32 %s6596_s4, 4 }
  0x26   : > { %s6603_s24 = scalar_lea.vmem %s7350_s1, %s5673_s30  ;;  %s7360_s11 = sld [smem:[#allocation24_spill]] }
  0x27   : > { %7351 = sst [smem:[#allocation10_spill]] %s6603_s24  ;;  %s6608_s26 = scalar_lea.vmem %s7352_s6, %s5673_s30 }
  0x28   : > { %s6613_s3 = scalar_lea.vmem %s7353_s7, %s5673_s30  ;;  %s7361_s13 = sld [smem:[#allocation26_spill]] }
  0x29   : > { %7354 = sst [smem:[#allocation11_spill]] %s6613_s3  ;;  %s6618_s22 = scalar_lea.vmem %s7355_s8, %s5362_s5 }
  0x2a   : > { %7356 = sst [smem:[#allocation12_spill]] %s6618_s22  ;;  %s6623_s24 = scalar_lea.vmem %s7357_s9, %s5362_s5 }
  0x2b   : > { %s6628_s6 = scalar_lea.vmem %s7358_s10, %s5362_s5  ;;  %s5677_s8 = sshll.u32 %s6596_s4, 8 }
  0x2c   : > { %s6638_s28 = scalar_lea.vmem %s7360_s11, %s5676_s29  ;;  %s7362_s14 = sld [smem:[#allocation27_spill]] }
  0x2d   : > { %s5678_s25 = sshll.u32 %s6596_s4, 10  ;;  %s923_s30 = scalar_lea.vmem %s7317_s16, %s6596_s4 }
  0x2e   : > { %s6644_s1 = scalar_lea.vmem %s7361_s13, %s5677_s8  ;;  %s6659_s21 = scalar_lea.vmem %s7316_s15, %s5678_s25 }
  0x2f   : > { %s926_s8 = scalar_lea.vmem %s7318_s17, %s6596_s4  ;;  %s929_s9 = scalar_lea.vmem %s7319_s18, %s6596_s4 }
  0x30   : > { %s932_s13 = scalar_lea.vmem %s7320_s19, %s6596_s4  ;;  %s935_s0 = scalar_lea.vmem %s7321_s20, %s6596_s4 }
  0x31   : > { %p5372_p5 = scmp.ne.s32.totalorder %s6441_s27, 0 }
  0x32   : > { %s6649_s5 = scalar_lea.vmem %s7362_s14, %s5676_s29  ;;  %s7363_s3 = sld [smem:[#allocation14_spill]] (!%p5372_p5)  ;;  %v6451_v2 = vmov (!%p5372_p5), 0.0   ;;  %vm6452_vm0 = vmmov (!%p5372_p5), 0   ;;  %vm959_vm1 = vcmask (!%p5372_p5), 130048   ;;  %vm1004_vm2 = vcmask (!%p5372_p5), 261120  }
  0x33   : > { %940 = sbr.rel (%p5372_p5) target bundleno = 277 (0x115), region = 108  ;;  %5935 = vmatprep.subr.bf16.mxu0 (!%p5372_p5), %v6451_v2  ;;  %s7364_s22 = sld [smem:[#allocation13_spill]] (!%p5372_p5)  ;;  %5937 = vmatprep.mubr.msk.bf16.mxu0 (!%p5372_p5), %vm6452_vm0, %v6451_v2 }
  0x34   : > { %s7365_s10 = sld [smem:[#allocation15_spill]] (!%p5372_p5) }
  0x38   : > { %v6201_v1 = vld [vmem:[%s7363_s3] sm:$0xff] (!%p5372_p5)  }
  0x39   : > { %v941_v3 = vld [vmem:[%s7364_s22] sm:$0xff] (!%p5372_p5)  ;;  %v942_v4 = vld [vmem:[%s7364_s22 + $0x8] sm:$0xff] (!%p5372_p5)  ;;  %5936 = vmatpush3.bf16.msra.mxu0 (!%p5372_p5), %v6201_v1 }
  0x3a   : > { %v943_v5 = vpack.c.bf16 %v942_v4, %v941_v3  ;;  %v5373_v6 = vld [vmem:[%s7365_s10] ss:$0 sm:$0xff] }
  0x3c   : > { %5938 = vmatmul.mubr.msk.bf16.vlgmr.msra.gmra.mrb[0].mxu0 %vm959_vm1, %v943_v5 }
 0x10f   : > { %v997_v7 = vpop.f32.mrb[0].mxu0 }
 0x110   : > { %v998_v8 = vadd.f32 %v5373_v6, %v997_v7  ;;  %v5939_v9 = vpop.f32.mrb[1].mxu0 }
 0x111   : > { %v1000_v10 = vpop.f32.mrb[2].mxu0 }
 0x112   : > { %1005 = vst.msk [vmem:[#allocation2] sm:$0xff] %vm1004_vm2, %v998_v8  ;;  %v1001_v11 = vadd.f32 %v5373_v6, %v1000_v10  ;;  %v5940_v12 = vpop.f32.mrb[3].mxu0 }
 0x114   : > { %1006 = vst.msk [vmem:[#allocation2 + $0x8] sm:$0xff] %vm1004_vm2, %v1001_v11 }
 0x115 PF: > { %s7366_s7 = sld [smem:[#allocation10_spill]]  ;;  %v6202_v13 = vld [vmem:[%s6608_s26] sm:$0xff]   ;;  %v6453_v14 = vmov 0.0   ;;  %s7367_s25 = sld [smem:[#allocation11_spill]]  ;;  %v6203_v15 = vld [vmem:[%s6608_s26 + $0x8] sm:$0xff]   ;;  %vm6454_vm3 = vmmov 0  }
 0x116   : > { %5949 = vmatprep.subr.bf16.mxu1 %v6453_v14  ;;  %5941 = vmatprep.subr.bf16.mxu0 %v6453_v14  ;;  %vm1033_vm4 = vcmask 261120   ;;  %s7368_s3 = sld [smem:[#allocation12_spill]]  ;;  %v5380_v23 = vld [vmem:[%s6623_s24] ss:$0 sm:$0xff]  ;;  %vm1212_vm5 = vcmask 64512   ;;  %vm1334_vm6 = vcmask 1043456  }
 0x117   : > { %5950 = vmatpush3.bf16.msra.mxu1 %v6202_v13  ;;  %5953 = vmatprep.mubr.msk.bf16.mxu1 %vm6454_vm3, %v6453_v14  ;;  %v5384_v40 = vld [vmem:[%s6628_s6] ss:$0 sm:$0xff]  ;;  %p5666_p6 = scmp.ne.s32.totalorder %s6441_s27, 1 }
 0x118   : > { %5951 = vmatprep.subr.bf16.mxu1 %v6453_v14  ;;  %5945 = vmatprep.mubr.msk.bf16.mxu0 %vm6454_vm3, %v6453_v14  ;;  %vm6457_vm7 = vmmov (!%p5666_p6), 0   ;;  %vm5036_vm8 = vcmask (!%p5666_p6), 1041409   ;;  %vm5113_vm9 = vcmask (!%p5666_p6), 8192  }
 0x119   : > { %v1007_v17 = vld [vmem:[#allocation2] sm:$0xff] }
 0x11b   : > { %v6204_v16 = vld [vmem:[%s7366_s7] sm:$0xff]   ;;  %v1008_v18 = vld [vmem:[#allocation2 + $0x8] sm:$0xff]  ;;  %5952 = vmatpush3.bf16.msra.mxu1 %v6203_v15 }
 0x11c   : > { %5942 = vmatpush3.bf16.msra.mxu0 %v6204_v16  ;;  %v6205_v19 = vld [vmem:[%s7366_s7 + $0x8] sm:$0xff]   ;;  %v6701_v20 = vpack.c.bf16 %v1008_v18, %v1007_v17  ;;  %v6206_v21 = vld [vmem:[%s7367_s25] sm:$0xff]   ;;  %5965 = vmatprep.subr.bf16.mxu1 %v6453_v14  ;;  %v6208_v17 = vld [vmem:[%s6608_s26 + $0x10] sm:$0xff]  }
 0x11d   : > { %5943 = vmatprep.subr.bf16.mxu0 %v6453_v14  ;;  %v6207_v22 = vld [vmem:[%s7367_s25 + $0x8] sm:$0xff]   ;;  %v5376_v28 = vld [vmem:[%s7368_s3] ss:$0 sm:$0xff] }
 0x11e   : > { %5954 = vmatmul.mubr.msk.bf16.vlgmr.msra.gmra.mrb[0].mxu1 %vm1033_vm4, %v6701_v20 }
 0x11f   : > { %5967 = vmatprep.mubr.msk.bf16.mxu1 %vm6454_vm3, %v6453_v14 }
 0x120   : > { %5944 = vmatpush3.bf16.msra.mxu0 %v6205_v19 }
 0x121   : > { %5957 = vmatprep.subr.bf16.mxu0 %v6453_v14 }
 0x123   : > { %5946 = vmatmul.mubr.msk.bf16.vlgmr.msra.gmra.mrb[0].mxu0 %vm1033_vm4, %v6701_v20 }
 0x124   : > { %5958 = vmatpush3.bf16.msra.mxu0 %v6206_v21  ;;  %5961 = vmatprep.mubr.msk.bf16.mxu0 %vm6454_vm3, %v6453_v14 }
 0x125   : > { %5959 = vmatprep.subr.bf16.mxu0 %v6453_v14 }
 0x128   : > { %5960 = vmatpush3.bf16.msra.mxu0 %v6207_v22  ;;  %v6209_v22 = vld [vmem:[%s6608_s26 + $0x18] sm:$0xff]  }
 0x129   : > { %5971 = vmatprep.subr.bf16.mxu0 %v6453_v14 }
 0x12b   : > { %5962 = vmatmul.mubr.msk.bf16.vlgmr.msra.gmra.mrb[4].mxu0 %vm1033_vm4, %v6701_v20 }
 0x12c   : > { %5973 = vmatprep.mubr.msk.bf16.mxu0 %vm6454_vm3, %v6453_v14 }
 0x1f1   : > { %v1135_v24 = vpop.f32.mrb[0].mxu1 }
 0x1f2   : > { %v1136_v25 = vadd.f32 %v5380_v23, %v1135_v24  ;;  %v5955_v26 = vpop.f32.mrb[1].mxu1 }
 0x1f3   : > { %v1138_v27 = vpop.f32.mrb[2].mxu1  ;;  %v6212_v26 = vld [vmem:[%s7367_s25 + $0x10] sm:$0xff]  }
 0x1f4   : > { %v1208_v30 = vpack.c.bf16 %v1136_v25, %v1136_v25  ;;  %v1139_v31 = vadd.f32 %v5380_v23, %v1138_v27  ;;  %v5956_v32 = vpop.f32.mrb[3].mxu1  ;;  %v6210_v23 = vld [vmem:[%s7366_s7 + $0x10] sm:$0xff]   ;;  %v6211_v25 = vld [vmem:[%s7366_s7 + $0x18] sm:$0xff]  }
 0x1f5   : > { %v6213_v27 = vld [vmem:[%s7367_s25 + $0x18] sm:$0xff]  }
 0x1f6   : > { %v1071_v29 = vpop.f32.mrb[0].mxu0  ;;  %v1217_v35 = vsel %vm1212_vm5, %v1208_v30, 0  ;;  %v1209_v36 = vpack.c.bf16 %v1139_v31, %v1139_v31 }
 0x1f7   : > { %v5947_v33 = vpop.f32.mrb[1].mxu0  ;;  %v1072_v37 = vadd.f32 %v5376_v28, %v1071_v29  ;;  %5966 = vmatpush3.bf16.xpose.msra.mxu1 %v1217_v35 }
 0x1f8   : > { %v1074_v34 = vpop.f32.mrb[2].mxu0  ;;  %v1263_v39 = vsel %vm1212_vm5, %v1209_v36, 0  ;;  %5977 = vmatprep.subr.bf16.mxu1 %v6453_v14  ;;  %v5406_v36 = vld [vmem:[%s6623_s24 + $0x1] ss:$0 sm:$0xff] }
 0x1f9   : > { %v5948_v38 = vpop.f32.mrb[3].mxu0  ;;  %5972 = vmatpush3.bf16.xpose.msra.mxu0 %v1263_v39  ;;  %v1206_v41 = vpack.c.bf16 %v1072_v37, %v1072_v37  ;;  %v1075_v42 = vadd.f32 %v5376_v28, %v1074_v34 }
 0x1fa   : > { %5983 = vmatprep.subr.bf16.mxu0 %v6453_v14 }
 0x1fb   : > { %v1207_v47 = vpack.c.bf16 %v1075_v42, %v1075_v42  ;;  %v5397_v42 = vld [vmem:[%s7368_s3 + $0x1] ss:$0 sm:$0xff] }
 0x1fe   : > { %v1199_v43 = vpop.f32.mrb[4].mxu0  ;;  %5968 = vmatmul.mubr.msk.bf16.vlgmr.msra.gmra.mrb[4].mxu1 %vm1212_vm5, %v1206_v41 }
 0x1ff   : > { %v1200_v44 = vadd.f32 %v5384_v40, %v1199_v43  ;;  %v5963_v45 = vpop.f32.mrb[5].mxu0  ;;  %5979 = vmatprep.mubr.msk.bf16.mxu1 %vm6454_vm3, %v6453_v14 }
 0x200   : > { %v1202_v46 = vpop.f32.mrb[6].mxu0  ;;  %5974 = vmatmul.mubr.msk.bf16.vlgmr.msra.gmra.mrb[8].mxu0 %vm1212_vm5, %v1207_v47 }
 0x201   : > { %v1210_v48 = vpack.c.bf16 %v1200_v44, %v1200_v44  ;;  %v1203_v49 = vadd.f32 %v5384_v40, %v1202_v46  ;;  %v5964_v50 = vpop.f32.mrb[7].mxu0  ;;  %5985 = vmatprep.mubr.msk.bf16.mxu0 %vm6454_vm3, %v6453_v14 }
 0x203   : > { %v1336_v51 = vsel %vm1334_vm6, %v1210_v48, 0  ;;  %v1211_v52 = vpack.c.bf16 %v1203_v49, %v1203_v49 }
 0x204   : > { %5978 = vmatpush3.bf16.msra.mxu1 %v1336_v51 }
 0x205   : > { %v1382_v53 = vsel %vm1334_vm6, %v1211_v52, 0  ;;  %5989 = vmatprep.subr.bf16.mxu1 %v6453_v14 }
 0x206   : > { %5984 = vmatpush3.bf16.msra.mxu0 %v1382_v53 }
 0x207   : > { %5997 = vmatprep.subr.bf16.mxu0 %v6453_v14 }
 0x2d1   : > { %v1253_v54 = vpop.f32.mrb[4].mxu1 }
 0x2d2   : > { %v5969_v55 = vpop.f32.mrb[5].mxu1  ;;  %v1305_v62 = vmul.f32 0.35355338, %v1253_v54 }
 0x2d3   : > { %v1256_v56 = vpop.f32.mrb[6].mxu1  ;;  %v1299_v57 = vpop.f32.mrb[8].mxu0 }
 0x2d4   : > { %v1306_v58 = vmul.f32 0.35355338, %v1299_v57  ;;  %v5970_v59 = vpop.f32.mrb[7].mxu1  ;;  %v5975_v60 = vpop.f32.mrb[9].mxu0  ;;  %v1307_v1 = vsel %vm1212_vm5, %v1305_v62, -inf }
 0x2d5   : > { %v1302_v61 = vpop.f32.mrb[10].mxu0  ;;  %v5415_v57 = vld [vmem:[%s6628_s6 + $0x1] ss:$0 sm:$0xff] }
 0x2d6   : > { %v5976_v63 = vpop.f32.mrb[11].mxu0  ;;  %v1310_v0 = vsel %vm1212_vm5, %v1306_v58, -inf }
 0x2d7   : > { %1311 = vmax.xlane.f32.xlu0 %v1310_v0 }
 0x2db   : > { %1308 = vmax.xlane.f32.xlu0 %v1307_v1 }
 0x364   : > { %v1312_v2 = vpop.xlane.xlu0 %1311 }
 0x365   : > { %v1314_v3 = vsub.f32 %v1306_v58, %v1312_v2 }
 0x367   : > { %v1317_v4 = vmul.f32 1.442695, %v1314_v3 }
 0x368   : > { %v1309_v5 = vpop.xlane.xlu0 %1308 }
 0x369   : > { %6354 = vpow2.f32 %v1317_v4  ;;  %v1313_v6 = vsub.f32 %v1305_v62, %v1309_v5 }
 0x36b   : > { %v1315_v7 = vmul.f32 1.442695, %v1313_v6 }
 0x36d   : > { %6356 = vpow2.f32 %v1315_v7 }
 0x373   : > { %v6355_v8 = vpop.eup %6354 }
 0x374   : > { %v1322_v9 = vsel %vm1212_vm5, %v6355_v8, 0.0 }
 0x375   : > { %1323 = vadd.xlane.f32.xlu1 %v1322_v9 }
 0x377   : > { %v6357_v10 = vpop.eup %6356 }
 0x378   : > { %v1319_v11 = vsel %vm1212_vm5, %v6357_v10, 0.0 }
 0x379   : > { %1320 = vadd.xlane.f32.xlu1 %v1319_v11 }
 0x402   : > { %v1324_v12 = vpop.xlane.xlu1 %1323 }
 0x403   : > { %6358 = vrcp.f32 %v1324_v12 }
 0x406   : > { %v1321_v13 = vpop.xlane.xlu1 %1320 }
 0x407   : > { %6360 = vrcp.f32 %v1321_v13 }
 0x40d   : > { %v6359_v15 = vpop.eup %6358 }
 0x40e   : > { %v1328_v16 = vmul.f32 %v6359_v15, %v6355_v8 }
 0x410   : > { %v1330_v18 = vpack.c.bf16 %v1328_v16, %v1328_v16 }
 0x411   : > { %v6361_v19 = vpop.eup %6360 }
 0x412   : > { %v1327_v21 = vmul.f32 %v6361_v19, %v6357_v10  ;;  %5986 = vmatmul.mubr.msk.bf16.vlgmr.msra.gmra.mrb[12].mxu0 %vm1212_vm5, %v1330_v18 }
 0x413   : > { %5998 = vmatpush3.bf16.msra.mxu0 %v6208_v17  ;;  %6001 = vmatprep.mubr.msk.bf16.mxu0 %vm6454_vm3, %v6453_v14 }
 0x414   : > { %v1329_v24 = vpack.c.bf16 %v1327_v21, %v1327_v21  ;;  %5999 = vmatprep.subr.bf16.mxu0 %v6453_v14 }
 0x416   : > { %5980 = vmatmul.mubr.msk.bf16.vlgmr.msra.gmra.mrb[8].mxu1 %vm1212_vm5, %v1329_v24 }
 0x417   : > { %6000 = vmatpush3.bf16.msra.mxu0 %v6209_v22  ;;  %5990 = vmatpush3.bf16.msra.mxu1 %v6210_v23 }
 0x418   : > { %5991 = vmatprep.subr.bf16.mxu1 %v6453_v14  ;;  %5993 = vmatprep.mubr.msk.bf16.mxu1 %vm6454_vm3, %v6453_v14 }
 0x419   : > { %6013 = vmatprep.subr.bf16.mxu0 %v6453_v14 }
 0x41a   : > { %6002 = vmatmul.mubr.msk.bf16.vlgmr.msra.gmra.mrb[16].mxu0 %vm1033_vm4, %v6701_v20 }
 0x41b   : > { %5992 = vmatpush3.bf16.msra.mxu1 %v6211_v25  ;;  %6015 = vmatprep.mubr.msk.bf16.mxu0 %vm6454_vm3, %v6453_v14 }
 0x41c   : > { %6005 = vmatprep.subr.bf16.mxu1 %v6453_v14 }
 0x41e   : > { %5994 = vmatmul.mubr.msk.bf16.vlgmr.msra.gmra.mrb[12].mxu1 %vm1033_vm4, %v6701_v20 }
 0x41f   : > { %6009 = vmatprep.mubr.msk.bf16.mxu1 %vm6454_vm3, %v6453_v14  ;;  %6006 = vmatpush3.bf16.msra.mxu1 %v6212_v26 }
 0x420   : > { %6007 = vmatprep.subr.bf16.mxu1 %v6453_v14 }
 0x423   : > { %6008 = vmatpush3.bf16.msra.mxu1 %v6213_v27 }
 0x424   : > { %6019 = vmatprep.subr.bf16.mxu1 %v6453_v14 }
 0x426   : > { %6010 = vmatmul.mubr.msk.bf16.vlgmr.msra.gmra.mrb[16].mxu1 %vm1033_vm4, %v6701_v20 }
 0x427   : > { %6021 = vmatprep.mubr.msk.bf16.mxu1 %vm6454_vm3, %v6453_v14 }
 0x4e5   : > { %v6773_v28 = vpop.f32.mrb[12].mxu0 }
 0x4e6   : > { %v5987_v29 = vpop.f32.mrb[13].mxu0 }
 0x4e7   : > { %v1421_v30 = vpop.f32.mrb[14].mxu0 }
 0x4e8   : > { %v5988_v31 = vpop.f32.mrb[15].mxu0 }
 0x4e9   : > { %v6775_v32 = vpop.f32.mrb[8].mxu1 }
 0x4ea   : > { %v1424_v33 = vpack.c.bf16 %v6773_v28, %v6775_v32  ;;  %v5981_v34 = vpop.f32.mrb[9].mxu1 }
 0x4eb   : > { %v1375_v35 = vpop.f32.mrb[10].mxu1  ;;  %v5423_v34 = vld [vmem:[%s6638_s28 + $0x4] sm:$0xf] }
 0x4ec   : > { %v5982_v37 = vpop.f32.mrb[11].mxu1 }
 0x4ed   : > { %v1551_v38 = vpop.f32.mrb[16].mxu0  ;;  %v1425_v37 = vld [vmem:[%s6638_s28] sm:$0xf] }
 0x4ee   : > { %v1552_v39 = vadd.f32 %v5406_v36, %v1551_v38  ;;  %v6003_v40 = vpop.f32.mrb[17].mxu0 }
 0x4ef   : > { %v1554_v41 = vpop.f32.mrb[18].mxu0  ;;  %v1847_v40 = vsel %vm1334_vm6, %v5423_v34, 0 }
 0x4f0   : > { %v1626_v43 = vpack.c.bf16 %v1552_v39, %v1552_v39  ;;  %v1555_v44 = vadd.f32 %v5406_v36, %v1554_v41  ;;  %v6004_v45 = vpop.f32.mrb[19].mxu0 }
 0x4f1   : > { %v1485_v46 = vpop.f32.mrb[12].mxu1 }
 0x4f2   : > { %v1634_v47 = vsel %vm1212_vm5, %v1626_v43, 0  ;;  %v1627_v48 = vpack.c.bf16 %v1555_v44, %v1555_v44  ;;  %v1486_v49 = vadd.f32 %v5397_v42, %v1485_v46  ;;  %v5995_v50 = vpop.f32.mrb[13].mxu1  ;;  %v6214_v43 = vld [vmem:[%s6608_s26 + $0x20] sm:$0xff]   ;;  %v6215_v44 = vld [vmem:[%s6608_s26 + $0x28] sm:$0xff]  }
 0x4f3   : > { %6014 = vmatpush3.bf16.xpose.msra.mxu0 %v1634_v47  ;;  %v1488_v51 = vpop.f32.mrb[14].mxu1  ;;  %v6216_v46 = vld [vmem:[%s7366_s7 + $0x20] sm:$0xff]  }
 0x4f4   : > { %v1680_v52 = vsel %vm1212_vm5, %v1627_v48, 0  ;;  %v5996_v53 = vpop.f32.mrb[15].mxu1  ;;  %6025 = vmatprep.subr.bf16.mxu0 %v6453_v14  ;;  %v1624_v54 = vpack.c.bf16 %v1486_v49, %v1486_v49  ;;  %v1489_v55 = vadd.f32 %v5397_v42, %v1488_v51  ;;  %v1894_v42 = vsel %vm1334_vm6, %v1425_v37, 0 }
 0x4f5   : > { %6020 = vmatpush3.bf16.xpose.msra.mxu1 %v1680_v52  ;;  %v6217_v52 = vld [vmem:[%s7366_s7 + $0x28] sm:$0xff]  }
 0x4f6   : > { %6031 = vmatprep.subr.bf16.mxu1 %v6453_v14  ;;  %v1625_v56 = vpack.c.bf16 %v1489_v55, %v1489_v55 }
 0x4f9   : > { %v1617_v58 = vpop.f32.mrb[16].mxu1 }
 0x4fa   : > { %6016 = vmatmul.mubr.msk.bf16.vlgmr.msra.gmra.mrb[20].mxu0 %vm1212_vm5, %v1624_v54  ;;  %v1618_v59 = vadd.f32 %v5415_v57, %v1617_v58  ;;  %v6011_v60 = vpop.f32.mrb[17].mxu1  ;;  %v6218_v54 = vld [vmem:[%s7367_s25 + $0x20] sm:$0xff]   ;;  %v6219_v58 = vld [vmem:[%s7367_s25 + $0x28] sm:$0xff]  }
 0x4fb   : > { %6027 = vmatprep.mubr.msk.bf16.mxu0 %vm6454_vm3, %v6453_v14  ;;  %v1620_v61 = vpop.f32.mrb[18].mxu1 }
 0x4fc   : > { %6022 = vmatmul.mubr.msk.bf16.vlgmr.msra.gmra.mrb[20].mxu1 %vm1212_vm5, %v1625_v56  ;;  %v1628_v62 = vpack.c.bf16 %v1618_v59, %v1618_v59  ;;  %v1621_v63 = vadd.f32 %v5415_v57, %v1620_v61  ;;  %v6012_v0 = vpop.f32.mrb[19].mxu1  ;;  %v5440_v59 = vld [vmem:[%s6623_s24 + $0x2] ss:$0 sm:$0xff] }
 0x4fd   : > { %6033 = vmatprep.mubr.msk.bf16.mxu1 %vm6454_vm3, %v6453_v14 }
 0x4fe   : > { %v1752_v1 = vsel %vm1334_vm6, %v1628_v62, 0  ;;  %v1629_v2 = vpack.c.bf16 %v1621_v63, %v1621_v63 }
 0x4ff   : > { %6026 = vmatpush3.bf16.msra.mxu0 %v1752_v1 }
 0x500   : > { %v1798_v3 = vsel %vm1334_vm6, %v1629_v2, 0  ;;  %6037 = vmatprep.subr.bf16.mxu0 %v6453_v14 }
 0x501   : > { %6032 = vmatpush3.bf16.msra.mxu1 %v1798_v3 }
 0x502   : > { %6043 = vmatprep.subr.bf16.mxu1 %v6453_v14 }
 0x5cd   : > { %v1670_v4 = vpop.f32.mrb[20].mxu0 }
 0x5ce   : > { %v1722_v5 = vmul.f32 0.35355338, %v1670_v4  ;;  %v6017_v6 = vpop.f32.mrb[21].mxu0 }
 0x5cf   : > { %v1673_v7 = vpop.f32.mrb[22].mxu0  ;;  %v1716_v8 = vpop.f32.mrb[20].mxu1 }
 0x5d0   : > { %v1723_v9 = vmul.f32 0.35355338, %v1716_v8  ;;  %v6018_v10 = vpop.f32.mrb[23].mxu0  ;;  %v6023_v11 = vpop.f32.mrb[21].mxu1  ;;  %v1724_v12 = vsel %vm1212_vm5, %v1722_v5, -inf }
 0x5d1   : > { %v1719_v13 = vpop.f32.mrb[22].mxu1  ;;  %1725 = vmax.xlane.f32.xlu0 %v1724_v12  ;;  %v5431_v12 = vld [vmem:[%s7368_s3 + $0x2] ss:$0 sm:$0xff] }
 0x5d2   : > { %v6024_v15 = vpop.f32.mrb[23].mxu1  ;;  %v1727_v16 = vsel %vm1212_vm5, %v1723_v9, -inf }
 0x5d3   : > { %1728 = vmax.xlane.f32.xlu1 %v1727_v16 }
 0x65e   : > { %v1726_v17 = vpop.xlane.xlu0 %1725 }
 0x65f   : > { %v1730_v18 = vsub.f32 %v1722_v5, %v1726_v17 }
 0x660   : > { %v1729_v19 = vpop.xlane.xlu1 %1728 }
 0x661   : > { %v1732_v21 = vmul.f32 1.442695, %v1730_v18  ;;  %v1731_v22 = vsub.f32 %v1723_v9, %v1729_v19 }
 0x663   : > { %6362 = vpow2.f32 %v1732_v21  ;;  %v1734_v23 = vmul.f32 1.442695, %v1731_v22 }
 0x665   : > { %6364 = vpow2.f32 %v1734_v23  ;;  %v5449_v23 = vld [vmem:[%s6628_s6 + $0x2] ss:$0 sm:$0xff] }
 0x66d   : > { %v6363_v24 = vpop.eup %6362 }
 0x66e   : > { %v1736_v25 = vsel %vm1212_vm5, %v6363_v24, 0.0 }
 0x66f   : > { %v6365_v26 = vpop.eup %6364  ;;  %1737 = vadd.xlane.f32.xlu0 %v1736_v25 }
 0x670   : > { %v1739_v27 = vsel %vm1212_vm5, %v6365_v26, 0.0 }
 0x671   : > { %1740 = vadd.xlane.f32.xlu1 %v1739_v27 }
 0x6fc   : > { %v1738_v29 = vpop.xlane.xlu0 %1737 }
 0x6fd   : > { %6366 = vrcp.f32 %v1738_v29 }
 0x6fe   : > { %v1741_v30 = vpop.xlane.xlu1 %1740 }
 0x6ff   : > { %6368 = vrcp.f32 %v1741_v30 }
 0x707   : > { %v6367_v31 = vpop.eup %6366 }
 0x708   : > { %v1744_v35 = vmul.f32 %v6367_v31, %v6363_v24 }
 0x709   : > { %v6369_v36 = vpop.eup %6368 }
 0x70a   : > { %v1745_v38 = vmul.f32 %v6369_v36, %v6365_v26  ;;  %v1746_v39 = vpack.c.bf16 %v1744_v35, %v1744_v35 }
 0x70c   : > { %6028 = vmatmul.mubr.msk.bf16.vlgmr.msra.gmra.mrb[24].mxu0 %vm1212_vm5, %v1746_v39  ;;  %v1747_v41 = vpack.c.bf16 %v1745_v38, %v1745_v38 }
 0x70d   : > { %6038 = vmatpush3.bf16.msra.mxu0 %v1847_v40  ;;  %6039 = vmatprep.mubr.msk.bf16.mxu0 %vm6454_vm3, %v6453_v14 }
 0x70e   : > { %6034 = vmatmul.mubr.msk.bf16.vlgmr.msra.gmra.mrb[24].mxu1 %vm1212_vm5, %v1747_v41  ;;  %6049 = vmatprep.subr.bf16.mxu0 %v6453_v14 }
 0x70f   : > { %6044 = vmatpush3.bf16.msra.mxu1 %v1894_v42  ;;  %6045 = vmatprep.mubr.msk.bf16.mxu1 %vm6454_vm3, %v6453_v14 }
 0x710   : > { %6057 = vmatprep.subr.bf16.mxu1 %v6453_v14 }
 0x716   : > { %6046 = vmatmul.mubr.msk.bf16.vlgmr.msra.gmra.mrb[28].mxu1 %vm1212_vm5, %v1424_v33 }
 0x717   : > { %6058 = vmatpush3.bf16.msra.mxu1 %v6214_v43  ;;  %6061 = vmatprep.mubr.msk.bf16.mxu1 %vm6454_vm3, %v6453_v14 }
 0x718   : > { %6059 = vmatprep.subr.bf16.mxu1 %v6453_v14 }
 0x71b   : > { %6060 = vmatpush3.bf16.msra.mxu1 %v6215_v44 }
 0x71c   : > { %6073 = vmatprep.subr.bf16.mxu1 %v6453_v14 }
 0x71e   : > { %6062 = vmatmul.mubr.msk.bf16.vlgmr.msra.gmra.mrb[32].mxu1 %vm1033_vm4, %v6701_v20 }
 0x71f   : > { %6075 = vmatprep.mubr.msk.bf16.mxu1 %vm6454_vm3, %v6453_v14 }
 0x7df   : > { %v1788_v28 = vpop.f32.mrb[24].mxu0 }
 0x7e0   : > { %v6029_v32 = vpop.f32.mrb[25].mxu0 }
 0x7e1   : > { %v1791_v33 = vpop.f32.mrb[26].mxu0  ;;  %v1834_v45 = vpop.f32.mrb[24].mxu1 }
 0x7e2   : > { %v1840_v47 = vpack.c.bf16 %v1834_v45, %v1788_v28  ;;  %v6030_v48 = vpop.f32.mrb[27].mxu0  ;;  %v6035_v49 = vpop.f32.mrb[25].mxu1 }
 0x7e3   : > { %v1837_v50 = vpop.f32.mrb[26].mxu1 }
 0x7e4   : > { %v6036_v51 = vpop.f32.mrb[27].mxu1  ;;  %6040 = vmatmul.mubr.msk.bf16.vlgmr.msra.gmra.mrb[28].mxu0 %vm1212_vm5, %v1840_v47 }
 0x7e5   : > { %6050 = vmatpush3.bf16.msra.mxu0 %v6216_v46  ;;  %6053 = vmatprep.mubr.msk.bf16.mxu0 %vm6454_vm3, %v6453_v14 }
 0x7e6   : > { %6051 = vmatprep.subr.bf16.mxu0 %v6453_v14 }
 0x7e9   : > { %v1930_v53 = vpop.f32.mrb[28].mxu1  ;;  %6052 = vmatpush3.bf16.msra.mxu0 %v6217_v52 }
 0x7ea   : > { %v6047_v55 = vpop.f32.mrb[29].mxu1  ;;  %6065 = vmatprep.subr.bf16.mxu0 %v6453_v14 }
 0x7eb   : > { %v1933_v56 = vpop.f32.mrb[30].mxu1 }
 0x7ec   : > { %v6048_v57 = vpop.f32.mrb[31].mxu1  ;;  %6054 = vmatmul.mubr.msk.bf16.vlgmr.msra.gmra.mrb[32].mxu0 %vm1033_vm4, %v6701_v20 }
 0x7ed   : > { %6066 = vmatpush3.bf16.msra.mxu0 %v6218_v54  ;;  %6069 = vmatprep.mubr.msk.bf16.mxu0 %vm6454_vm3, %v6453_v14 }
 0x7ee   : > { %6067 = vmatprep.subr.bf16.mxu0 %v6453_v14 }
 0x7f1   : > { %v2062_v60 = vpop.f32.mrb[32].mxu1  ;;  %6068 = vmatpush3.bf16.msra.mxu0 %v6219_v58 }
 0x7f2   : > { %v2063_v61 = vadd.f32 %v5440_v59, %v2062_v60  ;;  %v6063_v62 = vpop.f32.mrb[33].mxu1  ;;  %6079 = vmatprep.subr.bf16.mxu0 %v6453_v14 }
 0x7f3   : > { %v2065_v63 = vpop.f32.mrb[34].mxu1 }
 0x7f4   : > { %v2137_v0 = vpack.c.bf16 %v2063_v61, %v2063_v61  ;;  %v2066_v1 = vadd.f32 %v5440_v59, %v2065_v63  ;;  %v6064_v2 = vpop.f32.mrb[35].mxu1  ;;  %6070 = vmatmul.mubr.msk.bf16.vlgmr.msra.gmra.mrb[36].mxu0 %vm1033_vm4, %v6701_v20  ;;  %v5457_v59 = vld [vmem:[%s6638_s28 + $0x8] sm:$0xf] }
 0x7f5   : > { %6081 = vmatprep.mubr.msk.bf16.mxu0 %vm6454_vm3, %v6453_v14  ;;  %v6222_v2 = vld [vmem:[%s7366_s7 + $0x30] sm:$0xff]  }
 0x7f6   : > { %v2145_v3 = vsel %vm1212_vm5, %v2137_v0, 0  ;;  %v2138_v4 = vpack.c.bf16 %v2066_v1, %v2066_v1  ;;  %v2358_v0 = vsel %vm1334_vm6, %v5457_v59, 0 }
 0x7f7   : > { %6074 = vmatpush3.bf16.xpose.msra.mxu1 %v2145_v3  ;;  %v6223_v3 = vld [vmem:[%s7366_s7 + $0x38] sm:$0xff]  }
 0x7f8   : > { %v2191_v5 = vsel %vm1212_vm5, %v2138_v4, 0  ;;  %6085 = vmatprep.subr.bf16.mxu1 %v6453_v14 }
 0x7fa   : > { %6080 = vmatpush3.bf16.xpose.msra.mxu0 %v2191_v5 }
 0x7fb   : > { %6091 = vmatprep.subr.bf16.mxu0 %v6453_v14 }
 0x8b7   : > { %v1883_v6 = vpop.f32.mrb[28].mxu0 }
 0x8b8   : > { %v6850_v7 = vadd.f32 %v1930_v53, %v1883_v6  ;;  %v6041_v8 = vpop.f32.mrb[29].mxu0 }
 0x8b9   : > { %v1886_v9 = vpop.f32.mrb[30].mxu0 }
 0x8ba   : > { %v6852_v10 = vadd.f32 %v1933_v56, %v1886_v9  ;;  %v6042_v11 = vpop.f32.mrb[31].mxu0  ;;  %v6220_v9 = vld [vmem:[%s6608_s26 + $0x30] sm:$0xff]  }
 0x8bf   : > { %v1996_v13 = vpop.f32.mrb[32].mxu0 }
 0x8c0   : > { %v1997_v15 = vadd.f32 %v5431_v12, %v1996_v13  ;;  %v6055_v16 = vpop.f32.mrb[33].mxu0 }
 0x8c1   : > { %v1999_v17 = vpop.f32.mrb[34].mxu0 }
 0x8c2   : > { %v2135_v18 = vpack.c.bf16 %v1997_v15, %v1997_v15  ;;  %v2000_v19 = vadd.f32 %v5431_v12, %v1999_v17  ;;  %v6056_v21 = vpop.f32.mrb[35].mxu0  ;;  %v6221_v17 = vld [vmem:[%s6608_s26 + $0x38] sm:$0xff]   ;;  %s7369_s26 = sld [smem:[#allocation25_spill]] }
 0x8c4   : > { %v2136_v22 = vpack.c.bf16 %v2000_v19, %v2000_v19  ;;  %6076 = vmatmul.mubr.msk.bf16.vlgmr.msra.gmra.mrb[36].mxu1 %vm1212_vm5, %v2135_v18  ;;  %v6224_v18 = vld [vmem:[%s7367_s25 + $0x30] sm:$0xff]   ;;  %v6225_v19 = vld [vmem:[%s7367_s25 + $0x38] sm:$0xff]  }
 0x8c5   : > { %6087 = vmatprep.mubr.msk.bf16.mxu1 %vm6454_vm3, %v6453_v14 }
 0x8c6   : > { %6082 = vmatmul.mubr.msk.bf16.vlgmr.msra.gmra.mrb[40].mxu0 %vm1212_vm5, %v2136_v22 }
 0x8c7   : > { %v2128_v24 = vpop.f32.mrb[36].mxu0  ;;  %6093 = vmatprep.mubr.msk.bf16.mxu0 %vm6454_vm3, %v6453_v14 }
 0x8c8   : > { %v2129_v25 = vadd.f32 %v5449_v23, %v2128_v24  ;;  %v6071_v26 = vpop.f32.mrb[37].mxu0 }
 0x8c9   : > { %v2131_v27 = vpop.f32.mrb[38].mxu0 }
 0x8ca   : > { %v2139_v29 = vpack.c.bf16 %v2129_v25, %v2129_v25  ;;  %v2132_v30 = vadd.f32 %v5449_v23, %v2131_v27  ;;  %v6072_v31 = vpop.f32.mrb[39].mxu0 }
 0x8cc   : > { %v2263_v34 = vsel %vm1334_vm6, %v2139_v29, 0  ;;  %v2140_v35 = vpack.c.bf16 %v2132_v30, %v2132_v30 }
 0x8cd   : > { %6086 = vmatpush3.bf16.msra.mxu1 %v2263_v34  ;;  %v5473_v34 = vld [vmem:[%s6623_s24 + $0x3] ss:$0 sm:$0xff] }
 0x8ce   : > { %v2309_v36 = vsel %vm1334_vm6, %v2140_v35, 0  ;;  %6097 = vmatprep.subr.bf16.mxu1 %v6453_v14 }
 0x8cf   : > { %6092 = vmatpush3.bf16.msra.mxu0 %v2309_v36 }
 0x8d0   : > { %6103 = vmatprep.subr.bf16.mxu0 %v6453_v14 }
 0x997   : > { %v2181_v37 = vpop.f32.mrb[36].mxu1 }
 0x998   : > { %v2233_v38 = vmul.f32 0.35355338, %v2181_v37  ;;  %v6077_v39 = vpop.f32.mrb[37].mxu1 }
 0x999   : > { %v2184_v40 = vpop.f32.mrb[38].mxu1  ;;  %v2227_v41 = vpop.f32.mrb[40].mxu0 }
 0x99a   : > { %v2234_v42 = vmul.f32 0.35355338, %v2227_v41  ;;  %v6078_v43 = vpop.f32.mrb[39].mxu1  ;;  %v6083_v44 = vpop.f32.mrb[41].mxu0  ;;  %v2235_v28 = vsel %vm1212_vm5, %v2233_v38, -inf }
 0x99b   : > { %2236 = vmax.xlane.f32.xlu0 %v2235_v28  ;;  %v2230_v32 = vpop.f32.mrb[42].mxu0 }
 0x99c   : > { %v6084_v33 = vpop.f32.mrb[43].mxu0  ;;  %v2238_v45 = vsel %vm1212_vm5, %v2234_v42, -inf }
 0x99d   : > { %2239 = vmax.xlane.f32.xlu1 %v2238_v45  ;;  %v5482_v33 = vld [vmem:[%s6628_s6 + $0x3] ss:$0 sm:$0xff] }
 0xa28   : > { %v2237_v46 = vpop.xlane.xlu0 %2236 }
 0xa29   : > { %v2241_v47 = vsub.f32 %v2233_v38, %v2237_v46  ;;  %v5464_v38 = vld [vmem:[%s7368_s3 + $0x3] ss:$0 sm:$0xff] }
 0xa2a   : > { %v2240_v48 = vpop.xlane.xlu1 %2239 }
 0xa2b   : > { %v2243_v49 = vmul.f32 1.442695, %v2241_v47  ;;  %v2242_v50 = vsub.f32 %v2234_v42, %v2240_v48 }
 0xa2d   : > { %6370 = vpow2.f32 %v2243_v49  ;;  %v2245_v51 = vmul.f32 1.442695, %v2242_v50 }
 0xa2f   : > { %6372 = vpow2.f32 %v2245_v51 }
 0xa37   : > { %v6371_v52 = vpop.eup %6370 }
 0xa38   : > { %v2247_v53 = vsel %vm1212_vm5, %v6371_v52, 0.0 }
 0xa39   : > { %v6373_v54 = vpop.eup %6372  ;;  %2248 = vadd.xlane.f32.xlu0 %v2247_v53 }
 0xa3a   : > { %v2250_v55 = vsel %vm1212_vm5, %v6373_v54, 0.0 }
 0xa3b   : > { %2251 = vadd.xlane.f32.xlu1 %v2250_v55 }
 0xac6   : > { %v2249_v56 = vpop.xlane.xlu0 %2248 }
 0xac7   : > { %6374 = vrcp.f32 %v2249_v56 }
 0xac8   : > { %v2252_v57 = vpop.xlane.xlu1 %2251 }
 0xac9   : > { %6376 = vrcp.f32 %v2252_v57 }
 0xad1   : > { %v6375_v58 = vpop.eup %6374 }
 0xad2   : > { %v2255_v60 = vmul.f32 %v6375_v58, %v6371_v52 }
 0xad3   : > { %v6377_v61 = vpop.eup %6376 }
 0xad4   : > { %v2256_v62 = vmul.f32 %v6377_v61, %v6373_v54  ;;  %v2257_v63 = vpack.c.bf16 %v2255_v60, %v2255_v60 }
 0xad6   : > { %6088 = vmatmul.mubr.msk.bf16.vlgmr.msra.gmra.mrb[40].mxu1 %vm1212_vm5, %v2257_v63  ;;  %v2258_v1 = vpack.c.bf16 %v2256_v62, %v2256_v62 }
 0xad7   : > { %6098 = vmatpush3.bf16.msra.mxu1 %v2358_v0  ;;  %6099 = vmatprep.mubr.msk.bf16.mxu1 %vm6454_vm3, %v6453_v14 }
 0xad8   : > { %6094 = vmatmul.mubr.msk.bf16.vlgmr.msra.gmra.mrb[44].mxu0 %vm1212_vm5, %v2258_v1  ;;  %6111 = vmatprep.subr.bf16.mxu1 %v6453_v14 }
 0xad9   : > { %6107 = vmatprep.mubr.msk.bf16.mxu0 %vm6454_vm3, %v6453_v14  ;;  %6104 = vmatpush3.bf16.msra.mxu0 %v6222_v2 }
 0xada   : > { %6105 = vmatprep.subr.bf16.mxu0 %v6453_v14 }
 0xadd   : > { %6106 = vmatpush3.bf16.msra.mxu0 %v6223_v3 }
 0xade   : > { %6119 = vmatprep.subr.bf16.mxu0 %v6453_v14 }
 0xae0   : > { %6108 = vmatmul.mubr.msk.bf16.vlgmr.msra.gmra.mrb[48].mxu0 %vm1033_vm4, %v6701_v20 }
 0xae1   : > { %6123 = vmatprep.mubr.msk.bf16.mxu0 %vm6454_vm3, %v6453_v14  ;;  %6120 = vmatpush3.bf16.msra.mxu0 %v6224_v18 }
 0xae2   : > { %6121 = vmatprep.subr.bf16.mxu0 %v6453_v14 }
 0xae5   : > { %6122 = vmatpush3.bf16.msra.mxu0 %v6225_v19  ;;  %v5490_v19 = vld [vmem:[%s6638_s28 + $0xc] sm:$0xf]  ;;  %s7370_s28 = scalar_lea.vmem %s7369_s26, %s6596_s4  ;;  %s7371_s4 = sld [smem:[#allocation16_spill]] (!%p5666_p6) }
 0xae6   : > { %6133 = vmatprep.subr.bf16.mxu0 %v6453_v14 }
 0xae8   : > { %6124 = vmatmul.mubr.msk.bf16.vlgmr.msra.gmra.mrb[52].mxu0 %vm1033_vm4, %v6701_v20 }
 0xae9   : > { %6135 = vmatprep.mubr.msk.bf16.mxu0 %vm6454_vm3, %v6453_v14 }
 0xba9   : > { %v2299_v4 = vpop.f32.mrb[40].mxu1 }
 0xbaa   : > { %v6089_v5 = vpop.f32.mrb[41].mxu1 }
 0xbab   : > { %v2302_v6 = vpop.f32.mrb[42].mxu1  ;;  %v2345_v8 = vpop.f32.mrb[44].mxu0 }
 0xbac   : > { %v2351_v11 = vpack.c.bf16 %v2345_v8, %v2299_v4  ;;  %v6090_v12 = vpop.f32.mrb[43].mxu1  ;;  %v6095_v13 = vpop.f32.mrb[45].mxu0 }
 0xbad   : > { %v2348_v15 = vpop.f32.mrb[46].mxu0 }
 0xbae   : > { %v6096_v16 = vpop.f32.mrb[47].mxu0  ;;  %6100 = vmatmul.mubr.msk.bf16.vlgmr.msra.gmra.mrb[44].mxu1 %vm1212_vm5, %v2351_v11 }
 0xbaf   : > { %6112 = vmatpush3.bf16.msra.mxu1 %v6220_v9  ;;  %6115 = vmatprep.mubr.msk.bf16.mxu1 %vm6454_vm3, %v6453_v14 }
 0xbb0   : > { %6113 = vmatprep.subr.bf16.mxu1 %v6453_v14 }
 0xbb3   : > { %6114 = vmatpush3.bf16.msra.mxu1 %v6221_v17  ;;  %v2462_v21 = vpop.f32.mrb[48].mxu0 }
 0xbb4   : > { %6127 = vmatprep.subr.bf16.mxu1 %v6453_v14  ;;  %v6109_v22 = vpop.f32.mrb[49].mxu0  ;;  %v2463_v43 = vadd.f32 %v5464_v38, %v2462_v21 }
 0xbb5   : > { %v2465_v23 = vpop.f32.mrb[50].mxu0 }
 0xbb6   : > { %6116 = vmatmul.mubr.msk.bf16.vlgmr.msra.gmra.mrb[48].mxu1 %vm1033_vm4, %v6701_v20  ;;  %v6110_v24 = vpop.f32.mrb[51].mxu0  ;;  %v2466_v28 = vadd.f32 %v5464_v38, %v2465_v23 }
 0xbb7   : > { %6129 = vmatprep.mubr.msk.bf16.mxu1 %vm6454_vm3, %v6453_v14 }
 0xbb8   : > { %v2602_v32 = vpack.c.bf16 %v2466_v28, %v2466_v28 }
 0xbbb   : > { %v2594_v45 = vpop.f32.mrb[52].mxu0 }
 0xbbc   : > { %v2595_v46 = vadd.f32 %v5482_v33, %v2594_v45  ;;  %v6125_v47 = vpop.f32.mrb[53].mxu0 }
 0xbbd   : > { %v2597_v48 = vpop.f32.mrb[54].mxu0 }
 0xbbe   : > { %v2605_v49 = vpack.c.bf16 %v2595_v46, %v2595_v46  ;;  %v2598_v50 = vadd.f32 %v5482_v33, %v2597_v48  ;;  %v6126_v51 = vpop.f32.mrb[55].mxu0  ;;  %v6395_v46 = vld [vmem:[#allocation2 + $0x8] sm:$0xff] }
 0xbc0   : > { %v2729_v52 = vsel %vm1334_vm6, %v2605_v49, 0  ;;  %v2606_v53 = vpack.c.bf16 %v2598_v50, %v2598_v50 }
 0xbc2   : > { %v2775_v54 = vsel %vm1334_vm6, %v2606_v53, 0 }
 0xc81   : > { %v2394_v25 = vpop.f32.mrb[44].mxu1 }
 0xc82   : > { %v6907_v26 = vadd.f32 %v2394_v25, %v6850_v7  ;;  %v6101_v27 = vpop.f32.mrb[45].mxu1  ;;  %v2824_v25 = vsel %vm1334_vm6, %v5490_v19, 0 }
 0xc83   : > { %v2397_v29 = vpop.f32.mrb[46].mxu1 }
 0xc84   : > { %v6910_v30 = vadd.f32 %v2397_v29, %v6852_v10  ;;  %v6102_v31 = vpop.f32.mrb[47].mxu1  ;;  %v2601_v10 = vpack.c.bf16 %v2463_v43, %v2463_v43 }
 0xc89   : > { %v2528_v20 = vpop.f32.mrb[48].mxu1 }
 0xc8a   : > { %v2529_v35 = vadd.f32 %v5473_v34, %v2528_v20  ;;  %v6117_v36 = vpop.f32.mrb[49].mxu1 }
 0xc8b   : > { %v2531_v37 = vpop.f32.mrb[50].mxu1 }
 0xc8c   : > { %v2603_v39 = vpack.c.bf16 %v2529_v35, %v2529_v35  ;;  %v2532_v40 = vadd.f32 %v5473_v34, %v2531_v37  ;;  %v6118_v41 = vpop.f32.mrb[51].mxu1 }
 0xc8d   : > { %v5492_v41 = vld [vmem:[%s7370_s28] ss:$0 sm:$0xff] }
 0xc8e   : > { %v2611_v42 = vsel %vm1212_vm5, %v2603_v39, 0  ;;  %v2604_v7 = vpack.c.bf16 %v2532_v40, %v2532_v40 }
 0xc8f   : > { %6128 = vmatpush3.bf16.xpose.msra.mxu1 %v2611_v42 }
 0xc90   : > { %v2657_v44 = vsel %vm1212_vm5, %v2604_v7, 0  ;;  %6139 = vmatprep.subr.bf16.mxu1 %v6453_v14 }
 0xc91   : > { %6134 = vmatpush3.bf16.xpose.msra.mxu0 %v2657_v44 }
 0xc92   : > { %6145 = vmatprep.subr.bf16.mxu0 %v6453_v14 }
 0xc96   : > { %6130 = vmatmul.mubr.msk.bf16.vlgmr.msra.gmra.mrb[52].mxu1 %vm1212_vm5, %v2601_v10 }
 0xc97   : > { %6141 = vmatprep.mubr.msk.bf16.mxu1 %vm6454_vm3, %v6453_v14  ;;  %6140 = vmatpush3.bf16.msra.mxu1 %v2729_v52 }
 0xc98   : > { %6136 = vmatmul.mubr.msk.bf16.vlgmr.msra.gmra.mrb[56].mxu0 %vm1212_vm5, %v2602_v32  ;;  %6151 = vmatprep.subr.bf16.mxu1 %v6453_v14  ;;  %v6394_v32 = vld [vmem:[#allocation2] sm:$0xff] }
 0xc99   : > { %6147 = vmatprep.mubr.msk.bf16.mxu0 %vm6454_vm3, %v6453_v14  ;;  %6146 = vmatpush3.bf16.msra.mxu0 %v2775_v54 }
 0xd69   : > { %v2647_v55 = vpop.f32.mrb[52].mxu1 }
 0xd6a   : > { %v2699_v56 = vmul.f32 0.35355338, %v2647_v55  ;;  %v6131_v57 = vpop.f32.mrb[53].mxu1 }
 0xd6b   : > { %v2650_v58 = vpop.f32.mrb[54].mxu1  ;;  %v2693_v59 = vpop.f32.mrb[56].mxu0  ;;  %v2925_v57 = vld [vmem:[%s6644_s1] sm:$0xff] }
 0xd6c   : > { %v2700_v60 = vmul.f32 0.35355338, %v2693_v59  ;;  %v6132_v61 = vpop.f32.mrb[55].mxu1  ;;  %v6137_v62 = vpop.f32.mrb[57].mxu0  ;;  %v2701_v63 = vsel %vm1212_vm5, %v2699_v56, -inf  ;;  %v2933_v58 = vld [vmem:[%s6644_s1 + $0x40] sm:$0xff] }
 0xd6d   : > { %2702 = vmax.xlane.f32.xlu0 %v2701_v63  ;;  %v2696_v0 = vpop.f32.mrb[58].mxu0  ;;  %v2926_v59 = vld [vmem:[%s6644_s1 + $0x8] sm:$0xff]  ;;  %v5495_v62 = vcombine.low %v2925_v57, %v2933_v58 }
 0xd6e   : > { %v6138_v1 = vpop.f32.mrb[59].mxu0  ;;  %v2704_v2 = vsel %vm1212_vm5, %v2700_v60, -inf  ;;  %v2934_v61 = vld [vmem:[%s6644_s1 + $0x48] sm:$0xff] }
 0xd6f   : > { %2705 = vmax.xlane.f32.xlu1 %v2704_v2  ;;  %v5497_v63 = vcombine.low %v2926_v59, %v2934_v61  ;;  %v5498_v0 = vcombine.high %v2926_v59, %v2934_v61  ;;  %v2941_v1 = vld [vmem:[%s6644_s1 + $0x80] sm:$0xff]  ;;  %v2932_v59 = vld [vmem:[%s6644_s1 + $0x38] sm:$0xff] }
 0xd70   : > { %v2949_v2 = vld [vmem:[%s6644_s1 + $0xc0] sm:$0xff] }
 0xdfa   : > { %v2703_v3 = vpop.xlane.xlu0 %2702 }
 0xdfb   : > { %v2707_v4 = vsub.f32 %v2699_v56, %v2703_v3  ;;  %v2942_v3 = vld [vmem:[%s6644_s1 + $0x88] sm:$0xff] }
 0xdfc   : > { %v2706_v5 = vpop.xlane.xlu1 %2705 }
 0xdfd   : > { %v2709_v6 = vmul.f32 1.442695, %v2707_v4  ;;  %v2708_v8 = vsub.f32 %v2700_v60, %v2706_v5  ;;  %v5496_v60 = vcombine.high %v2925_v57, %v2933_v58  ;;  %v5512_v4 = vcombine.high %v2941_v1, %v2949_v2  ;;  %v2950_v5 = vld [vmem:[%s6644_s1 + $0xc8] sm:$0xff]  ;;  %v2931_v57 = vld [vmem:[%s6644_s1 + $0x30] sm:$0xff] }
 0xdfe   : > { %v2939_v58 = vld [vmem:[%s6644_s1 + $0x70] sm:$0xff] }
 0xdff   : > { %6378 = vpow2.f32 %v2709_v6  ;;  %v2711_v9 = vmul.f32 1.442695, %v2708_v8  ;;  %3204 = vmatprep.subr.bf16.mxu0 %v5496_v60  ;;  %v5511_v6 = vcombine.low %v2941_v1, %v2949_v2  ;;  %v5513_v8 = vcombine.low %v2942_v3, %v2950_v5  ;;  %v2940_v60 = vld [vmem:[%s6644_s1 + $0x78] sm:$0xff]  ;;  %v2947_v1 = vld [vmem:[%s6644_s1 + $0xb0] sm:$0xff] }
 0xe00   : > { %v2955_v2 = vld [vmem:[%s6644_s1 + $0xf0] sm:$0xff] }
 0xe01   : > { %6380 = vpow2.f32 %v2711_v9  ;;  %v5514_v9 = vcombine.high %v2942_v3, %v2950_v5  ;;  %v2948_v3 = vld [vmem:[%s6644_s1 + $0xb8] sm:$0xff]  ;;  %v5507_v5 = vcombine.low %v2931_v57, %v2939_v58 }
 0xe09   : > { %v6379_v11 = vpop.eup %6378 }
 0xe0a   : > { %v2713_v12 = vsel %vm1212_vm5, %v6379_v11, 0.0 }
 0xe0b   : > { %v6381_v13 = vpop.eup %6380  ;;  %2714 = vadd.xlane.f32.xlu0 %v2713_v12  ;;  %v2935_v12 = vld [vmem:[%s6644_s1 + $0x50] sm:$0xff] }
 0xe0c   : > { %v2716_v15 = vsel %vm1212_vm5, %v6381_v13, 0.0 }
 0xe0d   : > { %2717 = vadd.xlane.f32.xlu1 %v2716_v15 }
 0xe98   : > { %v2715_v16 = vpop.xlane.xlu0 %2714 }
 0xe99   : > { %6382 = vrcp.f32 %v2715_v16  ;;  %v2936_v16 = vld [vmem:[%s6644_s1 + $0x58] sm:$0xff] }
 0xe9a   : > { %v2718_v17 = vpop.xlane.xlu1 %2717 }
 0xe9b   : > { %6384 = vrcp.f32 %v2718_v17  ;;  %v6455_v17 = vmov 0  }
 0xea3   : > { %v6383_v18 = vpop.eup %6382 }
 0xea4   : > { %v2721_v21 = vmul.f32 %v6383_v18, %v6379_v11  ;;  %v2927_v11 = vld [vmem:[%s6644_s1 + $0x10] sm:$0xff] }
 0xea5   : > { %v6385_v22 = vpop.eup %6384  ;;  %v5500_v15 = vcombine.high %v2927_v11, %v2935_v12  ;;  %v5499_v18 = vcombine.low %v2927_v11, %v2935_v12  ;;  %v5523_v11 = vcombine.low %v2947_v1, %v2955_v2 }
 0xea6   : > { %v2722_v23 = vmul.f32 %v6385_v22, %v6381_v13  ;;  %v2723_v24 = vpack.c.bf16 %v2721_v21, %v2721_v21  ;;  %v2928_v13 = vld [vmem:[%s6644_s1 + $0x18] sm:$0xff] }
 0xea7   : > { %v5501_v19 = vcombine.low %v2928_v13, %v2936_v16  ;;  %v5502_v21 = vcombine.high %v2928_v13, %v2936_v16  ;;  %v6226_v13 = vld [vmem:[%s6659_s21 + $0x40] sm:$0xff]  }
 0xea8   : > { %6142 = vmatmul.mubr.msk.bf16.vlgmr.msra.gmra.mrb[56].mxu1 %vm1212_vm5, %v2723_v24  ;;  %v2724_v27 = vpack.c.bf16 %v2722_v23, %v2722_v23  ;;  %v6228_v16 = vld [vmem:[%s6659_s21] sm:$0xff]  }
 0xea9   : > { %6152 = vmatpush3.bf16.msra.mxu1 %v2824_v25  ;;  %6153 = vmatprep.mubr.msk.bf16.mxu1 %vm6454_vm3, %v6453_v14 }
 0xeaa   : > { %6148 = vmatmul.mubr.msk.bf16.vlgmr.msra.gmra.mrb[60].mxu0 %vm1212_vm5, %v2724_v27  ;;  %3247 = vmatprep.subr.bf16.mxu1 %v5498_v0  ;;  %v5510_v0 = vcombine.high %v2932_v59, %v2940_v60 }
 0xeab   : > { %3205 = vmatpush1.bf16.msra.mxu0 %v5495_v62  ;;  %3236 = vmatprep.mubr.bf16.mxu0 %v6455_v17 }
 0xeac   : > { %3206 = vmatprep.subr.bf16.mxu0 %v5512_v4  ;;  %v2956_v4 = vld [vmem:[%s6644_s1 + $0xf8] sm:$0xff] }
 0xead   : > { %v5525_v12 = vcombine.low %v2948_v3, %v2956_v4 }
 0xeaf   : > { %3207 = vmatpush1.bf16.msra.mxu0 %v5511_v6  ;;  %v5509_v6 = vcombine.low %v2932_v59, %v2940_v60 }
 0xeb0   : > { %3290 = vmatprep.subr.bf16.mxu0 %v5500_v15  ;;  %v6227_v15 = vld [vmem:[%s6659_s21 + $0xc0] sm:$0xff]  }
 0xf7b   : > { %v2765_v29 = vpop.f32.mrb[56].mxu1 }
 0xf7c   : > { %v6143_v31 = vpop.f32.mrb[57].mxu1 }
 0xf7d   : > { %v2768_v34 = vpop.f32.mrb[58].mxu1  ;;  %v2811_v20 = vpop.f32.mrb[60].mxu0 }
 0xf7e   : > { %v2817_v35 = vpack.c.bf16 %v2811_v20, %v2765_v29  ;;  %v6144_v36 = vpop.f32.mrb[59].mxu1  ;;  %v6149_v37 = vpop.f32.mrb[61].mxu0  ;;  %v5493_v34 = vld [vmem:[%s926_s8] ss:$0 sm:$0xff] }
 0xf7f   : > { %v2814_v38 = vpop.f32.mrb[62].mxu0 }
 0xf80   : > { %v6150_v39 = vpop.f32.mrb[63].mxu0  ;;  %6154 = vmatmul.mubr.msk.bf16.vlgmr.msra.gmra.mrb[60].mxu1 %vm1212_vm5, %v2817_v35  ;;  %v5494_v38 = vld [vmem:[%s929_s9] ss:$0 sm:$0xff] }
 0xf81   : > { %3248 = vmatpush1.bf16.msra.mxu1 %v5497_v63  ;;  %3279 = vmatprep.mubr.bf16.mxu1 %v6455_v17  ;;  %v5508_v63 = vcombine.high %v2931_v57, %v2939_v58 }
 0xf82   : > { %3249 = vmatprep.subr.bf16.mxu1 %v5514_v9  ;;  %v5526_v9 = vcombine.high %v2948_v3, %v2956_v4 }
 0xf85   : > { %3250 = vmatpush1.bf16.msra.mxu1 %v5513_v8  ;;  %v5524_v8 = vcombine.high %v2947_v1, %v2955_v2 }
 0xf86   : > { %3333 = vmatprep.subr.bf16.mxu1 %v5502_v21  ;;  %v6231_v21 = vld [vmem:[%s6659_s21 + $0xc8] sm:$0xff]  }
0x1053   : > { %v2860_v40 = vpop.f32.mrb[60].mxu1 }
0x1054   : > { %v2867_v14 = vadd.f32 %v2860_v40, %v6907_v26  ;;  %v6155_v42 = vpop.f32.mrb[61].mxu1  ;;  %v2943_v40 = vld [vmem:[%s6644_s1 + $0x90] sm:$0xff] }
0x1055   : > { %v2863_v7 = vpop.f32.mrb[62].mxu1  ;;  %v2952_v42 = vld [vmem:[%s6644_s1 + $0xd8] sm:$0xff] }
0x1056   : > { %v2876_v43 = vadd.f32 %v5492_v41, %v2867_v14  ;;  %v2868_v44 = vadd.f32 %v2863_v7, %v6910_v30  ;;  %v6156_v10 = vpop.f32.mrb[63].mxu1  ;;  %v2944_v14 = vld [vmem:[%s6644_s1 + $0x98] sm:$0xff] }
0x1058   : > { %v2877_v28 = vadd.f32 %v5492_v41, %v2868_v44  ;;  %v2880_v33 = vadd.f32 %v6394_v32, %v2876_v43  ;;  %v2951_v41 = vld [vmem:[%s6644_s1 + $0xd0] sm:$0xff]  ;;  %v2929_v32 = vld [vmem:[%s6644_s1 + $0x20] sm:$0xff] }
0x1059   : > { %v5516_v10 = vcombine.high %v2943_v40, %v2951_v41 }
0x105a   : > { %v2882_v45 = vsel %vm1033_vm4, %v2880_v33, 0.0  ;;  %v2881_v47 = vadd.f32 %v6395_v46, %v2877_v28  ;;  %v5518_v28 = vcombine.high %v2944_v14, %v2952_v42  ;;  %v2938_v46 = vld [vmem:[%s6644_s1 + $0x68] sm:$0xff] }
0x105b   : > { %2883 = vadd.xlane.f32.xlu0 %v2882_v45  ;;  %v2930_v45 = vld [vmem:[%s6644_s1 + $0x28] sm:$0xff] }
0x105c   : > { %v2885_v48 = vsel %vm1033_vm4, %v2881_v47, 0.0 }
0x105d   : > { %2886 = vadd.xlane.f32.xlu1 %v2885_v48  ;;  %v5517_v48 = vcombine.low %v2944_v14, %v2952_v42  ;;  %v6249_v14 = vld [vmem:[%s6659_s21 + $0xa8] sm:$0xff]   ;;  %v6250_v42 = vld [vmem:[%s6659_s21 + $0x70] sm:$0xff]  }
0x10e8   : > { %v2884_v26 = vpop.xlane.xlu0 %2883 }
0x10e9   : > { %v2888_v49 = vmul.f32 0.03125, %v2884_v26 }
0x10ea   : > { %v2887_v50 = vpop.xlane.xlu1 %2886 }
0x10eb   : > { %v2890_v30 = vsub.f32 %v2880_v33, %v2888_v49  ;;  %v2889_v51 = vmul.f32 0.03125, %v2887_v50  ;;  %v2937_v33 = vld [vmem:[%s6644_s1 + $0x60] sm:$0xff]  ;;  %v5506_v49 = vcombine.high %v2930_v45, %v2938_v46 }
0x10ec   : > { %v5504_v26 = vcombine.high %v2929_v32, %v2937_v33  ;;  %v2945_v50 = vld [vmem:[%s6644_s1 + $0xa0] sm:$0xff] }
0x10ed   : > { %v2891_v52 = vsub.f32 %v2881_v47, %v2889_v51  ;;  %v2892_v53 = vmul.f32 %v2890_v30, %v2890_v30  ;;  %v5515_v47 = vcombine.low %v2943_v40, %v2951_v41  ;;  %v2946_v51 = vld [vmem:[%s6644_s1 + $0xa8] sm:$0xff] }
0x10ee   : > { %v6247_v40 = vld [vmem:[%s6659_s21 + $0xe8] sm:$0xff]  }
0x10ef   : > { %v2894_v54 = vsel %vm1033_vm4, %v2892_v53, 0.0  ;;  %v2893_v55 = vmul.f32 %v2891_v52, %v2891_v52  ;;  %v5503_v53 = vcombine.low %v2929_v32, %v2937_v33  ;;  %v6248_v41 = vld [vmem:[%s6659_s21 + $0x28] sm:$0xff]   ;;  %v6254_v32 = vld [vmem:[%s6659_s21 + $0x78] sm:$0xff]  }
0x10f0   : > { %2895 = vadd.xlane.f32.xlu0 %v2894_v54  ;;  %v5505_v54 = vcombine.low %v2930_v45, %v2938_v46  ;;  %v6255_v33 = vld [vmem:[%s6659_s21 + $0xf8] sm:$0xff]  }
0x10f1   : > { %v2897_v56 = vsel %vm1033_vm4, %v2893_v55, 0.0  ;;  %v6256_v45 = vld [vmem:[%s6659_s21 + $0x38] sm:$0xff]  }
0x10f2   : > { %2898 = vadd.xlane.f32.xlu1 %v2897_v56  ;;  %v6257_v46 = vld [vmem:[%s6659_s21 + $0xb8] sm:$0xff]  }
0x117d   : > { %v2896_v22 = vpop.xlane.xlu0 %2895 }
0x117e   : > { %v2900_v23 = vmul.f32 0.03125, %v2896_v22  ;;  %v6233_v22 = vld [vmem:[%s6659_s21 + $0x88] sm:$0xff]  }
0x117f   : > { %v2899_v24 = vpop.xlane.xlu1 %2898 }
0x1180   : > { %v2902_v25 = vadd.f32 1e-05, %v2900_v23  ;;  %v2901_v27 = vmul.f32 0.03125, %v2899_v24  ;;  %v6234_v23 = vld [vmem:[%s6659_s21 + $0x50] sm:$0xff]  }
0x1181   : > { %v6235_v24 = vld [vmem:[%s6659_s21 + $0xd0] sm:$0xff]  }
0x1182   : > { %6386 = vrsqrt.f32 %v2902_v25  ;;  %v2903_v29 = vadd.f32 1e-05, %v2901_v27  ;;  %v6236_v25 = vld [vmem:[%s6659_s21 + $0x10] sm:$0xff]  }
0x1183   : > { %v6237_v27 = vld [vmem:[%s6659_s21 + $0x90] sm:$0xff]  }
0x1184   : > { %6388 = vrsqrt.f32 %v2903_v29  ;;  %v6238_v29 = vld [vmem:[%s6659_s21 + $0x58] sm:$0xff]  }
0x118c   : > { %v6387_v31 = vpop.eup %6386 }
0x118d   : > { %v2906_v20 = vmul.f32 %v6387_v31, %v2890_v30  ;;  %v2953_v30 = vld [vmem:[%s6644_s1 + $0xe0] sm:$0xff]  ;;  %v6239_v31 = vld [vmem:[%s6659_s21 + $0xd8] sm:$0xff]  }
0x118e   : > { %v6389_v35 = vpop.eup %6388  ;;  %v5520_v55 = vcombine.high %v2945_v50, %v2953_v30  ;;  %v5519_v61 = vcombine.low %v2945_v50, %v2953_v30  ;;  %v7062_v30 = vld [vmem:[%s6649_s5 + $0x8] sm:$0xff] }
0x118f   : > { %v2914_v36 = vmul.f32 %v5493_v34, %v2906_v20  ;;  %v2907_v37 = vmul.f32 %v6389_v35, %v2891_v52  ;;  %v2954_v52 = vld [vmem:[%s6644_s1 + $0xe8] sm:$0xff]  ;;  %v6241_v20 = vld [vmem:[%s6659_s21 + $0x98] sm:$0xff]   ;;  %v6242_v35 = vld [vmem:[%s6659_s21 + $0x60] sm:$0xff]  }
0x1190   : > { %v5522_v56 = vcombine.high %v2946_v51, %v2954_v52  ;;  %v5521_v62 = vcombine.low %v2946_v51, %v2954_v52 }
0x1191   : > { %v2915_v39 = vmul.f32 %v5493_v34, %v2907_v37  ;;  %v6978_v7 = vadd.f32 %v5494_v38, %v2914_v36  ;;  %v6240_v34 = vld [vmem:[%s6659_s21 + $0x18] sm:$0xff]   ;;  %v6243_v36 = vld [vmem:[%s6659_s21 + $0xe0] sm:$0xff]  }
0x1192   : > { %v6244_v37 = vld [vmem:[%s6659_s21 + $0x20] sm:$0xff]  }
0x1193   : > { %v6980_v43 = vadd.f32 %v5494_v38, %v2915_v39  ;;  %v6245_v38 = vld [vmem:[%s6659_s21 + $0xa0] sm:$0xff]   ;;  %v6246_v39 = vld [vmem:[%s6659_s21 + $0x68] sm:$0xff]  }
0x1195   : > { %v6984_v44 = vpack.c.bf16 %v6980_v43, %v6978_v7 }
0x1197   : > { %5527 = vmatmul.mubr.msk.bf16.vlgmr.msra.gmra.mrb[64].mxu0 %vm1033_vm4, %v6984_v44  ;;  %5528 = vmatmul.mubr.msk.bf16.vlgmr.msra.gmra.mrb[64].mxu1 %vm1033_vm4, %v6984_v44 }
0x1198   : > { %3291 = vmatpush1.bf16.msra.mxu0 %v5499_v18  ;;  %3334 = vmatpush1.bf16.msra.mxu1 %v5501_v19  ;;  %v6229_v18 = vld [vmem:[%s6659_s21 + $0x80] sm:$0xff]   ;;  %v6230_v19 = vld [vmem:[%s6659_s21 + $0x48] sm:$0xff]  }
0x1199   : > { %3292 = vmatprep.subr.bf16.mxu0 %v5516_v10  ;;  %3335 = vmatprep.subr.bf16.mxu1 %v5518_v28  ;;  %v6252_v10 = vld [vmem:[%s6659_s21 + $0x30] sm:$0xff]  }
0x119a   : > { %3322 = vmatprep.mubr.bf16.mxu0 %v6455_v17  ;;  %3365 = vmatprep.mubr.bf16.mxu1 %v6455_v17  ;;  %v6253_v28 = vld [vmem:[%s6659_s21 + $0xb0] sm:$0xff]  }
0x119c   : > { %3293 = vmatpush1.bf16.msra.mxu0 %v5515_v47  ;;  %3336 = vmatpush1.bf16.msra.mxu1 %v5517_v48  ;;  %v6258_v47 = vld [vmem:[%s6659_s21 + $0x140] sm:$0xff]  }
0x119d   : > { %3376 = vmatprep.subr.bf16.mxu0 %v5504_v26  ;;  %3419 = vmatprep.subr.bf16.mxu1 %v5506_v49  ;;  %v6259_v48 = vld [vmem:[%s6659_s21 + $0x1c0] sm:$0xff]   ;;  %v2961_v26 = vlaneseq }
0x119f   : > { %5529 = vmatmul.mubr.msk.bf16.vlgmr.msra.gmra.mrb[68].mxu0 %vm1033_vm4, %v6984_v44  ;;  %5530 = vmatmul.mubr.msk.bf16.vlgmr.msra.gmra.mrb[68].mxu1 %vm1033_vm4, %v6984_v44  ;;  %v7058_v49 = vshrl.u32 %v2961_v26, 7 }
0x11a0   : > { %3377 = vmatpush1.bf16.msra.mxu0 %v5503_v53  ;;  %3420 = vmatpush1.bf16.msra.mxu1 %v5505_v54  ;;  %v2957_v54 = vld [vmem:[%s6649_s5] sm:$0xff] }
0x11a1   : > { %3378 = vmatprep.subr.bf16.mxu0 %v5520_v55  ;;  %3421 = vmatprep.subr.bf16.mxu1 %v5522_v56  ;;  %v2987_v50 = vsub.s32 6, %v7058_v49  ;;  %v7068_v52 = vsub.s32 0, %v7058_v49  ;;  %v2971_v53 = vsub.s32 2, %v7058_v49  ;;  %v2967_v55 = vsub.s32 1, %v7058_v49 }
0x11a2   : > { %3408 = vmatprep.mubr.bf16.mxu0 %v6455_v17  ;;  %3451 = vmatprep.mubr.bf16.mxu1 %v6455_v17  ;;  %v2975_v56 = vsub.s32 3, %v7058_v49  ;;  %v2991_v1 = vsub.s32 7, %v7058_v49 }
0x11a3   : > { %v7065_v51 = vrot.slane %v7062_v30, %v2987_v50  ;;  %v2964_v57 = vrot.slane %v2957_v54, %v7068_v52  ;;  %v2972_v58 = vrot.slane %v2957_v54, %v2971_v53  ;;  %v2968_v59 = vrot.slane %v2957_v54, %v2967_v55 }
0x11a4   : > { %3379 = vmatpush1.bf16.msra.mxu0 %v5519_v61  ;;  %3422 = vmatpush1.bf16.msra.mxu1 %v5521_v62  ;;  %v2976_v60 = vrot.slane %v2957_v54, %v2975_v56  ;;  %v2979_v61 = vsub.s32 4, %v7058_v49 }
0x11a5   : > { %3462 = vmatprep.subr.bf16.mxu0 %v5508_v63  ;;  %3505 = vmatprep.subr.bf16.mxu1 %v5510_v0  ;;  %v2983_v0 = vsub.s32 5, %v7058_v49 }
0x11a7   : > { %5531 = vmatmul.mubr.msk.bf16.vlgmr.msra.gmra.mrb[72].mxu0 %vm1033_vm4, %v6984_v44  ;;  %5532 = vmatmul.mubr.msk.bf16.vlgmr.msra.gmra.mrb[72].mxu1 %vm1033_vm4, %v6984_v44 }
0x11a8   : > { %3463 = vmatpush1.bf16.msra.mxu0 %v5507_v5  ;;  %3506 = vmatpush1.bf16.msra.mxu1 %v5509_v6 }
0x11a9   : > { %3464 = vmatprep.subr.bf16.mxu0 %v5524_v8  ;;  %3507 = vmatprep.subr.bf16.mxu1 %v5526_v9 }
0x11aa   : > { %3494 = vmatprep.mubr.bf16.mxu0 %v6455_v17  ;;  %3537 = vmatprep.mubr.bf16.mxu1 %v6455_v17  ;;  %v6232_v17 = vld [vmem:[%s6659_s21 + $0x8] sm:$0xff]  }
0x11ac   : > { %3465 = vmatpush1.bf16.msra.mxu0 %v5523_v11  ;;  %3508 = vmatpush1.bf16.msra.mxu1 %v5525_v12 }
0x11ad   : > { %5757 = vmatprep.subr.bf16.mxu0 %v6226_v13  ;;  %5779 = vmatprep.subr.bf16.mxu1 %v6227_v15 }
0x11af   : > { %5533 = vmatmul.mubr.msk.bf16.vlgmr.msra.gmra.mrb[76].mxu0 %vm1033_vm4, %v6984_v44  ;;  %5534 = vmatmul.mubr.msk.bf16.vlgmr.msra.gmra.mrb[76].mxu1 %vm1033_vm4, %v6984_v44  ;;  %v6251_v44 = vld [vmem:[%s6659_s21 + $0xf0] sm:$0xff]  }
0x11b0   : > { %5758 = vmatpush3.bf16.msra.mxu0 %v6228_v16  ;;  %5780 = vmatpush3.bf16.msra.mxu1 %v6229_v18  ;;  %v2980_v18 = vrot.slane %v2957_v54, %v2979_v61 }
0x11b1   : > { %5759 = vmatprep.subr.bf16.mxu0 %v6230_v19  ;;  %5781 = vmatprep.subr.bf16.mxu1 %v6231_v21  ;;  %v2988_v19 = vrot.slane %v2957_v54, %v2987_v50 }
0x11b4   : > { %5760 = vmatpush3.bf16.msra.mxu0 %v6232_v17  ;;  %5782 = vmatpush3.bf16.msra.mxu1 %v6233_v22  ;;  %v2984_v22 = vrot.slane %v2957_v54, %v2983_v0 }
0x11b5   : > { %5761 = vmatprep.subr.bf16.mxu0 %v6234_v23  ;;  %5783 = vmatprep.subr.bf16.mxu1 %v6235_v24  ;;  %v2992_v23 = vrot.slane %v2957_v54, %v2991_v1  ;;  %v3004_v54 = vrot.slane %v7062_v30, %v2971_v53  ;;  %v3008_v53 = vrot.slane %v7062_v30, %v2975_v56 }
0x11b8   : > { %5762 = vmatpush3.bf16.msra.mxu0 %v6236_v25  ;;  %5784 = vmatpush3.bf16.msra.mxu1 %v6237_v27 }
0x11b9   : > { %5763 = vmatprep.subr.bf16.mxu0 %v6238_v29  ;;  %5785 = vmatprep.subr.bf16.mxu1 %v6239_v31 }
0x11bc   : > { %5764 = vmatpush3.bf16.msra.mxu0 %v6240_v34  ;;  %5786 = vmatpush3.bf16.msra.mxu1 %v6241_v20 }
0x11bd   : > { %5765 = vmatprep.subr.bf16.mxu0 %v6242_v35  ;;  %5787 = vmatprep.subr.bf16.mxu1 %v6243_v36 }
0x11c0   : > { %5766 = vmatpush3.bf16.msra.mxu0 %v6244_v37  ;;  %5788 = vmatpush3.bf16.msra.mxu1 %v6245_v38 }
0x11c1   : > { %5767 = vmatprep.subr.bf16.mxu0 %v6246_v39  ;;  %5789 = vmatprep.subr.bf16.mxu1 %v6247_v40 }
0x11c4   : > { %5768 = vmatpush3.bf16.msra.mxu0 %v6248_v41  ;;  %5790 = vmatpush3.bf16.msra.mxu1 %v6249_v14  ;;  %v6260_v14 = vld [vmem:[%s6659_s21 + $0x100] sm:$0xff]  }
0x11c5   : > { %5769 = vmatprep.subr.bf16.mxu0 %v6250_v42  ;;  %5791 = vmatprep.subr.bf16.mxu1 %v6251_v44  ;;  %v6261_v42 = vld [vmem:[%s6659_s21 + $0x180] sm:$0xff]  }
0x11c8   : > { %5770 = vmatpush3.bf16.msra.mxu0 %v6252_v10  ;;  %5792 = vmatpush3.bf16.msra.mxu1 %v6253_v28 }
0x11c9   : > { %5771 = vmatprep.subr.bf16.mxu0 %v6254_v32  ;;  %5793 = vmatprep.subr.bf16.mxu1 %v6255_v33  ;;  %v6262_v33 = vld [vmem:[%s6659_s21 + $0x148] sm:$0xff]  }
0x11cc   : > { %5772 = vmatpush3.bf16.msra.mxu0 %v6256_v45  ;;  %5794 = vmatpush3.bf16.msra.mxu1 %v6257_v46  ;;  %v6263_v45 = vld [vmem:[%s6659_s21 + $0x1c8] sm:$0xff]   ;;  %v2996_v46 = vrot.slane %v7062_v30, %v7068_v52 }
0x11cd   : > { %5801 = vmatprep.subr.bf16.mxu0 %v6258_v47  ;;  %5823 = vmatprep.subr.bf16.mxu1 %v6259_v48 }
0x126a   : > { %v3238_v62 = vpop.f32.mrb[64].mxu0  ;;  %v3281_v63 = vpop.f32.mrb[64].mxu1 }
0x126b   : > { %v3239_v2 = vadd.f32 %v3238_v62, %v2964_v57  ;;  %v3282_v3 = vadd.f32 %v3281_v63, %v2972_v58  ;;  %v3240_v4 = vpop.f32.mrb[65].mxu0  ;;  %v3283_v5 = vpop.f32.mrb[65].mxu1  ;;  %v3000_v62 = vrot.slane %v7062_v30, %v2967_v55  ;;  %v6267_v55 = vld [vmem:[%s6659_s21 + $0x1d0] sm:$0xff]  }
0x126c   : > { %v3241_v6 = vadd.f32 %v3240_v4, %v2968_v59  ;;  %v3284_v8 = vadd.f32 %v3283_v5, %v2976_v60  ;;  %v3242_v9 = vpop.f32.mrb[66].mxu0  ;;  %v3285_v11 = vpop.f32.mrb[66].mxu1  ;;  %v6265_v4 = vld [vmem:[%s6659_s21 + $0x188] sm:$0xff]  }
0x126d   : > { %v3243_v12 = vadd.f32 %v3242_v9, %v2964_v57  ;;  %v3286_v13 = vadd.f32 %v3285_v11, %v2972_v58  ;;  %v3244_v15 = vpop.f32.mrb[67].mxu0  ;;  %v3287_v16 = vpop.f32.mrb[67].mxu1  ;;  %v3548_v24 = vmax.f32 %v3239_v2, 0.0  ;;  %v3550_v25 = vmax.f32 %v3282_v3, 0.0  ;;  %v6264_v3 = vld [vmem:[%s6659_s21 + $0x108] sm:$0xff]   ;;  %v6266_v11 = vld [vmem:[%s6659_s21 + $0x150] sm:$0xff]  }
0x126e   : > { %v3245_v21 = vadd.f32 %v3244_v15, %v2968_v59  ;;  %v3288_v17 = vadd.f32 %v3287_v16, %v2976_v60  ;;  %v3549_v31 = vmax.f32 %v3241_v6, 0.0  ;;  %v3551_v34 = vmax.f32 %v3284_v8, 0.0 }
0x126f   : > { %v3564_v27 = vmax.f32 %v3243_v12, 0.0  ;;  %v3566_v29 = vmax.f32 %v3286_v13, 0.0 }
0x1270   : > { %v3565_v20 = vmax.f32 %v3245_v21, 0.0  ;;  %v3567_v35 = vmax.f32 %v3288_v17, 0.0 }
0x1271   : > { %v3580_v36 = vpack.c.bf16 %v3564_v27, %v3548_v24  ;;  %v3582_v37 = vpack.c.bf16 %v3566_v29, %v3550_v25  ;;  %v6269_v24 = vld [vmem:[%s6659_s21 + $0x190] sm:$0xff]  }
0x1272   : > { %v3581_v38 = vpack.c.bf16 %v3565_v20, %v3549_v31  ;;  %v3583_v39 = vpack.c.bf16 %v3567_v35, %v3551_v34  ;;  %v3324_v40 = vpop.f32.mrb[68].mxu0  ;;  %v3367_v41 = vpop.f32.mrb[68].mxu1  ;;  %v6270_v34 = vld [vmem:[%s6659_s21 + $0x158] sm:$0xff]  }
0x1273   : > { %v3325_v44 = vadd.f32 %v3324_v40, %v2980_v18  ;;  %v3368_v10 = vadd.f32 %v3367_v41, %v2988_v19  ;;  %v3326_v28 = vpop.f32.mrb[69].mxu0  ;;  %v3369_v32 = vpop.f32.mrb[69].mxu1  ;;  %v6271_v20 = vld [vmem:[%s6659_s21 + $0x1d8] sm:$0xff]  }
0x1274   : > { %v3327_v47 = vadd.f32 %v3326_v28, %v2984_v22  ;;  %v3370_v48 = vadd.f32 %v3369_v32, %v2992_v23  ;;  %v3328_v26 = vpop.f32.mrb[70].mxu0  ;;  %v3371_v50 = vpop.f32.mrb[70].mxu1  ;;  %4659 = vmatprep.mubr.bf16.mxu0 %v3581_v38  ;;  %4700 = vmatprep.mubr.bf16.mxu1 %v3583_v39  ;;  %v6272_v32 = vld [vmem:[%s6659_s21 + $0x118] sm:$0xff]  }
0x1275   : > { %v3329_v57 = vadd.f32 %v3328_v26, %v2980_v18  ;;  %v3372_v58 = vadd.f32 %v3371_v50, %v2988_v19  ;;  %v3330_v59 = vpop.f32.mrb[71].mxu0  ;;  %v3373_v60 = vpop.f32.mrb[71].mxu1  ;;  %4660 = vmatmul.mubr.bf16.vlgmr.msra.gmra.mrb[80].mxu0 %v3580_v36  ;;  %4701 = vmatmul.mubr.bf16.vlgmr.msra.gmra.mrb[80].mxu1 %v3582_v37  ;;  %v3552_v5 = vmax.f32 %v3325_v44, 0.0  ;;  %v3554_v6 = vmax.f32 %v3368_v10, 0.0 }
0x1276   : > { %v3331_v63 = vadd.f32 %v3330_v59, %v2984_v22  ;;  %v3374_v2 = vadd.f32 %v3373_v60, %v2992_v23  ;;  %5802 = vmatpush3.bf16.msra.mxu0 %v6260_v14  ;;  %5824 = vmatpush3.bf16.msra.mxu1 %v6261_v42  ;;  %v3553_v12 = vmax.f32 %v3327_v47, 0.0  ;;  %v3555_v13 = vmax.f32 %v3370_v48, 0.0  ;;  %v6268_v23 = vld [vmem:[%s6659_s21 + $0x110] sm:$0xff]  }
0x1277   : > { %v3568_v8 = vmax.f32 %v3329_v57, 0.0  ;;  %v3570_v9 = vmax.f32 %v3372_v58, 0.0  ;;  %5803 = vmatprep.subr.bf16.mxu0 %v6262_v33  ;;  %5825 = vmatprep.subr.bf16.mxu1 %v6263_v45  ;;  %v3012_v42 = vrot.slane %v7062_v30, %v2979_v61  ;;  %v3016_v44 = vrot.slane %v7062_v30, %v2983_v0  ;;  %v6273_v33 = vld [vmem:[%s6659_s21 + $0x198] sm:$0xff]   ;;  %v6274_v61 = vld [vmem:[%s6659_s21 + $0x160] sm:$0xff]  }
0x1278   : > { %v3569_v15 = vmax.f32 %v3331_v63, 0.0  ;;  %v3571_v16 = vmax.f32 %v3374_v2, 0.0  ;;  %v3024_v45 = vrot.slane %v7062_v30, %v2991_v1  ;;  %v6275_v0 = vld [vmem:[%s6659_s21 + $0x1e0] sm:$0xff]  }
0x1279   : > { %v7105_v18 = vpack.c.bf16 %v3568_v8, %v3552_v5  ;;  %v7107_v19 = vpack.c.bf16 %v3570_v9, %v3554_v6  ;;  %v6276_v63 = vld [vmem:[%s6659_s21 + $0x120] sm:$0xff]   ;;  %v6278_v6 = vld [vmem:[%s6659_s21 + $0x168] sm:$0xff]  }
0x127a   : > { %v3585_v56 = vpack.c.bf16 %v3569_v15, %v3553_v12  ;;  %v3587_v21 = vpack.c.bf16 %v3571_v16, %v3555_v13  ;;  %5804 = vmatpush3.bf16.msra.mxu0 %v6264_v3  ;;  %5826 = vmatpush3.bf16.msra.mxu1 %v6265_v4  ;;  %v3410_v17 = vpop.f32.mrb[72].mxu0  ;;  %v3453_v22 = vpop.f32.mrb[72].mxu1  ;;  %v6277_v2 = vld [vmem:[%s6659_s21 + $0x1a0] sm:$0xff]   ;;  %v6279_v8 = vld [vmem:[%s6659_s21 + $0x1e8] sm:$0xff]  }
0x127b   : > { %v3411_v25 = vadd.f32 %v3410_v17, %v2996_v46  ;;  %v3454_v27 = vadd.f32 %v3453_v22, %v3004_v54  ;;  %v3412_v29 = vpop.f32.mrb[73].mxu0  ;;  %v3455_v31 = vpop.f32.mrb[73].mxu1  ;;  %5805 = vmatprep.subr.bf16.mxu0 %v6266_v11  ;;  %5827 = vmatprep.subr.bf16.mxu1 %v6267_v55  ;;  %v6280_v22 = vld [vmem:[%s6659_s21 + $0x128] sm:$0xff]  }
0x127c   : > { %v3413_v35 = vadd.f32 %v3412_v29, %v3000_v62  ;;  %v3456_v36 = vadd.f32 %v3455_v31, %v3008_v53  ;;  %v3414_v37 = vpop.f32.mrb[74].mxu0  ;;  %v3457_v38 = vpop.f32.mrb[74].mxu1  ;;  %4741 = vmatprep.mubr.bf16.mxu0 %v3585_v56  ;;  %4782 = vmatprep.mubr.bf16.mxu1 %v3587_v21  ;;  %v6282_v31 = vld [vmem:[%s6659_s21 + $0x170] sm:$0xff]  }
0x127d   : > { %v3415_v39 = vadd.f32 %v3414_v37, %v2996_v46  ;;  %v3458_v40 = vadd.f32 %v3457_v38, %v3004_v54  ;;  %v3416_v41 = vpop.f32.mrb[75].mxu0  ;;  %v3459_v14 = vpop.f32.mrb[75].mxu1  ;;  %v3556_v46 = vmax.f32 %v3411_v25, 0.0  ;;  %v3558_v47 = vmax.f32 %v3454_v27, 0.0 }
0x127e   : > { %v3417_v10 = vadd.f32 %v3416_v41, %v3000_v62  ;;  %v3460_v28 = vadd.f32 %v3459_v14, %v3008_v53  ;;  %5806 = vmatpush3.bf16.msra.mxu0 %v6268_v23  ;;  %5828 = vmatpush3.bf16.msra.mxu1 %v6269_v24  ;;  %v3557_v50 = vmax.f32 %v3413_v35, 0.0  ;;  %v3559_v54 = vmax.f32 %v3456_v36, 0.0  ;;  %v6281_v23 = vld [vmem:[%s6659_s21 + $0x1a8] sm:$0xff]   ;;  %v6284_v41 = vld [vmem:[%s6659_s21 + $0x130] sm:$0xff]  }
0x127f   : > { %v3572_v48 = vmax.f32 %v3415_v39, 0.0  ;;  %v3574_v26 = vmax.f32 %v3458_v40, 0.0  ;;  %5807 = vmatprep.subr.bf16.mxu0 %v6270_v34  ;;  %5829 = vmatprep.subr.bf16.mxu1 %v6271_v20  ;;  %v6285_v14 = vld [vmem:[%s6659_s21 + $0x1b0] sm:$0xff]  }
0x1280   : > { %v3573_v57 = vmax.f32 %v3417_v10, 0.0  ;;  %v3575_v58 = vmax.f32 %v3460_v28, 0.0  ;;  %v6288_v10 = vld [vmem:[%s6659_s21 + $0x138] sm:$0xff]  }
0x1281   : > { %v7126_v59 = vpack.c.bf16 %v3572_v48, %v3556_v46  ;;  %v7128_v49 = vpack.c.bf16 %v3574_v26, %v3558_v47  ;;  %v6289_v28 = vld [vmem:[%s6659_s21 + $0x1b8] sm:$0xff]   ;;  %v6293_v46 = vld [vmem:[%s6659_s21 + $0x280] sm:$0xff]   ;;  %v6294_v47 = vld [vmem:[%s6659_s21 + $0x248] sm:$0xff]  }
0x1282   : > { %v7130_v30 = vpack.c.bf16 %v3573_v57, %v3557_v50  ;;  %v7132_v1 = vpack.c.bf16 %v3575_v58, %v3559_v54  ;;  %5808 = vmatpush3.bf16.msra.mxu0 %v6272_v32  ;;  %5830 = vmatpush3.bf16.msra.mxu1 %v6273_v33  ;;  %v3496_v60 = vpop.f32.mrb[76].mxu0  ;;  %v3539_v62 = vpop.f32.mrb[76].mxu1  ;;  %v6290_v32 = vld [vmem:[%s6659_s21 + $0x240] sm:$0xff]   ;;  %v6295_v48 = vld [vmem:[%s6659_s21 + $0x2c8] sm:$0xff]   ;;  %v6301_v50 = vld [vmem:[%s6659_s21 + $0x290] sm:$0xff]  }
0x1283   : > { %v3497_v3 = vadd.f32 %v3496_v60, %v3012_v42  ;;  %v3540_v4 = vadd.f32 %v3539_v62, %v7065_v51  ;;  %v3498_v53 = vpop.f32.mrb[77].mxu0  ;;  %v3541_v5 = vpop.f32.mrb[77].mxu1  ;;  %5809 = vmatprep.subr.bf16.mxu0 %v6274_v61  ;;  %5831 = vmatprep.subr.bf16.mxu1 %v6275_v0  ;;  %v6291_v33 = vld [vmem:[%s6659_s21 + $0x2c0] sm:$0xff]   ;;  %v6296_v26 = vld [vmem:[%s6659_s21 + $0x208] sm:$0xff]   ;;  %v6298_v0 = vld [vmem:[%s6659_s21 + $0x250] sm:$0xff]  }
0x1284   : > { %v3499_v9 = vadd.f32 %v3498_v53, %v3016_v44  ;;  %v3542_v11 = vadd.f32 %v3541_v5, %v3024_v45  ;;  %v3500_v55 = vpop.f32.mrb[78].mxu0  ;;  %v3543_v12 = vpop.f32.mrb[78].mxu1  ;;  %v6297_v61 = vld [vmem:[%s6659_s21 + $0x288] sm:$0xff]   ;;  %v6302_v54 = vld [vmem:[%s6659_s21 + $0x258] sm:$0xff]   ;;  %v6307_v60 = vld [vmem:[%s6659_s21 + $0x2e0] sm:$0xff]  }
0x1285   : > { %v3501_v13 = vadd.f32 %v3500_v55, %v3012_v42  ;;  %v3544_v15 = vadd.f32 %v3543_v12, %v7065_v51  ;;  %v3502_v16 = vpop.f32.mrb[79].mxu0  ;;  %v3545_v56 = vpop.f32.mrb[79].mxu1  ;;  %v3560_v24 = vmax.f32 %v3497_v3, 0.0  ;;  %v3562_v25 = vmax.f32 %v3540_v4, 0.0  ;;  %v6283_v51 = vld [vmem:[%s6659_s21 + $0x1f0] sm:$0xff]   ;;  %v6286_v42 = vld [vmem:[%s6659_s21 + $0x178] sm:$0xff]  }
0x1286   : > { %v3503_v21 = vadd.f32 %v3502_v16, %v3016_v44  ;;  %v3546_v17 = vadd.f32 %v3545_v56, %v3024_v45  ;;  %5810 = vmatpush3.bf16.msra.mxu0 %v6276_v63  ;;  %5832 = vmatpush3.bf16.msra.mxu1 %v6277_v2  ;;  %v3561_v34 = vmax.f32 %v3499_v9, 0.0  ;;  %v3563_v20 = vmax.f32 %v3542_v11, 0.0  ;;  %v6287_v44 = vld [vmem:[%s6659_s21 + $0x1f8] sm:$0xff]   ;;  %v6292_v45 = vld [vmem:[%s6659_s21 + $0x200] sm:$0xff]   ;;  %v6310_v2 = vld [vmem:[%s6659_s21 + $0x268] sm:$0xff]  }
0x1287   : > { %v3576_v27 = vmax.f32 %v3501_v13, 0.0  ;;  %v3578_v29 = vmax.f32 %v3544_v15, 0.0  ;;  %5811 = vmatprep.subr.bf16.mxu0 %v6278_v6  ;;  %5833 = vmatprep.subr.bf16.mxu1 %v6279_v8  ;;  %v6303_v57 = vld [vmem:[%s6659_s21 + $0x2d8] sm:$0xff]   ;;  %v6308_v62 = vld [vmem:[%s6659_s21 + $0x220] sm:$0xff]   ;;  %v6311_v3 = vld [vmem:[%s6659_s21 + $0x2e8] sm:$0xff]  }
0x1288   : > { %v3577_v35 = vmax.f32 %v3503_v21, 0.0  ;;  %v3579_v36 = vmax.f32 %v3546_v17, 0.0  ;;  %v6304_v58 = vld [vmem:[%s6659_s21 + $0x218] sm:$0xff]   ;;  %v6309_v63 = vld [vmem:[%s6659_s21 + $0x2a0] sm:$0xff]   ;;  %v6312_v4 = vld [vmem:[%s6659_s21 + $0x228] sm:$0xff]  }
0x1289   : > { %v7144_v37 = vpack.c.bf16 %v3576_v27, %v3560_v24  ;;  %v7146_v38 = vpack.c.bf16 %v3578_v29, %v3562_v25  ;;  %v6313_v53 = vld [vmem:[%s6659_s21 + $0x2a8] sm:$0xff]   ;;  %v6314_v5 = vld [vmem:[%s6659_s21 + $0x270] sm:$0xff]   ;;  %v6318_v11 = vld [vmem:[%s6659_s21 + $0x278] sm:$0xff]  }
0x128a   : > { %v7148_v39 = vpack.c.bf16 %v3577_v35, %v3561_v34  ;;  %v7150_v40 = vpack.c.bf16 %v3579_v36, %v3563_v20  ;;  %5812 = vmatpush3.bf16.msra.mxu0 %v6280_v22  ;;  %5834 = vmatpush3.bf16.msra.mxu1 %v6281_v23  ;;  %v6315_v6 = vld [vmem:[%s6659_s21 + $0x2f0] sm:$0xff]   ;;  %v6319_v55 = vld [vmem:[%s6659_s21 + $0x2f8] sm:$0xff]   ;;  %v6322_v15 = vld [vmem:[%s6659_s21 + $0x340] sm:$0xff]  }
0x128b   : > { %5813 = vmatprep.subr.bf16.mxu0 %v6282_v31  ;;  %5835 = vmatprep.subr.bf16.mxu1 %v6283_v51  ;;  %v6316_v8 = vld [vmem:[%s6659_s21 + $0x230] sm:$0xff]   ;;  %v6320_v12 = vld [vmem:[%s6659_s21 + $0x238] sm:$0xff]   ;;  %v6323_v16 = vld [vmem:[%s6659_s21 + $0x3c0] sm:$0xff]  }
0x128c   : > { %v6317_v9 = vld [vmem:[%s6659_s21 + $0x2b0] sm:$0xff]   ;;  %v6321_v13 = vld [vmem:[%s6659_s21 + $0x2b8] sm:$0xff]   ;;  %v6324_v56 = vld [vmem:[%s6659_s21 + $0x300] sm:$0xff]  }
0x128d   : > { %v6325_v21 = vld [vmem:[%s6659_s21 + $0x380] sm:$0xff]   ;;  %v6326_v17 = vld [vmem:[%s6659_s21 + $0x348] sm:$0xff]   ;;  %v6330_v25 = vld [vmem:[%s6659_s21 + $0x350] sm:$0xff]  }
0x128e   : > { %5814 = vmatpush3.bf16.msra.mxu0 %v6284_v41  ;;  %5836 = vmatpush3.bf16.msra.mxu1 %v6285_v14  ;;  %v6327_v22 = vld [vmem:[%s6659_s21 + $0x3c8] sm:$0xff]   ;;  %v6333_v27 = vld [vmem:[%s6659_s21 + $0x390] sm:$0xff]   ;;  %v6334_v29 = vld [vmem:[%s6659_s21 + $0x358] sm:$0xff]  }
0x128f   : > { %5815 = vmatprep.subr.bf16.mxu0 %v6286_v42  ;;  %5837 = vmatprep.subr.bf16.mxu1 %v6287_v44  ;;  %v6328_v23 = vld [vmem:[%s6659_s21 + $0x308] sm:$0xff]   ;;  %v6335_v31 = vld [vmem:[%s6659_s21 + $0x3d8] sm:$0xff]   ;;  %v6338_v20 = vld [vmem:[%s6659_s21 + $0x360] sm:$0xff]  }
0x1290   : > { %v6329_v24 = vld [vmem:[%s6659_s21 + $0x388] sm:$0xff]   ;;  %v6336_v51 = vld [vmem:[%s6659_s21 + $0x318] sm:$0xff]   ;;  %v6339_v35 = vld [vmem:[%s6659_s21 + $0x3e0] sm:$0xff]  }
0x1291   : > { %v6337_v34 = vld [vmem:[%s6659_s21 + $0x398] sm:$0xff]   ;;  %v6340_v36 = vld [vmem:[%s6659_s21 + $0x320] sm:$0xff]   ;;  %v6343_v41 = vld [vmem:[%s6659_s21 + $0x3e8] sm:$0xff]  }
0x1292   : > { %5816 = vmatpush3.bf16.msra.mxu0 %v6288_v10  ;;  %5838 = vmatpush3.bf16.msra.mxu1 %v6289_v28  ;;  %v6344_v14 = vld [vmem:[%s6659_s21 + $0x328] sm:$0xff]   ;;  %v6346_v44 = vld [vmem:[%s6659_s21 + $0x370] sm:$0xff]  }
0x1293   : > { %5845 = vmatprep.subr.bf16.mxu0 %v6290_v32  ;;  %5867 = vmatprep.subr.bf16.mxu1 %v6291_v33  ;;  %v6345_v42 = vld [vmem:[%s6659_s21 + $0x3a8] sm:$0xff]   ;;  %v6347_v10 = vld [vmem:[%s6659_s21 + $0x3f0] sm:$0xff]   ;;  %v6350_v33 = vld [vmem:[%s6659_s21 + $0x378] sm:$0xff]  }
0x1294   : > { %v6348_v28 = vld [vmem:[%s6659_s21 + $0x330] sm:$0xff]  }
0x1295   : > { %4742 = vmatmul.mubr.bf16.vlgmr.msra.gmra.mrb[84].mxu0 %v7105_v18  ;;  %4783 = vmatmul.mubr.bf16.vlgmr.msra.gmra.mrb[84].mxu1 %v7107_v19  ;;  %v6299_v18 = vld [vmem:[%s6659_s21 + $0x2d0] sm:$0xff]  }
0x1296   : > { %5846 = vmatpush3.bf16.msra.mxu0 %v6292_v45  ;;  %4823 = vmatprep.mubr.bf16.mxu0 %v7130_v30  ;;  %v6300_v19 = vld [vmem:[%s6659_s21 + $0x210] sm:$0xff]   ;;  %v6305_v30 = vld [vmem:[%s6659_s21 + $0x298] sm:$0xff]  }
0x1297   : > { %5868 = vmatpush3.bf16.msra.mxu1 %v6293_v46  ;;  %4864 = vmatprep.mubr.bf16.mxu1 %v7132_v1  ;;  %v6306_v1 = vld [vmem:[%s6659_s21 + $0x260] sm:$0xff]   ;;  %v6349_v32 = vld [vmem:[%s6659_s21 + $0x3b0] sm:$0xff]   ;;  %v6351_v45 = vld [vmem:[%s6659_s21 + $0x3f8] sm:$0xff]  }
0x1298   : > { %5847 = vmatprep.subr.bf16.mxu0 %v6294_v47  ;;  %5869 = vmatprep.subr.bf16.mxu1 %v6295_v48  ;;  %v6352_v46 = vld [vmem:[%s6659_s21 + $0x338] sm:$0xff]  }
0x1299   : > { %v6353_v47 = vld [vmem:[%s6659_s21 + $0x3b8] sm:$0xff]  }
0x129a   : > { %5848 = vmatpush3.bf16.msra.mxu0 %v6296_v26 }
0x129b   : > { %5870 = vmatpush3.bf16.msra.mxu1 %v6297_v61  ;;  %5849 = vmatprep.subr.bf16.mxu0 %v6298_v0  ;;  %v5535_v61 = vld [vmem:[%s923_s30] ss:$0 sm:$0xff] }
0x129c   : > { %5871 = vmatprep.subr.bf16.mxu1 %v6299_v18 }
0x129e   : > { %5850 = vmatpush3.bf16.msra.mxu0 %v6300_v19 }
0x129f   : > { %5872 = vmatpush3.bf16.msra.mxu1 %v6301_v50  ;;  %5851 = vmatprep.subr.bf16.mxu0 %v6302_v54 }
0x12a0   : > { %5873 = vmatprep.subr.bf16.mxu1 %v6303_v57 }
0x12a2   : > { %5852 = vmatpush3.bf16.msra.mxu0 %v6304_v58 }
0x12a3   : > { %5874 = vmatpush3.bf16.msra.mxu1 %v6305_v30  ;;  %5853 = vmatprep.subr.bf16.mxu0 %v6306_v1 }
0x12a4   : > { %5875 = vmatprep.subr.bf16.mxu1 %v6307_v60 }
0x12a6   : > { %5854 = vmatpush3.bf16.msra.mxu0 %v6308_v62 }
0x12a7   : > { %5876 = vmatpush3.bf16.msra.mxu1 %v6309_v63  ;;  %5855 = vmatprep.subr.bf16.mxu0 %v6310_v2 }
0x12a8   : > { %5877 = vmatprep.subr.bf16.mxu1 %v6311_v3 }
0x12aa   : > { %5856 = vmatpush3.bf16.msra.mxu0 %v6312_v4 }
0x12ab   : > { %5878 = vmatpush3.bf16.msra.mxu1 %v6313_v53  ;;  %5857 = vmatprep.subr.bf16.mxu0 %v6314_v5 }
0x12ac   : > { %5879 = vmatprep.subr.bf16.mxu1 %v6315_v6 }
0x12ae   : > { %5858 = vmatpush3.bf16.msra.mxu0 %v6316_v8 }
0x12af   : > { %5880 = vmatpush3.bf16.msra.mxu1 %v6317_v9  ;;  %5859 = vmatprep.subr.bf16.mxu0 %v6318_v11 }
0x12b0   : > { %5881 = vmatprep.subr.bf16.mxu1 %v6319_v55 }
0x12b2   : > { %5860 = vmatpush3.bf16.msra.mxu0 %v6320_v12 }
0x12b3   : > { %5882 = vmatpush3.bf16.msra.mxu1 %v6321_v13  ;;  %5889 = vmatprep.subr.bf16.mxu0 %v6322_v15 }
0x12b4   : > { %5911 = vmatprep.subr.bf16.mxu1 %v6323_v16 }
0x12b5   : > { %4824 = vmatmul.mubr.bf16.vlgmr.msra.gmra.mrb[88].mxu0 %v7126_v59  ;;  %v6331_v59 = vld [vmem:[%s6659_s21 + $0x3d0] sm:$0xff]  }
0x12b6   : > { %4865 = vmatmul.mubr.bf16.vlgmr.msra.gmra.mrb[88].mxu1 %v7128_v49  ;;  %5890 = vmatpush3.bf16.msra.mxu0 %v6324_v56  ;;  %v6332_v49 = vld [vmem:[%s6659_s21 + $0x310] sm:$0xff]  }
0x12b7   : > { %4905 = vmatprep.mubr.bf16.mxu0 %v7148_v39  ;;  %5912 = vmatpush3.bf16.msra.mxu1 %v6325_v21  ;;  %v6341_v39 = vld [vmem:[%s6659_s21 + $0x3a0] sm:$0xff]  }
0x12b8   : > { %4946 = vmatprep.mubr.bf16.mxu1 %v7150_v40  ;;  %5891 = vmatprep.subr.bf16.mxu0 %v6326_v17  ;;  %v6342_v40 = vld [vmem:[%s6659_s21 + $0x368] sm:$0xff]  }
0x12b9   : > { %5913 = vmatprep.subr.bf16.mxu1 %v6327_v22 }
0x12ba   : > { %5892 = vmatpush3.bf16.msra.mxu0 %v6328_v23 }
0x12bb   : > { %5914 = vmatpush3.bf16.msra.mxu1 %v6329_v24  ;;  %5893 = vmatprep.subr.bf16.mxu0 %v6330_v25 }
0x12bc   : > { %5915 = vmatprep.subr.bf16.mxu1 %v6331_v59 }
0x12be   : > { %5894 = vmatpush3.bf16.msra.mxu0 %v6332_v49 }
0x12bf   : > { %5916 = vmatpush3.bf16.msra.mxu1 %v6333_v27  ;;  %5895 = vmatprep.subr.bf16.mxu0 %v6334_v29 }
0x12c0   : > { %5917 = vmatprep.subr.bf16.mxu1 %v6335_v31 }
0x12c2   : > { %5896 = vmatpush3.bf16.msra.mxu0 %v6336_v51 }
0x12c3   : > { %5918 = vmatpush3.bf16.msra.mxu1 %v6337_v34  ;;  %5897 = vmatprep.subr.bf16.mxu0 %v6338_v20 }
0x12c4   : > { %5919 = vmatprep.subr.bf16.mxu1 %v6339_v35 }
0x12c6   : > { %5898 = vmatpush3.bf16.msra.mxu0 %v6340_v36 }
0x12c7   : > { %5920 = vmatpush3.bf16.msra.mxu1 %v6341_v39  ;;  %5899 = vmatprep.subr.bf16.mxu0 %v6342_v40 }
0x12c8   : > { %5921 = vmatprep.subr.bf16.mxu1 %v6343_v41 }
0x12ca   : > { %5900 = vmatpush3.bf16.msra.mxu0 %v6344_v14 }
0x12cb   : > { %5922 = vmatpush3.bf16.msra.mxu1 %v6345_v42  ;;  %5901 = vmatprep.subr.bf16.mxu0 %v6346_v44 }
0x12cc   : > { %5923 = vmatprep.subr.bf16.mxu1 %v6347_v10 }
0x12ce   : > { %5902 = vmatpush3.bf16.msra.mxu0 %v6348_v28 }
0x12cf   : > { %5924 = vmatpush3.bf16.msra.mxu1 %v6349_v32  ;;  %5903 = vmatprep.subr.bf16.mxu0 %v6350_v33 }
0x12d0   : > { %5925 = vmatprep.subr.bf16.mxu1 %v6351_v45 }
0x12d2   : > { %5904 = vmatpush3.bf16.msra.mxu0 %v6352_v46 }
0x12d3   : > { %5926 = vmatpush3.bf16.msra.mxu1 %v6353_v47 }
0x12d5   : > { %4906 = vmatmul.mubr.bf16.vlgmr.msra.gmra.mrb[92].mxu0 %v7144_v37 }
0x12d6   : > { %4947 = vmatmul.mubr.bf16.vlgmr.msra.gmra.mrb[92].mxu1 %v7146_v38 }
0x1348   : > { %v5773_v48 = vpop.f32.mrb[80].mxu0  ;;  %v5795_v26 = vpop.f32.mrb[80].mxu1 }
0x1349   : > { %v5774_v0 = vpop.f32.mrb[81].mxu0  ;;  %v5796_v18 = vpop.f32.mrb[81].mxu1 }
0x134a   : > { %v5775_v19 = vadd.f32 %v5774_v0, %v5773_v48  ;;  %v5797_v50 = vadd.f32 %v5796_v18, %v5795_v26  ;;  %v5776_v54 = vpop.f32.mrb[82].mxu0  ;;  %v5798_v57 = vpop.f32.mrb[82].mxu1 }
0x134b   : > { %v5777_v58 = vpop.f32.mrb[83].mxu0  ;;  %v5799_v30 = vpop.f32.mrb[83].mxu1 }
0x134c   : > { %v4662_v1 = vadd.f32 %v5775_v19, %v5535_v61  ;;  %v5778_v60 = vadd.f32 %v5777_v58, %v5776_v54  ;;  %v5800_v37 = vadd.f32 %v5799_v30, %v5798_v57 }
0x134e   : > { %v4703_v62 = vadd.f32 %v5797_v50, %v4662_v1  ;;  %v4665_v38 = vadd.f32 %v5778_v60, %v5535_v61 }
0x1350   : > { %v4706_v63 = vadd.f32 %v5800_v37, %v4665_v38 }
0x1368   : > { %v5817_v2 = vpop.f32.mrb[84].mxu0  ;;  %v5839_v3 = vpop.f32.mrb[84].mxu1 }
0x1369   : > { %v5818_v4 = vpop.f32.mrb[85].mxu0  ;;  %v5840_v53 = vpop.f32.mrb[85].mxu1 }
0x136a   : > { %v5819_v5 = vadd.f32 %v5818_v4, %v5817_v2  ;;  %v5841_v6 = vadd.f32 %v5840_v53, %v5839_v3  ;;  %v5820_v8 = vpop.f32.mrb[86].mxu0  ;;  %v5842_v9 = vpop.f32.mrb[86].mxu1 }
0x136b   : > { %v5821_v11 = vpop.f32.mrb[87].mxu0  ;;  %v5843_v55 = vpop.f32.mrb[87].mxu1 }
0x136c   : > { %v4744_v12 = vadd.f32 %v5819_v5, %v4703_v62  ;;  %v5822_v13 = vadd.f32 %v5821_v11, %v5820_v8  ;;  %v5844_v15 = vadd.f32 %v5843_v55, %v5842_v9  ;;  %v5664_v8 = vld [vmem:[%s932_s13] ss:$0 sm:$0xff] }
0x136d   : > { %v5665_v55 = vld [vmem:[%s935_s0] ss:$0 sm:$0xff] }
0x136e   : > { %v4785_v16 = vadd.f32 %v5841_v6, %v4744_v12  ;;  %v4747_v56 = vadd.f32 %v5822_v13, %v4706_v63 }
0x1370   : > { %v4788_v21 = vadd.f32 %v5844_v15, %v4747_v56 }
0x1388   : > { %v5861_v17 = vpop.f32.mrb[88].mxu0 }
0x1389   : > { %v5883_v22 = vpop.f32.mrb[88].mxu1  ;;  %v5862_v23 = vpop.f32.mrb[89].mxu0 }
0x138a   : > { %v5863_v24 = vadd.f32 %v5862_v23, %v5861_v17  ;;  %v5884_v25 = vpop.f32.mrb[89].mxu1  ;;  %v5864_v59 = vpop.f32.mrb[90].mxu0 }
0x138b   : > { %v5885_v49 = vadd.f32 %v5884_v25, %v5883_v22  ;;  %v5886_v27 = vpop.f32.mrb[90].mxu1  ;;  %v5865_v29 = vpop.f32.mrb[91].mxu0  ;;  %v6456_v22 = vmov (!%p5666_p6), 0.0   ;;  %v5024_v25 = vld [vmem:[#allocation3] sm:$0x1] (!%p5666_p6) }
0x138c   : > { %v4826_v31 = vadd.f32 %v5863_v24, %v4785_v16  ;;  %v5866_v51 = vadd.f32 %v5865_v29, %v5864_v59  ;;  %v5887_v34 = vpop.f32.mrb[91].mxu1  ;;  %6157 = vmatprep.subr.mxu0 (!%p5666_p6), %v6456_v22  ;;  %6159 = vmatprep.mubr.msk.f32.mxu0 (!%p5666_p6), %vm6457_vm7, %v6456_v22  ;;  %v6458_v59 = vmov (!%p5666_p6), 0  }
0x138d   : > { %v5888_v20 = vadd.f32 %v5887_v34, %v5886_v27  ;;  %6396 = vset.pattern.permute.xlu0 (!%p5666_p6), %v6458_v59 }
0x138e   : > { %v4867_v35 = vadd.f32 %v5885_v49, %v4826_v31  ;;  %v4829_v36 = vadd.f32 %v5866_v51, %v4788_v21 }
0x1390   : > { %v4870_v39 = vadd.f32 %v5888_v20, %v4829_v36 }
0x13a8   : > { %v5905_v40 = vpop.f32.mrb[92].mxu0 }
0x13a9   : > { %v5927_v41 = vpop.f32.mrb[92].mxu1  ;;  %v5906_v14 = vpop.f32.mrb[93].mxu0 }
0x13aa   : > { %v5907_v42 = vadd.f32 %v5906_v14, %v5905_v40  ;;  %v5928_v44 = vpop.f32.mrb[93].mxu1  ;;  %v5908_v10 = vpop.f32.mrb[94].mxu0 }
0x13ab   : > { %v5929_v28 = vadd.f32 %v5928_v44, %v5927_v41  ;;  %v5930_v32 = vpop.f32.mrb[94].mxu1  ;;  %v5909_v33 = vpop.f32.mrb[95].mxu0 }
0x13ac   : > { %v4908_v45 = vadd.f32 %v5907_v42, %v4867_v35  ;;  %v5910_v46 = vadd.f32 %v5909_v33, %v5908_v10  ;;  %v5931_v47 = vpop.f32.mrb[95].mxu1  ;;  %v5023_v42 = vld [vmem:[%s7371_s4] sm:$0x1] (!%p5666_p6) }
0x13ad   : > { %v5932_v48 = vadd.f32 %v5931_v47, %v5930_v32 }
0x13ae   : > { %v4949_v26 = vadd.f32 %v5929_v28, %v4908_v45  ;;  %v4911_v61 = vadd.f32 %v5910_v46, %v4870_v39 }
0x13b0   : > { %v4952_v0 = vadd.f32 %v5932_v48, %v4911_v61  ;;  %v4957_v18 = vadd.f32 %v4949_v26, %v6978_v7 }
0x13b2   : > { %v4959_v19 = vsel %vm1033_vm4, %v4957_v18, 0.0  ;;  %v4958_v50 = vadd.f32 %v4952_v0, %v6980_v43 }
0x13b3   : > { %4960 = vadd.xlane.f32.xlu0 %v4959_v19 }
0x13b4   : > { %v4962_v54 = vsel %vm1033_vm4, %v4958_v50, 0.0 }
0x13b5   : > { %4963 = vadd.xlane.f32.xlu1 %v4962_v54 }
0x1440   : > { %v4961_v57 = vpop.xlane.xlu0 %4960 }
0x1441   : > { %v4965_v58 = vmul.f32 0.03125, %v4961_v57 }
0x1442   : > { %v4964_v30 = vpop.xlane.xlu1 %4963 }
0x1443   : > { %v4967_v1 = vsub.f32 %v4957_v18, %v4965_v58  ;;  %v4966_v60 = vmul.f32 0.03125, %v4964_v30 }
0x1445   : > { %v4968_v37 = vsub.f32 %v4958_v50, %v4966_v60  ;;  %v4969_v62 = vmul.f32 %v4967_v1, %v4967_v1 }
0x1447   : > { %v4971_v38 = vsel %vm1033_vm4, %v4969_v62, 0.0  ;;  %v4970_v63 = vmul.f32 %v4968_v37, %v4968_v37 }
0x1448   : > { %4972 = vadd.xlane.f32.xlu0 %v4971_v38 }
0x1449   : > { %v4974_v7 = vsel %vm1033_vm4, %v4970_v63, 0.0 }
0x144a   : > { %4975 = vadd.xlane.f32.xlu1 %v4974_v7 }
0x145e   : > { %5027 = vperm.xlu0 (!%p5666_p6), %6396, %v5024_v25  }
0x14d5   : > { %v4973_v43 = vpop.xlane.xlu0 %4972 }
0x14d6   : > { %v4977_v2 = vmul.f32 0.03125, %v4973_v43 }
0x14d7   : > { %v4976_v3 = vpop.xlane.xlu1 %4975 }
0x14d8   : > { %v4979_v4 = vadd.f32 1e-05, %v4977_v2  ;;  %v4978_v53 = vmul.f32 0.03125, %v4976_v3 }
0x14da   : > { %6390 = vrsqrt.f32 %v4979_v4  ;;  %v4980_v5 = vadd.f32 1e-05, %v4978_v53 }
0x14dc   : > { %6392 = vrsqrt.f32 %v4980_v5 }
0x14dd   : > { %v5028_v44 = vpop.permute.xlu0 (!%p5666_p6), %5027 }
0x14de   : > { %v5033_v10 = vrot.slane (!%p5666_p6), %v5028_v44, %v7068_v52 }
0x14e4   : > { %v6391_v6 = vpop.eup %6390 }
0x14e5   : > { %v4983_v9 = vmul.f32 %v6391_v6, %v4967_v1 }
0x14e6   : > { %v6393_v11 = vpop.eup %6392 }
0x14e7   : > { %v4991_v12 = vmul.f32 %v5664_v8, %v4983_v9  ;;  %v4984_v13 = vmul.f32 %v6393_v11, %v4968_v37  ;;  %5006 = sbr.rel (%p5666_p6) target bundleno = 5591 (0x15d7), region = 112 }
0x14e9   : > { %v4999_v15 = vadd.f32 %v5665_v55, %v4991_v12  ;;  %v4992_v16 = vmul.f32 %v5664_v8, %v4984_v13 }
0x14eb   : > { %5001 = vst.msk [vmem:[#allocation2] sm:$0xff] %vm1033_vm4, %v4999_v15  ;;  %v5000_v56 = vadd.f32 %v5665_v55, %v4992_v16  ;;  %v5007_v21 = vsel (!%p5666_p6), %vm1033_vm4, %v4999_v15, 0.0 }
0x14ec   : > { %v5008_v23 = vrot.slane (!%p5666_p6), %v5007_v21, 4 }
0x14ed   : > { %5002 = vst.msk [vmem:[#allocation2 + $0x8] sm:$0xff] %vm1033_vm4, %v5000_v56  ;;  %v5014_v17 = vsel (!%p5666_p6), %vm1033_vm4, %v5000_v56, 0.0 }
0x14ee   : > { %v5015_v24 = vrot.slane %v5014_v17, 4  ;;  %v5009_v49 = vadd.f32 %v5008_v23, %v5007_v21 }
0x14f0   : > { %v5016_v27 = vadd.f32 %v5015_v24, %v5014_v17  ;;  %v5010_v29 = vrot.slane %v5009_v49, 2 }
0x14f2   : > { %v5017_v31 = vrot.slane %v5016_v27, 2  ;;  %v5011_v51 = vadd.f32 %v5010_v29, %v5009_v49 }
0x14f4   : > { %v5018_v34 = vadd.f32 %v5017_v31, %v5016_v27  ;;  %v5012_v20 = vrot.slane %v5011_v51, 1 }
0x14f6   : > { %v5019_v35 = vrot.slane %v5018_v34, 1  ;;  %v5013_v36 = vadd.f32 %v5012_v20, %v5011_v51 }
0x14f8   : > { %v5020_v39 = vadd.f32 %v5019_v35, %v5018_v34  ;;  %v5021_v40 = vmul.f32 0.125, %v5013_v36 }
0x14fa   : > { %v5022_v41 = vmul.f32 0.125, %v5020_v39 }
0x14fc   : > { %v5037_v14 = vsel %vm5036_vm8, %v5022_v41, %v5021_v40 }
0x14fd   : > { %6158 = vmatpush3.xpose.msk.msra.mxu0 %vm1033_vm4, %v5037_v14 }
0x1500   : > { %6160 = vmatmul.mubr.msk.f32.vlgmr.msra.gmra.mrb[0].mxu0 %vm1033_vm4, %v5023_v42 }
0x15d3   : > { %v5109_v28 = vpop.f32.mrb[0].mxu0 }
0x15d4   : > { %v5110_v32 = vadd.f32 %v5109_v28, %v5033_v10  ;;  %v6161_v33 = vpop.f32.mrb[1].mxu0 }
0x15d6   : > { %5114 = vst.msk [vmem:[#allocation4] sm:$0x1] %vm5113_vm9, %v5110_v32 }
0x15d7 PF: > { %s7372_s0 = sld [smem:[#allocation8_spill]]  ;;  %s6459_s10 = smov [#allocation4]  }
0x15d8   : > { %s5124_s7 = sshll.u32 %s6459_s10, 4  ;;  %s5125_s7 = int_to_ptr.vmem [resolvable:$true] %s5124_s7 }
0x15d9   : > { %s6397_s25 = scalar_lea.vmem %s5125_s7, 16  ;;  %s6403_s3 = scalar_lea.vmem %s5125_s7, 32 }
0x15da   : > { %p6398_p8 = scmp.ne.s32.totalorder %s5125_s7, %s6397_s25  ;;  %p6404_p11 = scmp.lt.s32.totalorder %s5125_s7, %s5125_s7 }
0x15db   : > { %p6405_p12 = scmp.lt.s32.totalorder %s6403_s3, %s6397_s25 }
0x15dd   : > { %s7373_s14 = sadd.s32 4294967295, %s7372_s0   ;;  %p6406_p13 = por %p6405_p12, %p6404_p11 }
0x15de   : > { %p7266_p7 = scmp.eq.s32.totalorder %s7373_s14, 1 }
0x15e0   : > { %p6399_p9 = pnand %p6398_p8, %p7266_p7 }
0x15e2   : > { %p6400_p10 = pneg %p6399_p9 }
0x15e4   : > { %p6407_p0 = pnand %p6406_p13, %p6400_p10 }
0x15e6   : > { %6410 = shalt.err (!%p6407_p0)
}
0x15e7   : > { %s7375_s26 = sld [smem:[#allocation28_spill]] }
0x15ed   : > { %s6411_s28 = scalar_lea.hbm %s7375_s26, 16 }
0x15ee   : > { %p6412_p1 = scmp.ne.s32.totalorder %s7375_s26, %s6411_s28  ;;  %p6417_p4 = scmp.lt.u32.totalorder %s6411_s28, %s7375_s26 }
0x15f0   : > { %p6413_p2 = pnand %p6412_p1, %p7266_p7 }
0x15f2   : > { %p6414_p3 = pneg %p6413_p2 }
0x15f4   : > { %p6419_p5 = pnand %p6417_p4, %p6414_p3 }
0x15f6   : > { %6422 = shalt.err (!%p6419_p5)
}
0x15f7   : > { %6163 = dma.vmem_to_hbm [thread:$0]  (%p7266_p7), %s5125_s7, 16, %s7375_s26, [#allocation5]  }
0x15f8   : > { %6436 = dma.done.wait (%p7266_p7), [#allocation5], 16  }
0x15f9   : > { %6438 = vsyncadd (%p7266_p7), [#allocation5], 4294967280 }
0x15fa PF: > { %s7376_s30 = sld [smem:[#allocation8_spill]]  ;;  %s7377_s27 = sld [smem:[#allocation7_spill]] }
0x15fb   : > { %s7378_s3 = sld [smem:[#allocation9_spill]] }
0x1600   : > { %s34_s28 = sadd.s32 1, %s7376_s30  }
0x1601   : > { %p31_p6 = scmp.ge.s32.totalorder %s34_s28, 4  }
0x1603   :  { %33 = sbr.rel (!%p31_p6) target bundleno = 19 (0x13), region = 209 }
0x160a   :  { %5137 = vsyncpa [#allocation5], 1 }
0x160b   :  { %5139 = vsyncpa [#allocation5 + $0x1], 1 }

</bundles_post_ra>
